<compile_context>
chip_gen: v7x
topology: tpu7x:2x2x1
jax: 0.10.0
libtpu: 0.0.40
codegen_flags: <defaults>
</compile_context>

<pallas_src>
import jax
import jax.numpy as jnp
from jax.experimental import pallas as pl
from jax.experimental.pallas import tpu as pltpu

EPS = 1e-5
IN_FEATURES = 8192          # hard-coded in the PyTorch module
HID = 1000                  # PyTorch hidden width
HID_P = 1024                # padded to a lane multiple (128)
OUT_P = 256                 # padded logits width (168 / 11 / 7 -> 256)
HEADS = ("graph", "vowel", "conso")
N_OUT = {"graph": 168, "vowel": 11, "conso": 7}


# ----------------------------------------------------------------------------
# Per-generation stage-1 tiling: v5e/v5p/v6e have 128 MiB VMEM -> whole-K
# weight tiles (1 K-step / head); v7x (64 MiB) and unknown chips stay at 2048.
# ----------------------------------------------------------------------------
def _pick_stage1_config():
    try:
        kind = jax.devices()[0].device_kind.lower()
    except Exception:  # pragma: no cover - defensive
        kind = ""
    if ("v5" in kind or "v6" in kind) and "v7" not in kind:
        # ~38 MiB peak (2 x 16 MiB bf16 FC1 tiles + fused FC2/FC3 weights).
        return 8192, 64 * 1024 * 1024
    # Conservative default (v7x 64 MiB physical VMEM, v4, unknown):
    # ~14 MiB peak with block_k=2048.
    return 2048, 40 * 1024 * 1024


# ----------------------------------------------------------------------------
# Backbone stub kernel: 1x1 conv (C -> F) + global average pool over H*W.
# 1x1 conv commutes with the pool, so pool-then-matmul is exact.
# ----------------------------------------------------------------------------
def _backbone_stub_kernel(x_ref, w_ref, o_ref):
    # x_ref: (Bp, C, HW) f32   w_ref: (C, F) bf16   o_ref: (Bp, F) f32
    inv_hw = 1.0 / x_ref.shape[-1]
    pooled = (jnp.sum(x_ref[...], axis=-1) * inv_hw).astype(jnp.bfloat16)
    o_ref[...] = jnp.dot(pooled, w_ref[...],
                         preferred_element_type=jnp.float32)


def backbone_stub(x_bchw, w_cf_bf16):
    # TODO(synk): at real backbone sizes (C>=512, HW>=4096) tile H*W with an
    #             accumulating grid axis instead of one whole-tensor VMEM block.
    B, C, H, W = x_bchw.shape
    F = w_cf_bf16.shape[1]
    Bp = max(8, ((B + 7) // 8) * 8)                # pad batch to sublane multiple
    xp = jnp.zeros((Bp, C, H * W), jnp.float32)
    xp = xp.at[:B].set(x_bchw.reshape(B, C, H * W).astype(jnp.float32))
    out = pl.pallas_call(
        _backbone_stub_kernel,
        out_shape=jax.ShapeDtypeStruct((Bp, F), jnp.float32),
        grid=(1,),
        in_specs=[
            pl.BlockSpec((Bp, C, H * W), lambda i: (0, 0, 0)),
            pl.BlockSpec((C, F), lambda i: (0, 0)),
        ],
        out_specs=pl.BlockSpec((Bp, F), lambda i: (0, 0)),
    )(xp, w_cf_bf16.astype(jnp.bfloat16))
    return out, B, Bp


# ----------------------------------------------------------------------------
# Fully-fused head kernel (one pallas_call for all 3 heads, all 3 FC stages):
#
#   acc  = sum_k relu(feat_k * s1[h,k] + t1[h,k]) @ W1[h,k]      (K tiled)
#   h1   = acc + b1[h]
#   h2   = relu(h1 * s2[h] + t2[h]) @ W2[h] + b2[h]              (epilogue)
#   out  = relu(h2 * s3[h] + t3[h]) @ W3[h] + b3[h]              (epilogue)
#
# Grid axis 0 = head (parallel, shards across TCs on v7x).
# Grid axis 1 = K tiles of FC1 (arbitrary, accumulated in VMEM scratch).
# FC2/FC3 params have index_maps depending only on h -> fetched once per head.
# ----------------------------------------------------------------------------
def _fused_head_kernel(feat_ref, s1_ref, t1_ref, w1_ref, b1_ref,
                       s2_ref, t2_ref, w2_ref, b2_ref,
                       s3_ref, t3_ref, w3_ref, b3_ref,
                       o_ref, acc_ref):
    k = pl.program_id(1)

    @pl.when(k == 0)
    def _():
        acc_ref[...] = jnp.zeros_like(acc_ref)

    # BN1 (folded) + ReLU in f32, bf16 operands into the MXU, f32 accumulate.
    xn = jnp.maximum(feat_ref[...] * s1_ref[0] + t1_ref[0], 0.0)
    acc_ref[...] += jnp.dot(xn.astype(jnp.bfloat16), w1_ref[0],
                            preferred_element_type=jnp.float32)

    @pl.when(k == pl.num_programs(1) - 1)
    def _():
        h1 = acc_ref[...] + b1_ref[0]                                 # (Bp, HID_P)
        h2n = jnp.maximum(h1 * s2_ref[0] + t2_ref[0], 0.0)
        h2 = jnp.dot(h2n.astype(jnp.bfloat16), w2_ref[0],
                     preferred_element_type=jnp.float32) + b2_ref[0]  # (Bp, HID_P)
        h3n = jnp.maximum(h2 * s3_ref[0] + t3_ref[0], 0.0)
        o_ref[0] = jnp.dot(h3n.astype(jnp.bfloat16), w3_ref[0],
                           preferred_element_type=jnp.float32) + b3_ref[0]


def fused_heads(feat, pk, *, block_k, vmem_limit):
    """feat: (Bp, K) f32 shared across heads; pk: packed per-head params."""
    Bp, K = feat.shape
    H = len(HEADS)
    assert K % block_k == 0
    return pl.pallas_call(
        _fused_head_kernel,
        out_shape=jax.ShapeDtypeStruct((H, Bp, OUT_P), jnp.float32),
        grid=(H, K // block_k),
        in_specs=[
            pl.BlockSpec((Bp, block_k), lambda h, k: (0, k)),           # feat (shared)
            pl.BlockSpec((1, 1, block_k), lambda h, k: (h, 0, k)),      # bn1 scale
            pl.BlockSpec((1, 1, block_k), lambda h, k: (h, 0, k)),      # bn1 shift
            pl.BlockSpec((1, block_k, HID_P), lambda h, k: (h, k, 0)),  # W1 (bf16)
            pl.BlockSpec((1, 1, HID_P), lambda h, k: (h, 0, 0)),        # b1
            pl.BlockSpec((1, 1, HID_P), lambda h, k: (h, 0, 0)),        # bn2 scale
            pl.BlockSpec((1, 1, HID_P), lambda h, k: (h, 0, 0)),        # bn2 shift
            pl.BlockSpec((1, HID_P, HID_P), lambda h, k: (h, 0, 0)),    # W2 (bf16)
            pl.BlockSpec((1, 1, HID_P), lambda h, k: (h, 0, 0)),        # b2
            pl.BlockSpec((1, 1, HID_P), lambda h, k: (h, 0, 0)),        # bn3 scale
            pl.BlockSpec((1, 1, HID_P), lambda h, k: (h, 0, 0)),        # bn3 shift
            pl.BlockSpec((1, HID_P, OUT_P), lambda h, k: (h, 0, 0)),    # W3 (bf16)
            pl.BlockSpec((1, 1, OUT_P), lambda h, k: (h, 0, 0)),        # b3
        ],
        out_specs=pl.BlockSpec((1, Bp, OUT_P), lambda h, k: (h, 0, 0)),
        scratch_shapes=[pltpu.VMEM((Bp, HID_P), jnp.float32)],
        compiler_params=pltpu.CompilerParams(
            dimension_semantics=("parallel", "arbitrary"),
            vmem_limit_bytes=vmem_limit),
    )(feat,
      pk["s1"], pk["t1"], pk["w1"], pk["b1"],
      pk["s2"], pk["t2"], pk["w2"], pk["b2"],
      pk["s3"], pk["t3"], pk["w3"], pk["b3"])


# ----------------------------------------------------------------------------
# Parameter construction (deterministic, synthetic) and kernel-layout packing
# ----------------------------------------------------------------------------
def make_params(key, in_channels):
    def nrm(k, shape, scale):
        return jax.random.normal(k, shape, jnp.float32) * scale

    keys = iter(jax.random.split(key, 64))
    p = {}
    p["backbone_w"] = nrm(next(keys), (in_channels, IN_FEATURES), 0.05)

    def bn(feat):
        return dict(
            gamma=1.0 + nrm(next(keys), (feat,), 0.1),
            beta=nrm(next(keys), (feat,), 0.1),
            mean=nrm(next(keys), (feat,), 0.1),
            var=jnp.abs(nrm(next(keys), (feat,), 0.1)) + 0.5,
        )

    def fc(fin, fout):
        # weights kept in bf16 (MXU-native, halves HBM bytes streamed)
        return dict(
            w=nrm(next(keys), (fin, fout), 1.0 / (fin ** 0.5)).astype(jnp.bfloat16),
            b=nrm(next(keys), (fout,), 0.01),
        )

    for name in HEADS:
        p[f"bn1_{name}"] = bn(IN_FEATURES)
        p[f"bn2_{name}"] = bn(HID)
        p[f"bn3_{name}"] = bn(HID)
        p[f"fc1_{name}"] = fc(IN_FEATURES, HID)
        p[f"fc2_{name}"] = fc(HID, HID)
        p[f"fc3_{name}"] = fc(HID, N_OUT[name])
    return p


def _fold_bn(bn, pad_to):
    """Fold inference-mode BN into scale/shift, zero-padded to pad_to."""
    s = bn["gamma"] * jax.lax.rsqrt(bn["var"] + EPS)
    t = bn["beta"] - bn["mean"] * s
    pad = pad_to - s.shape[0]
    return jnp.pad(s, (0, pad)), jnp.pad(t, (0, pad))


def pack_head_params(p):
    """Pack per-head params into stacked, lane-padded, kernel-ready tensors.

    Padding safety: padded hidden/logit units have s=t=0 -> relu(0)=0, and the
    corresponding weight rows/cols are zero, so real outputs are untouched.
    """
    def pad_w(w, kp, np_):
        k, n = w.shape
        return jnp.pad(w, ((0, kp - k), (0, np_ - n)))          # stays bf16

    def pad_b(b, np_):
        return jnp.pad(b, (0, np_ - b.shape[0])).astype(jnp.float32)

    s1, t1, s2, t2, s3, t3 = [], [], [], [], [], []
    w1, b1, w2, b2, w3, b3 = [], [], [], [], [], []
    for n in HEADS:
        a, b = _fold_bn(p[f"bn1_{n}"], IN_FEATURES); s1.append(a); t1.append(b)
        a, b = _fold_bn(p[f"bn2_{n}"], HID_P);       s2.append(a); t2.append(b)
        a, b = _fold_bn(p[f"bn3_{n}"], HID_P);       s3.append(a); t3.append(b)
        w1.append(pad_w(p[f"fc1_{n}"]["w"], IN_FEATURES, HID_P))
        b1.append(pad_b(p[f"fc1_{n}"]["b"], HID_P))
        w2.append(pad_w(p[f"fc2_{n}"]["w"], HID_P, HID_P))
        b2.append(pad_b(p[f"fc2_{n}"]["b"], HID_P))
        w3.append(pad_w(p[f"fc3_{n}"]["w"], HID_P, OUT_P))
        b3.append(pad_b(p[f"fc3_{n}"]["b"], OUT_P))

    stack_vec = lambda xs: jnp.stack(xs)[:, None, :].astype(jnp.float32)
    return dict(
        backbone_w=p["backbone_w"].astype(jnp.bfloat16),
        s1=stack_vec(s1), t1=stack_vec(t1),
        s2=stack_vec(s2), t2=stack_vec(t2),
        s3=stack_vec(s3), t3=stack_vec(t3),
        w1=jnp.stack(w1).astype(jnp.bfloat16), b1=stack_vec(b1),
        w2=jnp.stack(w2).astype(jnp.bfloat16), b2=stack_vec(b2),
        w3=jnp.stack(w3).astype(jnp.bfloat16), b3=stack_vec(b3),
    )


# ----------------------------------------------------------------------------
# Full forward: 2 pallas_calls total (backbone stub + fully-fused 3-head MLP)
# ----------------------------------------------------------------------------
def bengali_senet_forward(x_bchw, packed, *, block_k=None, vmem_limit=None):
    if block_k is None or vmem_limit is None:
        block_k, vmem_limit = _pick_stage1_config()
    feat, B, Bp = backbone_stub(x_bchw, packed["backbone_w"])        # (Bp, 8192)
    logits = fused_heads(feat, packed,
                         block_k=block_k, vmem_limit=vmem_limit)      # (3, Bp, 256)
    return (logits[0, :B, :N_OUT["graph"]],
            logits[1, :B, :N_OUT["vowel"]],
            logits[2, :B, :N_OUT["conso"]])


# ----------------------------------------------------------------------------
# Plain-JAX references for correctness checks
# ----------------------------------------------------------------------------
def reference_forward_f32(x_bchw, params):
    """Same math as the PyTorch module (inference-mode BN), full f32."""
    B, C, H, W = x_bchw.shape
    pooled = jnp.mean(x_bchw.reshape(B, C, H * W), axis=-1)
    feat = pooled @ params["backbone_w"]

    def stage(h, bn, fc):
        hn = (h - bn["mean"]) * jax.lax.rsqrt(bn["var"] + EPS) * bn["gamma"] \
             + bn["beta"]
        hn = jnp.maximum(hn, 0.0)
        return hn @ fc["w"].astype(jnp.float32) + fc["b"]

    outs = []
    for n in HEADS:
        h = stage(feat, params[f"bn1_{n}"], params[f"fc1_{n}"])
        h = stage(h, params[f"bn2_{n}"], params[f"fc2_{n}"])
        h = stage(h, params[f"bn3_{n}"], params[f"fc3_{n}"])
        outs.append(h)
    return tuple(outs)


def reference_forward_matched(x_bchw, params):
    """Reference matching the kernel's precision (bf16 MXU operands, f32 acc)."""
    B, C, H, W = x_bchw.shape
    pooled = jnp.mean(x_bchw.reshape(B, C, H * W), axis=-1)
    feat = jnp.dot(pooled.astype(jnp.bfloat16),
                   params["backbone_w"].astype(jnp.bfloat16),
                   preferred_element_type=jnp.float32)

    def stage(h, bn, fc):
        s = bn["gamma"] * jax.lax.rsqrt(bn["var"] + EPS)
        t = bn["beta"] - bn["mean"] * s
        hn = jnp.maximum(h * s + t, 0.0).astype(jnp.bfloat16)
        return jnp.dot(hn, fc["w"], preferred_element_type=jnp.float32) + fc["b"]

    outs = []
    for n in HEADS:
        h = stage(feat, params[f"bn1_{n}"], params[f"fc1_{n}"])
        h = stage(h, params[f"bn2_{n}"], params[f"fc2_{n}"])
        h = stage(h, params[f"bn3_{n}"], params[f"fc3_{n}"])
        outs.append(h)
    return tuple(outs)


if __name__ == "__main__":
    key = jax.random.PRNGKey(0)
    kx, kp = jax.random.split(key)

    B, C, H, W = 2, 4, 16, 16
    x = jax.random.normal(kx, (B, C, H, W), jnp.float32)
    params = make_params(kp, C)
    packed = pack_head_params(params)

    forward = jax.jit(bengali_senet_forward)
    out = forward(x, packed)
    out = jax.block_until_ready(out)

    ref_m = reference_forward_matched(x, params)   # same precision path
    ref_f = reference_forward_f32(x, params)       # full-f32 module math
    for o, rm, rf in zip(out, ref_m, ref_f):
        assert o.shape == rm.shape, (o.shape, rm.shape)
        assert jnp.allclose(o, rm, atol=2e-3, rtol=2e-3), \
            float(jnp.max(jnp.abs(o - rm)))
        # bf16 MXU operands vs the full-f32 module math: looser tolerance.
        assert jnp.allclose(o, rf, atol=4e-2, rtol=4e-2), \
            float(jnp.max(jnp.abs(o - rf)))

    assert out[0].shape == (B, 168)
    assert out[1].shape == (B, 11)
    assert out[2].shape == (B, 7)
    print("KERNEL_OK")
</pallas_src>

<mosaic_0001>
module attributes {stable_mosaic.version = 11 : i64} {
  func.func @_fused_head_kernel(%arg0: i32, %arg1: i32, %arg2: memref<8x2048xf32, #tpu.memory_space<vmem>>, %arg3: memref<1x1x2048xf32, #tpu.memory_space<vmem>>, %arg4: memref<1x1x2048xf32, #tpu.memory_space<vmem>>, %arg5: memref<1x2048x1024xbf16, #tpu.memory_space<vmem>>, %arg6: memref<1x1x1024xf32, #tpu.memory_space<vmem>>, %arg7: memref<1x1x1024xf32, #tpu.memory_space<vmem>>, %arg8: memref<1x1x1024xf32, #tpu.memory_space<vmem>>, %arg9: memref<1x1024x1024xbf16, #tpu.memory_space<vmem>>, %arg10: memref<1x1x1024xf32, #tpu.memory_space<vmem>>, %arg11: memref<1x1x1024xf32, #tpu.memory_space<vmem>>, %arg12: memref<1x1x1024xf32, #tpu.memory_space<vmem>>, %arg13: memref<1x1024x256xbf16, #tpu.memory_space<vmem>>, %arg14: memref<1x1x256xf32, #tpu.memory_space<vmem>>, %arg15: memref<1x8x256xf32, #tpu.memory_space<vmem>>, %arg16: memref<8x1024xf32, #tpu.memory_space<vmem>>) attributes {dimension_semantics = [#tpu.dimension_semantics<parallel>, #tpu.dimension_semantics<arbitrary>], iteration_bounds = array<i64: 3, 4>, scalar_prefetch = 0 : i64, scratch_operands = 1 : i64, tpu.core_type = #tpu.core_type<tc>, window_params = [{transform_indices = @transform_0, window_bounds = array<i64: 8, 2048>}, {transform_indices = @transform_1, window_bounds = array<i64: 1, 1, 2048>}, {transform_indices = @transform_2, window_bounds = array<i64: 1, 1, 2048>}, {transform_indices = @transform_3, window_bounds = array<i64: 1, 2048, 1024>}, {transform_indices = @transform_4, window_bounds = array<i64: 1, 1, 1024>}, {transform_indices = @transform_5, window_bounds = array<i64: 1, 1, 1024>}, {transform_indices = @transform_6, window_bounds = array<i64: 1, 1, 1024>}, {transform_indices = @transform_7, window_bounds = array<i64: 1, 1024, 1024>}, {transform_indices = @transform_8, window_bounds = array<i64: 1, 1, 1024>}, {transform_indices = @transform_9, window_bounds = array<i64: 1, 1, 1024>}, {transform_indices = @transform_10, window_bounds = array<i64: 1, 1, 1024>}, {transform_indices = @transform_11, window_bounds = array<i64: 1, 1024, 256>}, {transform_indices = @transform_12, window_bounds = array<i64: 1, 1, 256>}, {transform_indices = @transform_13, window_bounds = array<i64: 1, 8, 256>}]} {
    %c0_i32 = arith.constant 0 : i32
    %0 = arith.cmpi eq, %arg1, %c0_i32 : i32
    %1 = arith.extui %0 : i1 to i32
    %c0_i32_0 = arith.constant 0 : i32
    %2 = arith.cmpi ne, %1, %c0_i32_0 : i32
    scf.if %2 {
      %cst_17 = arith.constant 0.000000e+00 : f32
      %24 = vector.broadcast %cst_17 : f32 to vector<8x1024xf32>
      %c0_18 = arith.constant 0 : index
      %c0_19 = arith.constant 0 : index
      %25 = vector.load %arg16[%c0_18, %c0_19] : memref<8x1024xf32, #tpu.memory_space<vmem>>, vector<8x1024xf32>
      tpu.vector_store %arg16[%c0_18, %c0_19], %24 {strides = array<i32>} : memref<8x1024xf32, #tpu.memory_space<vmem>>, vector<8x1024xf32>,
    } else {
    }
    %c0 = arith.constant 0 : index
    %c0_1 = arith.constant 0 : index
    %3 = vector.load %arg2[%c0, %c0_1] : memref<8x2048xf32, #tpu.memory_space<vmem>>, vector<8x2048xf32>
    %c0_2 = arith.constant 0 : index
    %c0_3 = arith.constant 0 : index
    %c0_4 = arith.constant 0 : index
    %4 = vector.load %arg3[%c0_2, %c0_3, %c0_4] : memref<1x1x2048xf32, #tpu.memory_space<vmem>>, vector<1x1x2048xf32>
    %5 = vector.shape_cast %4 : vector<1x1x2048xf32> to vector<1x2048xf32>
    %6 = vector.broadcast %5 : vector<1x2048xf32> to vector<8x2048xf32>
    %7 = arith.mulf %3, %6 : vector<8x2048xf32>
    %c0_5 = arith.constant 0 : index
    %c0_6 = arith.constant 0 : index
    %c0_7 = arith.constant 0 : index
    %8 = vector.load %arg4[%c0_5, %c0_6, %c0_7] : memref<1x1x2048xf32, #tpu.memory_space<vmem>>, vector<1x1x2048xf32>
    %9 = vector.shape_cast %8 : vector<1x1x2048xf32> to vector<1x2048xf32>
    %10 = vector.broadcast %9 : vector<1x2048xf32> to vector<8x2048xf32>
    %11 = arith.addf %7, %10 : vector<8x2048xf32>
    %cst = arith.constant 0.000000e+00 : f32
    %12 = vector.broadcast %cst : f32 to vector<8x2048xf32>
    %13 = arith.maximumf %11, %12 : vector<8x2048xf32>
    %c0_8 = arith.constant 0 : index
    %c0_9 = arith.constant 0 : index
    %14 = vector.load %arg16[%c0_8, %c0_9] : memref<8x1024xf32, #tpu.memory_space<vmem>>, vector<8x1024xf32>
    %15 = arith.truncf %13 : vector<8x2048xf32> to vector<8x2048xbf16>
    %c0_10 = arith.constant 0 : index
    %c0_11 = arith.constant 0 : index
    %c0_12 = arith.constant 0 : index
    %16 = vector.load %arg5[%c0_10, %c0_11, %c0_12] : memref<1x2048x1024xbf16, #tpu.memory_space<vmem>>, vector<1x2048x1024xbf16>
    %17 = vector.shape_cast %16 : vector<1x2048x1024xbf16> to vector<2048x1024xbf16>
    %cst_13 = arith.constant dense<0.000000e+00> : vector<8x1024xf32>
    %18 = tpu.matmul %15, %17, %cst_13 {dimension_numbers = #tpu.dot_dimension_numbers<[1], [0], [0], [1], [0, 0, 1, 1], [], []>} : vector<8x2048xbf16>, vector<2048x1024xbf16>, vector<8x1024xf32> -> vector<8x1024xf32>
    %19 = arith.addf %14, %18 : vector<8x1024xf32>
    %c0_14 = arith.constant 0 : index
    %c0_15 = arith.constant 0 : index
    %20 = vector.load %arg16[%c0_14, %c0_15] : memref<8x1024xf32, #tpu.memory_space<vmem>>, vector<8x1024xf32>
    tpu.vector_store %arg16[%c0_14, %c0_15], %19 {strides = array<i32>} : memref<8x1024xf32, #tpu.memory_space<vmem>>, vector<8x1024xf32>,
    %c3_i32 = arith.constant 3 : i32
    %21 = arith.cmpi eq, %arg1, %c3_i32 : i32
    %22 = arith.extui %21 : i1 to i32
    %c0_i32_16 = arith.constant 0 : i32
    %23 = arith.cmpi ne, %22, %c0_i32_16 : i32
    scf.if %23 {
      %c0_17 = arith.constant 0 : index
      %c0_18 = arith.constant 0 : index
      %24 = vector.load %arg16[%c0_17, %c0_18] : memref<8x1024xf32, #tpu.memory_space<vmem>>, vector<8x1024xf32>
      %c0_19 = arith.constant 0 : index
      %c0_20 = arith.constant 0 : index
      %c0_21 = arith.constant 0 : index
      %25 = vector.load %arg6[%c0_19, %c0_20, %c0_21] : memref<1x1x1024xf32, #tpu.memory_space<vmem>>, vector<1x1x1024xf32>
      %26 = vector.shape_cast %25 : vector<1x1x1024xf32> to vector<1x1024xf32>
      %27 = vector.broadcast %26 : vector<1x1024xf32> to vector<8x1024xf32>
      %28 = arith.addf %24, %27 : vector<8x1024xf32>
      %c0_22 = arith.constant 0 : index
      %c0_23 = arith.constant 0 : index
      %c0_24 = arith.constant 0 : index
      %29 = vector.load %arg7[%c0_22, %c0_23, %c0_24] : memref<1x1x1024xf32, #tpu.memory_space<vmem>>, vector<1x1x1024xf32>
      %30 = vector.shape_cast %29 : vector<1x1x1024xf32> to vector<1x1024xf32>
      %31 = vector.broadcast %30 : vector<1x1024xf32> to vector<8x1024xf32>
      %32 = arith.mulf %28, %31 : vector<8x1024xf32>
      %c0_25 = arith.constant 0 : index
      %c0_26 = arith.constant 0 : index
      %c0_27 = arith.constant 0 : index
      %33 = vector.load %arg8[%c0_25, %c0_26, %c0_27] : memref<1x1x1024xf32, #tpu.memory_space<vmem>>, vector<1x1x1024xf32>
      %34 = vector.shape_cast %33 : vector<1x1x1024xf32> to vector<1x1024xf32>
      %35 = vector.broadcast %34 : vector<1x1024xf32> to vector<8x1024xf32>
      %36 = arith.addf %32, %35 : vector<8x1024xf32>
      %cst_28 = arith.constant 0.000000e+00 : f32
      %37 = vector.broadcast %cst_28 : f32 to vector<8x1024xf32>
      %38 = arith.maximumf %36, %37 : vector<8x1024xf32>
      %39 = arith.truncf %38 : vector<8x1024xf32> to vector<8x1024xbf16>
      %c0_29 = arith.constant 0 : index
      %c0_30 = arith.constant 0 : index
      %c0_31 = arith.constant 0 : index
      %40 = vector.load %arg9[%c0_29, %c0_30, %c0_31] : memref<1x1024x1024xbf16, #tpu.memory_space<vmem>>, vector<1x1024x1024xbf16>
      %41 = vector.shape_cast %40 : vector<1x1024x1024xbf16> to vector<1024x1024xbf16>
      %cst_32 = arith.constant dense<0.000000e+00> : vector<8x1024xf32>
      %42 = tpu.matmul %39, %41, %cst_32 {dimension_numbers = #tpu.dot_dimension_numbers<[1], [0], [0], [1], [0, 0, 1, 1], [], []>} : vector<8x1024xbf16>, vector<1024x1024xbf16>, vector<8x1024xf32> -> vector<8x1024xf32>
      %c0_33 = arith.constant 0 : index
      %c0_34 = arith.constant 0 : index
      %c0_35 = arith.constant 0 : index
      %43 = vector.load %arg10[%c0_33, %c0_34, %c0_35] : memref<1x1x1024xf32, #tpu.memory_space<vmem>>, vector<1x1x1024xf32>
      %44 = vector.shape_cast %43 : vector<1x1x1024xf32> to vector<1x1024xf32>
      %45 = vector.broadcast %44 : vector<1x1024xf32> to vector<8x1024xf32>
      %46 = arith.addf %42, %45 : vector<8x1024xf32>
      %c0_36 = arith.constant 0 : index
      %c0_37 = arith.constant 0 : index
      %c0_38 = arith.constant 0 : index
      %47 = vector.load %arg11[%c0_36, %c0_37, %c0_38] : memref<1x1x1024xf32, #tpu.memory_space<vmem>>, vector<1x1x1024xf32>
      %48 = vector.shape_cast %47 : vector<1x1x1024xf32> to vector<1x1024xf32>
      %49 = vector.broadcast %48 : vector<1x1024xf32> to vector<8x1024xf32>
      %50 = arith.mulf %46, %49 : vector<8x1024xf32>
      %c0_39 = arith.constant 0 : index
      %c0_40 = arith.constant 0 : index
      %c0_41 = arith.constant 0 : index
      %51 = vector.load %arg12[%c0_39, %c0_40, %c0_41] : memref<1x1x1024xf32, #tpu.memory_space<vmem>>, vector<1x1x1024xf32>
      %52 = vector.shape_cast %51 : vector<1x1x1024xf32> to vector<1x1024xf32>
      %53 = vector.broadcast %52 : vector<1x1024xf32> to vector<8x1024xf32>
      %54 = arith.addf %50, %53 : vector<8x1024xf32>
      %cst_42 = arith.constant 0.000000e+00 : f32
      %55 = vector.broadcast %cst_42 : f32 to vector<8x1024xf32>
      %56 = arith.maximumf %54, %55 : vector<8x1024xf32>
      %57 = arith.truncf %56 : vector<8x1024xf32> to vector<8x1024xbf16>
      %c0_43 = arith.constant 0 : index
      %c0_44 = arith.constant 0 : index
      %c0_45 = arith.constant 0 : index
      %58 = vector.load %arg13[%c0_43, %c0_44, %c0_45] : memref<1x1024x256xbf16, #tpu.memory_space<vmem>>, vector<1x1024x256xbf16>
      %59 = vector.shape_cast %58 : vector<1x1024x256xbf16> to vector<1024x256xbf16>
      %cst_46 = arith.constant dense<0.000000e+00> : vector<8x256xf32>
      %60 = tpu.matmul %57, %59, %cst_46 {dimension_numbers = #tpu.dot_dimension_numbers<[1], [0], [0], [1], [0, 0, 1, 1], [], []>} : vector<8x1024xbf16>, vector<1024x256xbf16>, vector<8x256xf32> -> vector<8x256xf32>
      %c0_47 = arith.constant 0 : index
      %c0_48 = arith.constant 0 : index
      %c0_49 = arith.constant 0 : index
      %61 = vector.load %arg14[%c0_47, %c0_48, %c0_49] : memref<1x1x256xf32, #tpu.memory_space<vmem>>, vector<1x1x256xf32>
      %62 = vector.shape_cast %61 : vector<1x1x256xf32> to vector<1x256xf32>
      %63 = vector.broadcast %62 : vector<1x256xf32> to vector<8x256xf32>
      %64 = arith.addf %60, %63 : vector<8x256xf32>
      %c0_50 = arith.constant 0 : index
      %c0_51 = arith.constant 0 : index
      %c0_52 = arith.constant 0 : index
      %65 = vector.load %arg15[%c0_50, %c0_51, %c0_52] : memref<1x8x256xf32, #tpu.memory_space<vmem>>, vector<1x8x256xf32>
      %66 = vector.shape_cast %65 : vector<1x8x256xf32> to vector<8x256xf32>
      %67 = vector.shape_cast %64 : vector<8x256xf32> to vector<1x8x256xf32>
      tpu.vector_store %arg15[%c0_50, %c0_51, %c0_52], %67 {strides = array<i32>} : memref<1x8x256xf32, #tpu.memory_space<vmem>>, vector<1x8x256xf32>,
    } else {
    }
    return
  }
  func.func @transform_0(%arg0: i32, %arg1: i32) -> (i32, i32) {
    %c0_i32 = arith.constant 0 : i32
    %c0_i32_0 = arith.constant 0 : i32
    return %c0_i32, %arg1 : i32, i32
  }
  func.func @transform_1(%arg0: i32, %arg1: i32) -> (i32, i32, i32) {
    %c0_i32 = arith.constant 0 : i32
    %c0_i32_0 = arith.constant 0 : i32
    return %arg0, %c0_i32, %arg1 : i32, i32, i32
  }
  func.func @transform_2(%arg0: i32, %arg1: i32) -> (i32, i32, i32) {
    %c0_i32 = arith.constant 0 : i32
    %c0_i32_0 = arith.constant 0 : i32
    return %arg0, %c0_i32, %arg1 : i32, i32, i32
  }
  func.func @transform_3(%arg0: i32, %arg1: i32) -> (i32, i32, i32) {
    %c0_i32 = arith.constant 0 : i32
    %c0_i32_0 = arith.constant 0 : i32
    return %arg0, %arg1, %c0_i32 : i32, i32, i32
  }
  func.func @transform_4(%arg0: i32, %arg1: i32) -> (i32, i32, i32) {
    %c0_i32 = arith.constant 0 : i32
    %c0_i32_0 = arith.constant 0 : i32
    %c0_i32_1 = arith.constant 0 : i32
    return %arg0, %c0_i32, %c0_i32_0 : i32, i32, i32
  }
  func.func @transform_5(%arg0: i32, %arg1: i32) -> (i32, i32, i32) {
    %c0_i32 = arith.constant 0 : i32
    %c0_i32_0 = arith.constant 0 : i32
    %c0_i32_1 = arith.constant 0 : i32
    return %arg0, %c0_i32, %c0_i32_0 : i32, i32, i32
  }
  func.func @transform_6(%arg0: i32, %arg1: i32) -> (i32, i32, i32) {
    %c0_i32 = arith.constant 0 : i32
    %c0_i32_0 = arith.constant 0 : i32
    %c0_i32_1 = arith.constant 0 : i32
    return %arg0, %c0_i32, %c0_i32_0 : i32, i32, i32
  }
  func.func @transform_7(%arg0: i32, %arg1: i32) -> (i32, i32, i32) {
    %c0_i32 = arith.constant 0 : i32
    %c0_i32_0 = arith.constant 0 : i32
    %c0_i32_1 = arith.constant 0 : i32
    return %arg0, %c0_i32, %c0_i32_0 : i32, i32, i32
  }
  func.func @transform_8(%arg0: i32, %arg1: i32) -> (i32, i32, i32) {
    %c0_i32 = arith.constant 0 : i32
    %c0_i32_0 = arith.constant 0 : i32
    %c0_i32_1 = arith.constant 0 : i32
    return %arg0, %c0_i32, %c0_i32_0 : i32, i32, i32
  }
  func.func @transform_9(%arg0: i32, %arg1: i32) -> (i32, i32, i32) {
    %c0_i32 = arith.constant 0 : i32
    %c0_i32_0 = arith.constant 0 : i32
    %c0_i32_1 = arith.constant 0 : i32
    return %arg0, %c0_i32, %c0_i32_0 : i32, i32, i32
  }
  func.func @transform_10(%arg0: i32, %arg1: i32) -> (i32, i32, i32) {
    %c0_i32 = arith.constant 0 : i32
    %c0_i32_0 = arith.constant 0 : i32
    %c0_i32_1 = arith.constant 0 : i32
    return %arg0, %c0_i32, %c0_i32_0 : i32, i32, i32
  }
  func.func @transform_11(%arg0: i32, %arg1: i32) -> (i32, i32, i32) {
    %c0_i32 = arith.constant 0 : i32
    %c0_i32_0 = arith.constant 0 : i32
    %c0_i32_1 = arith.constant 0 : i32
    return %arg0, %c0_i32, %c0_i32_0 : i32, i32, i32
  }
  func.func @transform_12(%arg0: i32, %arg1: i32) -> (i32, i32, i32) {
    %c0_i32 = arith.constant 0 : i32
    %c0_i32_0 = arith.constant 0 : i32
    %c0_i32_1 = arith.constant 0 : i32
    return %arg0, %c0_i32, %c0_i32_0 : i32, i32, i32
  }
  func.func @transform_13(%arg0: i32, %arg1: i32) -> (i32, i32, i32) {
    %c0_i32 = arith.constant 0 : i32
    %c0_i32_0 = arith.constant 0 : i32
    %c0_i32_1 = arith.constant 0 : i32
    return %arg0, %c0_i32, %c0_i32_0 : i32, i32, i32
  }
}

module attributes {stable_mosaic.version = 11 : i64} {
  func.func @_backbone_stub_kernel(%arg0: i32, %arg1: memref<8x4x256xf32, #tpu.memory_space<vmem>>, %arg2: memref<4x8192xbf16, #tpu.memory_space<vmem>>, %arg3: memref<8x8192xf32, #tpu.memory_space<vmem>>) attributes {dimension_semantics = [#tpu.dimension_semantics<arbitrary>], iteration_bounds = array<i64: 1>, scalar_prefetch = 0 : i64, scratch_operands = 0 : i64, tpu.core_type = #tpu.core_type<tc>, window_params = [{pipeline_mode = #tpu.pipeline_mode<synchronous>, transform_indices = @transform_0, window_bounds = array<i64: 8, 4, 256>}, {pipeline_mode = #tpu.pipeline_mode<synchronous>, transform_indices = @transform_1, window_bounds = array<i64: 4, 8192>}, {pipeline_mode = #tpu.pipeline_mode<synchronous>, transform_indices = @transform_2, window_bounds = array<i64: 8, 8192>}]} {
    %c0 = arith.constant 0 : index
    %c0_0 = arith.constant 0 : index
    %c0_1 = arith.constant 0 : index
    %0 = vector.load %arg1[%c0, %c0_0, %c0_1] : memref<8x4x256xf32, #tpu.memory_space<vmem>>, vector<8x4x256xf32>
    %cst = arith.constant dense<0.000000e+00> : vector<8x4xf32>
    %1 = vector.multi_reduction <add>, %0, %cst [2] : vector<8x4x256xf32> to vector<8x4xf32>
    %cst_2 = arith.constant 3.906250e-03 : f32
    %2 = vector.broadcast %cst_2 : f32 to vector<8x4xf32>
    %3 = arith.mulf %1, %2 : vector<8x4xf32>
    %4 = arith.truncf %3 : vector<8x4xf32> to vector<8x4xbf16>
    %c0_3 = arith.constant 0 : index
    %c0_4 = arith.constant 0 : index
    %5 = vector.load %arg2[%c0_3, %c0_4] : memref<4x8192xbf16, #tpu.memory_space<vmem>>, vector<4x8192xbf16>
    %cst_5 = arith.constant dense<0.000000e+00> : vector<8x8192xf32>
    %6 = tpu.matmul %4, %5, %cst_5 {dimension_numbers = #tpu.dot_dimension_numbers<[1], [0], [0], [1], [0, 0, 1, 1], [], []>} : vector<8x4xbf16>, vector<4x8192xbf16>, vector<8x8192xf32> -> vector<8x8192xf32>
    %c0_6 = arith.constant 0 : index
    %c0_7 = arith.constant 0 : index
    %7 = vector.load %arg3[%c0_6, %c0_7] : memref<8x8192xf32, #tpu.memory_space<vmem>>, vector<8x8192xf32>
    tpu.vector_store %arg3[%c0_6, %c0_7], %6 {strides = array<i32>} : memref<8x8192xf32, #tpu.memory_space<vmem>>, vector<8x8192xf32>,
    return
  }
  func.func @transform_0(%arg0: i32) -> (i32, i32, i32) {
    %c0_i32 = arith.constant 0 : i32
    %c0_i32_0 = arith.constant 0 : i32
    %c0_i32_1 = arith.constant 0 : i32
    %c0_i32_2 = arith.constant 0 : i32
    return %c0_i32, %c0_i32_0, %c0_i32_1 : i32, i32, i32
  }
  func.func @transform_1(%arg0: i32) -> (i32, i32) {
    %c0_i32 = arith.constant 0 : i32
    %c0_i32_0 = arith.constant 0 : i32
    %c0_i32_1 = arith.constant 0 : i32
    return %c0_i32, %c0_i32_0 : i32, i32
  }
  func.func @transform_2(%arg0: i32) -> (i32, i32) {
    %c0_i32 = arith.constant 0 : i32
    %c0_i32_0 = arith.constant 0 : i32
    %c0_i32_1 = arith.constant 0 : i32
    return %c0_i32, %c0_i32_0 : i32, i32
  }
}

</mosaic_0001>

<bundles_post_ra>
// kernel: bengali_senet_forward.2
= control target key start
LH: loop header
LB: loop body
LE: loop exit
PB: predicated region body
PF: predicated region fallthrough
CT: control target
= control target key end

     0   :  { %7 = vsyncpa [#allocation3], 0  ;;  %s2175_s9 = smov [#allocation2]   ;;  %s2653_s0 = inlined_call_operand.vmem [shape: f32[8,4,256], index: 0, kind: input, shape index: {}]   ;;  %s2654_s1 = inlined_call_operand.hbm [shape: bf16[4,8192], index: 1, kind: input, shape index: {}]   ;;  %s2655_s2 = inlined_call_operand.vmem [shape: f32[8,8192], index: 2, kind: output, shape index: {}]  }
   0x1   :  { %s16_s10 = sshll.u32 %s2175_s9, 4  ;;  %s2151_s13 = scalar_lea.hbm %s2654_s1, 2048  ;;  %s17_s10 = int_to_ptr.vmem [resolvable:$true] %s16_s10 }
   0x2   :  { %p2152_p0 = scmp.ne.s32.totalorder %s2654_s1, %s2151_s13  ;;  %p2155_p1 = scmp.lt.u32.totalorder %s2151_s13, %s2654_s1 }
   0x4   :  { %p2157_p2 = pnand %p2155_p1, %p2152_p0 }
   0x6   :  { %2160 = shalt.err (!%p2157_p2)
}
   0x7   :  { %s2161_s18 = scalar_lea.vmem %s17_s10, 2048  ;;  %p2166_p4 = scmp.lt.s32.totalorder %s17_s10, %s17_s10 }
   0x8   :  { %p2162_p3 = scmp.ne.s32.totalorder %s17_s10, %s2161_s18  ;;  %p2167_p5 = scmp.lt.s32.totalorder %s2161_s18, %s2161_s18 }
   0xa   :  { %p2168_p6 = por %p2167_p5, %p2166_p4 }
   0xc   :  { %p2169_p7 = pnand %p2168_p6, %p2162_p3 }
   0xe   :  { %2172 = shalt.err (!%p2169_p7)
}
   0xf   :  { %19 = dma.hbm_to_vmem [thread:$0]  %s2654_s1, 2048, %s17_s10, [#allocation3]  }
  0x10   :  { %2173 = dma.done.wait [#allocation3], 2048  }
  0x11   :  { %2174 = vsyncadd [#allocation3], 4294965248  ;;  %v145_v0 = vlaneseq  ;;  %vm56_vm0 = vcmask 1043456   ;;  %v24_v4 = vld [vmem:[%s2653_s0] sm:$0xff]  ;;  %v26_v5 = vld [vmem:[%s2653_s0 + $0x10] sm:$0xff]  ;;  %vm486_vm1 = vcmask 1041408  }
  0x12   :  { %v25_v6 = vld [vmem:[%s2653_s0 + $0x8] sm:$0xff]  ;;  %v40_v7 = vcombine.high %v24_v4, %v24_v4  ;;  %v57_v8 = vsel %vm56_vm0, %v24_v4, 0.0  ;;  %v42_v9 = vcombine.high %v26_v5, %v26_v5  ;;  %v67_v10 = vsel %vm56_vm0, %v26_v5, 0.0  ;;  %v27_v11 = vld [vmem:[%s2653_s0 + $0x18] sm:$0xff]  ;;  %v28_v12 = vld [vmem:[%s2653_s0 + $0x20] sm:$0xff] }
  0x13   :  { %v146_v1 = vand.u32 127, %v145_v0  ;;  %v148_v2 = vshrl.u32 %v145_v0, 7  ;;  %v41_v13 = vcombine.high %v25_v6, %v25_v6  ;;  %v62_v14 = vsel %vm56_vm0, %v25_v6, 0.0  ;;  %v29_v16 = vld [vmem:[%s2653_s0 + $0x28] sm:$0xff]  ;;  %v30_v25 = vld [vmem:[%s2653_s0 + $0x30] sm:$0xff]  ;;  %v31_v26 = vld [vmem:[%s2653_s0 + $0x38] sm:$0xff] }
  0x14   :  { %v43_v15 = vcombine.high %v27_v11, %v27_v11  ;;  %v58_v17 = vsel %vm56_vm0, %v40_v7, 0.0  ;;  %v68_v18 = vsel %vm56_vm0, %v42_v9, 0.0  ;;  %v72_v19 = vsel %vm56_vm0, %v27_v11, 0.0  ;;  %v113_v48 = vld [vmem:[#allocation2] sm:$0xff]  ;;  %v114_v56 = vld [vmem:[#allocation2 + $0x8] sm:$0xff] }
  0x15   :  { %v2205_v3 = vsub.s32 %v146_v1, %v148_v2  ;;  %v44_v20 = vcombine.high %v28_v12, %v28_v12  ;;  %v59_v21 = vadd.f32 %v58_v17, %v57_v8  ;;  %v69_v22 = vadd.f32 %v68_v18, %v67_v10 }
  0x16   :  { %v63_v23 = vsel %vm56_vm0, %v41_v13, 0.0  ;;  %v73_v24 = vsel %vm56_vm0, %v43_v15, 0.0  ;;  %v45_v27 = vcombine.high %v29_v16, %v29_v16  ;;  %v77_v30 = vsel %vm56_vm0, %v28_v12, 0.0 }
  0x17   :  { %60 = vadd.xlane.f32.xlu0 %v59_v21  ;;  %70 = vadd.xlane.f32.xlu1 %v69_v22  ;;  %v64_v28 = vadd.f32 %v63_v23, %v62_v14  ;;  %v74_v29 = vadd.f32 %v73_v24, %v72_v19  ;;  %v78_v31 = vsel %vm56_vm0, %v44_v20, 0.0  ;;  %v82_v32 = vsel %vm56_vm0, %v29_v16, 0.0 }
  0x18   :  { %v83_v33 = vsel %vm56_vm0, %v45_v27, 0.0  ;;  %v46_v34 = vcombine.high %v30_v25, %v30_v25  ;;  %v47_v35 = vcombine.high %v31_v26, %v31_v26  ;;  %v79_v36 = vadd.f32 %v78_v31, %v77_v30 }
  0x19   :  { %v84_v37 = vadd.f32 %v83_v33, %v82_v32  ;;  %v87_v38 = vsel %vm56_vm0, %v30_v25, 0.0  ;;  %v92_v40 = vsel %vm56_vm0, %v31_v26, 0.0  ;;  %v2176_v44 = vmov 1983009808   ;;  %v115_v32 = vld [vmem:[#allocation2 + $0x10] sm:$0xff] }
  0x1a   :  { %v88_v39 = vsel %vm56_vm0, %v46_v34, 0.0  ;;  %v93_v41 = vsel %vm56_vm0, %v47_v35, 0.0  ;;  %v212_v45 = vunpack.c.l.s4 %v2176_v44  ;;  %v210_v49 = vcombine.high %v113_v48, %v113_v48 }
  0x1b   :  { %65 = vadd.xlane.f32.xlu0 %v64_v28  ;;  %75 = vadd.xlane.f32.xlu1 %v74_v29  ;;  %v89_v42 = vadd.f32 %v88_v39, %v87_v38  ;;  %v94_v43 = vadd.f32 %v93_v41, %v92_v40  ;;  %v227_v58 = vcombine.high %v114_v56, %v114_v56  ;;  %v2177_v59 = vmov 0  }
  0x1c   :  { %v213_v46 = vunpack.c.0.s8 %v212_v45  ;;  %711 = vmatprep.mubr.bf16.mxu0 %v2177_v59  ;;  %752 = vmatprep.mubr.bf16.mxu1 %v2177_v59  ;;  %vm179_vm2 = vcmask 1041409   ;;  %vm181_vm3 = vcmask 1042434   ;;  %vm183_vm4 = vcmask 1043459  }
  0x1d   :  { %vm185_vm5 = vcmask 1044484   ;;  %v244_v40 = vcombine.high %v115_v32, %v115_v32  ;;  %vm187_vm6 = vcmask 1045509   ;;  %vm189_vm7 = vcmask 1046534  }
  0x1e   :  { %v2247_v47 = vsub.s32 %v213_v46, %v148_v2  ;;  %vm191_vm8 = vcmask 1047559   ;;  %vm482_vm9 = vcmask 31744  }
  0x1f   :  { %80 = vadd.xlane.f32.xlu0 %v79_v36  ;;  %85 = vadd.xlane.f32.xlu1 %v84_v37 }
  0x20   :  { %v217_v50 = vrot.slane %v113_v48, %v2247_v47  ;;  %v224_v51 = vrot.slane %v210_v49, %v2247_v47  ;;  %v2256_v57 = vrot.slane %v114_v56, %v2247_v47  ;;  %v2263_v61 = vrot.slane %v227_v58, %v2247_v47 }
  0x21   :  { %v251_v48 = vrot.slane %v115_v32, %v2247_v47  ;;  %v258_v49 = vrot.slane %v244_v40, %v2247_v47 }
  0x22   :  { %v225_v52 = vcombine.high %v217_v50, %v217_v50  ;;  %v226_v53 = vcombine.high %v224_v51, %v224_v51  ;;  %v488_v54 = vsel %vm486_vm1, %v217_v50, 0  ;;  %v494_v55 = vsel %vm486_vm1, %v224_v51, 0  ;;  %v116_v51 = vld [vmem:[#allocation2 + $0x18] sm:$0xff] }
  0x23   :  { %90 = vadd.xlane.f32.xlu0 %v89_v42  ;;  %95 = vadd.xlane.f32.xlu1 %v94_v43  ;;  %v242_v60 = vcombine.high %v2256_v57, %v2256_v57  ;;  %v243_v62 = vcombine.high %v2263_v61, %v2263_v61  ;;  %v259_v56 = vcombine.high %v251_v48, %v251_v48 }
  0x24   :  { %2060 = vmatprep.subr.msk.bf16.mxu0 %vm486_vm1, %v225_v52  ;;  %2062 = vmatprep.subr.msk.bf16.mxu1 %vm486_vm1, %v226_v53  ;;  %v260_v58 = vcombine.high %v258_v49, %v258_v49 }
  0x25   :  { %680 = vmatpush1.bf16.msra.mxu0 %v488_v54  ;;  %721 = vmatpush1.bf16.msra.mxu1 %v494_v55  ;;  %v500_v54 = vsel %vm486_vm1, %v2256_v57, 0  ;;  %v506_v55 = vsel %vm486_vm1, %v2263_v61, 0  ;;  %v117_v61 = vld [vmem:[#allocation2 + $0x20] sm:$0xff] }
  0x26   :  { %2064 = vmatprep.subr.msk.bf16.mxu0 %vm486_vm1, %v242_v60  ;;  %2066 = vmatprep.subr.msk.bf16.mxu1 %vm486_vm1, %v243_v62  ;;  %v261_v60 = vcombine.high %v116_v51, %v116_v51  ;;  %v512_v62 = vsel %vm486_vm1, %v251_v48, 0 }
  0x28   :  { %v275_v57 = vrot.slane %v261_v60, %v2247_v47 }
  0xa4   :  { %v61_v63 = vpop.xlane.xlu0 %60  ;;  %v71_v0 = vpop.xlane.xlu1 %70 }
  0xa5   :  { %v97_v1 = vmul.f32 0.00390625, %v61_v63  ;;  %v99_v2 = vmul.f32 0.00390625, %v71_v0  ;;  %v518_v63 = vsel %vm486_vm1, %v258_v49, 0 }
  0xa7   :  { %v105_v4 = vpack.c.bf16 %v97_v1, %v97_v1  ;;  %v107_v5 = vpack.c.bf16 %v99_v2, %v99_v2  ;;  %v277_v1 = vcombine.high %v275_v57, %v275_v57  ;;  %v278_v2 = vcombine.high %v117_v61, %v117_v61 }
  0xa8   :  { %v66_v6 = vpop.xlane.xlu0 %65  ;;  %v76_v7 = vpop.xlane.xlu1 %75 }
  0xa9   :  { %v98_v8 = vmul.f32 0.00390625, %v66_v6  ;;  %v100_v9 = vmul.f32 0.00390625, %v76_v7  ;;  %v137_v10 = vunpack.c.l.b16 %v105_v4  ;;  %v139_v13 = vunpack.c.l.b16 %v107_v5  ;;  %v118_v6 = vld [vmem:[#allocation2 + $0x28] sm:$0xff] }
  0xaa   :  { %v285_v4 = vrot.slane %v117_v61, %v2247_v47  ;;  %v292_v5 = vrot.slane %v278_v2, %v2247_v47 }
  0xab   :  { %v106_v11 = vpack.c.bf16 %v98_v8, %v98_v8  ;;  %v108_v12 = vpack.c.bf16 %v100_v9, %v100_v9  ;;  %v150_v20 = vrot.slane %v137_v10, %v2205_v3  ;;  %v158_v25 = vrot.slane %v139_v13, %v2205_v3 }
  0xac   :  { %v81_v14 = vpop.xlane.xlu0 %80  ;;  %v86_v15 = vpop.xlane.xlu1 %85  ;;  %v530_v8 = vsel %vm486_vm1, %v275_v57, 0  ;;  %v293_v9 = vcombine.high %v285_v4, %v285_v4  ;;  %v294_v10 = vcombine.high %v292_v5, %v292_v5 }
  0xad   :  { %v138_v16 = vunpack.c.l.b16 %v106_v11  ;;  %v140_v17 = vunpack.c.l.b16 %v108_v12  ;;  %v101_v18 = vmul.f32 0.00390625, %v81_v14  ;;  %v102_v19 = vmul.f32 0.00390625, %v86_v15  ;;  %v119_v14 = vld [vmem:[#allocation2 + $0x30] sm:$0xff] }
  0xae   :  { %v295_v11 = vcombine.high %v118_v6, %v118_v6  ;;  %v302_v12 = vrot.slane %v118_v6, %v2247_v47  ;;  %v536_v15 = vsel %vm486_vm1, %v285_v4, 0 }
  0xaf   :  { %v154_v21 = vrot.slane %v138_v16, %v2205_v3  ;;  %v162_v22 = vrot.slane %v140_v17, %v2205_v3  ;;  %v109_v23 = vpack.c.bf16 %v101_v18, %v101_v18  ;;  %v110_v24 = vpack.c.bf16 %v102_v19, %v102_v19 }
  0xb0   :  { %v91_v26 = vpop.xlane.xlu0 %90  ;;  %v96_v27 = vpop.xlane.xlu1 %95  ;;  %v309_v13 = vrot.slane %v295_v11, %v2247_v47  ;;  %v542_v16 = vsel %vm486_vm1, %v292_v5, 0  ;;  %v310_v17 = vcombine.high %v302_v12, %v302_v12  ;;  %v312_v19 = vcombine.high %v119_v14, %v119_v14 }
  0xb1   :  { %v180_v28 = vsel %vm179_vm2, %v154_v21, %v150_v20  ;;  %v141_v29 = vunpack.c.l.b16 %v109_v23  ;;  %v142_v30 = vunpack.c.l.b16 %v110_v24  ;;  %v103_v31 = vmul.f32 0.00390625, %v91_v26 }
  0xb2   :  { %v182_v33 = vsel %vm181_vm3, %v158_v25, %v180_v28  ;;  %v104_v34 = vmul.f32 0.00390625, %v96_v27  ;;  %v311_v18 = vcombine.high %v309_v13, %v309_v13  ;;  %v319_v20 = vrot.slane %v119_v14, %v2247_v47 }
  0xb3   :  { %v184_v35 = vsel %vm183_vm4, %v162_v22, %v182_v33  ;;  %v166_v36 = vrot.slane %v141_v29, %v2205_v3  ;;  %v111_v37 = vpack.c.bf16 %v103_v31, %v103_v31  ;;  %v170_v38 = vrot.slane %v142_v30, %v2205_v3  ;;  %v120_v22 = vld [vmem:[#allocation2 + $0x38] sm:$0xff]  ;;  %v121_v30 = vld [vmem:[#allocation2 + $0x40] sm:$0xff] }
  0xb4   :  { %v112_v39 = vpack.c.bf16 %v104_v34, %v104_v34  ;;  %v326_v21 = vrot.slane %v312_v19, %v2247_v47  ;;  %v548_v23 = vsel %vm486_vm1, %v302_v12, 0  ;;  %v554_v24 = vsel %vm486_vm1, %v309_v13, 0 }
  0xb5   :  { %v186_v41 = vsel %vm185_vm5, %v166_v36, %v184_v35  ;;  %v143_v42 = vunpack.c.l.b16 %v111_v37  ;;  %v327_v25 = vcombine.high %v319_v20, %v319_v20  ;;  %v329_v27 = vcombine.high %v120_v22, %v120_v22 }
  0xb6   :  { %v144_v43 = vunpack.c.l.b16 %v112_v39  ;;  %v188_v45 = vsel %vm187_vm6, %v170_v38, %v186_v41  ;;  %v328_v26 = vcombine.high %v326_v21, %v326_v21  ;;  %v336_v28 = vrot.slane %v120_v22, %v2247_v47  ;;  %v122_v38 = vld [vmem:[#allocation2 + $0x48] sm:$0xff] }
  0xb7   :  { %v174_v44 = vrot.slane %v143_v42, %v2205_v3  ;;  %v343_v29 = vrot.slane %v329_v27, %v2247_v47  ;;  %v560_v31 = vsel %vm486_vm1, %v319_v20, 0  ;;  %v566_v32 = vsel %vm486_vm1, %v326_v21, 0 }
  0xb8   :  { %v178_v46 = vrot.slane %v144_v43, %v2205_v3  ;;  %v268_v3 = vrot.slane %v116_v51, %v2247_v47  ;;  %v344_v33 = vcombine.high %v336_v28, %v336_v28  ;;  %v346_v35 = vcombine.high %v121_v30, %v121_v30 }
  0xb9   :  { %v190_v50 = vsel %vm189_vm7, %v174_v44, %v188_v45  ;;  %v345_v34 = vcombine.high %v343_v29, %v343_v29  ;;  %v353_v36 = vrot.slane %v121_v30, %v2247_v47  ;;  %v572_v39 = vsel %vm486_vm1, %v336_v28, 0 }
  0xba   :  { %v192_v52 = vsel %vm191_vm8, %v178_v46, %v190_v50  ;;  %v276_v0 = vcombine.high %v268_v3, %v268_v3  ;;  %v524_v7 = vsel %vm486_vm1, %v268_v3, 0  ;;  %v360_v37 = vrot.slane %v346_v35, %v2247_v47  ;;  %v123_v46 = vld [vmem:[#allocation2 + $0x50] sm:$0xff] }
  0xbb   :  { %v2279_v53 = vpack.c.b16 %v192_v52, %v192_v52  ;;  %v578_v40 = vsel %vm486_vm1, %v343_v29, 0  ;;  %v361_v41 = vcombine.high %v353_v36, %v353_v36  ;;  %v363_v43 = vcombine.high %v122_v38, %v122_v38 }
  0xbc   :  { %v362_v42 = vcombine.high %v360_v37, %v360_v37  ;;  %v370_v44 = vrot.slane %v122_v38, %v2247_v47  ;;  %v584_v48 = vsel %vm486_vm1, %v353_v36, 0  ;;  %v590_v49 = vsel %vm486_vm1, %v360_v37, 0 }
  0xbd   :  { %2061 = vmatmul.mubr.msk.bf16.vlgmr.msra.gmra.mrb[0].mxu0 %vm482_vm9, %v2279_v53  ;;  %2063 = vmatmul.mubr.msk.bf16.vlgmr.msra.gmra.mrb[0].mxu1 %vm482_vm9, %v2279_v53  ;;  %v377_v45 = vrot.slane %v363_v43, %v2247_v47  ;;  %v380_v52 = vcombine.high %v123_v46, %v123_v46 }
  0xbe   :  { %762 = vmatpush1.bf16.msra.mxu0 %v500_v54  ;;  %803 = vmatpush1.bf16.msra.mxu1 %v506_v55  ;;  %v378_v50 = vcombine.high %v370_v44, %v370_v44  ;;  %v387_v54 = vrot.slane %v123_v46, %v2247_v47 }
  0xbf   :  { %793 = vmatprep.mubr.bf16.mxu0 %v2177_v59  ;;  %834 = vmatprep.mubr.bf16.mxu1 %v2177_v59  ;;  %v379_v51 = vcombine.high %v377_v45, %v377_v45  ;;  %v394_v55 = vrot.slane %v380_v52, %v2247_v47  ;;  %v602_v60 = vsel %vm486_vm1, %v377_v45, 0 }
  0xc0   :  { %2068 = vmatprep.subr.msk.bf16.mxu0 %vm486_vm1, %v259_v56  ;;  %2070 = vmatprep.subr.msk.bf16.mxu1 %vm486_vm1, %v260_v58  ;;  %v124_v56 = vld [vmem:[#allocation2 + $0x58] sm:$0xff]  ;;  %v596_v58 = vsel %vm486_vm1, %v370_v44, 0  ;;  %v395_v3 = vcombine.high %v387_v54, %v387_v54 }
  0xc1   :  { %v396_v57 = vcombine.high %v394_v55, %v394_v55  ;;  %v397_v61 = vcombine.high %v124_v56, %v124_v56  ;;  %v614_v2 = vsel %vm486_vm1, %v394_v55, 0 }
  0xc5   :  { %2065 = vmatmul.mubr.msk.bf16.vlgmr.msra.gmra.mrb[4].mxu0 %vm482_vm9, %v2279_v53  ;;  %2067 = vmatmul.mubr.msk.bf16.vlgmr.msra.gmra.mrb[4].mxu1 %vm482_vm9, %v2279_v53 }
  0xc6   :  { %844 = vmatpush1.bf16.msra.mxu0 %v512_v62  ;;  %885 = vmatpush1.bf16.msra.mxu1 %v518_v63  ;;  %v404_v62 = vrot.slane %v124_v56, %v2247_v47  ;;  %v411_v63 = vrot.slane %v397_v61, %v2247_v47 }
  0xc7   :  { %875 = vmatprep.mubr.bf16.mxu0 %v2177_v59  ;;  %916 = vmatprep.mubr.bf16.mxu1 %v2177_v59 }
  0xc8   :  { %2072 = vmatprep.subr.msk.bf16.mxu0 %vm486_vm1, %v276_v0  ;;  %2074 = vmatprep.subr.msk.bf16.mxu1 %vm486_vm1, %v277_v1  ;;  %v125_v0 = vld [vmem:[#allocation2 + $0x60] sm:$0xff]  ;;  %v608_v1 = vsel %vm486_vm1, %v387_v54, 0  ;;  %v412_v4 = vcombine.high %v404_v62, %v404_v62  ;;  %v413_v5 = vcombine.high %v411_v63, %v411_v63  ;;  %v626_v11 = vsel %vm486_vm1, %v411_v63, 0 }
  0xc9   :  { %v414_v6 = vcombine.high %v125_v0, %v125_v0 }
  0xcd   :  { %2069 = vmatmul.mubr.msk.bf16.vlgmr.msra.gmra.mrb[8].mxu0 %vm482_vm9, %v2279_v53  ;;  %2071 = vmatmul.mubr.msk.bf16.vlgmr.msra.gmra.mrb[8].mxu1 %vm482_vm9, %v2279_v53 }
  0xce   :  { %926 = vmatpush1.bf16.msra.mxu0 %v524_v7  ;;  %967 = vmatpush1.bf16.msra.mxu1 %v530_v8  ;;  %v421_v7 = vrot.slane %v125_v0, %v2247_v47  ;;  %v428_v8 = vrot.slane %v414_v6, %v2247_v47 }
  0xcf   :  { %957 = vmatprep.mubr.bf16.mxu0 %v2177_v59  ;;  %998 = vmatprep.mubr.bf16.mxu1 %v2177_v59 }
  0xd0   :  { %2076 = vmatprep.subr.msk.bf16.mxu0 %vm486_vm1, %v293_v9  ;;  %2078 = vmatprep.subr.msk.bf16.mxu1 %vm486_vm1, %v294_v10  ;;  %v126_v9 = vld [vmem:[#allocation2 + $0x68] sm:$0xff]  ;;  %v620_v10 = vsel %vm486_vm1, %v404_v62, 0  ;;  %v429_v12 = vcombine.high %v421_v7, %v421_v7  ;;  %v430_v13 = vcombine.high %v428_v8, %v428_v8  ;;  %v638_v19 = vsel %vm486_vm1, %v428_v8, 0 }
  0xd1   :  { %v431_v14 = vcombine.high %v126_v9, %v126_v9 }
  0xd5   :  { %2073 = vmatmul.mubr.msk.bf16.vlgmr.msra.gmra.mrb[12].mxu0 %vm482_vm9, %v2279_v53  ;;  %2075 = vmatmul.mubr.msk.bf16.vlgmr.msra.gmra.mrb[12].mxu1 %vm482_vm9, %v2279_v53 }
  0xd6   :  { %1008 = vmatpush1.bf16.msra.mxu0 %v536_v15  ;;  %1049 = vmatpush1.bf16.msra.mxu1 %v542_v16  ;;  %v438_v15 = vrot.slane %v126_v9, %v2247_v47  ;;  %v445_v16 = vrot.slane %v431_v14, %v2247_v47 }
  0xd7   :  { %1039 = vmatprep.mubr.bf16.mxu0 %v2177_v59  ;;  %1080 = vmatprep.mubr.bf16.mxu1 %v2177_v59 }
  0xd8   :  { %2080 = vmatprep.subr.msk.bf16.mxu0 %vm486_vm1, %v310_v17  ;;  %2082 = vmatprep.subr.msk.bf16.mxu1 %vm486_vm1, %v311_v18  ;;  %v127_v17 = vld [vmem:[#allocation2 + $0x70] sm:$0xff]  ;;  %v632_v18 = vsel %vm486_vm1, %v421_v7, 0  ;;  %v446_v20 = vcombine.high %v438_v15, %v438_v15  ;;  %v447_v21 = vcombine.high %v445_v16, %v445_v16  ;;  %v650_v27 = vsel %vm486_vm1, %v445_v16, 0 }
  0xd9   :  { %v448_v22 = vcombine.high %v127_v17, %v127_v17 }
  0xdd   :  { %2077 = vmatmul.mubr.msk.bf16.vlgmr.msra.gmra.mrb[16].mxu0 %vm482_vm9, %v2279_v53  ;;  %2079 = vmatmul.mubr.msk.bf16.vlgmr.msra.gmra.mrb[16].mxu1 %vm482_vm9, %v2279_v53 }
  0xde   :  { %1090 = vmatpush1.bf16.msra.mxu0 %v548_v23  ;;  %1131 = vmatpush1.bf16.msra.mxu1 %v554_v24  ;;  %v455_v23 = vrot.slane %v127_v17, %v2247_v47  ;;  %v462_v24 = vrot.slane %v448_v22, %v2247_v47 }
  0xdf   :  { %1121 = vmatprep.mubr.bf16.mxu0 %v2177_v59  ;;  %1162 = vmatprep.mubr.bf16.mxu1 %v2177_v59 }
  0xe0   :  { %2084 = vmatprep.subr.msk.bf16.mxu0 %vm486_vm1, %v327_v25  ;;  %2086 = vmatprep.subr.msk.bf16.mxu1 %vm486_vm1, %v328_v26  ;;  %v128_v25 = vld [vmem:[#allocation2 + $0x78] sm:$0xff]  ;;  %v644_v26 = vsel %vm486_vm1, %v438_v15, 0  ;;  %v463_v28 = vcombine.high %v455_v23, %v455_v23  ;;  %v464_v29 = vcombine.high %v462_v24, %v462_v24 }
  0xe1   :  { %v465_v30 = vcombine.high %v128_v25, %v128_v25 }
  0xe5   :  { %2081 = vmatmul.mubr.msk.bf16.vlgmr.msra.gmra.mrb[20].mxu0 %vm482_vm9, %v2279_v53  ;;  %2083 = vmatmul.mubr.msk.bf16.vlgmr.msra.gmra.mrb[20].mxu1 %vm482_vm9, %v2279_v53 }
  0xe6   :  { %1172 = vmatpush1.bf16.msra.mxu0 %v560_v31  ;;  %1213 = vmatpush1.bf16.msra.mxu1 %v566_v32  ;;  %v472_v31 = vrot.slane %v128_v25, %v2247_v47  ;;  %v479_v32 = vrot.slane %v465_v30, %v2247_v47 }
  0xe7   :  { %1203 = vmatprep.mubr.bf16.mxu0 %v2177_v59  ;;  %1244 = vmatprep.mubr.bf16.mxu1 %v2177_v59 }
  0xe8   :  { %2088 = vmatprep.subr.msk.bf16.mxu0 %vm486_vm1, %v344_v33  ;;  %2090 = vmatprep.subr.msk.bf16.mxu1 %vm486_vm1, %v345_v34  ;;  %v656_v33 = vsel %vm486_vm1, %v455_v23, 0  ;;  %v662_v34 = vsel %vm486_vm1, %v462_v24, 0  ;;  %v480_v35 = vcombine.high %v472_v31, %v472_v31  ;;  %v481_v36 = vcombine.high %v479_v32, %v479_v32 }
  0xe9   :  { %v668_v47 = vsel %vm486_vm1, %v472_v31, 0  ;;  %v674_v37 = vsel %vm486_vm1, %v479_v32, 0 }
  0xed   :  { %2085 = vmatmul.mubr.msk.bf16.vlgmr.msra.gmra.mrb[24].mxu0 %vm482_vm9, %v2279_v53  ;;  %2087 = vmatmul.mubr.msk.bf16.vlgmr.msra.gmra.mrb[24].mxu1 %vm482_vm9, %v2279_v53 }
  0xee   :  { %1254 = vmatpush1.bf16.msra.mxu0 %v572_v39  ;;  %1295 = vmatpush1.bf16.msra.mxu1 %v578_v40 }
  0xef   :  { %1285 = vmatprep.mubr.bf16.mxu0 %v2177_v59  ;;  %1326 = vmatprep.mubr.bf16.mxu1 %v2177_v59 }
  0xf0   :  { %2092 = vmatprep.subr.msk.bf16.mxu0 %vm486_vm1, %v361_v41  ;;  %2094 = vmatprep.subr.msk.bf16.mxu1 %vm486_vm1, %v362_v42 }
  0xf5   :  { %2089 = vmatmul.mubr.msk.bf16.vlgmr.msra.gmra.mrb[28].mxu0 %vm482_vm9, %v2279_v53  ;;  %2091 = vmatmul.mubr.msk.bf16.vlgmr.msra.gmra.mrb[28].mxu1 %vm482_vm9, %v2279_v53 }
  0xf6   :  { %1336 = vmatpush1.bf16.msra.mxu0 %v584_v48  ;;  %1377 = vmatpush1.bf16.msra.mxu1 %v590_v49 }
  0xf7   :  { %1367 = vmatprep.mubr.bf16.mxu0 %v2177_v59  ;;  %1408 = vmatprep.mubr.bf16.mxu1 %v2177_v59 }
  0xf8   :  { %2096 = vmatprep.subr.msk.bf16.mxu0 %vm486_vm1, %v378_v50  ;;  %2098 = vmatprep.subr.msk.bf16.mxu1 %vm486_vm1, %v379_v51 }
  0xfd   :  { %2093 = vmatmul.mubr.msk.bf16.vlgmr.msra.gmra.mrb[32].mxu0 %vm482_vm9, %v2279_v53  ;;  %2095 = vmatmul.mubr.msk.bf16.vlgmr.msra.gmra.mrb[32].mxu1 %vm482_vm9, %v2279_v53 }
  0xfe   :  { %1418 = vmatpush1.bf16.msra.mxu0 %v596_v58  ;;  %1459 = vmatpush1.bf16.msra.mxu1 %v602_v60 }
  0xff   :  { %1449 = vmatprep.mubr.bf16.mxu0 %v2177_v59  ;;  %1490 = vmatprep.mubr.bf16.mxu1 %v2177_v59 }
 0x100   :  { %2100 = vmatprep.subr.msk.bf16.mxu0 %vm486_vm1, %v395_v3  ;;  %2102 = vmatprep.subr.msk.bf16.mxu1 %vm486_vm1, %v396_v57 }
 0x105   :  { %2097 = vmatmul.mubr.msk.bf16.vlgmr.msra.gmra.mrb[36].mxu0 %vm482_vm9, %v2279_v53  ;;  %2099 = vmatmul.mubr.msk.bf16.vlgmr.msra.gmra.mrb[36].mxu1 %vm482_vm9, %v2279_v53 }
 0x106   :  { %1500 = vmatpush1.bf16.msra.mxu0 %v608_v1  ;;  %1541 = vmatpush1.bf16.msra.mxu1 %v614_v2 }
 0x107   :  { %1531 = vmatprep.mubr.bf16.mxu0 %v2177_v59  ;;  %1572 = vmatprep.mubr.bf16.mxu1 %v2177_v59 }
 0x108   :  { %2104 = vmatprep.subr.msk.bf16.mxu0 %vm486_vm1, %v412_v4  ;;  %2106 = vmatprep.subr.msk.bf16.mxu1 %vm486_vm1, %v413_v5 }
 0x10d   :  { %2101 = vmatmul.mubr.msk.bf16.vlgmr.msra.gmra.mrb[40].mxu0 %vm482_vm9, %v2279_v53  ;;  %2103 = vmatmul.mubr.msk.bf16.vlgmr.msra.gmra.mrb[40].mxu1 %vm482_vm9, %v2279_v53 }
 0x10e   :  { %1582 = vmatpush1.bf16.msra.mxu0 %v620_v10  ;;  %1623 = vmatpush1.bf16.msra.mxu1 %v626_v11 }
 0x10f   :  { %1613 = vmatprep.mubr.bf16.mxu0 %v2177_v59  ;;  %1654 = vmatprep.mubr.bf16.mxu1 %v2177_v59 }
 0x110   :  { %2108 = vmatprep.subr.msk.bf16.mxu0 %vm486_vm1, %v429_v12  ;;  %2110 = vmatprep.subr.msk.bf16.mxu1 %vm486_vm1, %v430_v13 }
 0x115   :  { %2105 = vmatmul.mubr.msk.bf16.vlgmr.msra.gmra.mrb[44].mxu0 %vm482_vm9, %v2279_v53  ;;  %2107 = vmatmul.mubr.msk.bf16.vlgmr.msra.gmra.mrb[44].mxu1 %vm482_vm9, %v2279_v53 }
 0x116   :  { %1664 = vmatpush1.bf16.msra.mxu0 %v632_v18  ;;  %1705 = vmatpush1.bf16.msra.mxu1 %v638_v19 }
 0x117   :  { %1695 = vmatprep.mubr.bf16.mxu0 %v2177_v59  ;;  %1736 = vmatprep.mubr.bf16.mxu1 %v2177_v59 }
 0x118   :  { %2112 = vmatprep.subr.msk.bf16.mxu0 %vm486_vm1, %v446_v20  ;;  %2114 = vmatprep.subr.msk.bf16.mxu1 %vm486_vm1, %v447_v21 }
 0x11d   :  { %2109 = vmatmul.mubr.msk.bf16.vlgmr.msra.gmra.mrb[48].mxu0 %vm482_vm9, %v2279_v53  ;;  %2111 = vmatmul.mubr.msk.bf16.vlgmr.msra.gmra.mrb[48].mxu1 %vm482_vm9, %v2279_v53 }
 0x11e   :  { %1746 = vmatpush1.bf16.msra.mxu0 %v644_v26  ;;  %1787 = vmatpush1.bf16.msra.mxu1 %v650_v27 }
 0x11f   :  { %1777 = vmatprep.mubr.bf16.mxu0 %v2177_v59  ;;  %1818 = vmatprep.mubr.bf16.mxu1 %v2177_v59 }
 0x120   :  { %2116 = vmatprep.subr.msk.bf16.mxu0 %vm486_vm1, %v463_v28  ;;  %2118 = vmatprep.subr.msk.bf16.mxu1 %vm486_vm1, %v464_v29 }
 0x125   :  { %2113 = vmatmul.mubr.msk.bf16.vlgmr.msra.gmra.mrb[52].mxu0 %vm482_vm9, %v2279_v53  ;;  %2115 = vmatmul.mubr.msk.bf16.vlgmr.msra.gmra.mrb[52].mxu1 %vm482_vm9, %v2279_v53 }
 0x126   :  { %1828 = vmatpush1.bf16.msra.mxu0 %v656_v33  ;;  %1869 = vmatpush1.bf16.msra.mxu1 %v662_v34 }
 0x127   :  { %1859 = vmatprep.mubr.bf16.mxu0 %v2177_v59  ;;  %1900 = vmatprep.mubr.bf16.mxu1 %v2177_v59 }
 0x128   :  { %2120 = vmatprep.subr.msk.bf16.mxu0 %vm486_vm1, %v480_v35  ;;  %2122 = vmatprep.subr.msk.bf16.mxu1 %vm486_vm1, %v481_v36 }
 0x12d   :  { %2117 = vmatmul.mubr.msk.bf16.vlgmr.msra.gmra.mrb[56].mxu0 %vm482_vm9, %v2279_v53  ;;  %2119 = vmatmul.mubr.msk.bf16.vlgmr.msra.gmra.mrb[56].mxu1 %vm482_vm9, %v2279_v53 }
 0x12e   :  { %1910 = vmatpush1.bf16.msra.mxu0 %v668_v47  ;;  %1951 = vmatpush1.bf16.msra.mxu1 %v674_v37 }
 0x12f   :  { %1941 = vmatprep.mubr.bf16.mxu0 %v2177_v59  ;;  %1982 = vmatprep.mubr.bf16.mxu1 %v2177_v59 }
 0x135   :  { %2121 = vmatmul.mubr.msk.bf16.vlgmr.msra.gmra.mrb[60].mxu0 %vm482_vm9, %v2279_v53  ;;  %2123 = vmatmul.mubr.msk.bf16.vlgmr.msra.gmra.mrb[60].mxu1 %vm482_vm9, %v2279_v53 }
 0x190   :  { %v713_v38 = vpop.f32.mrb[0].mxu0  ;;  %v754_v39 = vpop.f32.mrb[0].mxu1 }
 0x191   :  { %1991 = vst [vmem:[%s2655_s2] sm:$0xff] %v713_v38  ;;  %1993 = vst [vmem:[%s2655_s2 + $0x10] sm:$0xff] %v754_v39  ;;  %v715_v40 = vpop.f32.mrb[1].mxu0  ;;  %v756_v41 = vpop.f32.mrb[1].mxu1 }
 0x192   :  { %1992 = vst [vmem:[%s2655_s2 + $0x8] sm:$0xff] %v715_v40  ;;  %1994 = vst [vmem:[%s2655_s2 + $0x18] sm:$0xff] %v756_v41  ;;  %v717_v59 = vpop.f32.mrb[2].mxu0  ;;  %v758_v53 = vpop.f32.mrb[2].mxu1 }
 0x193   :  { %v718_v42 = vpop.f32.mrb[3].mxu0  ;;  %v759_v43 = vpop.f32.mrb[3].mxu1 }
 0x198   :  { %v795_v44 = vpop.f32.mrb[4].mxu0  ;;  %v836_v45 = vpop.f32.mrb[4].mxu1 }
 0x199   :  { %1995 = vst [vmem:[%s2655_s2 + $0x20] sm:$0xff] %v795_v44  ;;  %1997 = vst [vmem:[%s2655_s2 + $0x30] sm:$0xff] %v836_v45  ;;  %v797_v46 = vpop.f32.mrb[5].mxu0  ;;  %v838_v48 = vpop.f32.mrb[5].mxu1 }
 0x19a   :  { %1996 = vst [vmem:[%s2655_s2 + $0x28] sm:$0xff] %v797_v46  ;;  %1998 = vst [vmem:[%s2655_s2 + $0x38] sm:$0xff] %v838_v48  ;;  %v799_v49 = vpop.f32.mrb[6].mxu0  ;;  %v840_v50 = vpop.f32.mrb[6].mxu1 }
 0x19b   :  { %v800_v51 = vpop.f32.mrb[7].mxu0  ;;  %v841_v52 = vpop.f32.mrb[7].mxu1 }
 0x1a0   :  { %v877_v54 = vpop.f32.mrb[8].mxu0  ;;  %v918_v55 = vpop.f32.mrb[8].mxu1 }
 0x1a1   :  { %1999 = vst [vmem:[%s2655_s2 + $0x40] sm:$0xff] %v877_v54  ;;  %2001 = vst [vmem:[%s2655_s2 + $0x50] sm:$0xff] %v918_v55  ;;  %v879_v56 = vpop.f32.mrb[9].mxu0  ;;  %v920_v58 = vpop.f32.mrb[9].mxu1 }
 0x1a2   :  { %2000 = vst [vmem:[%s2655_s2 + $0x48] sm:$0xff] %v879_v56  ;;  %2002 = vst [vmem:[%s2655_s2 + $0x58] sm:$0xff] %v920_v58  ;;  %v881_v60 = vpop.f32.mrb[10].mxu0  ;;  %v922_v3 = vpop.f32.mrb[10].mxu1 }
 0x1a3   :  { %v882_v57 = vpop.f32.mrb[11].mxu0  ;;  %v923_v61 = vpop.f32.mrb[11].mxu1 }
 0x1a8   :  { %v959_v62 = vpop.f32.mrb[12].mxu0  ;;  %v1000_v63 = vpop.f32.mrb[12].mxu1 }
 0x1a9   :  { %2003 = vst [vmem:[%s2655_s2 + $0x60] sm:$0xff] %v959_v62  ;;  %2005 = vst [vmem:[%s2655_s2 + $0x70] sm:$0xff] %v1000_v63  ;;  %v961_v0 = vpop.f32.mrb[13].mxu0  ;;  %v1002_v1 = vpop.f32.mrb[13].mxu1 }
 0x1aa   :  { %2004 = vst [vmem:[%s2655_s2 + $0x68] sm:$0xff] %v961_v0  ;;  %2006 = vst [vmem:[%s2655_s2 + $0x78] sm:$0xff] %v1002_v1  ;;  %v963_v2 = vpop.f32.mrb[14].mxu0  ;;  %v1004_v4 = vpop.f32.mrb[14].mxu1 }
 0x1ab   :  { %v964_v5 = vpop.f32.mrb[15].mxu0  ;;  %v1005_v6 = vpop.f32.mrb[15].mxu1 }
 0x1b0   :  { %v1041_v7 = vpop.f32.mrb[16].mxu0  ;;  %v1082_v8 = vpop.f32.mrb[16].mxu1 }
 0x1b1   :  { %2007 = vst [vmem:[%s2655_s2 + $0x80] sm:$0xff] %v1041_v7  ;;  %2009 = vst [vmem:[%s2655_s2 + $0x90] sm:$0xff] %v1082_v8  ;;  %v1043_v9 = vpop.f32.mrb[17].mxu0  ;;  %v1084_v10 = vpop.f32.mrb[17].mxu1 }
 0x1b2   :  { %2008 = vst [vmem:[%s2655_s2 + $0x88] sm:$0xff] %v1043_v9  ;;  %2010 = vst [vmem:[%s2655_s2 + $0x98] sm:$0xff] %v1084_v10  ;;  %v1045_v11 = vpop.f32.mrb[18].mxu0  ;;  %v1086_v12 = vpop.f32.mrb[18].mxu1 }
 0x1b3   :  { %v1046_v13 = vpop.f32.mrb[19].mxu0  ;;  %v1087_v14 = vpop.f32.mrb[19].mxu1 }
 0x1b8   :  { %v1123_v15 = vpop.f32.mrb[20].mxu0  ;;  %v1164_v16 = vpop.f32.mrb[20].mxu1 }
 0x1b9   :  { %2011 = vst [vmem:[%s2655_s2 + $0xa0] sm:$0xff] %v1123_v15  ;;  %2013 = vst [vmem:[%s2655_s2 + $0xb0] sm:$0xff] %v1164_v16  ;;  %v1125_v17 = vpop.f32.mrb[21].mxu0  ;;  %v1166_v18 = vpop.f32.mrb[21].mxu1 }
 0x1ba   :  { %2012 = vst [vmem:[%s2655_s2 + $0xa8] sm:$0xff] %v1125_v17  ;;  %2014 = vst [vmem:[%s2655_s2 + $0xb8] sm:$0xff] %v1166_v18  ;;  %v1127_v19 = vpop.f32.mrb[22].mxu0  ;;  %v1168_v20 = vpop.f32.mrb[22].mxu1 }
 0x1bb   :  { %v1128_v21 = vpop.f32.mrb[23].mxu0  ;;  %v1169_v22 = vpop.f32.mrb[23].mxu1 }
 0x1c0   :  { %v1205_v23 = vpop.f32.mrb[24].mxu0  ;;  %v1246_v24 = vpop.f32.mrb[24].mxu1 }
 0x1c1   :  { %2015 = vst [vmem:[%s2655_s2 + $0xc0] sm:$0xff] %v1205_v23  ;;  %2017 = vst [vmem:[%s2655_s2 + $0xd0] sm:$0xff] %v1246_v24  ;;  %v1207_v25 = vpop.f32.mrb[25].mxu0  ;;  %v1248_v26 = vpop.f32.mrb[25].mxu1 }
 0x1c2   :  { %2016 = vst [vmem:[%s2655_s2 + $0xc8] sm:$0xff] %v1207_v25  ;;  %2018 = vst [vmem:[%s2655_s2 + $0xd8] sm:$0xff] %v1248_v26  ;;  %v1209_v27 = vpop.f32.mrb[26].mxu0  ;;  %v1250_v28 = vpop.f32.mrb[26].mxu1 }
 0x1c3   :  { %v1210_v29 = vpop.f32.mrb[27].mxu0  ;;  %v1251_v30 = vpop.f32.mrb[27].mxu1 }
 0x1c8   :  { %v1287_v31 = vpop.f32.mrb[28].mxu0  ;;  %v1328_v32 = vpop.f32.mrb[28].mxu1 }
 0x1c9   :  { %2019 = vst [vmem:[%s2655_s2 + $0xe0] sm:$0xff] %v1287_v31  ;;  %2021 = vst [vmem:[%s2655_s2 + $0xf0] sm:$0xff] %v1328_v32  ;;  %v1289_v33 = vpop.f32.mrb[29].mxu0  ;;  %v1330_v34 = vpop.f32.mrb[29].mxu1 }
 0x1ca   :  { %2020 = vst [vmem:[%s2655_s2 + $0xe8] sm:$0xff] %v1289_v33  ;;  %2022 = vst [vmem:[%s2655_s2 + $0xf8] sm:$0xff] %v1330_v34  ;;  %v1291_v35 = vpop.f32.mrb[30].mxu0  ;;  %v1332_v36 = vpop.f32.mrb[30].mxu1 }
 0x1cb   :  { %v1292_v47 = vpop.f32.mrb[31].mxu0  ;;  %v1333_v37 = vpop.f32.mrb[31].mxu1 }
 0x1d0   :  { %v1369_v38 = vpop.f32.mrb[32].mxu0  ;;  %v1410_v39 = vpop.f32.mrb[32].mxu1 }
 0x1d1   :  { %2023 = vst [vmem:[%s2655_s2 + $0x100] sm:$0xff] %v1369_v38  ;;  %2025 = vst [vmem:[%s2655_s2 + $0x110] sm:$0xff] %v1410_v39  ;;  %v1371_v40 = vpop.f32.mrb[33].mxu0  ;;  %v1412_v41 = vpop.f32.mrb[33].mxu1 }
 0x1d2   :  { %2024 = vst [vmem:[%s2655_s2 + $0x108] sm:$0xff] %v1371_v40  ;;  %2026 = vst [vmem:[%s2655_s2 + $0x118] sm:$0xff] %v1412_v41  ;;  %v1373_v59 = vpop.f32.mrb[34].mxu0  ;;  %v1414_v53 = vpop.f32.mrb[34].mxu1 }
 0x1d3   :  { %v1374_v42 = vpop.f32.mrb[35].mxu0  ;;  %v1415_v43 = vpop.f32.mrb[35].mxu1 }
 0x1d8   :  { %v1451_v44 = vpop.f32.mrb[36].mxu0  ;;  %v1492_v45 = vpop.f32.mrb[36].mxu1 }
 0x1d9   :  { %2027 = vst [vmem:[%s2655_s2 + $0x120] sm:$0xff] %v1451_v44  ;;  %2029 = vst [vmem:[%s2655_s2 + $0x130] sm:$0xff] %v1492_v45  ;;  %v1453_v46 = vpop.f32.mrb[37].mxu0  ;;  %v1494_v48 = vpop.f32.mrb[37].mxu1 }
 0x1da   :  { %2028 = vst [vmem:[%s2655_s2 + $0x128] sm:$0xff] %v1453_v46  ;;  %2030 = vst [vmem:[%s2655_s2 + $0x138] sm:$0xff] %v1494_v48  ;;  %v1455_v49 = vpop.f32.mrb[38].mxu0  ;;  %v1496_v50 = vpop.f32.mrb[38].mxu1 }
 0x1db   :  { %v1456_v51 = vpop.f32.mrb[39].mxu0  ;;  %v1497_v52 = vpop.f32.mrb[39].mxu1 }
 0x1e0   :  { %v1533_v54 = vpop.f32.mrb[40].mxu0  ;;  %v1574_v55 = vpop.f32.mrb[40].mxu1 }
 0x1e1   :  { %2031 = vst [vmem:[%s2655_s2 + $0x140] sm:$0xff] %v1533_v54  ;;  %2033 = vst [vmem:[%s2655_s2 + $0x150] sm:$0xff] %v1574_v55  ;;  %v1535_v56 = vpop.f32.mrb[41].mxu0  ;;  %v1576_v58 = vpop.f32.mrb[41].mxu1 }
 0x1e2   :  { %2032 = vst [vmem:[%s2655_s2 + $0x148] sm:$0xff] %v1535_v56  ;;  %2034 = vst [vmem:[%s2655_s2 + $0x158] sm:$0xff] %v1576_v58  ;;  %v1537_v60 = vpop.f32.mrb[42].mxu0  ;;  %v1578_v3 = vpop.f32.mrb[42].mxu1 }
 0x1e3   :  { %v1538_v57 = vpop.f32.mrb[43].mxu0  ;;  %v1579_v61 = vpop.f32.mrb[43].mxu1 }
 0x1e8   :  { %v1615_v62 = vpop.f32.mrb[44].mxu0  ;;  %v1656_v63 = vpop.f32.mrb[44].mxu1 }
 0x1e9   :  { %2035 = vst [vmem:[%s2655_s2 + $0x160] sm:$0xff] %v1615_v62  ;;  %2037 = vst [vmem:[%s2655_s2 + $0x170] sm:$0xff] %v1656_v63  ;;  %v1617_v0 = vpop.f32.mrb[45].mxu0  ;;  %v1658_v1 = vpop.f32.mrb[45].mxu1 }
 0x1ea   :  { %2036 = vst [vmem:[%s2655_s2 + $0x168] sm:$0xff] %v1617_v0  ;;  %2038 = vst [vmem:[%s2655_s2 + $0x178] sm:$0xff] %v1658_v1  ;;  %v1619_v2 = vpop.f32.mrb[46].mxu0  ;;  %v1660_v4 = vpop.f32.mrb[46].mxu1 }
 0x1eb   :  { %v1620_v5 = vpop.f32.mrb[47].mxu0  ;;  %v1661_v6 = vpop.f32.mrb[47].mxu1 }
 0x1f0   :  { %v1697_v7 = vpop.f32.mrb[48].mxu0  ;;  %v1738_v8 = vpop.f32.mrb[48].mxu1 }
 0x1f1   :  { %2039 = vst [vmem:[%s2655_s2 + $0x180] sm:$0xff] %v1697_v7  ;;  %2041 = vst [vmem:[%s2655_s2 + $0x190] sm:$0xff] %v1738_v8  ;;  %v1699_v9 = vpop.f32.mrb[49].mxu0  ;;  %v1740_v10 = vpop.f32.mrb[49].mxu1 }
 0x1f2   :  { %2040 = vst [vmem:[%s2655_s2 + $0x188] sm:$0xff] %v1699_v9  ;;  %2042 = vst [vmem:[%s2655_s2 + $0x198] sm:$0xff] %v1740_v10  ;;  %v1701_v11 = vpop.f32.mrb[50].mxu0  ;;  %v1742_v12 = vpop.f32.mrb[50].mxu1 }
 0x1f3   :  { %v1702_v13 = vpop.f32.mrb[51].mxu0  ;;  %v1743_v14 = vpop.f32.mrb[51].mxu1 }
 0x1f8   :  { %v1779_v15 = vpop.f32.mrb[52].mxu0  ;;  %v1820_v16 = vpop.f32.mrb[52].mxu1 }
 0x1f9   :  { %2043 = vst [vmem:[%s2655_s2 + $0x1a0] sm:$0xff] %v1779_v15  ;;  %2045 = vst [vmem:[%s2655_s2 + $0x1b0] sm:$0xff] %v1820_v16  ;;  %v1781_v17 = vpop.f32.mrb[53].mxu0  ;;  %v1822_v18 = vpop.f32.mrb[53].mxu1 }
 0x1fa   :  { %2044 = vst [vmem:[%s2655_s2 + $0x1a8] sm:$0xff] %v1781_v17  ;;  %2046 = vst [vmem:[%s2655_s2 + $0x1b8] sm:$0xff] %v1822_v18  ;;  %v1783_v19 = vpop.f32.mrb[54].mxu0  ;;  %v1824_v20 = vpop.f32.mrb[54].mxu1 }
 0x1fb   :  { %v1784_v21 = vpop.f32.mrb[55].mxu0  ;;  %v1825_v22 = vpop.f32.mrb[55].mxu1 }
 0x200   :  { %v1861_v23 = vpop.f32.mrb[56].mxu0  ;;  %v1902_v24 = vpop.f32.mrb[56].mxu1 }
 0x201   :  { %2047 = vst [vmem:[%s2655_s2 + $0x1c0] sm:$0xff] %v1861_v23  ;;  %2049 = vst [vmem:[%s2655_s2 + $0x1d0] sm:$0xff] %v1902_v24  ;;  %v1863_v25 = vpop.f32.mrb[57].mxu0  ;;  %v1904_v26 = vpop.f32.mrb[57].mxu1 }
 0x202   :  { %2048 = vst [vmem:[%s2655_s2 + $0x1c8] sm:$0xff] %v1863_v25  ;;  %2050 = vst [vmem:[%s2655_s2 + $0x1d8] sm:$0xff] %v1904_v26  ;;  %v1865_v27 = vpop.f32.mrb[58].mxu0  ;;  %v1906_v28 = vpop.f32.mrb[58].mxu1 }
 0x203   :  { %v1866_v29 = vpop.f32.mrb[59].mxu0  ;;  %v1907_v30 = vpop.f32.mrb[59].mxu1 }
 0x208   :  { %v1943_v31 = vpop.f32.mrb[60].mxu0  ;;  %v1984_v32 = vpop.f32.mrb[60].mxu1 }
 0x209   :  { %2051 = vst [vmem:[%s2655_s2 + $0x1e0] sm:$0xff] %v1943_v31  ;;  %2053 = vst [vmem:[%s2655_s2 + $0x1f0] sm:$0xff] %v1984_v32  ;;  %v1945_v33 = vpop.f32.mrb[61].mxu0  ;;  %v1986_v34 = vpop.f32.mrb[61].mxu1 }
 0x20a   :  { %2052 = vst [vmem:[%s2655_s2 + $0x1e8] sm:$0xff] %v1945_v33  ;;  %2054 = vst [vmem:[%s2655_s2 + $0x1f8] sm:$0xff] %v1986_v34  ;;  %v1947_v35 = vpop.f32.mrb[62].mxu0  ;;  %v1988_v36 = vpop.f32.mrb[62].mxu1 }
 0x20b   :  { %v1948_v47 = vpop.f32.mrb[63].mxu0  ;;  %v1989_v37 = vpop.f32.mrb[63].mxu1 }
 0x20c   :  { %2059 = vsyncpa [#allocation3], 1 }

// kernel: bengali_senet_forward.3
= control target key start
LH: loop header
LB: loop body
LE: loop exit
PB: predicated region body
PF: predicated region fallthrough
CT: control target
= control target key end

     0   :  { %s19457_s0 = inlined_call_operand.vmem [shape: f32[8,8192], index: 0, kind: input, shape index: {}]   ;;  %s19458_s1 = inlined_call_operand.hbm [shape: f32[3,1,8192], index: 1, kind: input, shape index: {}]   ;;  %s19459_s2 = inlined_call_operand.hbm [shape: f32[3,1,8192], index: 2, kind: input, shape index: {}]   ;;  %s19460_s3 = inlined_call_operand.hbm [shape: bf16[3,8192,1024], index: 3, kind: input, shape index: {}]   ;;  %s19461_s4 = inlined_call_operand.hbm [shape: f32[3,1,1024], index: 4, kind: input, shape index: {}]   ;;  %s19462_s5 = inlined_call_operand.hbm [shape: f32[3,1,1024], index: 5, kind: input, shape index: {}]   ;;  %s19463_s6 = inlined_call_operand.hbm [shape: f32[3,1,1024], index: 6, kind: input, shape index: {}]   ;;  %s19464_s7 = inlined_call_operand.hbm [shape: bf16[3,1024,1024], index: 7, kind: input, shape index: {}]   ;;  %s19465_s8 = inlined_call_operand.hbm [shape: f32[3,1,1024], index: 8, kind: input, shape index: {}]   ;;  %s19466_s9 = inlined_call_operand.hbm [shape: f32[3,1,1024], index: 9, kind: input, shape index: {}]   ;;  %s19467_s10 = inlined_call_operand.hbm [shape: f32[3,1,1024], index: 10, kind: input, shape index: {}]   ;;  %s19468_s11 = inlined_call_operand.hbm [shape: bf16[3,1024,256], index: 11, kind: input, shape index: {}]   ;;  %s19469_s12 = inlined_call_operand.hbm [shape: f32[3,1,256], index: 12, kind: input, shape index: {}]   ;;  %s19470_s13 = inlined_call_operand.vmem [shape: f32[3,8,256], index: 13, kind: output, shape index: {}]  }
   0x1   :  { %19501 = sst [smem:[#allocation42_spill]] %s19457_s0 }
   0x2   :  { %19502 = sst [smem:[#allocation43_spill]] %s19458_s1 }
   0x3   :  { %19503 = sst [smem:[#allocation44_spill]] %s19459_s2 }
   0x4   :  { %19504 = sst [smem:[#allocation45_spill]] %s19460_s3 }
   0x5   :  { %19505 = sst [smem:[#allocation46_spill]] %s19461_s4 }
   0x6   :  { %19506 = sst [smem:[#allocation47_spill]] %s19464_s7 }
   0x7   :  { %19507 = sst [smem:[#allocation48_spill]] %s19466_s9 }
   0x8   :  { %19508 = sst [smem:[#allocation49_spill]] %s19468_s11 }
   0x9   :  { %19509 = sst [smem:[#allocation50_spill]] %s19469_s12 }
   0xa   :  { %19510 = sst [smem:[#allocation51_spill]] %s19470_s13 }
   0xb   :  { %18 = vsyncpa [#allocation4], 0 }
   0xc   :  { %20 = vsyncpa [#allocation4 + $0x1], 0 }
   0xd   :  { %21 = vsyncpa [#allocation6], 0 }
   0xe   :  { %23 = vsyncpa [#allocation6 + $0x1], 0 }
   0xf   :  { %24 = vsyncpa [#allocation9], 0 }
  0x10   :  { %26 = vsyncpa [#allocation9 + $0x1], 0 }
  0x11   :  { %27 = vsyncpa [#allocation12], 0 }
  0x12   :  { %29 = vsyncpa [#allocation12 + $0x1], 0 }
  0x13   :  { %30 = vsyncpa [#allocation15], 0 }
  0x14   :  { %32 = vsyncpa [#allocation15 + $0x1], 0 }
  0x15   :  { %33 = vsyncpa [#allocation18], 0 }
  0x16   :  { %35 = vsyncpa [#allocation18 + $0x1], 0 }
  0x17   :  { %36 = vsyncpa [#allocation21], 0 }
  0x18   :  { %38 = vsyncpa [#allocation21 + $0x1], 0  ;;  %s16664_s25 = smov 0   ;;  %s16666_s26 = smov 0  }
  0x19   :  { %s16668_s27 = smov 0   ;;  %s16670_s28 = smov 0  }
  0x1a   :  { %s16672_s29 = smov 0   ;;  %s16674_s30 = smov 0  }
  0x1b   :  { %s16676_s14 = smov 0   ;;  %s16678_s15 = smov 0  }
  0x1c   :  { %s16680_s16 = smov 0   ;;  %s16682_s17 = smov 0  }
  0x1d   :  { %s16684_s18 = smov 0  }
  0x1e LB: > { %19511 = sst [smem:[#allocation29_spill]] %s16539_s26  ;;  %s19473_s19 = sadd.s32 4294967295, %s16575_s18   ;;  %s16575_s18 = sphi %s16684_s18, %s44_s18   ;;  %s16571_s17 = sphi %s16682_s17, %s19584_s17   ;;  %s16567_s16 = sphi %s16680_s16, %s19583_s16   ;;  %s16563_s15 = sphi %s16678_s15, %s19582_s15   ;;  %s16559_s14 = sphi %s16676_s14, %s19581_s14   ;;  %s16555_s30 = sphi %s16674_s30, %s19578_s30   ;;  %s16551_s29 = sphi %s16672_s29, %s19577_s29   ;;  %s16547_s28 = sphi %s16670_s28, %s19576_s28   ;;  %s16543_s27 = sphi %s16668_s27, %s19575_s27   ;;  %s16539_s26 = sphi %s16666_s26, %s19574_s26   ;;  %s16535_s25 = sphi %s16664_s25, %s19573_s25  }
  0x1f   : > { %19512 = sst [smem:[#allocation30_spill]] %s16543_s27  ;;  %s53_s20 = sadd.s32 1, %s16567_s16 }
  0x20   : > { %19513 = sst [smem:[#allocation31_spill]] %s16551_s29  ;;  %p54_p0 = scmp.ge.s32.totalorder %s53_s20, 4 }
  0x21   : > { %19514 = sst [smem:[#allocation32_spill]] %s16555_s30  ;;  %s56_s21 = sadd.s32 1, %s16571_s17 }
  0x22   : > { %19515 = sst [smem:[#allocation33_spill]] %s16559_s14  ;;  %s91_s22 = sadd.s32 1, %s16555_s30 }
  0x23   : > { %19516 = sst [smem:[#allocation34_spill]] %s16563_s15  ;;  %p98_p1 = scmp.ne.s32.totalorder %s16555_s30, %s16551_s29 }
  0x24   : > { %19517 = sst [smem:[#allocation35_spill]] %s16575_s18  ;;  %s19586_s20 = smov (%p54_p0, %s53_s20), 0 }
  0x25   : > { %19518 = sst [smem:[#allocation36_spill]] %s19586_s20  ;;  %s19588_s21 = smov (!%p54_p0, %s56_s21), %s16571_s17 }
  0x26   : > { %s87_s23 = ssub.s32 %s16567_s16, %s19586_s20  ;;  %p99_p2 = scmp.eq.s32.totalorder %s16575_s18, 0 }
  0x27   : > { %p58_p3 = scmp.ge.s32.totalorder %s19588_s21, 3  ;;  %p104_p4 = scmp.ne.s32.totalorder %s16551_s29, %s16547_s28 }
  0x28   : > { %p16732_p5 = por %p99_p2, %p98_p1  ;;  %p16738_p6 = scmp.eq.s32.totalorder %s19473_s19, 0 }
  0x29   : > { %s19590_s21 = smov (%p58_p3, %s19588_s21), 0  ;;  %s173_s28 = sadd.s32 1, %s16543_s27 }
  0x2a   : > { %s19519_s24 = scalar_select %p16732_p5, 1, 0 }
  0x2b   : > { %19521 = sst [smem:[#allocation37_spill]] %s19590_s21  ;;  %p16746_p7 = por %p16738_p6, %p104_p4 }
  0x2c   : > { %s86_s13 = ssub.s32 %s16571_s17, %s19590_s21  ;;  %p180_p8 = scmp.ne.s32.totalorder %s16543_s27, %s16539_s26 }
  0x2d   : > { %s19522_s20 = scalar_select %p16746_p7, 1, 0 }
  0x2e   : > { %s88_s15 = sor.u32 %s87_s23, %s86_s13  ;;  %p171_p9 = scmp.eq.s32.totalorder %s86_s13, 0 }
  0x2f   : > { %19523 = sst [smem:[#allocation38_spill]] %s19522_s20  ;;  %p89_p10 = scmp.eq.s32.totalorder %s88_s15, 0 }
  0x30   : > { %p16757_p11 = por %p180_p8, %p99_p2  ;;  %p186_p12 = scmp.ne.s32.totalorder %s16539_s26, %s16535_s25 }
  0x31   : > { %s16762_s14 = scalar_select %p171_p9, %s16543_s27, %s173_s28  }
  0x32   : > { %s19524_s19 = scalar_select %p16757_p11, 1, 0 }
  0x33   : > { %19525 = sst [smem:[#allocation39_spill]] %s16762_s14  ;;  %p16771_p13 = por %p186_p12, %p16738_p6 }
  0x34   : > { %s16765_s29 = scalar_select %p89_p10, %s16555_s30, %s91_s22  }
  0x35   : > { %s19527_s12 = scalar_select %p16771_p13, 1, 0 }
  0x36   : > { %19526 = sst [smem:[#allocation40_spill]] %s16765_s29  ;;  %p14008_p0 = scmp.ge.s32.totalorder %s16575_s18, 12 }
  0x37   : > { %19528 = sst [smem:[#allocation41_spill]] %s19527_s12  ;;  %s16777_s13 = sand.u32 (!%p14008_p0), 1, %s16555_s30  }
  0x38   : > { %440 = sbr.rel (%p14008_p0) target bundleno = 387 (0x183), region = 16  ;;  %s14010_s15 = sshll.u32 (!%p14008_p0), %s16567_s16, 4 }
  0x39   : > { %s19487_s25 = sshll.u32 (!%p14008_p0), %s16777_s13, 4  ;;  %s14011_s0 = sshll.u32 (!%p14008_p0), %s16571_s17, 6 }
  0x3a   : > { %s16782_s22 = sadd.s32 (!%p14008_p0), %s14011_s0, %s14010_s15  ;;  %s16785_s23 = sand.u32 (!%p14008_p0), 1, %s16575_s18  }
  0x3b   : > { %s19486_s28 = sshll.u32 (!%p14008_p0), %s16782_s22, 4  ;;  %s19529_s2 = sld [smem:[#allocation44_spill]] (!%p14008_p0) }
  0x3c   : > { %s478_s14 = scalar_lea.vmem (!%p14008_p0), [#allocation5], %s19487_s25  ;;  %s19491_s12 = scalar_lea.sflag (!%p14008_p0), [#allocation6], %s16785_s23 }
  0x3d   : > { %s488_s15 = sshll.u32 (!%p14008_p0), %s478_s14, 4  ;;  %s489_s15 = int_to_ptr.vmem [resolvable:$true] %s488_s15 }
  0x41   : > { %s16793_s30 = scalar_lea.hbm %s19529_s2, %s19486_s28  ;;  %s16129_s29 = scalar_lea.hbm %s19529_s2, 3072 }
  0x42   : > { %s16125_s26 = scalar_lea.hbm %s16793_s30, 256  ;;  %p16130_p4 = scmp.lt.u32.totalorder %s16793_s30, %s19529_s2 }
  0x43   : > { %p16126_p1 = scmp.ne.s32.totalorder %s16793_s30, %s16125_s26  ;;  %p16131_p6 = scmp.lt.u32.totalorder %s16129_s29, %s16125_s26 }
  0x44   : > { %p16133_p9 = scmp.lt.u32.totalorder %s16125_s26, %s16793_s30 }
  0x45   : > { %p16127_p2 = pnand %p16126_p1, %p16732_p5  ;;  %p16132_p8 = por %p16131_p6, %p16130_p4 }
  0x47   : > { %p16128_p3 = pneg %p16127_p2  ;;  %p16134_p10 = por %p16133_p9, %p16132_p8 }
  0x49   : > { %p16135_p12 = pnand %p16134_p10, %p16128_p3 }
  0x4b   : > { %16138 = shalt.err (!%p16135_p12)
}
  0x4c   : > { %s16139_s14 = scalar_lea.vmem %s489_s15, 256  ;;  %s16577_s25 = smov [#allocation5]  }
  0x4d   : > { %p16140_p0 = scmp.ne.s32.totalorder %s489_s15, %s16139_s14  ;;  %s16143_s0 = sshll.u32 %s16577_s25, 4  ;;  %s16144_s0 = int_to_ptr.vmem [resolvable:$false] %s16143_s0 }
  0x4e   : > { %s16145_s18 = scalar_lea.vmem %s16144_s0, 512  ;;  %p16146_p13 = scmp.lt.s32.totalorder %s489_s15, %s16144_s0 }
  0x4f   : > { %p16141_p1 = pnand %p16140_p0, %p16732_p5  ;;  %p16147_p7 = scmp.lt.s32.totalorder %s16145_s18, %s16139_s14 }
  0x51   : > { %p16142_p2 = pneg %p16141_p1  ;;  %p16148_p11 = por %p16147_p7, %p16146_p13 }
  0x53   : > { %p16149_p4 = pnand %p16148_p11, %p16142_p2 }
  0x55   : > { %16152 = shalt.err (!%p16149_p4)
}
  0x56   : > { %15814 = dma.hbm_to_vmem [thread:$0]  (%p16732_p5), %s16793_s30, 256, %s489_s15, %s19491_s12  }
  0x57   : > { %s19530_s26 = sshll.u32 %s16777_s13, 13  ;;  %s16824_s28 = sand.u32 1, %s16543_s27  }
  0x58   : > { %s16820_s20 = scalar_lea.vmem [#allocation7], %s19530_s26  ;;  %s16827_s0 = sshll.u32 %s16571_s17, 7 }
  0x59   : > { %s16830_s29 = sshll.u32 %s16824_s28, 3  ;;  %s19531_s4 = sld [smem:[#allocation46_spill]] }
  0x5a   : > { %s523_s30 = scalar_lea.vmem [#allocation8], %s16830_s29  ;;  %s16845_s25 = scalar_lea.hbm %s19463_s6, %s16827_s0 }
  0x5b   : > { %s531_s15 = sshll.u32 %s523_s30, 4  ;;  %s19500_s2 = scalar_lea.sflag [#allocation9], %s16785_s23  ;;  %s16839_s15 = int_to_ptr.vmem [resolvable:$true] %s531_s15 }
  0x5c   : > { %p19532_p11 = scmp.ne.s32.totalorder %s19524_s19, 0 }
  0x5f   : > { %s16836_s18 = scalar_lea.hbm %s19531_s4, %s16827_s0  ;;  %s16157_s11 = scalar_lea.hbm %s19531_s4, 384 }
  0x60   : > { %s16153_s27 = scalar_lea.hbm %s16836_s18, 128  ;;  %p16158_p6 = scmp.lt.u32.totalorder %s16836_s18, %s19531_s4 }
  0x61   : > { %p16154_p7 = scmp.ne.s32.totalorder %s16836_s18, %s16153_s27  ;;  %p16159_p8 = scmp.lt.u32.totalorder %s16157_s11, %s16153_s27 }
  0x62   : > { %p16161_p10 = scmp.lt.u32.totalorder %s16153_s27, %s16836_s18 }
  0x63   : > { %p16155_p13 = pnand %p16154_p7, %p19532_p11  ;;  %p16160_p9 = por %p16159_p8, %p16158_p6 }
  0x65   : > { %p16156_p3 = pneg %p16155_p13  ;;  %p16162_p12 = por %p16161_p10, %p16160_p9 }
  0x67   : > { %p16163_p0 = pnand %p16162_p12, %p16156_p3 }
  0x69   : > { %16166 = shalt.err (!%p16163_p0)
}
  0x6a   : > { %s16167_s12 = scalar_lea.vmem %s16839_s15, 128  ;;  %s16578_s30 = smov [#allocation8]  }
  0x6b   : > { %p16168_p1 = scmp.ne.s32.totalorder %s16839_s15, %s16167_s12  ;;  %s16171_s26 = sshll.u32 %s16578_s30, 4  ;;  %s16172_s26 = int_to_ptr.vmem [resolvable:$false] %s16171_s26 }
  0x6c   : > { %s16173_s7 = scalar_lea.vmem %s16172_s26, 256  ;;  %p16174_p7 = scmp.lt.s32.totalorder %s16839_s15, %s16172_s26 }
  0x6d   : > { %p16169_p2 = pnand %p16168_p1, %p19532_p11  ;;  %p16175_p13 = scmp.lt.s32.totalorder %s16173_s7, %s16167_s12 }
  0x6f   : > { %p16170_p4 = pneg %p16169_p2  ;;  %p16176_p6 = por %p16175_p13, %p16174_p7 }
  0x71   : > { %p16177_p8 = pnand %p16176_p6, %p16170_p4 }
  0x73   : > { %16180 = shalt.err (!%p16177_p8)
}
  0x74   : > { %15816 = dma.hbm_to_vmem [thread:$0]  (%p19532_p11), %s16836_s18, 128, %s16839_s15, %s19500_s2  }
  0x75   : > { %s561_s9 = scalar_lea.vmem [#allocation11], %s16830_s29  ;;  %s19498_s27 = scalar_lea.sflag [#allocation12], %s16785_s23 }
  0x76   : > { %s569_s11 = sshll.u32 %s561_s9, 4  ;;  %s16181_s21 = scalar_lea.hbm %s16845_s25, 128  ;;  %s570_s11 = int_to_ptr.vmem [resolvable:$true] %s569_s11 }
  0x77   : > { %p16182_p3 = scmp.ne.s32.totalorder %s16845_s25, %s16181_s21  ;;  %s16185_s30 = scalar_lea.hbm %s19463_s6, 384 }
  0x78   : > { %p16186_p12 = scmp.lt.u32.totalorder %s16845_s25, %s19463_s6  ;;  %p16187_p0 = scmp.lt.u32.totalorder %s16185_s30, %s16181_s21 }
  0x79   : > { %p16183_p9 = pnand %p16182_p3, %p19532_p11  ;;  %p16189_p2 = scmp.lt.u32.totalorder %s16181_s21, %s16845_s25 }
  0x7a   : > { %p16188_p1 = por %p16187_p0, %p16186_p12 }
  0x7b   : > { %p16184_p10 = pneg %p16183_p9 }
  0x7c   : > { %p16190_p4 = por %p16189_p2, %p16188_p1 }
  0x7e   : > { %p16191_p7 = pnand %p16190_p4, %p16184_p10 }
  0x80   : > { %16194 = shalt.err (!%p16191_p7)
}
  0x81   : > { %s16195_s18 = scalar_lea.vmem %s570_s11, 128  ;;  %s16579_s15 = smov [#allocation11]  }
  0x82   : > { %p16196_p13 = scmp.ne.s32.totalorder %s570_s11, %s16195_s18  ;;  %s16199_s9 = sshll.u32 %s16579_s15, 4  ;;  %s16200_s9 = int_to_ptr.vmem [resolvable:$false] %s16199_s9 }
  0x83   : > { %s16201_s14 = scalar_lea.vmem %s16200_s9, 256  ;;  %p16202_p3 = scmp.lt.s32.totalorder %s570_s11, %s16200_s9 }
  0x84   : > { %p16197_p6 = pnand %p16196_p13, %p19532_p11  ;;  %p16203_p9 = scmp.lt.s32.totalorder %s16201_s14, %s16195_s18 }
  0x86   : > { %p16198_p8 = pneg %p16197_p6  ;;  %p16204_p5 = por %p16203_p9, %p16202_p3 }
  0x88   : > { %p16205_p0 = pnand %p16204_p5, %p16198_p8 }
  0x8a   : > { %16208 = shalt.err (!%p16205_p0)
}
  0x8b   : > { %15818 = dma.hbm_to_vmem [thread:$0]  (%p19532_p11), %s16845_s25, 128, %s570_s11, %s19498_s27  }
  0x8c   : > { %s16896_s30 = scalar_lea.hbm %s19465_s8, %s16827_s0  ;;  %s601_s26 = scalar_lea.vmem [#allocation14], %s16830_s29 }
  0x8d   : > { %s609_s7 = sshll.u32 %s601_s26, 4  ;;  %s19499_s18 = scalar_lea.sflag [#allocation15], %s16785_s23  ;;  %s610_s7 = int_to_ptr.vmem [resolvable:$true] %s609_s7 }
  0x8e   : > { %s16209_s15 = scalar_lea.hbm %s16896_s30, 128  ;;  %s16213_s11 = scalar_lea.hbm %s19465_s8, 384 }
  0x8f   : > { %p16210_p5 = scmp.ne.s32.totalorder %s16896_s30, %s16209_s15  ;;  %p16214_p1 = scmp.lt.u32.totalorder %s16896_s30, %s19465_s8 }
  0x90   : > { %p16215_p2 = scmp.lt.u32.totalorder %s16213_s11, %s16209_s15  ;;  %p16217_p7 = scmp.lt.u32.totalorder %s16209_s15, %s16896_s30 }
  0x91   : > { %p16211_p10 = pnand %p16210_p5, %p19532_p11 }
  0x92   : > { %p16216_p4 = por %p16215_p2, %p16214_p1 }
  0x93   : > { %p16212_p12 = pneg %p16211_p10 }
  0x94   : > { %p16218_p13 = por %p16217_p7, %p16216_p4 }
  0x96   : > { %p16219_p6 = pnand %p16218_p13, %p16212_p12 }
  0x98   : > { %16222 = shalt.err (!%p16219_p6)
}
  0x99   : > { %s16223_s12 = scalar_lea.vmem %s610_s7, 128  ;;  %s16580_s26 = smov [#allocation14]  }
  0x9a   : > { %p16224_p8 = scmp.ne.s32.totalorder %s610_s7, %s16223_s12  ;;  %s16227_s27 = sshll.u32 %s16580_s26, 4  ;;  %s16228_s27 = int_to_ptr.vmem [resolvable:$false] %s16227_s27 }
  0x9b   : > { %s16229_s9 = scalar_lea.vmem %s16228_s27, 256  ;;  %p16230_p0 = scmp.lt.s32.totalorder %s610_s7, %s16228_s27 }
  0x9c   : > { %p16225_p3 = pnand %p16224_p8, %p19532_p11  ;;  %p16231_p5 = scmp.lt.s32.totalorder %s16229_s9, %s16223_s12 }
  0x9e   : > { %p16226_p9 = pneg %p16225_p3  ;;  %p16232_p10 = por %p16231_p5, %p16230_p0 }
  0xa0   : > { %p16233_p1 = pnand %p16232_p10, %p16226_p9 }
  0xa2   : > { %16236 = shalt.err (!%p16233_p1)
}
  0xa3   : > { %15820 = dma.hbm_to_vmem [thread:$0]  (%p19532_p11), %s16896_s30, 128, %s610_s7, %s19499_s18  }
  0xa4   : > { %s16923_s11 = scalar_lea.hbm %s19467_s10, %s16827_s0  ;;  %s639_s27 = scalar_lea.vmem [#allocation17], %s16830_s29 }
  0xa5   : > { %s647_s14 = sshll.u32 %s639_s27, 4  ;;  %s636_s21 = scalar_lea.sflag [#allocation18], %s16785_s23  ;;  %s648_s14 = int_to_ptr.vmem [resolvable:$true] %s647_s14 }
  0xa6   : > { %s16237_s12 = scalar_lea.hbm %s16923_s11, 128  ;;  %s16241_s7 = scalar_lea.hbm %s19467_s10, 384 }
  0xa7   : > { %p16238_p12 = scmp.ne.s32.totalorder %s16923_s11, %s16237_s12  ;;  %p16242_p7 = scmp.lt.u32.totalorder %s16923_s11, %s19467_s10 }
  0xa8   : > { %p16243_p13 = scmp.lt.u32.totalorder %s16241_s7, %s16237_s12  ;;  %p16245_p8 = scmp.lt.u32.totalorder %s16237_s12, %s16923_s11 }
  0xa9   : > { %p16239_p2 = pnand %p16238_p12, %p19532_p11 }
  0xaa   : > { %p16244_p6 = por %p16243_p13, %p16242_p7 }
  0xab   : > { %p16240_p4 = pneg %p16239_p2 }
  0xac   : > { %p16246_p3 = por %p16245_p8, %p16244_p6 }
  0xae   : > { %p16247_p9 = pnand %p16246_p3, %p16240_p4 }
  0xb0   : > { %16250 = shalt.err (!%p16247_p9)
}
  0xb1   : > { %s16251_s25 = scalar_lea.vmem %s648_s14, 128  ;;  %s16581_s27 = smov [#allocation17]  }
  0xb2   : > { %p16252_p0 = scmp.ne.s32.totalorder %s648_s14, %s16251_s25  ;;  %s16255_s18 = sshll.u32 %s16581_s27, 4  ;;  %s16256_s18 = int_to_ptr.vmem [resolvable:$false] %s16255_s18 }
  0xb3   : > { %s16257_s26 = scalar_lea.vmem %s16256_s18, 256  ;;  %p16258_p1 = scmp.lt.s32.totalorder %s648_s14, %s16256_s18 }
  0xb4   : > { %p16253_p5 = pnand %p16252_p0, %p19532_p11  ;;  %p16259_p12 = scmp.lt.s32.totalorder %s16257_s26, %s16251_s25 }
  0xb6   : > { %p16254_p10 = pneg %p16253_p5  ;;  %p16260_p2 = por %p16259_p12, %p16258_p1 }
  0xb8   : > { %p16261_p7 = pnand %p16260_p2, %p16254_p10 }
  0xba   : > { %16264 = shalt.err (!%p16261_p7)
}
  0xbb   : > { %15822 = dma.hbm_to_vmem [thread:$0]  (%p19532_p11), %s16923_s11, 128, %s648_s14, %s636_s21  }
  0xbc   : > { %s19533_s12 = sshll.u32 %s16782_s22, 4  ;;  %s19534_s1 = sld [smem:[#allocation43_spill]] }
  0xbd   : > { %s19535_s9 = sshll.u32 %s16777_s13, 4  ;;  %s15734_s27 = sshll.u32 %s16567_s16, 11 }
  0xbe   : > { %s457_s15 = scalar_lea.vmem [#allocation3], %s19535_s9  ;;  %s454_s26 = scalar_lea.sflag [#allocation4], %s16777_s13 }
  0xbf   : > { %s467_s25 = sshll.u32 %s457_s15, 4  ;;  %p19536_p13 = scmp.ne.s32.totalorder %s19519_s24, 0  ;;  %s16955_s25 = int_to_ptr.vmem [resolvable:$true] %s467_s25 }
  0xc2   : > { %s16951_s18 = scalar_lea.hbm %s19534_s1, %s19533_s12  ;;  %s16269_s14 = scalar_lea.hbm %s19534_s1, 3072 }
  0xc3   : > { %s16265_s2 = scalar_lea.hbm %s16951_s18, 256  ;;  %p16270_p3 = scmp.lt.u32.totalorder %s16951_s18, %s19534_s1 }
  0xc4   : > { %p16266_p4 = scmp.ne.s32.totalorder %s16951_s18, %s16265_s2  ;;  %p16271_p9 = scmp.lt.u32.totalorder %s16269_s14, %s16265_s2 }
  0xc5   : > { %p16273_p5 = scmp.lt.u32.totalorder %s16265_s2, %s16951_s18 }
  0xc6   : > { %p16267_p6 = pnand %p16266_p4, %p19536_p13  ;;  %p16272_p0 = por %p16271_p9, %p16270_p3 }
  0xc8   : > { %p16268_p8 = pneg %p16267_p6  ;;  %p16274_p10 = por %p16273_p5, %p16272_p0 }
  0xca   : > { %p16275_p1 = pnand %p16274_p10, %p16268_p8 }
  0xcc   : > { %16278 = shalt.err (!%p16275_p1)
}
  0xcd   : > { %s16279_s13 = scalar_lea.vmem %s16955_s25, 256  ;;  %s16582_s7 = smov [#allocation3]  }
  0xce   : > { %p16280_p12 = scmp.ne.s32.totalorder %s16955_s25, %s16279_s13  ;;  %s16283_s9 = sshll.u32 %s16582_s7, 4  ;;  %s16284_s9 = int_to_ptr.vmem [resolvable:$false] %s16283_s9 }
  0xcf   : > { %s16285_s15 = scalar_lea.vmem %s16284_s9, 512  ;;  %p16286_p4 = scmp.lt.s32.totalorder %s16955_s25, %s16284_s9 }
  0xd0   : > { %p16281_p2 = pnand %p16280_p12, %p19536_p13  ;;  %p16287_p6 = scmp.lt.s32.totalorder %s16285_s15, %s16279_s13 }
  0xd2   : > { %p16282_p7 = pneg %p16281_p2  ;;  %p16288_p3 = por %p16287_p6, %p16286_p4 }
  0xd4   : > { %p16289_p9 = pnand %p16288_p3, %p16282_p7 }
  0xd6   : > { %16292 = shalt.err (!%p16289_p9)
}
  0xd7   : > { %15813 = dma.hbm_to_vmem [thread:$0]  (%p19536_p13), %s16951_s18, 256, %s16955_s25, %s454_s26  }
  0xd8   : > { %s14020_s2 = sshll.u32 %s16571_s17, 13  ;;  %s19537_s22 = sshll.u32 %s16820_s20, 4  ;;  %s16983_s22 = int_to_ptr.vmem [resolvable:$true] %s19537_s22 }
  0xd9   : > { %s506_s11 = sadd.s32 %s15734_s27, %s14020_s2  ;;  %s19538_s3 = sld [smem:[#allocation45_spill]] }
  0xda   : > { %s14021_s14 = sshll.u32 %s506_s11, 6 }
  0xdf   : > { %s16990_s13 = scalar_lea.hbm %s19538_s3, %s14021_s14  ;;  %s16297_s25 = scalar_lea.hbm %s19538_s3, 1572864 }
  0xe0   : > { %s16293_s7 = scalar_lea.hbm %s16990_s13, 131072  ;;  %p16298_p10 = scmp.lt.u32.totalorder %s16990_s13, %s19538_s3 }
  0xe1   : > { %p16294_p8 = scmp.ne.s32.totalorder %s16990_s13, %s16293_s7  ;;  %p16299_p1 = scmp.lt.u32.totalorder %s16297_s25, %s16293_s7 }
  0xe2   : > { %p16301_p2 = scmp.lt.u32.totalorder %s16293_s7, %s16990_s13 }
  0xe3   : > { %p16295_p0 = pnand %p16294_p8, %p19536_p13  ;;  %p16300_p12 = por %p16299_p1, %p16298_p10 }
  0xe5   : > { %p16296_p5 = pneg %p16295_p0  ;;  %p16302_p7 = por %p16301_p2, %p16300_p12 }
  0xe7   : > { %p16303_p4 = pnand %p16302_p7, %p16296_p5 }
  0xe9   : > { %16306 = shalt.err (!%p16303_p4)
}
  0xea   : > { %s16307_s9 = scalar_lea.vmem %s16983_s22, 131072  ;;  %s16583_s15 = smov [#allocation7]  }
  0xeb   : > { %p16308_p6 = scmp.ne.s32.totalorder %s16983_s22, %s16307_s9  ;;  %s16311_s2 = sshll.u32 %s16583_s15, 4  ;;  %s16312_s2 = int_to_ptr.vmem [resolvable:$false] %s16311_s2 }
  0xec   : > { %s16313_s11 = scalar_lea.vmem %s16312_s2, 262144  ;;  %p16314_p8 = scmp.lt.s32.totalorder %s16983_s22, %s16312_s2 }
  0xed   : > { %p16309_p3 = pnand %p16308_p6, %p19536_p13  ;;  %p16315_p0 = scmp.lt.s32.totalorder %s16313_s11, %s16307_s9 }
  0xef   : > { %p16310_p9 = pneg %p16309_p3  ;;  %p16316_p10 = por %p16315_p0, %p16314_p8 }
  0xf1   : > { %p16317_p1 = pnand %p16316_p10, %p16310_p9 }
  0xf3   : > { %16320 = shalt.err (!%p16317_p1)
}
  0xf4   : > { %s16584_s14 = smov 512   ;;  %s16585_s12 = smov 32  }
  0xf5   : > { %s19539_s30 = scalar_lea.sflag [#allocation6], %s16785_s23  ;;  %s17022_s18 = scalar_lea.hbm %s19462_s5, %s16827_s0 }
  0xf6   : > { %15815 = dma.hbm_to_vmem [thread:$0]  (%p19536_p13), %s16990_s13, 131072, %s16983_s22, %s19539_s30, %s16584_s14, %s16584_s14, %s16585_s12  }
  0xf7   : > { %s542_s25 = scalar_lea.vmem [#allocation10], %s16830_s29  ;;  %s14031_s26 = sshll.u32 %s16824_s28, 12 }
  0xf8   : > { %s550_s27 = sshll.u32 %s542_s25, 4  ;;  %s16321_s9 = scalar_lea.hbm %s17022_s18, 128  ;;  %s551_s27 = int_to_ptr.vmem [resolvable:$true] %s550_s27 }
  0xf9   : > { %p16322_p5 = scmp.ne.s32.totalorder %s17022_s18, %s16321_s9  ;;  %s16325_s13 = scalar_lea.hbm %s19462_s5, 384 }
  0xfa   : > { %p16326_p13 = scmp.lt.u32.totalorder %s17022_s18, %s19462_s5  ;;  %p16327_p7 = scmp.lt.u32.totalorder %s16325_s13, %s16321_s9 }
  0xfb   : > { %p16323_p12 = pnand %p16322_p5, %p19532_p11  ;;  %p16329_p6 = scmp.lt.u32.totalorder %s16321_s9, %s17022_s18 }
  0xfc   : > { %p16328_p4 = por %p16327_p7, %p16326_p13 }
  0xfd   : > { %p16324_p2 = pneg %p16323_p12 }
  0xfe   : > { %p16330_p3 = por %p16329_p6, %p16328_p4 }
 0x100   : > { %p16331_p9 = pnand %p16330_p3, %p16324_p2 }
 0x102   : > { %16334 = shalt.err (!%p16331_p9)
}
 0x103   : > { %s16335_s11 = scalar_lea.vmem %s551_s27, 128  ;;  %s16586_s30 = smov [#allocation10]  }
 0x104   : > { %p16336_p8 = scmp.ne.s32.totalorder %s551_s27, %s16335_s11  ;;  %s16339_s7 = sshll.u32 %s16586_s30, 4  ;;  %s16340_s7 = int_to_ptr.vmem [resolvable:$false] %s16339_s7 }
 0x105   : > { %s16341_s20 = scalar_lea.vmem %s16340_s7, 256  ;;  %p16342_p1 = scmp.lt.s32.totalorder %s551_s27, %s16340_s7 }
 0x106   : > { %p16337_p0 = pnand %p16336_p8, %p19532_p11  ;;  %p16343_p5 = scmp.lt.s32.totalorder %s16341_s20, %s16335_s11 }
 0x108   : > { %p16338_p10 = pneg %p16337_p0  ;;  %p16344_p12 = por %p16343_p5, %p16342_p1 }
 0x10a   : > { %p16345_p7 = pnand %p16344_p12, %p16338_p10 }
 0x10c   : > { %16348 = shalt.err (!%p16345_p7)
}
 0x10d   : > { %s19540_s25 = scalar_lea.sflag [#allocation9], %s16785_s23  ;;  %s15738_s9 = sshll.u32 %s16571_s17, 16 }
 0x10e   : > { %15817 = dma.hbm_to_vmem [thread:$0]  (%p19532_p11), %s17022_s18, 128, %s551_s27, %s19540_s25  }
 0x10f   : > { %s19541_s13 = sld [smem:[#allocation47_spill]]  ;;  %s580_s2 = scalar_lea.vmem [#allocation13], %s14031_s26 }
 0x110   : > { %s587_s11 = sshll.u32 %s580_s2, 4  ;;  %s17053_s11 = int_to_ptr.vmem [resolvable:$true] %s587_s11 }
 0x115   : > { %s17049_s15 = scalar_lea.hbm %s19541_s13, %s15738_s9  ;;  %s16353_s7 = scalar_lea.hbm %s19541_s13, 196608 }
 0x116   : > { %s16349_s30 = scalar_lea.hbm %s17049_s15, 65536  ;;  %p16354_p6 = scmp.lt.u32.totalorder %s17049_s15, %s19541_s13 }
 0x117   : > { %p16350_p2 = scmp.ne.s32.totalorder %s17049_s15, %s16349_s30  ;;  %p16355_p3 = scmp.lt.u32.totalorder %s16353_s7, %s16349_s30 }
 0x118   : > { %p16357_p8 = scmp.lt.u32.totalorder %s16349_s30, %s17049_s15 }
 0x119   : > { %p16351_p13 = pnand %p16350_p2, %p19532_p11  ;;  %p16356_p9 = por %p16355_p3, %p16354_p6 }
 0x11b   : > { %p16352_p4 = pneg %p16351_p13  ;;  %p16358_p0 = por %p16357_p8, %p16356_p9 }
 0x11d   : > { %p16359_p10 = pnand %p16358_p0, %p16352_p4 }
 0x11f   : > { %16362 = shalt.err (!%p16359_p10)
}
 0x120   : > { %s16363_s26 = scalar_lea.vmem %s17053_s11, 65536  ;;  %s16587_s9 = smov [#allocation13]  }
 0x121   : > { %p16364_p1 = scmp.ne.s32.totalorder %s17053_s11, %s16363_s26  ;;  %s16367_s24 = sshll.u32 %s16587_s9, 4  ;;  %s16368_s24 = int_to_ptr.vmem [resolvable:$false] %s16367_s24 }
 0x122   : > { %s16369_s22 = scalar_lea.vmem %s16368_s24, 131072  ;;  %p16370_p7 = scmp.lt.s32.totalorder %s17053_s11, %s16368_s24 }
 0x123   : > { %p16365_p5 = pnand %p16364_p1, %p19532_p11  ;;  %p16371_p2 = scmp.lt.s32.totalorder %s16369_s22, %s16363_s26 }
 0x125   : > { %p16366_p12 = pneg %p16365_p5  ;;  %p16372_p13 = por %p16371_p2, %p16370_p7 }
 0x127   : > { %p16373_p6 = pnand %p16372_p13, %p16366_p12 }
 0x129   : > { %16376 = shalt.err (!%p16373_p6)
}
 0x12a   : > { %s19542_s2 = scalar_lea.sflag [#allocation12], %s16785_s23  ;;  %s19543_s27 = sld [smem:[#allocation48_spill]] }
 0x12b   : > { %15819 = dma.hbm_to_vmem [thread:$0]  (%p19532_p11), %s17049_s15, 65536, %s17053_s11, %s19542_s2, %s16584_s14, %s16584_s14, %s16585_s12  }
 0x12c   : > { %s620_s25 = scalar_lea.vmem [#allocation16], %s16830_s29  ;;  %s14043_s9 = sshll.u32 %s16824_s28, 10 }
 0x12d   : > { %s628_s26 = sshll.u32 %s620_s25, 4  ;;  %s629_s26 = int_to_ptr.vmem [resolvable:$true] %s628_s26 }
 0x130   : > { %s19544_s7 = smov %s19543_s27  ;;  %s17085_s20 = scalar_lea.hbm %s19543_s27, %s16827_s0 }
 0x131   : > { %s16377_s24 = scalar_lea.hbm %s17085_s20, 128  ;;  %s16381_s12 = scalar_lea.hbm %s19544_s7, 384 }
 0x132   : > { %p16378_p4 = scmp.ne.s32.totalorder %s17085_s20, %s16377_s24  ;;  %p16382_p8 = scmp.lt.u32.totalorder %s17085_s20, %s19544_s7 }
 0x133   : > { %p16383_p0 = scmp.lt.u32.totalorder %s16381_s12, %s16377_s24  ;;  %p16385_p1 = scmp.lt.u32.totalorder %s16377_s24, %s17085_s20 }
 0x134   : > { %p16379_p3 = pnand %p16378_p4, %p19532_p11 }
 0x135   : > { %p16384_p10 = por %p16383_p0, %p16382_p8 }
 0x136   : > { %p16380_p9 = pneg %p16379_p3 }
 0x137   : > { %p16386_p5 = por %p16385_p1, %p16384_p10 }
 0x139   : > { %p16387_p12 = pnand %p16386_p5, %p16380_p9 }
 0x13b   : > { %16390 = shalt.err (!%p16387_p12)
}
 0x13c   : > { %s16391_s29 = scalar_lea.vmem %s629_s26, 128  ;;  %s16588_s11 = smov [#allocation16]  }
 0x13d   : > { %p16392_p7 = scmp.ne.s32.totalorder %s629_s26, %s16391_s29  ;;  %s16395_s2 = sshll.u32 %s16588_s11, 4  ;;  %s16396_s2 = int_to_ptr.vmem [resolvable:$false] %s16395_s2 }
 0x13e   : > { %s16397_s30 = scalar_lea.vmem %s16396_s2, 256  ;;  %p16398_p6 = scmp.lt.s32.totalorder %s629_s26, %s16396_s2 }
 0x13f   : > { %p16393_p2 = pnand %p16392_p7, %p19532_p11  ;;  %p16399_p4 = scmp.lt.s32.totalorder %s16397_s30, %s16391_s29 }
 0x141   : > { %p16394_p13 = pneg %p16393_p2  ;;  %p16400_p3 = por %p16399_p4, %p16398_p6 }
 0x143   : > { %p16401_p0 = pnand %p16400_p3, %p16394_p13 }
 0x145   : > { %16404 = shalt.err (!%p16401_p0)
}
 0x146   : > { %s19545_s18 = scalar_lea.sflag [#allocation15], %s16785_s23  ;;  %s15742_s27 = sshll.u32 %s16571_s17, 14 }
 0x147   : > { %15821 = dma.hbm_to_vmem [thread:$0]  (%p19532_p11), %s17085_s20, 128, %s629_s26, %s19545_s18  }
 0x148   : > { %s19546_s22 = sld [smem:[#allocation49_spill]]  ;;  %s658_s12 = scalar_lea.vmem [#allocation19], %s14043_s9 }
 0x149   : > { %s665_s15 = sshll.u32 %s658_s12, 4  ;;  %s17116_s15 = int_to_ptr.vmem [resolvable:$true] %s665_s15 }
 0x14e   : > { %s17112_s14 = scalar_lea.hbm %s19546_s22, %s15742_s27  ;;  %s16409_s29 = scalar_lea.hbm %s19546_s22, 49152 }
 0x14f   : > { %s16405_s0 = scalar_lea.hbm %s17112_s14, 16384  ;;  %p16410_p1 = scmp.lt.u32.totalorder %s17112_s14, %s19546_s22 }
 0x150   : > { %p16406_p9 = scmp.ne.s32.totalorder %s17112_s14, %s16405_s0  ;;  %p16411_p5 = scmp.lt.u32.totalorder %s16409_s29, %s16405_s0 }
 0x151   : > { %p16413_p7 = scmp.lt.u32.totalorder %s16405_s0, %s17112_s14 }
 0x152   : > { %p16407_p8 = pnand %p16406_p9, %p19532_p11  ;;  %p16412_p12 = por %p16411_p5, %p16410_p1 }
 0x154   : > { %p16408_p10 = pneg %p16407_p8  ;;  %p16414_p2 = por %p16413_p7, %p16412_p12 }
 0x156   : > { %p16415_p13 = pnand %p16414_p2, %p16408_p10 }
 0x158   : > { %16418 = shalt.err (!%p16415_p13)
}
 0x159   : > { %s16419_s9 = scalar_lea.vmem %s17116_s15, 16384  ;;  %s16589_s30 = smov [#allocation19]  }
 0x15a   : > { %p16420_p6 = scmp.ne.s32.totalorder %s17116_s15, %s16419_s9  ;;  %s16423_s18 = sshll.u32 %s16589_s30, 4  ;;  %s16424_s18 = int_to_ptr.vmem [resolvable:$false] %s16423_s18 }
 0x15b   : > { %s16425_s27 = scalar_lea.vmem %s16424_s18, 32768  ;;  %p16426_p0 = scmp.lt.s32.totalorder %s17116_s15, %s16424_s18 }
 0x15c   : > { %p16421_p4 = pnand %p16420_p6, %p19532_p11  ;;  %p16427_p9 = scmp.lt.s32.totalorder %s16425_s27, %s16419_s9 }
 0x15e   : > { %p16422_p3 = pneg %p16421_p4  ;;  %p16428_p8 = por %p16427_p9, %p16426_p0 }
 0x160   : > { %p16429_p1 = pnand %p16428_p8, %p16422_p3 }
 0x162   : > { %16432 = shalt.err (!%p16429_p1)
}
 0x163   : > { %s16590_s25 = smov 128   ;;  %s16591_s24 = smov 8  }
 0x164   : > { %15823 = dma.hbm_to_vmem [thread:$0]  (%p19532_p11), %s17112_s14, 16384, %s17116_s15, %s636_s21, %s16590_s25, %s16590_s25, %s16591_s24  }
 0x165   : > { %s14046_s12 = sshll.u32 %s16824_s28, 1  ;;  %s15743_s0 = sshll.u32 %s16571_s17, 5 }
 0x166   : > { %s19547_s29 = sld [smem:[#allocation50_spill]]  ;;  %s679_s9 = scalar_lea.vmem [#allocation20], %s14046_s12 }
 0x167   : > { %s687_s30 = sshll.u32 %s679_s9, 4  ;;  %s676_s18 = scalar_lea.sflag [#allocation21], %s16824_s28  ;;  %s688_s30 = int_to_ptr.vmem [resolvable:$true] %s687_s30 }
 0x16c   : > { %s19548_s11 = smov %s19547_s29  ;;  %s17146_s2 = scalar_lea.hbm %s19547_s29, %s15743_s0 }
 0x16d   : > { %s16433_s27 = scalar_lea.hbm %s17146_s2, 32  ;;  %s16437_s14 = scalar_lea.hbm %s19548_s11, 96 }
 0x16e   : > { %p16434_p10 = scmp.ne.s32.totalorder %s17146_s2, %s16433_s27  ;;  %p16438_p7 = scmp.lt.u32.totalorder %s17146_s2, %s19548_s11 }
 0x16f   : > { %p16439_p2 = scmp.lt.u32.totalorder %s16437_s14, %s16433_s27  ;;  %p16441_p6 = scmp.lt.u32.totalorder %s16433_s27, %s17146_s2 }
 0x170   : > { %p16435_p5 = pnand %p16434_p10, %p19532_p11 }
 0x171   : > { %p16440_p13 = por %p16439_p2, %p16438_p7 }
 0x172   : > { %p16436_p12 = pneg %p16435_p5 }
 0x173   : > { %p16442_p4 = por %p16441_p6, %p16440_p13 }
 0x175   : > { %p16443_p3 = pnand %p16442_p4, %p16436_p12 }
 0x177   : > { %16446 = shalt.err (!%p16443_p3)
}
 0x178   : > { %s16447_s28 = scalar_lea.vmem %s688_s30, 32  ;;  %s16592_s24 = smov [#allocation20]  }
 0x179   : > { %p16448_p0 = scmp.ne.s32.totalorder %s688_s30, %s16447_s28  ;;  %s16451_s12 = sshll.u32 %s16592_s24, 4  ;;  %s16452_s12 = int_to_ptr.vmem [resolvable:$false] %s16451_s12 }
 0x17a   : > { %s16453_s0 = scalar_lea.vmem %s16452_s12, 64  ;;  %p16454_p1 = scmp.lt.s32.totalorder %s688_s30, %s16452_s12 }
 0x17b   : > { %p16449_p9 = pnand %p16448_p0, %p19532_p11  ;;  %p16455_p10 = scmp.lt.s32.totalorder %s16453_s0, %s16447_s28 }
 0x17d   : > { %p16450_p8 = pneg %p16449_p9  ;;  %p16456_p5 = por %p16455_p10, %p16454_p1 }
 0x17f   : > { %p16457_p2 = pnand %p16456_p5, %p16450_p8 }
 0x181   : > { %16460 = shalt.err (!%p16457_p2)
}
 0x182   : > { %15824 = dma.hbm_to_vmem [thread:$0]  (%p19532_p11), %s17146_s2, 32, %s688_s30, %s676_s18  }
 0x183 PF: > { %s19549_s20 = sld [smem:[#allocation35_spill]] }
 0x189   : > { %p14049_p12 = scmp.ge.s32.totalorder %s19549_s20, 1  ;;  %p692_p7 = scmp.lt.s32.totalorder %s19549_s20, 13 }
 0x18b   : > { %p693_p13 = pnand %p14049_p12, %p692_p7 }
 0x18c   : > { %s19550_s26 = sld [smem:[#allocation31_spill]] (!%p693_p13)  ;;  %s19551_s29 = sld [smem:[#allocation38_spill]] (!%p693_p13) }
 0x18d   : > { %696 = sbr.rel (%p693_p13) target bundleno = 2768 (0xad0), region = 72 }
 0x192   : > { %s698_s9 = sand.u32 (!%p693_p13), 1, %s19550_s26   ;;  %p19552_p6 = scmp.ne.s32.totalorder (!%p693_p13), %s19551_s29, 0 }
 0x193   : > { %s14050_s27 = sshll.u32 (!%p693_p13), %s698_s9, 4  ;;  %s699_s23 = scalar_lea.sflag (!%p693_p13), [#allocation4], %s698_s9 }
 0x194   : > { %s17169_s21 = scalar_lea.vmem [#allocation3], %s14050_s27 }
 0x195   : > { %16506 = dma.done.wait (%p19552_p6), %s699_s23, 256  }
 0x196   : > { %16508 = vsyncadd (%p19552_p6), %s699_s23, 4294967040  ;;  %s19553_s19 = sld [smem:[#allocation35_spill]]  ;;  %s17177_s14 = scalar_lea.vmem [#allocation5], %s14050_s27 }
 0x19c   : > { %s19554_s2 = sadd.s32 4294967295, %s19553_s19  }
 0x19d   : > { %s707_s30 = sand.u32 1, %s19554_s2  }
 0x19e   : > { %s708_s18 = scalar_lea.sflag [#allocation6], %s707_s30 }
 0x19f   : > { %16510 = dma.done.wait (%p19552_p6), %s708_s18, 131328  }
 0x1a0   : > { %16512 = vsyncadd (%p19552_p6), %s708_s18, 4294835968  ;;  %s19555_s15 = sld [smem:[#allocation29_spill]]  ;;  %s19556_s25 = sld [smem:[#allocation41_spill]] }
 0x1a1   : > { %s14052_s28 = sshll.u32 %s698_s9, 13  ;;  %s726_s20 = scalar_lea.sflag [#allocation9], %s707_s30 }
 0x1a2   : > { %s17189_s0 = scalar_lea.vmem [#allocation7], %s14052_s28 }
 0x1a6   : > { %s17184_s24 = sand.u32 1, %s19555_s15   ;;  %p19557_p11 = scmp.ne.s32.totalorder %s19556_s25, 0 }
 0x1a7   : > { %s17187_s12 = sshll.u32 %s17184_s24, 3 }
 0x1a8   : > { %16514 = dma.done.wait (%p19557_p11), %s726_s20, 256  }
 0x1a9   : > { %16516 = vsyncadd (%p19557_p11), %s726_s20, 4294967040  ;;  %s744_s9 = scalar_lea.sflag [#allocation12], %s707_s30 }
 0x1aa   : > { %16518 = dma.done.wait (%p19557_p11), %s744_s9, 65664  }
 0x1ab   : > { %16520 = vsyncadd (%p19557_p11), %s744_s9, 4294901632  ;;  %s14056_s23 = sshll.u32 %s17184_s24, 12  ;;  %s762_s2 = scalar_lea.sflag [#allocation15], %s707_s30 }
 0x1ac   : > { %s17203_s19 = scalar_lea.vmem [#allocation13], %s14056_s23 }
 0x1ad   : > { %16522 = dma.done.wait (%p19557_p11), %s762_s2, 256  }
 0x1ae   : > { %16524 = vsyncadd (%p19557_p11), %s762_s2, 4294967040  ;;  %s780_s28 = scalar_lea.sflag [#allocation18], %s707_s30 }
 0x1af   : > { %16526 = dma.done.wait (%p19557_p11), %s780_s28, 16512  }
 0x1b0   : > { %16528 = vsyncadd (%p19557_p11), %s780_s28, 4294950784  ;;  %s14060_s9 = sshll.u32 %s17184_s24, 10  ;;  %s14061_s23 = sshll.u32 %s17184_s24, 1 }
 0x1b1   : > { %s17218_s18 = scalar_lea.vmem [#allocation19], %s14060_s9  ;;  %s798_s2 = scalar_lea.sflag [#allocation21], %s17184_s24 }
 0x1b2   : > { %s17221_s27 = scalar_lea.vmem [#allocation20], %s14061_s23 }
 0x1b3   : > { %16530 = dma.done.wait (%p19557_p11), %s798_s2, 32  }
 0x1b4   : > { %16532 = vsyncadd (%p19557_p11), %s798_s2, 4294967264  ;;  %s19558_s30 = sld [smem:[#allocation33_spill]]  ;;  %s19559_s20 = sld [smem:[#allocation34_spill]] }
 0x1b5   : > { %s19560_s24 = sld [smem:[#allocation51_spill]]  ;;  %s19561_s4 = sld [smem:[#allocation42_spill]] }
 0x1ba   : > { %s14062_s28 = sshll.u32 %s19558_s30, 4  ;;  %p913_p4 = scmp.lt.s32.totalorder %s19559_s20, 2 }
 0x1bb   : > { %p905_p3 = scmp.lt.s32.totalorder %s14062_s28, 63  ;;  %p14066_p0 = scmp.ne.s32.totalorder %s19558_s30, 0 }
 0x1bc   : > { %s19592_s20 = smov (!%p913_p4, %s19559_s20), 2  ;;  %v16593_v0 = vmov (!%p14066_p0), 0.0  }
 0x1bd   : > { %s19594_s28 = smov (!%p905_p3, %s14062_s28), 63  ;;  %s15744_s15 = sshll.u32 %s19592_s20, 4  ;;  %922 = vst [vmem:[#allocation2] sm:$0xff] (!%p14066_p0), %v16593_v0  ;;  %923 = vst [vmem:[#allocation2 + $0x8] sm:$0xff] (!%p14066_p0), %v16593_v0 }
 0x1be   : > { %s14063_s29 = sshll.u32 %s19594_s28, 3  ;;  %s17233_s23 = scalar_lea.vmem %s19560_s24, %s15744_s15  ;;  %924 = vst [vmem:[#allocation2 + $0x10] sm:$0xff] (!%p14066_p0), %v16593_v0  ;;  %925 = vst [vmem:[#allocation2 + $0x18] sm:$0xff] (!%p14066_p0), %v16593_v0 }
 0x1bf   : > { %s17238_s25 = scalar_lea.vmem %s19561_s4, %s14063_s29  ;;  %921 = sbr.rel (%p14066_p0) target bundleno = 454 (0x1c6), region = 124  ;;  %926 = vst [vmem:[#allocation2 + $0x20] sm:$0xff] (!%p14066_p0), %v16593_v0  ;;  %927 = vst [vmem:[#allocation2 + $0x28] sm:$0xff] (!%p14066_p0), %v16593_v0 }
 0x1c0   : > { %928 = vst [vmem:[#allocation2 + $0x30] sm:$0xff] (!%p14066_p0), %v16593_v0  ;;  %929 = vst [vmem:[#allocation2 + $0x38] sm:$0xff] (!%p14066_p0), %v16593_v0 }
 0x1c6 PF: > { %v1186_v1 = vld [vmem:[%s17189_s0] sm:$0xff]  ;;  %v950_v33 = vlaneseq  ;;  %v931_v59 = vld [vmem:[%s17238_s25 + $0x8] sm:$0xff]  ;;  %s19562_s1 = sld [smem:[#allocation33_spill]] }
 0x1c7   : > { %v1190_v2 = vld [vmem:[%s17189_s0 + $0x20] sm:$0xff] }
 0x1c8   : > { %v1314_v3 = vld [vmem:[%s17189_s0 + $0x400] sm:$0xff]  ;;  %v14068_v4 = vcombine.high %v1186_v1, %v1190_v2  ;;  %v14067_v6 = vcombine.low %v1186_v1, %v1190_v2  ;;  %v17263_v42 = vshrl.u32 %v950_v33, 7  ;;  %v933_v1 = vld [vmem:[%s17238_s25 + $0x18] sm:$0xff] }
 0x1c9   : > { %v1318_v5 = vld [vmem:[%s17189_s0 + $0x420] sm:$0xff] }
 0x1ca   : > { %v1194_v7 = vld [vmem:[%s17189_s0 + $0x40] sm:$0xff]  ;;  %v14196_v9 = vcombine.high %v1314_v3, %v1318_v5  ;;  %v14195_v10 = vcombine.low %v1314_v3, %v1318_v5  ;;  %7330 = vmatprep.subr.bf16.mxu0 %v14068_v4  ;;  %v17270_v51 = vsub.s32 1, %v17263_v42  ;;  %v17273_v52 = vsub.s32 3, %v17263_v42 }
 0x1cb   : > { %v1198_v8 = vld [vmem:[%s17189_s0 + $0x60] sm:$0xff]  ;;  %7331 = vmatpush1.bf16.msra.mxu0 %v14067_v6 }
 0x1cc   : > { %v14076_v11 = vcombine.high %v1194_v7, %v1198_v8  ;;  %v1322_v12 = vld [vmem:[%s17189_s0 + $0x440] sm:$0xff]  ;;  %7371 = vmatprep.subr.bf16.mxu1 %v14196_v9  ;;  %v14075_v19 = vcombine.low %v1194_v7, %v1198_v8  ;;  %p15091_p9 = scmp.ne.s32.totalorder %s19562_s1, 3 }
 0x1cd   : > { %v1326_v13 = vld [vmem:[%s17189_s0 + $0x460] sm:$0xff]  ;;  %7372 = vmatpush1.bf16.msra.mxu1 %v14195_v10  ;;  %s19563_s3 = scalar_lea.vmem (!%p15091_p9), [#allocation8], %s17187_s12  ;;  %s19564_s4 = scalar_lea.vmem (!%p15091_p9), [#allocation10], %s17187_s12 }
 0x1ce   : > { %v1202_v14 = vld [vmem:[%s17189_s0 + $0x80] sm:$0xff]  ;;  %v14204_v15 = vcombine.high %v1322_v12, %v1326_v13  ;;  %7332 = vmatprep.subr.bf16.mxu0 %v14076_v11  ;;  %v14203_v20 = vcombine.low %v1322_v12, %v1326_v13  ;;  %s19568_s26 = scalar_lea.vmem (!%p15091_p9), [#allocation17], %s17187_s12 }
 0x1cf   : > { %v1206_v16 = vld [vmem:[%s17189_s0 + $0xa0] sm:$0xff]  ;;  %7333 = vmatpush1.bf16.msra.mxu0 %v14075_v19  ;;  %s19571_s20 = smov (!%p15091_p9), %s19568_s26 }
 0x1d0   : > { %v1330_v17 = vld [vmem:[%s17189_s0 + $0x480] sm:$0xff]  ;;  %v14084_v21 = vcombine.high %v1202_v14, %v1206_v16  ;;  %7373 = vmatprep.subr.bf16.mxu1 %v14204_v15  ;;  %v14083_v27 = vcombine.low %v1202_v14, %v1206_v16 }
 0x1d1   : > { %v1334_v18 = vld [vmem:[%s17189_s0 + $0x4a0] sm:$0xff]  ;;  %7374 = vmatpush1.bf16.msra.mxu1 %v14203_v20 }
 0x1d2   : > { %v14212_v22 = vcombine.high %v1330_v17, %v1334_v18  ;;  %v1210_v23 = vld [vmem:[%s17189_s0 + $0xc0] sm:$0xff]  ;;  %7334 = vmatprep.subr.bf16.mxu0 %v14084_v21  ;;  %v14211_v28 = vcombine.low %v1330_v17, %v1334_v18 }
 0x1d3   : > { %v1214_v24 = vld [vmem:[%s17189_s0 + $0xe0] sm:$0xff]  ;;  %7335 = vmatpush1.bf16.msra.mxu0 %v14083_v27 }
 0x1d4   : > { %v1338_v25 = vld [vmem:[%s17189_s0 + $0x4c0] sm:$0xff]  ;;  %v14092_v29 = vcombine.high %v1210_v23, %v1214_v24  ;;  %7375 = vmatprep.subr.bf16.mxu1 %v14212_v22  ;;  %v14091_v36 = vcombine.low %v1210_v23, %v1214_v24 }
 0x1d5   : > { %v1342_v26 = vld [vmem:[%s17189_s0 + $0x4e0] sm:$0xff]  ;;  %7376 = vmatpush1.bf16.msra.mxu1 %v14211_v28 }
 0x1d6   : > { %v14220_v30 = vcombine.high %v1338_v25, %v1342_v26  ;;  %v1218_v31 = vld [vmem:[%s17189_s0 + $0x100] sm:$0xff]  ;;  %7336 = vmatprep.subr.bf16.mxu0 %v14092_v29  ;;  %v14219_v37 = vcombine.low %v1338_v25, %v1342_v26 }
 0x1d7   : > { %v1222_v32 = vld [vmem:[%s17189_s0 + $0x120] sm:$0xff]  ;;  %7337 = vmatpush1.bf16.msra.mxu0 %v14091_v36 }
 0x1d8   : > { %v1346_v34 = vld [vmem:[%s17189_s0 + $0x500] sm:$0xff]  ;;  %v14100_v38 = vcombine.high %v1218_v31, %v1222_v32  ;;  %7377 = vmatprep.subr.bf16.mxu1 %v14220_v30  ;;  %v14099_v45 = vcombine.low %v1218_v31, %v1222_v32 }
 0x1d9   : > { %v1350_v35 = vld [vmem:[%s17189_s0 + $0x520] sm:$0xff]  ;;  %7378 = vmatpush1.bf16.msra.mxu1 %v14219_v37 }
 0x1da   : > { %v14228_v39 = vcombine.high %v1346_v34, %v1350_v35  ;;  %v1226_v40 = vld [vmem:[%s17189_s0 + $0x140] sm:$0xff]  ;;  %7338 = vmatprep.subr.bf16.mxu0 %v14100_v38  ;;  %v14227_v46 = vcombine.low %v1346_v34, %v1350_v35 }
 0x1db   : > { %v1230_v41 = vld [vmem:[%s17189_s0 + $0x160] sm:$0xff]  ;;  %7339 = vmatpush1.bf16.msra.mxu0 %v14099_v45 }
 0x1dc   : > { %v1354_v43 = vld [vmem:[%s17189_s0 + $0x540] sm:$0xff]  ;;  %v14108_v47 = vcombine.high %v1226_v40, %v1230_v41  ;;  %7379 = vmatprep.subr.bf16.mxu1 %v14228_v39  ;;  %v14107_v55 = vcombine.low %v1226_v40, %v1230_v41 }
 0x1dd   : > { %v1358_v44 = vld [vmem:[%s17189_s0 + $0x560] sm:$0xff]  ;;  %7380 = vmatpush1.bf16.msra.mxu1 %v14227_v46 }
 0x1de   : > { %v14236_v48 = vcombine.high %v1354_v43, %v1358_v44  ;;  %v1234_v49 = vld [vmem:[%s17189_s0 + $0x180] sm:$0xff]  ;;  %7340 = vmatprep.subr.bf16.mxu0 %v14108_v47  ;;  %v14235_v56 = vcombine.low %v1354_v43, %v1358_v44 }
 0x1df   : > { %v1238_v50 = vld [vmem:[%s17189_s0 + $0x1a0] sm:$0xff]  ;;  %7341 = vmatpush1.bf16.msra.mxu0 %v14107_v55 }
 0x1e0   : > { %v1362_v53 = vld [vmem:[%s17189_s0 + $0x580] sm:$0xff]  ;;  %v14116_v57 = vcombine.high %v1234_v49, %v1238_v50  ;;  %7381 = vmatprep.subr.bf16.mxu1 %v14236_v48  ;;  %v14115_v7 = vcombine.low %v1234_v49, %v1238_v50 }
 0x1e1   : > { %v1366_v54 = vld [vmem:[%s17189_s0 + $0x5a0] sm:$0xff]  ;;  %7382 = vmatpush1.bf16.msra.mxu1 %v14235_v56 }
 0x1e2   : > { %v1242_v58 = vld [vmem:[%s17189_s0 + $0x1c0] sm:$0xff]  ;;  %v14244_v61 = vcombine.high %v1362_v53, %v1366_v54  ;;  %7342 = vmatprep.subr.bf16.mxu0 %v14116_v57  ;;  %v14243_v10 = vcombine.low %v1362_v53, %v1366_v54 }
 0x1e3   : > { %v17280_v60 = vld [vmem:[%s17169_s21] sm:$0xff]  ;;  %7343 = vmatpush1.bf16.msra.mxu0 %v14115_v7  ;;  %v17341_v7 = vsub.s32 7, %v17263_v42 }
 0x1e4   : > { %v1246_v62 = vld [vmem:[%s17189_s0 + $0x1e0] sm:$0xff]  ;;  %v957_v63 = vrot.slane %v17280_v60, %v17270_v51  ;;  %v965_v2 = vrot.slane %v17280_v60, %v17273_v52  ;;  %7383 = vmatprep.subr.bf16.mxu1 %v14244_v61  ;;  %v17330_v61 = vsub.s32 6, %v17263_v42 }
 0x1e5   : > { %v17286_v0 = vld [vmem:[%s17177_s14] sm:$0xff]  ;;  %v14124_v11 = vcombine.high %v1242_v58, %v1246_v62  ;;  %v14123_v19 = vcombine.low %v1242_v58, %v1246_v62  ;;  %7384 = vmatpush1.bf16.msra.mxu1 %v14243_v10  ;;  %v17324_v58 = vsub.s32 0, %v17263_v42 }
 0x1e6   : > { %v1370_v3 = vld [vmem:[%s17189_s0 + $0x5c0] sm:$0xff]  ;;  %v1057_v5 = vrot.slane %v17286_v0, %v17270_v51  ;;  %v1065_v6 = vrot.slane %v17286_v0, %v17273_v52  ;;  %v1031_v8 = vmul.f32 %v957_v63, %v931_v59  ;;  %v1033_v9 = vmul.f32 %v965_v2, %v933_v1 }
 0x1e7   : > { %v1374_v4 = vld [vmem:[%s17189_s0 + $0x5e0] sm:$0xff]  ;;  %7344 = vmatprep.subr.bf16.mxu0 %v14124_v11  ;;  %v17327_v59 = vsub.s32 4, %v17263_v42  ;;  %v17333_v63 = vsub.s32 2, %v17263_v42 }
 0x1e8   : > { %v14252_v12 = vcombine.high %v1370_v3, %v1374_v4  ;;  %v1250_v13 = vld [vmem:[%s17189_s0 + $0x200] sm:$0xff]  ;;  %v1131_v15 = vadd.f32 %v1057_v5, %v1031_v8  ;;  %v1133_v16 = vadd.f32 %v1065_v6, %v1033_v9  ;;  %v14251_v22 = vcombine.low %v1370_v3, %v1374_v4  ;;  %7345 = vmatpush1.bf16.msra.mxu0 %v14123_v19  ;;  %v936_v9 = vld [vmem:[%s17238_s25 + $0x30] sm:$0xff] }
 0x1e9   : > { %v1254_v14 = vld [vmem:[%s17189_s0 + $0x220] sm:$0xff]  ;;  %v17338_v6 = vsub.s32 5, %v17263_v42  ;;  %v1077_v19 = vrot.slane %v17286_v0, %v17330_v61 }
 0x1ea   : > { %v1378_v17 = vld [vmem:[%s17189_s0 + $0x600] sm:$0xff]  ;;  %v1147_v20 = vmax.f32 %v1131_v15, 0.0  ;;  %v1149_v21 = vmax.f32 %v1133_v16, 0.0  ;;  %v14132_v23 = vcombine.high %v1250_v13, %v1254_v14  ;;  %7385 = vmatprep.subr.bf16.mxu1 %v14252_v12  ;;  %v14131_v31 = vcombine.low %v1250_v13, %v1254_v14 }
 0x1eb   : > { %v1382_v18 = vld [vmem:[%s17189_s0 + $0x620] sm:$0xff]  ;;  %7386 = vmatpush1.bf16.msra.mxu1 %v14251_v22  ;;  %v953_v12 = vrot.slane %v17280_v60, %v17324_v58  ;;  %v969_v13 = vrot.slane %v17280_v60, %v17327_v59  ;;  %v1069_v14 = vrot.slane %v17286_v0, %v17327_v59  ;;  %v977_v15 = vrot.slane %v17280_v60, %v17330_v61 }
 0x1ec   : > { %v14260_v24 = vcombine.high %v1378_v17, %v1382_v18  ;;  %v1258_v25 = vld [vmem:[%s17189_s0 + $0x240] sm:$0xff]  ;;  %v17303_v27 = vpack.c.bf16 %v1147_v20, %v1147_v20  ;;  %v17305_v28 = vpack.c.bf16 %v1149_v21, %v1149_v21  ;;  %7346 = vmatprep.subr.bf16.mxu0 %v14132_v23  ;;  %v14259_v32 = vcombine.low %v1378_v17, %v1382_v18  ;;  %v932_v21 = vld [vmem:[%s17238_s25 + $0x10] sm:$0xff] }
 0x1ed   : > { %v1262_v26 = vld [vmem:[%s17189_s0 + $0x260] sm:$0xff]  ;;  %7347 = vmatpush1.bf16.msra.mxu0 %v14131_v31  ;;  %v961_v18 = vrot.slane %v17280_v60, %v17333_v63  ;;  %v1036_v23 = vmul.f32 %v977_v15, %v936_v9 }
 0x1ee   : > { %v1386_v29 = vld [vmem:[%s17189_s0 + $0x640] sm:$0xff]  ;;  %7362 = vmatprep.mubr.bf16.mxu0 %v17303_v27  ;;  %v14140_v33 = vcombine.high %v1258_v25, %v1262_v26  ;;  %7387 = vmatprep.subr.bf16.mxu1 %v14260_v24  ;;  %v14139_v39 = vcombine.low %v1258_v25, %v1262_v26 }
 0x1ef   : > { %v1390_v30 = vld [vmem:[%s17189_s0 + $0x660] sm:$0xff]  ;;  %7403 = vmatprep.mubr.bf16.mxu1 %v17305_v28  ;;  %7388 = vmatpush1.bf16.msra.mxu1 %v14259_v32 }
 0x1f0   : > { %v14268_v34 = vcombine.high %v1386_v29, %v1390_v30  ;;  %v1266_v35 = vld [vmem:[%s17189_s0 + $0x280] sm:$0xff]  ;;  %7348 = vmatprep.subr.bf16.mxu0 %v14140_v33  ;;  %v14267_v40 = vcombine.low %v1386_v29, %v1390_v30  ;;  %v1053_v29 = vrot.slane %v17286_v0, %v17324_v58  ;;  %v973_v30 = vrot.slane %v17280_v60, %v17338_v6 }
 0x1f1   : > { %v1270_v36 = vld [vmem:[%s17189_s0 + $0x2a0] sm:$0xff]  ;;  %7349 = vmatpush1.bf16.msra.mxu0 %v14139_v39  ;;  %v1032_v39 = vmul.f32 %v961_v18, %v932_v21 }
 0x1f2   : > { %v1394_v37 = vld [vmem:[%s17189_s0 + $0x680] sm:$0xff]  ;;  %v14148_v41 = vcombine.high %v1266_v35, %v1270_v36  ;;  %7389 = vmatprep.subr.bf16.mxu1 %v14268_v34  ;;  %v14147_v48 = vcombine.low %v1266_v35, %v1270_v36  ;;  %v935_v34 = vld [vmem:[%s17238_s25 + $0x28] sm:$0xff]  ;;  %v981_v35 = vrot.slane %v17280_v60, %v17341_v7 }
 0x1f3   : > { %v1398_v38 = vld [vmem:[%s17189_s0 + $0x6a0] sm:$0xff]  ;;  %7390 = vmatpush1.bf16.msra.mxu1 %v14267_v40  ;;  %v1061_v40 = vrot.slane %v17286_v0, %v17333_v63 }
 0x1f4   : > { %v14276_v43 = vcombine.high %v1394_v37, %v1398_v38  ;;  %v1274_v44 = vld [vmem:[%s17189_s0 + $0x2c0] sm:$0xff]  ;;  %7350 = vmatprep.subr.bf16.mxu0 %v14148_v41  ;;  %v14275_v49 = vcombine.low %v1394_v37, %v1398_v38  ;;  %v17374_v37 = vadd.f32 %v1077_v19, %v1036_v23  ;;  %v937_v41 = vld [vmem:[%s17238_s25 + $0x38] sm:$0xff] }
 0x1f5   : > { %v1278_v45 = vld [vmem:[%s17189_s0 + $0x2e0] sm:$0xff]  ;;  %7351 = vmatpush1.bf16.msra.mxu0 %v14147_v48  ;;  %v1073_v48 = vrot.slane %v17286_v0, %v17338_v6 }
 0x1f6   : > { %v1402_v46 = vld [vmem:[%s17189_s0 + $0x6c0] sm:$0xff]  ;;  %v14156_v50 = vcombine.high %v1274_v44, %v1278_v45  ;;  %7391 = vmatprep.subr.bf16.mxu1 %v14276_v43  ;;  %v14155_v62 = vcombine.low %v1274_v44, %v1278_v45 }
 0x1f7   : > { %v1406_v47 = vld [vmem:[%s17189_s0 + $0x6e0] sm:$0xff]  ;;  %7392 = vmatpush1.bf16.msra.mxu1 %v14275_v49 }
 0x1f8   : > { %v14284_v53 = vcombine.high %v1402_v46, %v1406_v47  ;;  %v1282_v54 = vld [vmem:[%s17189_s0 + $0x300] sm:$0xff]  ;;  %7352 = vmatprep.subr.bf16.mxu0 %v14156_v50  ;;  %v14283_v1 = vcombine.low %v1402_v46, %v1406_v47  ;;  %v1035_v47 = vmul.f32 %v973_v30, %v935_v34 }
 0x1f9   : > { %v1286_v55 = vld [vmem:[%s17189_s0 + $0x320] sm:$0xff]  ;;  %7353 = vmatpush1.bf16.msra.mxu0 %v14155_v62 }
 0x1fa   : > { %v1410_v56 = vld [vmem:[%s17189_s0 + $0x700] sm:$0xff]  ;;  %v14164_v2 = vcombine.high %v1282_v54, %v1286_v55  ;;  %7393 = vmatprep.subr.bf16.mxu1 %v14284_v53  ;;  %v14163_v42 = vcombine.low %v1282_v54, %v1286_v55  ;;  %v1037_v54 = vmul.f32 %v981_v35, %v937_v41  ;;  %v1081_v55 = vrot.slane %v17286_v0, %v17341_v7 }
 0x1fb   : > { %v1414_v57 = vld [vmem:[%s17189_s0 + $0x720] sm:$0xff]  ;;  %7394 = vmatpush1.bf16.msra.mxu1 %v14283_v1 }
 0x1fc   : > { %v1290_v3 = vld [vmem:[%s17189_s0 + $0x340] sm:$0xff]  ;;  %v14292_v4 = vcombine.high %v1410_v56, %v1414_v57  ;;  %v14291_v16 = vcombine.low %v1410_v56, %v1414_v57  ;;  %7354 = vmatprep.subr.bf16.mxu0 %v14164_v2  ;;  %v1132_v57 = vadd.f32 %v1061_v40, %v1032_v39  ;;  %v1137_v0 = vadd.f32 %v1081_v55, %v1037_v54 }
 0x1fd   : > { %v1294_v5 = vld [vmem:[%s17189_s0 + $0x360] sm:$0xff]  ;;  %7355 = vmatpush1.bf16.msra.mxu0 %v14163_v42 }
 0x1fe   : > { %v934_v8 = vld [vmem:[%s17238_s25 + $0x20] sm:$0xff]  ;;  %v14172_v20 = vcombine.high %v1290_v3, %v1294_v5  ;;  %7395 = vmatprep.subr.bf16.mxu1 %v14292_v4  ;;  %v14171_v38 = vcombine.low %v1290_v3, %v1294_v5  ;;  %v1135_v5 = vadd.f32 %v1073_v48, %v1035_v47  ;;  %v1153_v21 = vmax.f32 %v1137_v0, 0.0 }
 0x1ff   : > { %v1418_v10 = vld [vmem:[%s17189_s0 + $0x740] sm:$0xff]  ;;  %v1034_v22 = vmul.f32 %v969_v13, %v934_v8  ;;  %7396 = vmatpush1.bf16.msra.mxu1 %v14291_v16 }
 0x200   : > { %v1422_v11 = vld [vmem:[%s17189_s0 + $0x760] sm:$0xff]  ;;  %7356 = vmatprep.subr.bf16.mxu0 %v14172_v20  ;;  %v17406_v34 = vpack.c.bf16 %v1153_v21, %v1153_v21 }
 0x201   : > { %v930_v17 = vld [vmem:[%s17238_s25] sm:$0xff]  ;;  %v14300_v24 = vcombine.high %v1418_v10, %v1422_v11  ;;  %v17372_v36 = vadd.f32 %v1069_v14, %v1034_v22  ;;  %v14299_v43 = vcombine.low %v1418_v10, %v1422_v11  ;;  %7357 = vmatpush1.bf16.msra.mxu0 %v14171_v38 }
 0x202   : > { %v1298_v25 = vld [vmem:[%s17189_s0 + $0x380] sm:$0xff]  ;;  %v1030_v33 = vmul.f32 %v953_v12, %v930_v17  ;;  %v1148_v12 = vmax.f32 %v1132_v57, 0.0  ;;  %v1151_v17 = vmax.f32 %v1135_v5, 0.0 }
 0x203   : > { %v1302_v26 = vld [vmem:[%s17189_s0 + $0x3a0] sm:$0xff]  ;;  %7397 = vmatprep.subr.bf16.mxu1 %v14300_v24 }
 0x204   : > { %v1426_v31 = vld [vmem:[%s17189_s0 + $0x780] sm:$0xff]  ;;  %v14180_v44 = vcombine.high %v1298_v25, %v1302_v26  ;;  %v1130_v53 = vadd.f32 %v1053_v29, %v1030_v33  ;;  %v14179_v56 = vcombine.low %v1298_v25, %v1302_v26  ;;  %7398 = vmatpush1.bf16.msra.mxu1 %v14299_v43  ;;  %v17397_v22 = vpack.c.bf16 %v1148_v12, %v1148_v12 }
 0x205   : > { %v1430_v32 = vld [vmem:[%s17189_s0 + $0x7a0] sm:$0xff] }
 0x206   : > { %v14308_v45 = vcombine.high %v1426_v31, %v1430_v32  ;;  %v1306_v60 = vld [vmem:[%s17189_s0 + $0x3c0] sm:$0xff]  ;;  %7358 = vmatprep.subr.bf16.mxu0 %v14180_v44  ;;  %v14307_v62 = vcombine.low %v1426_v31, %v1430_v32  ;;  %v1146_v8 = vmax.f32 %v1130_v53, 0.0  ;;  %v17401_v31 = vpack.c.bf16 %v1151_v17, %v1151_v17 }
 0x207   : > { %v1310_v46 = vld [vmem:[%s17189_s0 + $0x3e0] sm:$0xff]  ;;  %7359 = vmatpush1.bf16.msra.mxu0 %v14179_v56 }
 0x208   : > { %v1434_v49 = vld [vmem:[%s17189_s0 + $0x7c0] sm:$0xff]  ;;  %v14188_v1 = vcombine.high %v1306_v60, %v1310_v46  ;;  %7399 = vmatprep.subr.bf16.mxu1 %v14308_v45  ;;  %v14187_v11 = vcombine.low %v1306_v60, %v1310_v46  ;;  %v17393_v18 = vpack.c.bf16 %v1146_v8, %v1146_v8 }
 0x209   : > { %v1438_v50 = vld [vmem:[%s17189_s0 + $0x7e0] sm:$0xff]  ;;  %7400 = vmatpush1.bf16.msra.mxu1 %v14307_v62 }
 0x20a   : > { %v14316_v2 = vcombine.high %v1434_v49, %v1438_v50  ;;  %v1442_v3 = vld [vmem:[%s17189_s0 + $0x800] sm:$0xff]  ;;  %7360 = vmatprep.subr.bf16.mxu0 %v14188_v1  ;;  %v14315_v13 = vcombine.low %v1434_v49, %v1438_v50 }
 0x20b   : > { %v1446_v4 = vld [vmem:[%s17189_s0 + $0x820] sm:$0xff]  ;;  %7361 = vmatpush1.bf16.msra.mxu0 %v14187_v11 }
 0x20c   : > { %v1570_v9 = vld [vmem:[%s17189_s0 + $0xc00] sm:$0xff]  ;;  %v14324_v14 = vcombine.high %v1442_v3, %v1446_v4  ;;  %7401 = vmatprep.subr.bf16.mxu1 %v14316_v2  ;;  %v14323_v23 = vcombine.low %v1442_v3, %v1446_v4 }
 0x20d   : > { %v1574_v10 = vld [vmem:[%s17189_s0 + $0xc20] sm:$0xff]  ;;  %7402 = vmatpush1.bf16.msra.mxu1 %v14315_v13 }
 0x20e   : > { %v14452_v15 = vcombine.high %v1570_v9, %v1574_v10  ;;  %v1450_v42 = vld [vmem:[%s17189_s0 + $0x840] sm:$0xff]  ;;  %7412 = vmatprep.subr.bf16.mxu0 %v14324_v14  ;;  %v14451_v24 = vcombine.low %v1570_v9, %v1574_v10  ;;  %7363 = vmatmul.mubr.bf16.vlgmr.msra.gmra.mrb[0].mxu0 %v17393_v18 }
 0x20f   : > { %v1454_v16 = vld [vmem:[%s17189_s0 + $0x860] sm:$0xff]  ;;  %7413 = vmatpush1.bf16.msra.mxu0 %v14323_v23  ;;  %7444 = vmatprep.mubr.bf16.mxu0 %v17401_v31 }
 0x210   : > { %v1578_v19 = vld [vmem:[%s17189_s0 + $0xc40] sm:$0xff]  ;;  %v14332_v25 = vcombine.high %v1450_v42, %v1454_v16  ;;  %7453 = vmatprep.subr.bf16.mxu1 %v14452_v15  ;;  %7404 = vmatmul.mubr.bf16.vlgmr.msra.gmra.mrb[0].mxu1 %v17397_v22  ;;  %v14331_v35 = vcombine.low %v1450_v42, %v1454_v16 }
 0x211   : > { %v1582_v20 = vld [vmem:[%s17189_s0 + $0xc60] sm:$0xff]  ;;  %7454 = vmatpush1.bf16.msra.mxu1 %v14451_v24  ;;  %7485 = vmatprep.mubr.bf16.mxu1 %v17406_v34 }
 0x212   : > { %v14460_v26 = vcombine.high %v1578_v19, %v1582_v20  ;;  %v1458_v29 = vld [vmem:[%s17189_s0 + $0x880] sm:$0xff]  ;;  %7414 = vmatprep.subr.bf16.mxu0 %v14332_v25  ;;  %v14459_v38 = vcombine.low %v1578_v19, %v1582_v20 }
 0x213   : > { %v1462_v30 = vld [vmem:[%s17189_s0 + $0x8a0] sm:$0xff]  ;;  %7415 = vmatpush1.bf16.msra.mxu0 %v14331_v35 }
 0x214   : > { %v1586_v32 = vld [vmem:[%s17189_s0 + $0xc80] sm:$0xff]  ;;  %v14340_v39 = vcombine.high %v1458_v29, %v1462_v30  ;;  %7455 = vmatprep.subr.bf16.mxu1 %v14460_v26  ;;  %v14339_v60 = vcombine.low %v1458_v29, %v1462_v30 }
 0x215   : > { %v1590_v33 = vld [vmem:[%s17189_s0 + $0xca0] sm:$0xff]  ;;  %7456 = vmatpush1.bf16.msra.mxu1 %v14459_v38 }
 0x216   : > { %v14468_v40 = vcombine.high %v1586_v32, %v1590_v33  ;;  %v1466_v41 = vld [vmem:[%s17189_s0 + $0x8c0] sm:$0xff]  ;;  %7416 = vmatprep.subr.bf16.mxu0 %v14340_v39  ;;  %v14467_v46 = vcombine.low %v1586_v32, %v1590_v33 }
 0x217   : > { %v1470_v43 = vld [vmem:[%s17189_s0 + $0x8e0] sm:$0xff]  ;;  %7417 = vmatpush1.bf16.msra.mxu0 %v14339_v60 }
 0x218   : > { %v1594_v44 = vld [vmem:[%s17189_s0 + $0xcc0] sm:$0xff]  ;;  %v14348_v47 = vcombine.high %v1466_v41, %v1470_v43  ;;  %7457 = vmatprep.subr.bf16.mxu1 %v14468_v40  ;;  %v14347_v55 = vcombine.low %v1466_v41, %v1470_v43 }
 0x219   : > { %v1598_v45 = vld [vmem:[%s17189_s0 + $0xce0] sm:$0xff]  ;;  %7458 = vmatpush1.bf16.msra.mxu1 %v14467_v46 }
 0x21a   : > { %v14476_v48 = vcombine.high %v1594_v44, %v1598_v45  ;;  %v1474_v49 = vld [vmem:[%s17189_s0 + $0x900] sm:$0xff]  ;;  %7418 = vmatprep.subr.bf16.mxu0 %v14348_v47  ;;  %v14475_v56 = vcombine.low %v1594_v44, %v1598_v45 }
 0x21b   : > { %v1478_v50 = vld [vmem:[%s17189_s0 + $0x920] sm:$0xff]  ;;  %7419 = vmatpush1.bf16.msra.mxu0 %v14347_v55 }
 0x21c   : > { %v1602_v53 = vld [vmem:[%s17189_s0 + $0xd00] sm:$0xff]  ;;  %v14356_v57 = vcombine.high %v1474_v49, %v1478_v50  ;;  %7459 = vmatprep.subr.bf16.mxu1 %v14476_v48  ;;  %v14355_v5 = vcombine.low %v1474_v49, %v1478_v50 }
 0x21d   : > { %v1606_v54 = vld [vmem:[%s17189_s0 + $0xd20] sm:$0xff]  ;;  %7460 = vmatpush1.bf16.msra.mxu1 %v14475_v56 }
 0x21e   : > { %v14484_v62 = vcombine.high %v1602_v53, %v1606_v54  ;;  %v1482_v1 = vld [vmem:[%s17189_s0 + $0x940] sm:$0xff]  ;;  %7420 = vmatprep.subr.bf16.mxu0 %v14356_v57  ;;  %v14483_v8 = vcombine.low %v1602_v53, %v1606_v54 }
 0x21f   : > { %v1486_v2 = vld [vmem:[%s17189_s0 + $0x960] sm:$0xff]  ;;  %7421 = vmatpush1.bf16.msra.mxu0 %v14355_v5 }
 0x220   : > { %v1610_v3 = vld [vmem:[%s17189_s0 + $0xd40] sm:$0xff]  ;;  %v14364_v9 = vcombine.high %v1482_v1, %v1486_v2  ;;  %7461 = vmatprep.subr.bf16.mxu1 %v14484_v62  ;;  %v14363_v14 = vcombine.low %v1482_v1, %v1486_v2 }
 0x221   : > { %v1614_v4 = vld [vmem:[%s17189_s0 + $0xd60] sm:$0xff]  ;;  %7462 = vmatpush1.bf16.msra.mxu1 %v14483_v8 }
 0x222   : > { %v14492_v10 = vcombine.high %v1610_v3, %v1614_v4  ;;  %v1490_v0 = vld [vmem:[%s17189_s0 + $0x980] sm:$0xff]  ;;  %7422 = vmatprep.subr.bf16.mxu0 %v14364_v9  ;;  %v14491_v15 = vcombine.low %v1610_v3, %v1614_v4 }
 0x223   : > { %v1494_v11 = vld [vmem:[%s17189_s0 + $0x9a0] sm:$0xff]  ;;  %7423 = vmatpush1.bf16.msra.mxu0 %v14363_v14 }
 0x224   : > { %v1618_v12 = vld [vmem:[%s17189_s0 + $0xd80] sm:$0xff]  ;;  %v14372_v42 = vcombine.high %v1490_v0, %v1494_v11  ;;  %7463 = vmatprep.subr.bf16.mxu1 %v14492_v10  ;;  %v14371_v23 = vcombine.low %v1490_v0, %v1494_v11 }
 0x225   : > { %v1622_v13 = vld [vmem:[%s17189_s0 + $0xda0] sm:$0xff]  ;;  %7464 = vmatpush1.bf16.msra.mxu1 %v14491_v15 }
 0x226   : > { %v14500_v16 = vcombine.high %v1618_v12, %v1622_v13  ;;  %v1498_v17 = vld [vmem:[%s17189_s0 + $0x9c0] sm:$0xff]  ;;  %7424 = vmatprep.subr.bf16.mxu0 %v14372_v42  ;;  %v14499_v24 = vcombine.low %v1618_v12, %v1622_v13 }
 0x227   : > { %v1502_v19 = vld [vmem:[%s17189_s0 + $0x9e0] sm:$0xff]  ;;  %7425 = vmatpush1.bf16.msra.mxu0 %v14371_v23  ;;  %v17456_v23 = vld [vmem:[%s17169_s21 + $0x8] sm:$0xff]  ;;  %s19565_s21 = scalar_lea.vmem (!%p15091_p9), [#allocation11], %s17187_s12 }
 0x228   : > { %v1626_v20 = vld [vmem:[%s17189_s0 + $0xdc0] sm:$0xff]  ;;  %v14380_v25 = vcombine.high %v1498_v17, %v1502_v19  ;;  %7465 = vmatprep.subr.bf16.mxu1 %v14500_v16  ;;  %v14379_v35 = vcombine.low %v1498_v17, %v1502_v19 }
 0x229   : > { %v1630_v21 = vld [vmem:[%s17189_s0 + $0xde0] sm:$0xff]  ;;  %7466 = vmatpush1.bf16.msra.mxu1 %v14499_v24 }
 0x22a   : > { %v14508_v26 = vcombine.high %v1626_v20, %v1630_v21  ;;  %v1506_v29 = vld [vmem:[%s17189_s0 + $0xa00] sm:$0xff]  ;;  %7426 = vmatprep.subr.bf16.mxu0 %v14380_v25  ;;  %v14507_v38 = vcombine.low %v1626_v20, %v1630_v21 }
 0x22b   : > { %v1510_v30 = vld [vmem:[%s17189_s0 + $0xa20] sm:$0xff]  ;;  %7427 = vmatpush1.bf16.msra.mxu0 %v14379_v35  ;;  %v989_v35 = vrot.slane %v17456_v23, %v17270_v51 }
 0x22c   : > { %v1634_v32 = vld [vmem:[%s17189_s0 + $0xe00] sm:$0xff]  ;;  %v14388_v39 = vcombine.high %v1506_v29, %v1510_v30  ;;  %7467 = vmatprep.subr.bf16.mxu1 %v14508_v26  ;;  %v14387_v60 = vcombine.low %v1506_v29, %v1510_v30 }
 0x22d   : > { %v1638_v33 = vld [vmem:[%s17189_s0 + $0xe20] sm:$0xff]  ;;  %7468 = vmatpush1.bf16.msra.mxu1 %v14507_v38 }
 0x22e   : > { %v14516_v40 = vcombine.high %v1634_v32, %v1638_v33  ;;  %v1514_v41 = vld [vmem:[%s17189_s0 + $0xa40] sm:$0xff]  ;;  %7428 = vmatprep.subr.bf16.mxu0 %v14388_v39  ;;  %v14515_v46 = vcombine.low %v1634_v32, %v1638_v33  ;;  %v939_v39 = vld [vmem:[%s17238_s25 + $0x48] sm:$0xff] }
 0x22f   : > { %v1518_v43 = vld [vmem:[%s17189_s0 + $0xa60] sm:$0xff]  ;;  %7429 = vmatpush1.bf16.msra.mxu0 %v14387_v60 }
 0x230   : > { %v1642_v44 = vld [vmem:[%s17189_s0 + $0xe40] sm:$0xff]  ;;  %v14396_v47 = vcombine.high %v1514_v41, %v1518_v43  ;;  %7469 = vmatprep.subr.bf16.mxu1 %v14516_v40  ;;  %v14395_v55 = vcombine.low %v1514_v41, %v1518_v43  ;;  %v17466_v40 = vld [vmem:[%s17177_s14 + $0x8] sm:$0xff]  ;;  %v997_v41 = vrot.slane %v17456_v23, %v17273_v52  ;;  %s19566_s14 = scalar_lea.vmem (!%p15091_p9), [#allocation14], %s17187_s12 }
 0x231   : > { %v1646_v45 = vld [vmem:[%s17189_s0 + $0xe60] sm:$0xff]  ;;  %7470 = vmatpush1.bf16.msra.mxu1 %v14515_v46  ;;  %s19569_s29 = smov (!%p15091_p9), %s19566_s14 }
 0x232   : > { %v14524_v48 = vcombine.high %v1642_v44, %v1646_v45  ;;  %v1522_v49 = vld [vmem:[%s17189_s0 + $0xa80] sm:$0xff]  ;;  %7430 = vmatprep.subr.bf16.mxu0 %v14396_v47  ;;  %v14523_v56 = vcombine.low %v1642_v44, %v1646_v45  ;;  %v941_v45 = vld [vmem:[%s17238_s25 + $0x58] sm:$0xff] }
 0x233   : > { %v1526_v50 = vld [vmem:[%s17189_s0 + $0xaa0] sm:$0xff]  ;;  %7431 = vmatpush1.bf16.msra.mxu0 %v14395_v55  ;;  %v1039_v55 = vmul.f32 %v989_v35, %v939_v39  ;;  %v1109_v35 = vrot.slane %v17466_v40, %v17330_v61 }
 0x234   : > { %v1650_v53 = vld [vmem:[%s17189_s0 + $0xe80] sm:$0xff]  ;;  %v14404_v57 = vcombine.high %v1522_v49, %v1526_v50  ;;  %7471 = vmatprep.subr.bf16.mxu1 %v14524_v48  ;;  %v14403_v5 = vcombine.low %v1522_v49, %v1526_v50 }
 0x235   : > { %v1654_v54 = vld [vmem:[%s17189_s0 + $0xea0] sm:$0xff]  ;;  %7472 = vmatpush1.bf16.msra.mxu1 %v14523_v56  ;;  %v1089_v56 = vrot.slane %v17466_v40, %v17270_v51 }
 0x236   : > { %v14532_v62 = vcombine.high %v1650_v53, %v1654_v54  ;;  %v1530_v1 = vld [vmem:[%s17189_s0 + $0xac0] sm:$0xff]  ;;  %7432 = vmatprep.subr.bf16.mxu0 %v14404_v57  ;;  %v14531_v8 = vcombine.low %v1650_v53, %v1654_v54 }
 0x237   : > { %v1534_v2 = vld [vmem:[%s17189_s0 + $0xae0] sm:$0xff]  ;;  %7433 = vmatpush1.bf16.msra.mxu0 %v14403_v5 }
 0x238   : > { %v1658_v3 = vld [vmem:[%s17189_s0 + $0xec0] sm:$0xff]  ;;  %v14412_v9 = vcombine.high %v1530_v1, %v1534_v2  ;;  %7473 = vmatprep.subr.bf16.mxu1 %v14532_v62  ;;  %v14411_v14 = vcombine.low %v1530_v1, %v1534_v2  ;;  %v1041_v1 = vmul.f32 %v997_v41, %v941_v45  ;;  %v1097_v2 = vrot.slane %v17466_v40, %v17273_v52 }
 0x239   : > { %v1662_v4 = vld [vmem:[%s17189_s0 + $0xee0] sm:$0xff]  ;;  %7474 = vmatpush1.bf16.msra.mxu1 %v14531_v8 }
 0x23a   : > { %v14540_v10 = vcombine.high %v1658_v3, %v1662_v4  ;;  %v1538_v0 = vld [vmem:[%s17189_s0 + $0xb00] sm:$0xff]  ;;  %7434 = vmatprep.subr.bf16.mxu0 %v14412_v9  ;;  %v14539_v15 = vcombine.low %v1658_v3, %v1662_v4 }
 0x23b   : > { %v1542_v11 = vld [vmem:[%s17189_s0 + $0xb20] sm:$0xff]  ;;  %7435 = vmatpush1.bf16.msra.mxu0 %v14411_v14  ;;  %v943_v14 = vld [vmem:[%s17238_s25 + $0x68] sm:$0xff] }
 0x23c   : > { %v1666_v12 = vld [vmem:[%s17189_s0 + $0xf00] sm:$0xff]  ;;  %v14420_v42 = vcombine.high %v1538_v0, %v1542_v11  ;;  %7475 = vmatprep.subr.bf16.mxu1 %v14540_v10  ;;  %v14419_v24 = vcombine.low %v1538_v0, %v1542_v11  ;;  %v1005_v10 = vrot.slane %v17456_v23, %v17338_v6  ;;  %v1013_v0 = vrot.slane %v17456_v23, %v17341_v7 }
 0x23d   : > { %v1670_v13 = vld [vmem:[%s17189_s0 + $0xf20] sm:$0xff]  ;;  %7476 = vmatpush1.bf16.msra.mxu1 %v14539_v15  ;;  %v1150_v11 = vmax.f32 %v17372_v36, 0.0  ;;  %v945_v15 = vld [vmem:[%s17238_s25 + $0x78] sm:$0xff] }
 0x23e   : > { %v14548_v16 = vcombine.high %v1666_v12, %v1670_v13  ;;  %v1546_v17 = vld [vmem:[%s17189_s0 + $0xb40] sm:$0xff]  ;;  %7436 = vmatprep.subr.bf16.mxu0 %v14420_v42  ;;  %v14547_v25 = vcombine.low %v1666_v12, %v1670_v13  ;;  %v1139_v13 = vadd.f32 %v1089_v56, %v1039_v55  ;;  %v1001_v42 = vrot.slane %v17456_v23, %v17327_v59 }
 0x23f   : > { %v1550_v19 = vld [vmem:[%s17189_s0 + $0xb60] sm:$0xff]  ;;  %7437 = vmatpush1.bf16.msra.mxu0 %v14419_v24  ;;  %v1105_v24 = vrot.slane %v17466_v40, %v17338_v6 }
 0x240   : > { %v1674_v20 = vld [vmem:[%s17189_s0 + $0xf40] sm:$0xff]  ;;  %v14428_v26 = vcombine.high %v1546_v17, %v1550_v19  ;;  %7477 = vmatprep.subr.bf16.mxu1 %v14548_v16  ;;  %v14427_v43 = vcombine.low %v1546_v17, %v1550_v19  ;;  %v1009_v16 = vrot.slane %v17456_v23, %v17330_v61  ;;  %v1152_v17 = vmax.f32 %v17374_v37, 0.0 }
 0x241   : > { %v1678_v21 = vld [vmem:[%s17189_s0 + $0xf60] sm:$0xff]  ;;  %7478 = vmatpush1.bf16.msra.mxu1 %v14547_v25  ;;  %v944_v25 = vld [vmem:[%s17238_s25 + $0x70] sm:$0xff]  ;;  %v1101_v37 = vrot.slane %v17466_v40, %v17327_v59 }
 0x242   : > { %v14556_v29 = vcombine.high %v1674_v20, %v1678_v21  ;;  %v1554_v30 = vld [vmem:[%s17189_s0 + $0xb80] sm:$0xff]  ;;  %7438 = vmatprep.subr.bf16.mxu0 %v14428_v26  ;;  %v14555_v60 = vcombine.low %v1674_v20, %v1678_v21  ;;  %v1141_v20 = vadd.f32 %v1097_v2, %v1041_v1  ;;  %v1043_v21 = vmul.f32 %v1005_v10, %v943_v14 }
 0x243   : > { %v1558_v32 = vld [vmem:[%s17189_s0 + $0xba0] sm:$0xff]  ;;  %7439 = vmatpush1.bf16.msra.mxu0 %v14427_v43  ;;  %v1045_v26 = vmul.f32 %v1013_v0, %v945_v15  ;;  %v1155_v43 = vmax.f32 %v1139_v13, 0.0 }
 0x244   : > { %v1682_v33 = vld [vmem:[%s17189_s0 + $0xf80] sm:$0xff]  ;;  %v14436_v46 = vcombine.high %v1554_v30, %v1558_v32  ;;  %7479 = vmatprep.subr.bf16.mxu1 %v14556_v29  ;;  %v14435_v57 = vcombine.low %v1554_v30, %v1558_v32  ;;  %v1113_v29 = vrot.slane %v17466_v40, %v17341_v7  ;;  %v17513_v32 = vadd.f32 %v1105_v24, %v1043_v21 }
 0x245   : > { %v1686_v38 = vld [vmem:[%s17189_s0 + $0xfa0] sm:$0xff]  ;;  %7480 = vmatpush1.bf16.msra.mxu1 %v14555_v60  ;;  %v17523_v60 = vpack.c.bf16 %v1150_v11, %v1150_v11 }
 0x246   : > { %v17471_v44 = vld [vmem:[%s17189_s0 + $0xbc0] sm:$0xff]  ;;  %v14564_v50 = vcombine.high %v1682_v33, %v1686_v38  ;;  %v14563_v62 = vcombine.low %v1682_v33, %v1686_v38  ;;  %7440 = vmatprep.subr.bf16.mxu0 %v14436_v46  ;;  %v1044_v33 = vmul.f32 %v1009_v16, %v944_v25 }
 0x247   : > { %v1566_v47 = vld [vmem:[%s17189_s0 + $0xbe0] sm:$0xff]  ;;  %7441 = vmatpush1.bf16.msra.mxu0 %v14435_v57 }
 0x248   : > { %v1690_v48 = vld [vmem:[%s17189_s0 + $0xfc0] sm:$0xff]  ;;  %v14443_v3 = vcombine.low %v17471_v44, %v1566_v47  ;;  %v14444_v4 = vcombine.high %v17471_v44, %v1566_v47  ;;  %7481 = vmatprep.subr.bf16.mxu1 %v14564_v50  ;;  %v17519_v44 = vadd.f32 %v1113_v29, %v1045_v26  ;;  %v17529_v50 = vpack.c.bf16 %v1152_v17, %v1152_v17 }
 0x249   : > { %v1694_v49 = vld [vmem:[%s17189_s0 + $0xfe0] sm:$0xff]  ;;  %7482 = vmatpush1.bf16.msra.mxu1 %v14563_v62 }
 0x24a   : > { %v17478_v53 = vld [vmem:[%s17189_s0 + $0x1000] sm:$0xff]  ;;  %v14571_v5 = vcombine.low %v1690_v48, %v1694_v49  ;;  %v14572_v8 = vcombine.high %v1690_v48, %v1694_v49  ;;  %7442 = vmatprep.subr.bf16.mxu0 %v14444_v4  ;;  %v1157_v48 = vmax.f32 %v1141_v20, 0.0  ;;  %v17527_v49 = vadd.f32 %v1109_v35, %v1044_v33 }
 0x24b   : > { %v17481_v54 = vld [vmem:[%s17189_s0 + $0x1020] sm:$0xff]  ;;  %7443 = vmatpush1.bf16.msra.mxu0 %v14443_v3  ;;  %v17535_v4 = vpack.c.bf16 %v1155_v43, %v1155_v43 }
 0x24c   : > { %v14580_v9 = vcombine.high %v17478_v53, %v17481_v54  ;;  %v1826_v12 = vld [vmem:[%s17189_s0 + $0x1400] sm:$0xff]  ;;  %7483 = vmatprep.subr.bf16.mxu1 %v14572_v8  ;;  %v14579_v55 = vcombine.low %v17478_v53, %v17481_v54  ;;  %v17540_v10 = vpack.c.bf16 %v1157_v48, %v1157_v48 }
 0x24d   : > { %v1830_v19 = vld [vmem:[%s17189_s0 + $0x1420] sm:$0xff]  ;;  %7484 = vmatpush1.bf16.msra.mxu1 %v14571_v5 }
 0x24e   : > { %v942_v36 = vld [vmem:[%s17238_s25 + $0x60] sm:$0xff]  ;;  %v14708_v38 = vcombine.high %v1826_v12, %v1830_v19  ;;  %7494 = vmatprep.subr.bf16.mxu0 %v14580_v9  ;;  %v14707_v56 = vcombine.low %v1826_v12, %v1830_v19  ;;  %7445 = vmatmul.mubr.bf16.vlgmr.msra.gmra.mrb[4].mxu0 %v17523_v60 }
 0x24f   : > { %v1042_v30 = vmul.f32 %v1001_v42, %v942_v36  ;;  %v1706_v39 = vld [vmem:[%s17189_s0 + $0x1040] sm:$0xff]  ;;  %7495 = vmatpush1.bf16.msra.mxu0 %v14579_v55  ;;  %7526 = vmatprep.mubr.bf16.mxu0 %v17535_v4 }
 0x250   : > { %v1710_v41 = vld [vmem:[%s17189_s0 + $0x1060] sm:$0xff]  ;;  %7535 = vmatprep.subr.bf16.mxu1 %v14708_v38  ;;  %7486 = vmatmul.mubr.bf16.vlgmr.msra.gmra.mrb[4].mxu1 %v17529_v50 }
 0x251   : > { %v17521_v45 = vadd.f32 %v1101_v37, %v1042_v30  ;;  %v1834_v46 = vld [vmem:[%s17189_s0 + $0x1440] sm:$0xff]  ;;  %v14588_v57 = vcombine.high %v1706_v39, %v1710_v41  ;;  %v14587_v53 = vcombine.low %v1706_v39, %v1710_v41  ;;  %7536 = vmatpush1.bf16.msra.mxu1 %v14707_v56  ;;  %7567 = vmatprep.mubr.bf16.mxu1 %v17540_v10 }
 0x252   : > { %v1838_v47 = vld [vmem:[%s17189_s0 + $0x1460] sm:$0xff] }
 0x253   : > { %v14716_v62 = vcombine.high %v1834_v46, %v1838_v47  ;;  %v1714_v1 = vld [vmem:[%s17189_s0 + $0x1080] sm:$0xff]  ;;  %7496 = vmatprep.subr.bf16.mxu0 %v14588_v57  ;;  %v14715_v54 = vcombine.low %v1834_v46, %v1838_v47 }
 0x254   : > { %v1718_v2 = vld [vmem:[%s17189_s0 + $0x10a0] sm:$0xff]  ;;  %7497 = vmatpush1.bf16.msra.mxu0 %v14587_v53 }
 0x255   : > { %v1842_v3 = vld [vmem:[%s17189_s0 + $0x1480] sm:$0xff]  ;;  %v14596_v5 = vcombine.high %v1714_v1, %v1718_v2  ;;  %7537 = vmatprep.subr.bf16.mxu1 %v14716_v62  ;;  %v14595_v14 = vcombine.low %v1714_v1, %v1718_v2 }
 0x256   : > { %v1846_v8 = vld [vmem:[%s17189_s0 + $0x14a0] sm:$0xff]  ;;  %7538 = vmatpush1.bf16.msra.mxu1 %v14715_v54 }
 0x257   : > { %v14724_v9 = vcombine.high %v1842_v3, %v1846_v8  ;;  %v1722_v0 = vld [vmem:[%s17189_s0 + $0x10c0] sm:$0xff]  ;;  %7498 = vmatprep.subr.bf16.mxu0 %v14596_v5  ;;  %v14723_v15 = vcombine.low %v1842_v3, %v1846_v8 }
 0x258   : > { %v1726_v11 = vld [vmem:[%s17189_s0 + $0x10e0] sm:$0xff]  ;;  %7499 = vmatpush1.bf16.msra.mxu0 %v14595_v14 }
 0x259   : > { %v1850_v12 = vld [vmem:[%s17189_s0 + $0x14c0] sm:$0xff]  ;;  %v14604_v42 = vcombine.high %v1722_v0, %v1726_v11  ;;  %7539 = vmatprep.subr.bf16.mxu1 %v14724_v9  ;;  %v14603_v24 = vcombine.low %v1722_v0, %v1726_v11 }
 0x25a   : > { %v1854_v13 = vld [vmem:[%s17189_s0 + $0x14e0] sm:$0xff]  ;;  %7540 = vmatpush1.bf16.msra.mxu1 %v14723_v15 }
 0x25b   : > { %v14732_v16 = vcombine.high %v1850_v12, %v1854_v13  ;;  %v1730_v17 = vld [vmem:[%s17189_s0 + $0x1100] sm:$0xff]  ;;  %7500 = vmatprep.subr.bf16.mxu0 %v14604_v42  ;;  %v14731_v36 = vcombine.low %v1850_v12, %v1854_v13 }
 0x25c   : > { %v1734_v19 = vld [vmem:[%s17189_s0 + $0x1120] sm:$0xff]  ;;  %7501 = vmatpush1.bf16.msra.mxu0 %v14603_v24 }
 0x25d   : > { %v1858_v20 = vld [vmem:[%s17189_s0 + $0x1500] sm:$0xff]  ;;  %v14612_v25 = vcombine.high %v1730_v17, %v1734_v19  ;;  %7541 = vmatprep.subr.bf16.mxu1 %v14732_v16  ;;  %v14611_v35 = vcombine.low %v1730_v17, %v1734_v19 }
 0x25e   : > { %v1862_v21 = vld [vmem:[%s17189_s0 + $0x1520] sm:$0xff]  ;;  %7542 = vmatpush1.bf16.msra.mxu1 %v14731_v36 }
 0x25f   : > { %v14740_v26 = vcombine.high %v1858_v20, %v1862_v21  ;;  %v1738_v29 = vld [vmem:[%s17189_s0 + $0x1140] sm:$0xff]  ;;  %7502 = vmatprep.subr.bf16.mxu0 %v14612_v25  ;;  %v14739_v38 = vcombine.low %v1858_v20, %v1862_v21 }
 0x260   : > { %v1742_v30 = vld [vmem:[%s17189_s0 + $0x1160] sm:$0xff]  ;;  %7503 = vmatpush1.bf16.msra.mxu0 %v14611_v35 }
 0x261   : > { %v1866_v37 = vld [vmem:[%s17189_s0 + $0x1540] sm:$0xff]  ;;  %v14620_v39 = vcombine.high %v1738_v29, %v1742_v30  ;;  %7543 = vmatprep.subr.bf16.mxu1 %v14740_v26  ;;  %v14619_v55 = vcombine.low %v1738_v29, %v1742_v30 }
 0x262   : > { %v1870_v33 = vld [vmem:[%s17189_s0 + $0x1560] sm:$0xff]  ;;  %7544 = vmatpush1.bf16.msra.mxu1 %v14739_v38 }
 0x263   : > { %v14748_v41 = vcombine.high %v1866_v37, %v1870_v33  ;;  %v1746_v43 = vld [vmem:[%s17189_s0 + $0x1180] sm:$0xff]  ;;  %7504 = vmatprep.subr.bf16.mxu0 %v14620_v39  ;;  %v14747_v56 = vcombine.low %v1866_v37, %v1870_v33 }
 0x264   : > { %v1750_v46 = vld [vmem:[%s17189_s0 + $0x11a0] sm:$0xff]  ;;  %7505 = vmatpush1.bf16.msra.mxu0 %v14619_v55 }
 0x265   : > { %v1874_v47 = vld [vmem:[%s17189_s0 + $0x1580] sm:$0xff]  ;;  %v14628_v57 = vcombine.high %v1746_v43, %v1750_v46  ;;  %7545 = vmatprep.subr.bf16.mxu1 %v14748_v41  ;;  %v14627_v53 = vcombine.low %v1746_v43, %v1750_v46 }
 0x266   : > { %v1878_v48 = vld [vmem:[%s17189_s0 + $0x15a0] sm:$0xff]  ;;  %7546 = vmatpush1.bf16.msra.mxu1 %v14747_v56 }
 0x267   : > { %v14756_v62 = vcombine.high %v1874_v47, %v1878_v48  ;;  %v1754_v1 = vld [vmem:[%s17189_s0 + $0x11c0] sm:$0xff]  ;;  %7506 = vmatprep.subr.bf16.mxu0 %v14628_v57  ;;  %v14755_v54 = vcombine.low %v1874_v47, %v1878_v48 }
 0x268   : > { %v1758_v2 = vld [vmem:[%s17189_s0 + $0x11e0] sm:$0xff]  ;;  %7507 = vmatpush1.bf16.msra.mxu0 %v14627_v53 }
 0x269   : > { %v1882_v3 = vld [vmem:[%s17189_s0 + $0x15c0] sm:$0xff]  ;;  %v14636_v5 = vcombine.high %v1754_v1, %v1758_v2  ;;  %7547 = vmatprep.subr.bf16.mxu1 %v14756_v62  ;;  %v14635_v14 = vcombine.low %v1754_v1, %v1758_v2 }
 0x26a   : > { %v1886_v8 = vld [vmem:[%s17189_s0 + $0x15e0] sm:$0xff]  ;;  %7548 = vmatpush1.bf16.msra.mxu1 %v14755_v54 }
 0x26b   : > { %v14764_v9 = vcombine.high %v1882_v3, %v1886_v8  ;;  %v1762_v0 = vld [vmem:[%s17189_s0 + $0x1200] sm:$0xff]  ;;  %7508 = vmatprep.subr.bf16.mxu0 %v14636_v5  ;;  %v14763_v15 = vcombine.low %v1882_v3, %v1886_v8 }
 0x26c   : > { %v1766_v11 = vld [vmem:[%s17189_s0 + $0x1220] sm:$0xff]  ;;  %7509 = vmatpush1.bf16.msra.mxu0 %v14635_v14  ;;  %v985_v14 = vrot.slane %v17456_v23, %v17324_v58 }
 0x26d   : > { %v1890_v12 = vld [vmem:[%s17189_s0 + $0x1600] sm:$0xff]  ;;  %v14644_v42 = vcombine.high %v1762_v0, %v1766_v11  ;;  %7549 = vmatprep.subr.bf16.mxu1 %v14764_v9  ;;  %v14643_v24 = vcombine.low %v1762_v0, %v1766_v11 }
 0x26e   : > { %v1894_v13 = vld [vmem:[%s17189_s0 + $0x1620] sm:$0xff]  ;;  %7550 = vmatpush1.bf16.msra.mxu1 %v14763_v15 }
 0x26f   : > { %v14772_v16 = vcombine.high %v1890_v12, %v1894_v13  ;;  %v1770_v17 = vld [vmem:[%s17189_s0 + $0x1240] sm:$0xff]  ;;  %7510 = vmatprep.subr.bf16.mxu0 %v14644_v42  ;;  %v14771_v36 = vcombine.low %v1890_v12, %v1894_v13 }
 0x270   : > { %v1774_v19 = vld [vmem:[%s17189_s0 + $0x1260] sm:$0xff]  ;;  %7511 = vmatpush1.bf16.msra.mxu0 %v14643_v24 }
 0x271   : > { %v1898_v20 = vld [vmem:[%s17189_s0 + $0x1640] sm:$0xff]  ;;  %v14652_v25 = vcombine.high %v1770_v17, %v1774_v19  ;;  %7551 = vmatprep.subr.bf16.mxu1 %v14772_v16  ;;  %v14651_v35 = vcombine.low %v1770_v17, %v1774_v19  ;;  %v993_v16 = vrot.slane %v17456_v23, %v17333_v63 }
 0x272   : > { %v1902_v21 = vld [vmem:[%s17189_s0 + $0x1660] sm:$0xff]  ;;  %7552 = vmatpush1.bf16.msra.mxu1 %v14771_v36 }
 0x273   : > { %v14780_v26 = vcombine.high %v1898_v20, %v1902_v21  ;;  %v1778_v29 = vld [vmem:[%s17189_s0 + $0x1280] sm:$0xff]  ;;  %7512 = vmatprep.subr.bf16.mxu0 %v14652_v25  ;;  %v14779_v38 = vcombine.low %v1898_v20, %v1902_v21  ;;  %v940_v20 = vld [vmem:[%s17238_s25 + $0x50] sm:$0xff] }
 0x274   : > { %v1782_v30 = vld [vmem:[%s17189_s0 + $0x12a0] sm:$0xff]  ;;  %7513 = vmatpush1.bf16.msra.mxu0 %v14651_v35 }
 0x275   : > { %v1906_v37 = vld [vmem:[%s17189_s0 + $0x1680] sm:$0xff]  ;;  %v14660_v39 = vcombine.high %v1778_v29, %v1782_v30  ;;  %7553 = vmatprep.subr.bf16.mxu1 %v14780_v26  ;;  %v14659_v55 = vcombine.low %v1778_v29, %v1782_v30  ;;  %v1085_v30 = vrot.slane %v17466_v40, %v17324_v58 }
 0x276   : > { %v1910_v33 = vld [vmem:[%s17189_s0 + $0x16a0] sm:$0xff]  ;;  %7554 = vmatpush1.bf16.msra.mxu1 %v14779_v38 }
 0x277   : > { %v14788_v41 = vcombine.high %v1906_v37, %v1910_v33  ;;  %v1786_v43 = vld [vmem:[%s17189_s0 + $0x12c0] sm:$0xff]  ;;  %7514 = vmatprep.subr.bf16.mxu0 %v14660_v39  ;;  %v14787_v56 = vcombine.low %v1906_v37, %v1910_v33  ;;  %v1040_v37 = vmul.f32 %v993_v16, %v940_v20  ;;  %v1093_v33 = vrot.slane %v17466_v40, %v17333_v63 }
 0x278   : > { %v1790_v46 = vld [vmem:[%s17189_s0 + $0x12e0] sm:$0xff]  ;;  %7515 = vmatpush1.bf16.msra.mxu0 %v14659_v55 }
 0x279   : > { %v1914_v47 = vld [vmem:[%s17189_s0 + $0x16c0] sm:$0xff]  ;;  %v14668_v57 = vcombine.high %v1786_v43, %v1790_v46  ;;  %7555 = vmatprep.subr.bf16.mxu1 %v14788_v41  ;;  %v14667_v53 = vcombine.low %v1786_v43, %v1790_v46 }
 0x27a   : > { %v1918_v48 = vld [vmem:[%s17189_s0 + $0x16e0] sm:$0xff]  ;;  %7556 = vmatpush1.bf16.msra.mxu1 %v14787_v56  ;;  %v1140_v56 = vadd.f32 %v1093_v33, %v1040_v37 }
 0x27b   : > { %v14796_v62 = vcombine.high %v1914_v47, %v1918_v48  ;;  %v1794_v1 = vld [vmem:[%s17189_s0 + $0x1300] sm:$0xff]  ;;  %7516 = vmatprep.subr.bf16.mxu0 %v14668_v57  ;;  %v14795_v54 = vcombine.low %v1914_v47, %v1918_v48 }
 0x27c   : > { %v1798_v2 = vld [vmem:[%s17189_s0 + $0x1320] sm:$0xff]  ;;  %7517 = vmatpush1.bf16.msra.mxu0 %v14667_v53 }
 0x27d   : > { %v1922_v3 = vld [vmem:[%s17189_s0 + $0x1700] sm:$0xff]  ;;  %v14676_v5 = vcombine.high %v1794_v1, %v1798_v2  ;;  %7557 = vmatprep.subr.bf16.mxu1 %v14796_v62  ;;  %v14675_v15 = vcombine.low %v1794_v1, %v1798_v2 }
 0x27e   : > { %v1926_v8 = vld [vmem:[%s17189_s0 + $0x1720] sm:$0xff]  ;;  %7558 = vmatpush1.bf16.msra.mxu1 %v14795_v54 }
 0x27f   : > { %v14804_v9 = vcombine.high %v1922_v3, %v1926_v8  ;;  %v1802_v0 = vld [vmem:[%s17189_s0 + $0x1340] sm:$0xff]  ;;  %7518 = vmatprep.subr.bf16.mxu0 %v14676_v5  ;;  %v14803_v17 = vcombine.low %v1922_v3, %v1926_v8  ;;  %v1156_v5 = vmax.f32 %v1140_v56, 0.0 }
 0x280   : > { %v1806_v11 = vld [vmem:[%s17189_s0 + $0x1360] sm:$0xff]  ;;  %7519 = vmatpush1.bf16.msra.mxu0 %v14675_v15 }
 0x281   : > { %v1930_v12 = vld [vmem:[%s17189_s0 + $0x1740] sm:$0xff]  ;;  %v14684_v19 = vcombine.high %v1802_v0, %v1806_v11  ;;  %7559 = vmatprep.subr.bf16.mxu1 %v14804_v9  ;;  %v14683_v23 = vcombine.low %v1802_v0, %v1806_v11 }
 0x282   : > { %v1934_v13 = vld [vmem:[%s17189_s0 + $0x1760] sm:$0xff]  ;;  %7560 = vmatpush1.bf16.msra.mxu1 %v14803_v17  ;;  %v1161_v17 = vmax.f32 %v17519_v44, 0.0 }
 0x283   : > { %v938_v42 = vld [vmem:[%s17238_s25 + $0x40] sm:$0xff]  ;;  %v14812_v21 = vcombine.high %v1930_v12, %v1934_v13  ;;  %7520 = vmatprep.subr.bf16.mxu0 %v14684_v19  ;;  %v14811_v35 = vcombine.low %v1930_v12, %v1934_v13  ;;  %v17619_v19 = vpack.c.bf16 %v1156_v5, %v1156_v5 }
 0x284   : > { %v1810_v24 = vld [vmem:[%s17189_s0 + $0x1380] sm:$0xff]  ;;  %v1038_v29 = vmul.f32 %v985_v14, %v938_v42  ;;  %7521 = vmatpush1.bf16.msra.mxu0 %v14683_v23  ;;  %v1159_v14 = vmax.f32 %v17513_v32, 0.0 }
 0x285   : > { %v1814_v36 = vld [vmem:[%s17189_s0 + $0x13a0] sm:$0xff]  ;;  %7561 = vmatprep.subr.bf16.mxu1 %v14812_v21 }
 0x286   : > { %v1938_v25 = vld [vmem:[%s17189_s0 + $0x1780] sm:$0xff]  ;;  %v14692_v38 = vcombine.high %v1810_v24, %v1814_v36  ;;  %v1138_v48 = vadd.f32 %v1085_v30, %v1038_v29  ;;  %v14691_v55 = vcombine.low %v1810_v24, %v1814_v36  ;;  %7562 = vmatpush1.bf16.msra.mxu1 %v14811_v35  ;;  %v17628_v30 = vpack.c.bf16 %v1161_v17, %v1161_v17 }
 0x287   : > { %v1942_v26 = vld [vmem:[%s17189_s0 + $0x17a0] sm:$0xff] }
 0x288   : > { %v14820_v39 = vcombine.high %v1938_v25, %v1942_v26  ;;  %v1818_v41 = vld [vmem:[%s17189_s0 + $0x13c0] sm:$0xff]  ;;  %7522 = vmatprep.subr.bf16.mxu0 %v14692_v38  ;;  %v14819_v40 = vcombine.low %v1938_v25, %v1942_v26  ;;  %v1154_v3 = vmax.f32 %v1138_v48, 0.0  ;;  %v17623_v26 = vpack.c.bf16 %v1159_v14, %v1159_v14 }
 0x289   : > { %v1822_v43 = vld [vmem:[%s17189_s0 + $0x13e0] sm:$0xff]  ;;  %7523 = vmatpush1.bf16.msra.mxu0 %v14691_v55 }
 0x28a   : > { %v1946_v46 = vld [vmem:[%s17189_s0 + $0x17c0] sm:$0xff]  ;;  %v14700_v57 = vcombine.high %v1818_v41, %v1822_v43  ;;  %7563 = vmatprep.subr.bf16.mxu1 %v14820_v39  ;;  %v14699_v54 = vcombine.low %v1818_v41, %v1822_v43  ;;  %v17614_v15 = vpack.c.bf16 %v1154_v3, %v1154_v3 }
 0x28b   : > { %v1950_v47 = vld [vmem:[%s17189_s0 + $0x17e0] sm:$0xff]  ;;  %7564 = vmatpush1.bf16.msra.mxu1 %v14819_v40 }
 0x28c   : > { %v14828_v62 = vcombine.high %v1946_v46, %v1950_v47  ;;  %v1954_v1 = vld [vmem:[%s17189_s0 + $0x1800] sm:$0xff]  ;;  %7524 = vmatprep.subr.bf16.mxu0 %v14700_v57  ;;  %v14827_v9 = vcombine.low %v1946_v46, %v1950_v47 }
 0x28d   : > { %v1958_v2 = vld [vmem:[%s17189_s0 + $0x1820] sm:$0xff]  ;;  %7525 = vmatpush1.bf16.msra.mxu0 %v14699_v54 }
 0x28e   : > { %v2082_v8 = vld [vmem:[%s17189_s0 + $0x1c00] sm:$0xff]  ;;  %v14836_v0 = vcombine.high %v1954_v1, %v1958_v2  ;;  %7565 = vmatprep.subr.bf16.mxu1 %v14828_v62  ;;  %v14835_v20 = vcombine.low %v1954_v1, %v1958_v2 }
 0x28f   : > { %v2086_v53 = vld [vmem:[%s17189_s0 + $0x1c20] sm:$0xff]  ;;  %7566 = vmatpush1.bf16.msra.mxu1 %v14827_v9 }
 0x290   : > { %v14964_v11 = vcombine.high %v2082_v8, %v2086_v53  ;;  %v1962_v12 = vld [vmem:[%s17189_s0 + $0x1840] sm:$0xff]  ;;  %7576 = vmatprep.subr.bf16.mxu0 %v14836_v0  ;;  %v14963_v21 = vcombine.low %v2082_v8, %v2086_v53  ;;  %7527 = vmatmul.mubr.bf16.vlgmr.msra.gmra.mrb[8].mxu0 %v17614_v15 }
 0x291   : > { %v1966_v13 = vld [vmem:[%s17189_s0 + $0x1860] sm:$0xff]  ;;  %7577 = vmatpush1.bf16.msra.mxu0 %v14835_v20  ;;  %7608 = vmatprep.mubr.bf16.mxu0 %v17623_v26 }
 0x292   : > { %v2090_v42 = vld [vmem:[%s17189_s0 + $0x1c40] sm:$0xff]  ;;  %v14844_v24 = vcombine.high %v1962_v12, %v1966_v13  ;;  %7617 = vmatprep.subr.bf16.mxu1 %v14964_v11  ;;  %7568 = vmatmul.mubr.bf16.vlgmr.msra.gmra.mrb[8].mxu1 %v17619_v19  ;;  %v14843_v23 = vcombine.low %v1962_v12, %v1966_v13 }
 0x293   : > { %v2094_v16 = vld [vmem:[%s17189_s0 + $0x1c60] sm:$0xff]  ;;  %7618 = vmatpush1.bf16.msra.mxu1 %v14963_v21  ;;  %7649 = vmatprep.mubr.bf16.mxu1 %v17628_v30 }
 0x294   : > { %v14972_v36 = vcombine.high %v2090_v42, %v2094_v16  ;;  %v1970_v25 = vld [vmem:[%s17189_s0 + $0x1880] sm:$0xff]  ;;  %7578 = vmatprep.subr.bf16.mxu0 %v14844_v24  ;;  %v14971_v37 = vcombine.low %v2090_v42, %v2094_v16 }
 0x295   : > { %v1974_v32 = vld [vmem:[%s17189_s0 + $0x18a0] sm:$0xff]  ;;  %7579 = vmatpush1.bf16.msra.mxu0 %v14843_v23 }
 0x296   : > { %v2098_v44 = vld [vmem:[%s17189_s0 + $0x1c80] sm:$0xff]  ;;  %v14852_v33 = vcombine.high %v1970_v25, %v1974_v32  ;;  %7619 = vmatprep.subr.bf16.mxu1 %v14972_v36  ;;  %v14851_v46 = vcombine.low %v1970_v25, %v1974_v32 }
 0x297   : > { %v2102_v29 = vld [vmem:[%s17189_s0 + $0x1ca0] sm:$0xff]  ;;  %7620 = vmatpush1.bf16.msra.mxu1 %v14971_v37 }
 0x298   : > { %v14980_v35 = vcombine.high %v2098_v44, %v2102_v29  ;;  %v1978_v38 = vld [vmem:[%s17189_s0 + $0x18c0] sm:$0xff]  ;;  %7580 = vmatprep.subr.bf16.mxu0 %v14852_v33  ;;  %v14979_v47 = vcombine.low %v2098_v44, %v2102_v29 }
 0x299   : > { %v1982_v39 = vld [vmem:[%s17189_s0 + $0x18e0] sm:$0xff]  ;;  %7581 = vmatpush1.bf16.msra.mxu0 %v14851_v46 }
 0x29a   : > { %v2106_v41 = vld [vmem:[%s17189_s0 + $0x1cc0] sm:$0xff]  ;;  %v14860_v48 = vcombine.high %v1978_v38, %v1982_v39  ;;  %7621 = vmatprep.subr.bf16.mxu1 %v14980_v35  ;;  %v14859_v1 = vcombine.low %v1978_v38, %v1982_v39 }
 0x29b   : > { %v2110_v43 = vld [vmem:[%s17189_s0 + $0x1ce0] sm:$0xff]  ;;  %7622 = vmatpush1.bf16.msra.mxu1 %v14979_v47 }
 0x29c   : > { %v14988_v55 = vcombine.high %v2106_v41, %v2110_v43  ;;  %v1986_v56 = vld [vmem:[%s17189_s0 + $0x1900] sm:$0xff]  ;;  %7582 = vmatprep.subr.bf16.mxu0 %v14860_v48  ;;  %v14987_v2 = vcombine.low %v2106_v41, %v2110_v43 }
 0x29d   : > { %v1990_v40 = vld [vmem:[%s17189_s0 + $0x1920] sm:$0xff]  ;;  %7583 = vmatpush1.bf16.msra.mxu0 %v14859_v1 }
 0x29e   : > { %v2114_v57 = vld [vmem:[%s17189_s0 + $0x1d00] sm:$0xff]  ;;  %v14868_v3 = vcombine.high %v1986_v56, %v1990_v40  ;;  %7623 = vmatprep.subr.bf16.mxu1 %v14988_v55  ;;  %v14867_v0 = vcombine.low %v1986_v56, %v1990_v40 }
 0x29f   : > { %v2118_v62 = vld [vmem:[%s17189_s0 + $0x1d20] sm:$0xff]  ;;  %7624 = vmatpush1.bf16.msra.mxu1 %v14987_v2 }
 0x2a0   : > { %v14996_v8 = vcombine.high %v2114_v57, %v2118_v62  ;;  %v1994_v53 = vld [vmem:[%s17189_s0 + $0x1940] sm:$0xff]  ;;  %7584 = vmatprep.subr.bf16.mxu0 %v14868_v3  ;;  %v14995_v11 = vcombine.low %v2114_v57, %v2118_v62 }
 0x2a1   : > { %v1998_v54 = vld [vmem:[%s17189_s0 + $0x1960] sm:$0xff]  ;;  %7585 = vmatpush1.bf16.msra.mxu0 %v14867_v0 }
 0x2a2   : > { %v2122_v5 = vld [vmem:[%s17189_s0 + $0x1d40] sm:$0xff]  ;;  %v14876_v12 = vcombine.high %v1994_v53, %v1998_v54  ;;  %7625 = vmatprep.subr.bf16.mxu1 %v14996_v8  ;;  %v14875_v20 = vcombine.low %v1994_v53, %v1998_v54 }
 0x2a3   : > { %v2126_v9 = vld [vmem:[%s17189_s0 + $0x1d60] sm:$0xff]  ;;  %7626 = vmatpush1.bf16.msra.mxu1 %v14995_v11 }
 0x2a4   : > { %v15004_v13 = vcombine.high %v2122_v5, %v2126_v9  ;;  %v2002_v14 = vld [vmem:[%s17189_s0 + $0x1980] sm:$0xff]  ;;  %7586 = vmatprep.subr.bf16.mxu0 %v14876_v12  ;;  %v15003_v21 = vcombine.low %v2122_v5, %v2126_v9 }
 0x2a5   : > { %v2006_v42 = vld [vmem:[%s17189_s0 + $0x19a0] sm:$0xff]  ;;  %7587 = vmatpush1.bf16.msra.mxu0 %v14875_v20 }
 0x2a6   : > { %v2130_v16 = vld [vmem:[%s17189_s0 + $0x1d80] sm:$0xff]  ;;  %v14884_v24 = vcombine.high %v2002_v14, %v2006_v42  ;;  %7627 = vmatprep.subr.bf16.mxu1 %v15004_v13  ;;  %v14883_v23 = vcombine.low %v2002_v14, %v2006_v42 }
 0x2a7   : > { %v2134_v17 = vld [vmem:[%s17189_s0 + $0x1da0] sm:$0xff]  ;;  %7628 = vmatpush1.bf16.msra.mxu1 %v15003_v21 }
 0x2a8   : > { %v15012_v36 = vcombine.high %v2130_v16, %v2134_v17  ;;  %v2010_v25 = vld [vmem:[%s17189_s0 + $0x19c0] sm:$0xff]  ;;  %7588 = vmatprep.subr.bf16.mxu0 %v14884_v24  ;;  %v15011_v37 = vcombine.low %v2130_v16, %v2134_v17 }
 0x2a9   : > { %v2014_v32 = vld [vmem:[%s17189_s0 + $0x19e0] sm:$0xff]  ;;  %7589 = vmatpush1.bf16.msra.mxu0 %v14883_v23 }
 0x2aa   : > { %v2138_v44 = vld [vmem:[%s17189_s0 + $0x1dc0] sm:$0xff]  ;;  %v14892_v33 = vcombine.high %v2010_v25, %v2014_v32  ;;  %7629 = vmatprep.subr.bf16.mxu1 %v15012_v36  ;;  %v14891_v46 = vcombine.low %v2010_v25, %v2014_v32 }
 0x2ab   : > { %v2142_v29 = vld [vmem:[%s17189_s0 + $0x1de0] sm:$0xff]  ;;  %7630 = vmatpush1.bf16.msra.mxu1 %v15011_v37 }
 0x2ac   : > { %v15020_v35 = vcombine.high %v2138_v44, %v2142_v29  ;;  %v2018_v38 = vld [vmem:[%s17189_s0 + $0x1a00] sm:$0xff]  ;;  %7590 = vmatprep.subr.bf16.mxu0 %v14892_v33  ;;  %v15019_v47 = vcombine.low %v2138_v44, %v2142_v29 }
 0x2ad   : > { %v2022_v39 = vld [vmem:[%s17189_s0 + $0x1a20] sm:$0xff]  ;;  %7591 = vmatpush1.bf16.msra.mxu0 %v14891_v46 }
 0x2ae   : > { %v2146_v41 = vld [vmem:[%s17189_s0 + $0x1e00] sm:$0xff]  ;;  %v14900_v48 = vcombine.high %v2018_v38, %v2022_v39  ;;  %7631 = vmatprep.subr.bf16.mxu1 %v15020_v35  ;;  %v14899_v1 = vcombine.low %v2018_v38, %v2022_v39 }
 0x2af   : > { %v2150_v43 = vld [vmem:[%s17189_s0 + $0x1e20] sm:$0xff]  ;;  %7632 = vmatpush1.bf16.msra.mxu1 %v15019_v47 }
 0x2b0   : > { %v15028_v55 = vcombine.high %v2146_v41, %v2150_v43  ;;  %v2026_v56 = vld [vmem:[%s17189_s0 + $0x1a40] sm:$0xff]  ;;  %7592 = vmatprep.subr.bf16.mxu0 %v14900_v48  ;;  %v15027_v2 = vcombine.low %v2146_v41, %v2150_v43 }
 0x2b1   : > { %v2030_v40 = vld [vmem:[%s17189_s0 + $0x1a60] sm:$0xff]  ;;  %7593 = vmatpush1.bf16.msra.mxu0 %v14899_v1 }
 0x2b2   : > { %v2154_v57 = vld [vmem:[%s17189_s0 + $0x1e40] sm:$0xff]  ;;  %v14908_v3 = vcombine.high %v2026_v56, %v2030_v40  ;;  %7633 = vmatprep.subr.bf16.mxu1 %v15028_v55  ;;  %v14907_v0 = vcombine.low %v2026_v56, %v2030_v40 }
 0x2b3   : > { %v2158_v62 = vld [vmem:[%s17189_s0 + $0x1e60] sm:$0xff]  ;;  %7634 = vmatpush1.bf16.msra.mxu1 %v15027_v2 }
 0x2b4   : > { %v15036_v8 = vcombine.high %v2154_v57, %v2158_v62  ;;  %v2034_v53 = vld [vmem:[%s17189_s0 + $0x1a80] sm:$0xff]  ;;  %7594 = vmatprep.subr.bf16.mxu0 %v14908_v3  ;;  %v15035_v11 = vcombine.low %v2154_v57, %v2158_v62 }
 0x2b5   : > { %v2038_v54 = vld [vmem:[%s17189_s0 + $0x1aa0] sm:$0xff]  ;;  %7595 = vmatpush1.bf16.msra.mxu0 %v14907_v0 }
 0x2b6   : > { %v2162_v5 = vld [vmem:[%s17189_s0 + $0x1e80] sm:$0xff]  ;;  %v14916_v12 = vcombine.high %v2034_v53, %v2038_v54  ;;  %7635 = vmatprep.subr.bf16.mxu1 %v15036_v8  ;;  %v14915_v20 = vcombine.low %v2034_v53, %v2038_v54 }
 0x2b7   : > { %v2166_v9 = vld [vmem:[%s17189_s0 + $0x1ea0] sm:$0xff]  ;;  %7636 = vmatpush1.bf16.msra.mxu1 %v15035_v11 }
 0x2b8   : > { %v15044_v13 = vcombine.high %v2162_v5, %v2166_v9  ;;  %v2042_v14 = vld [vmem:[%s17189_s0 + $0x1ac0] sm:$0xff]  ;;  %7596 = vmatprep.subr.bf16.mxu0 %v14916_v12  ;;  %v15043_v21 = vcombine.low %v2162_v5, %v2166_v9 }
 0x2b9   : > { %v2046_v42 = vld [vmem:[%s17189_s0 + $0x1ae0] sm:$0xff]  ;;  %7597 = vmatpush1.bf16.msra.mxu0 %v14915_v20  ;;  %v1319_v20 = vld [vmem:[%s17189_s0 + $0x428] sm:$0xff] }
 0x2ba   : > { %v2170_v16 = vld [vmem:[%s17189_s0 + $0x1ec0] sm:$0xff]  ;;  %v14924_v24 = vcombine.high %v2042_v14, %v2046_v42  ;;  %7637 = vmatprep.subr.bf16.mxu1 %v15044_v13  ;;  %v14923_v23 = vcombine.low %v2042_v14, %v2046_v42  ;;  %v1187_v14 = vld [vmem:[%s17189_s0 + $0x8] sm:$0xff] }
 0x2bb   : > { %v2174_v17 = vld [vmem:[%s17189_s0 + $0x1ee0] sm:$0xff]  ;;  %7638 = vmatpush1.bf16.msra.mxu1 %v15043_v21  ;;  %v1191_v42 = vld [vmem:[%s17189_s0 + $0x28] sm:$0xff] }
 0x2bc   : > { %v15052_v36 = vcombine.high %v2170_v16, %v2174_v17  ;;  %v2050_v25 = vld [vmem:[%s17189_s0 + $0x1b00] sm:$0xff]  ;;  %7598 = vmatprep.subr.bf16.mxu0 %v14924_v24  ;;  %v15051_v37 = vcombine.low %v2170_v16, %v2174_v17  ;;  %v1158_v16 = vmax.f32 %v17521_v45, 0.0  ;;  %v1315_v17 = vld [vmem:[%s17189_s0 + $0x408] sm:$0xff]  ;;  %v1160_v24 = vmax.f32 %v17527_v49, 0.0 }
 0x2bd   : > { %v2054_v32 = vld [vmem:[%s17189_s0 + $0x1b20] sm:$0xff]  ;;  %7599 = vmatpush1.bf16.msra.mxu0 %v14923_v23  ;;  %v1323_v45 = vld [vmem:[%s17189_s0 + $0x448] sm:$0xff]  ;;  %v14069_v49 = vcombine.low %v1187_v14, %v1191_v42 }
 0x2be   : > { %v2178_v44 = vld [vmem:[%s17189_s0 + $0x1f00] sm:$0xff]  ;;  %v14932_v33 = vcombine.high %v2050_v25, %v2054_v32  ;;  %7639 = vmatprep.subr.bf16.mxu1 %v15052_v36  ;;  %v14931_v46 = vcombine.low %v2050_v25, %v2054_v32  ;;  %v14070_v25 = vcombine.high %v1187_v14, %v1191_v42  ;;  %v14198_v32 = vcombine.high %v1315_v17, %v1319_v20 }
 0x2bf   : > { %v2182_v29 = vld [vmem:[%s17189_s0 + $0x1f20] sm:$0xff]  ;;  %7640 = vmatpush1.bf16.msra.mxu1 %v15051_v37  ;;  %v17693_v23 = vpack.c.bf16 %v1158_v16, %v1158_v16  ;;  %v1327_v37 = vld [vmem:[%s17189_s0 + $0x468] sm:$0xff] }
 0x2c0   : > { %v15060_v35 = vcombine.high %v2178_v44, %v2182_v29  ;;  %v2058_v38 = vld [vmem:[%s17189_s0 + $0x1b40] sm:$0xff]  ;;  %7600 = vmatprep.subr.bf16.mxu0 %v14932_v33  ;;  %v15059_v47 = vcombine.low %v2178_v44, %v2182_v29  ;;  %v1195_v44 = vld [vmem:[%s17189_s0 + $0x48] sm:$0xff]  ;;  %v17697_v33 = vpack.c.bf16 %v1160_v24, %v1160_v24 }
 0x2c1   : > { %v2062_v39 = vld [vmem:[%s17189_s0 + $0x1b60] sm:$0xff]  ;;  %7601 = vmatpush1.bf16.msra.mxu0 %v14931_v46  ;;  %v1199_v29 = vld [vmem:[%s17189_s0 + $0x68] sm:$0xff] }
 0x2c2   : > { %v2186_v41 = vld [vmem:[%s17189_s0 + $0x1f40] sm:$0xff]  ;;  %v14940_v48 = vcombine.high %v2058_v38, %v2062_v39  ;;  %7641 = vmatprep.subr.bf16.mxu1 %v15060_v35  ;;  %v14939_v1 = vcombine.low %v2058_v38, %v2062_v39  ;;  %v14197_v35 = vcombine.low %v1315_v17, %v1319_v20  ;;  %v14078_v38 = vcombine.high %v1195_v44, %v1199_v29  ;;  %v1331_v46 = vld [vmem:[%s17189_s0 + $0x488] sm:$0xff] }
 0x2c3   : > { %v2190_v43 = vld [vmem:[%s17189_s0 + $0x1f60] sm:$0xff]  ;;  %7642 = vmatpush1.bf16.msra.mxu1 %v15059_v47  ;;  %v14206_v39 = vcombine.high %v1323_v45, %v1327_v37  ;;  %v1335_v47 = vld [vmem:[%s17189_s0 + $0x4a8] sm:$0xff] }
 0x2c4   : > { %v15068_v55 = vcombine.high %v2186_v41, %v2190_v43  ;;  %v2066_v56 = vld [vmem:[%s17189_s0 + $0x1b80] sm:$0xff]  ;;  %7602 = vmatprep.subr.bf16.mxu0 %v14940_v48  ;;  %v15067_v2 = vcombine.low %v2186_v41, %v2190_v43  ;;  %v1203_v41 = vld [vmem:[%s17189_s0 + $0x88] sm:$0xff]  ;;  %v14077_v48 = vcombine.low %v1195_v44, %v1199_v29 }
 0x2c5   : > { %v2070_v40 = vld [vmem:[%s17189_s0 + $0x1ba0] sm:$0xff]  ;;  %7603 = vmatpush1.bf16.msra.mxu0 %v14939_v1  ;;  %v1207_v43 = vld [vmem:[%s17189_s0 + $0xa8] sm:$0xff] }
 0x2c6   : > { %v2194_v57 = vld [vmem:[%s17189_s0 + $0x1f80] sm:$0xff]  ;;  %v14948_v3 = vcombine.high %v2066_v56, %v2070_v40  ;;  %7643 = vmatprep.subr.bf16.mxu1 %v15068_v55  ;;  %v14947_v0 = vcombine.low %v2066_v56, %v2070_v40  ;;  %v14205_v55 = vcombine.low %v1323_v45, %v1327_v37  ;;  %v14086_v56 = vcombine.high %v1203_v41, %v1207_v43  ;;  %v1339_v1 = vld [vmem:[%s17189_s0 + $0x4c8] sm:$0xff] }
 0x2c7   : > { %v2198_v62 = vld [vmem:[%s17189_s0 + $0x1fa0] sm:$0xff]  ;;  %7644 = vmatpush1.bf16.msra.mxu1 %v15067_v2  ;;  %v14214_v40 = vcombine.high %v1331_v46, %v1335_v47  ;;  %v1343_v2 = vld [vmem:[%s17189_s0 + $0x4e8] sm:$0xff] }
 0x2c8   : > { %v15076_v8 = vcombine.high %v2194_v57, %v2198_v62  ;;  %v2074_v53 = vld [vmem:[%s17189_s0 + $0x1bc0] sm:$0xff]  ;;  %7604 = vmatprep.subr.bf16.mxu0 %v14948_v3  ;;  %v15075_v11 = vcombine.low %v2194_v57, %v2198_v62  ;;  %v1211_v57 = vld [vmem:[%s17189_s0 + $0xc8] sm:$0xff]  ;;  %v14085_v3 = vcombine.low %v1203_v41, %v1207_v43 }
 0x2c9   : > { %v2078_v54 = vld [vmem:[%s17189_s0 + $0x1be0] sm:$0xff]  ;;  %7605 = vmatpush1.bf16.msra.mxu0 %v14947_v0  ;;  %v1215_v62 = vld [vmem:[%s17189_s0 + $0xe8] sm:$0xff] }
 0x2ca   : > { %v2202_v5 = vld [vmem:[%s17189_s0 + $0x1fc0] sm:$0xff]  ;;  %v14956_v12 = vcombine.high %v2074_v53, %v2078_v54  ;;  %7645 = vmatprep.subr.bf16.mxu1 %v15076_v8  ;;  %v14955_v21 = vcombine.low %v2074_v53, %v2078_v54  ;;  %v14213_v8 = vcombine.low %v1331_v46, %v1335_v47  ;;  %v14094_v53 = vcombine.high %v1211_v57, %v1215_v62  ;;  %v1347_v0 = vld [vmem:[%s17189_s0 + $0x508] sm:$0xff] }
 0x2cb   : > { %v2206_v9 = vld [vmem:[%s17189_s0 + $0x1fe0] sm:$0xff]  ;;  %7646 = vmatpush1.bf16.msra.mxu1 %v15075_v11  ;;  %v14222_v54 = vcombine.high %v1339_v1, %v1343_v2  ;;  %v1351_v11 = vld [vmem:[%s17189_s0 + $0x528] sm:$0xff] }
 0x2cc   : > { %v15084_v13 = vcombine.high %v2202_v5, %v2206_v9  ;;  %7606 = vmatprep.subr.bf16.mxu0 %v14956_v12  ;;  %v15083_v36 = vcombine.low %v2202_v5, %v2206_v9  ;;  %v1219_v5 = vld [vmem:[%s17189_s0 + $0x108] sm:$0xff]  ;;  %v14093_v12 = vcombine.low %v1211_v57, %v1215_v62  ;;  %v14230_v42 = vcombine.high %v1347_v0, %v1351_v11 }
 0x2cd   : > { %7607 = vmatpush1.bf16.msra.mxu0 %v14955_v21  ;;  %v1223_v9 = vld [vmem:[%s17189_s0 + $0x128] sm:$0xff] }
 0x2ce   : > { %7647 = vmatprep.subr.bf16.mxu1 %v15084_v13  ;;  %7658 = vmatprep.subr.bf16.mxu0 %v14070_v25  ;;  %v14221_v13 = vcombine.low %v1339_v1, %v1343_v2  ;;  %v14102_v14 = vcombine.high %v1219_v5, %v1223_v9  ;;  %v1227_v16 = vld [vmem:[%s17189_s0 + $0x148] sm:$0xff]  ;;  %v14101_v24 = vcombine.low %v1219_v5, %v1223_v9 }
 0x2cf   : > { %7648 = vmatpush1.bf16.msra.mxu1 %v15083_v36  ;;  %v1231_v17 = vld [vmem:[%s17189_s0 + $0x168] sm:$0xff]  ;;  %v14229_v36 = vcombine.low %v1347_v0, %v1351_v11 }
 0x2d0   : > { %7699 = vmatprep.subr.bf16.mxu1 %v14198_v32  ;;  %7609 = vmatmul.mubr.bf16.vlgmr.msra.gmra.mrb[12].mxu0 %v17693_v23  ;;  %v1355_v20 = vld [vmem:[%s17189_s0 + $0x548] sm:$0xff]  ;;  %v14110_v25 = vcombine.high %v1227_v16, %v1231_v17 }
 0x2d1   : > { %7659 = vmatpush1.bf16.msra.mxu0 %v14069_v49  ;;  %7690 = vmatprep.mubr.bf16.mxu0 %v17303_v27  ;;  %v1359_v21 = vld [vmem:[%s17189_s0 + $0x568] sm:$0xff]  ;;  %v14109_v49 = vcombine.low %v1227_v16, %v1231_v17 }
 0x2d2   : > { %7650 = vmatmul.mubr.bf16.vlgmr.msra.gmra.mrb[12].mxu1 %v17697_v33  ;;  %7660 = vmatprep.subr.bf16.mxu0 %v14078_v38  ;;  %v14238_v32 = vcombine.high %v1355_v20, %v1359_v21  ;;  %v1235_v44 = vld [vmem:[%s17189_s0 + $0x188] sm:$0xff] }
 0x2d3   : > { %7700 = vmatpush1.bf16.msra.mxu1 %v14197_v35  ;;  %7731 = vmatprep.mubr.bf16.mxu1 %v17305_v28  ;;  %v1239_v29 = vld [vmem:[%s17189_s0 + $0x1a8] sm:$0xff]  ;;  %v14237_v35 = vcombine.low %v1355_v20, %v1359_v21 }
 0x2d4   : > { %7701 = vmatprep.subr.bf16.mxu1 %v14206_v39  ;;  %v1363_v45 = vld [vmem:[%s17189_s0 + $0x588] sm:$0xff]  ;;  %v14118_v38 = vcombine.high %v1235_v44, %v1239_v29  ;;  %v14117_v1 = vcombine.low %v1235_v44, %v1239_v29 }
 0x2d5   : > { %7661 = vmatpush1.bf16.msra.mxu0 %v14077_v48  ;;  %v1367_v37 = vld [vmem:[%s17189_s0 + $0x5a8] sm:$0xff] }
 0x2d6   : > { %7662 = vmatprep.subr.bf16.mxu0 %v14086_v56  ;;  %v14246_v41 = vcombine.high %v1363_v45, %v1367_v37  ;;  %v1243_v43 = vld [vmem:[%s17189_s0 + $0x1c8] sm:$0xff] }
 0x2d7   : > { %7702 = vmatpush1.bf16.msra.mxu1 %v14205_v55  ;;  %v1247_v46 = vld [vmem:[%s17189_s0 + $0x1e8] sm:$0xff] }
 0x2d8   : > { %7703 = vmatprep.subr.bf16.mxu1 %v14214_v40  ;;  %v1371_v55 = vld [vmem:[%s17189_s0 + $0x5c8] sm:$0xff] }
 0x2d9   : > { %7663 = vmatpush1.bf16.msra.mxu0 %v14085_v3  ;;  %v1375_v56 = vld [vmem:[%s17189_s0 + $0x5e8] sm:$0xff] }
 0x2da   : > { %7664 = vmatprep.subr.bf16.mxu0 %v14094_v53  ;;  %v14245_v53 = vcombine.low %v1363_v45, %v1367_v37  ;;  %v14254_v9 = vcombine.high %v1371_v55, %v1375_v56  ;;  %v1251_v0 = vld [vmem:[%s17189_s0 + $0x208] sm:$0xff] }
 0x2db   : > { %7704 = vmatpush1.bf16.msra.mxu1 %v14213_v8  ;;  %v1255_v11 = vld [vmem:[%s17189_s0 + $0x228] sm:$0xff] }
 0x2dc   : > { %7705 = vmatprep.subr.bf16.mxu1 %v14222_v54  ;;  %v14126_v54 = vcombine.high %v1243_v43, %v1247_v46  ;;  %v14134_v16 = vcombine.high %v1251_v0, %v1255_v11  ;;  %v1259_v20 = vld [vmem:[%s17189_s0 + $0x248] sm:$0xff] }
 0x2dd   : > { %7665 = vmatpush1.bf16.msra.mxu0 %v14093_v12  ;;  %v1379_v12 = vld [vmem:[%s17189_s0 + $0x608] sm:$0xff] }
 0x2de   : > { %7666 = vmatprep.subr.bf16.mxu0 %v14102_v14  ;;  %v14125_v14 = vcombine.low %v1243_v43, %v1247_v46  ;;  %v1263_v21 = vld [vmem:[%s17189_s0 + $0x268] sm:$0xff] }
 0x2df   : > { %7706 = vmatpush1.bf16.msra.mxu1 %v14221_v13  ;;  %v1383_v13 = vld [vmem:[%s17189_s0 + $0x628] sm:$0xff]  ;;  %v14142_v44 = vcombine.high %v1259_v20, %v1263_v21 }
 0x2e0   : > { %7707 = vmatprep.subr.bf16.mxu1 %v14230_v42  ;;  %v14253_v42 = vcombine.low %v1371_v55, %v1375_v56  ;;  %v14262_v17 = vcombine.high %v1379_v12, %v1383_v13  ;;  %v1267_v45 = vld [vmem:[%s17189_s0 + $0x288] sm:$0xff] }
 0x2e1   : > { %7667 = vmatpush1.bf16.msra.mxu0 %v14101_v24  ;;  %v7364_v39 = vpop.f32.mrb[0].mxu0  ;;  %v1387_v24 = vld [vmem:[%s17189_s0 + $0x648] sm:$0xff] }
 0x2e2   : > { %7668 = vmatprep.subr.bf16.mxu0 %v14110_v25  ;;  %v7366_v48 = vpop.f32.mrb[1].mxu0  ;;  %v14133_v25 = vcombine.low %v1251_v0, %v1255_v11  ;;  %v1271_v37 = vld [vmem:[%s17189_s0 + $0x2a8] sm:$0xff] }
 0x2e3   : > { %7708 = vmatpush1.bf16.msra.mxu1 %v14229_v36  ;;  %v7405_v47 = vpop.f32.mrb[0].mxu1  ;;  %v7368_v62 = vpop.f32.mrb[2].mxu0  ;;  %v1391_v36 = vld [vmem:[%s17189_s0 + $0x668] sm:$0xff]  ;;  %v14149_v56 = vcombine.low %v1267_v45, %v1271_v37 }
 0x2e4   : > { %7709 = vmatprep.subr.bf16.mxu1 %v14238_v32  ;;  %v17727_v40 = vadd.f32 %v7405_v47, %v7364_v39  ;;  %v7407_v57 = vpop.f32.mrb[1].mxu1  ;;  %v7369_v8 = vpop.f32.mrb[3].mxu0  ;;  %v14261_v32 = vcombine.low %v1379_v12, %v1383_v13  ;;  %v14270_v29 = vcombine.high %v1387_v24, %v1391_v36  ;;  %v14269_v39 = vcombine.low %v1387_v24, %v1391_v36  ;;  %v1275_v46 = vld [vmem:[%s17189_s0 + $0x2c8] sm:$0xff] }
 0x2e5   : > { %7669 = vmatpush1.bf16.msra.mxu0 %v14109_v49  ;;  %v17729_v2 = vadd.f32 %v7407_v57, %v7366_v48  ;;  %v7409_v3 = vpop.f32.mrb[2].mxu1  ;;  %v1395_v49 = vld [vmem:[%s17189_s0 + $0x688] sm:$0xff] }
 0x2e6   : > { %7670 = vmatprep.subr.bf16.mxu0 %v14118_v38  ;;  %v7410_v5 = vpop.f32.mrb[3].mxu1  ;;  %v14141_v38 = vcombine.low %v1259_v20, %v1263_v21  ;;  %v1279_v47 = vld [vmem:[%s17189_s0 + $0x2e8] sm:$0xff] }
 0x2e7   : > { %7710 = vmatpush1.bf16.msra.mxu1 %v14237_v35  ;;  %v1399_v35 = vld [vmem:[%s17189_s0 + $0x6a8] sm:$0xff]  ;;  %v14158_v62 = vcombine.high %v1275_v46, %v1279_v47  ;;  %v14157_v5 = vcombine.low %v1275_v46, %v1279_v47 }
 0x2e8   : > { %7711 = vmatprep.subr.bf16.mxu1 %v14246_v41  ;;  %v14150_v41 = vcombine.high %v1267_v45, %v1271_v37  ;;  %v14278_v43 = vcombine.high %v1395_v49, %v1399_v35  ;;  %v1403_v48 = vld [vmem:[%s17189_s0 + $0x6c8] sm:$0xff]  ;;  %v14277_v57 = vcombine.low %v1395_v49, %v1399_v35 }
 0x2e9   : > { %7671 = vmatpush1.bf16.msra.mxu0 %v14117_v1  ;;  %v1407_v55 = vld [vmem:[%s17189_s0 + $0x6e8] sm:$0xff] }
 0x2ea   : > { %7672 = vmatprep.subr.bf16.mxu0 %v14126_v54  ;;  %v14286_v1 = vcombine.high %v1403_v48, %v1407_v55  ;;  %v1283_v3 = vld [vmem:[%s17189_s0 + $0x308] sm:$0xff] }
 0x2eb   : > { %7712 = vmatpush1.bf16.msra.mxu1 %v14245_v53  ;;  %v1287_v8 = vld [vmem:[%s17189_s0 + $0x328] sm:$0xff] }
 0x2ec   : > { %7713 = vmatprep.subr.bf16.mxu1 %v14254_v9  ;;  %v1411_v53 = vld [vmem:[%s17189_s0 + $0x708] sm:$0xff]  ;;  %v14285_v9 = vcombine.low %v1403_v48, %v1407_v55  ;;  %v14166_v0 = vcombine.high %v1283_v3, %v1287_v8 }
 0x2ed   : > { %7673 = vmatpush1.bf16.msra.mxu0 %v14125_v14  ;;  %v1415_v54 = vld [vmem:[%s17189_s0 + $0x728] sm:$0xff] }
 0x2ee   : > { %7674 = vmatprep.subr.bf16.mxu0 %v14134_v16  ;;  %v14294_v11 = vcombine.high %v1411_v53, %v1415_v54  ;;  %v1291_v12 = vld [vmem:[%s17189_s0 + $0x348] sm:$0xff]  ;;  %v14165_v16 = vcombine.low %v1283_v3, %v1287_v8 }
 0x2ef   : > { %7714 = vmatpush1.bf16.msra.mxu1 %v14253_v42  ;;  %v1295_v13 = vld [vmem:[%s17189_s0 + $0x368] sm:$0xff] }
 0x2f0   : > { %7715 = vmatprep.subr.bf16.mxu1 %v14262_v17  ;;  %v1419_v14 = vld [vmem:[%s17189_s0 + $0x748] sm:$0xff]  ;;  %v14293_v17 = vcombine.low %v1411_v53, %v1415_v54  ;;  %v14174_v20 = vcombine.high %v1291_v12, %v1295_v13 }
 0x2f1   : > { %7675 = vmatpush1.bf16.msra.mxu0 %v14133_v25  ;;  %v1423_v42 = vld [vmem:[%s17189_s0 + $0x768] sm:$0xff] }
 0x2f2   : > { %7676 = vmatprep.subr.bf16.mxu0 %v14142_v44  ;;  %v14302_v21 = vcombine.high %v1419_v14, %v1423_v42  ;;  %v1299_v24 = vld [vmem:[%s17189_s0 + $0x388] sm:$0xff]  ;;  %v14173_v44 = vcombine.low %v1291_v12, %v1295_v13 }
 0x2f3   : > { %7716 = vmatpush1.bf16.msra.mxu1 %v14261_v32  ;;  %v1303_v36 = vld [vmem:[%s17189_s0 + $0x3a8] sm:$0xff] }
 0x2f4   : > { %7717 = vmatprep.subr.bf16.mxu1 %v14270_v29  ;;  %v1427_v25 = vld [vmem:[%s17189_s0 + $0x788] sm:$0xff]  ;;  %v14301_v29 = vcombine.low %v1419_v14, %v1423_v42  ;;  %v14182_v45 = vcombine.high %v1299_v24, %v1303_v36 }
 0x2f5   : > { %7677 = vmatpush1.bf16.msra.mxu0 %v14141_v38  ;;  %v1431_v32 = vld [vmem:[%s17189_s0 + $0x7a8] sm:$0xff] }
 0x2f6   : > { %7678 = vmatprep.subr.bf16.mxu0 %v14150_v41  ;;  %v14310_v37 = vcombine.high %v1427_v25, %v1431_v32  ;;  %v1307_v49 = vld [vmem:[%s17189_s0 + $0x3c8] sm:$0xff]  ;;  %v14181_v41 = vcombine.low %v1299_v24, %v1303_v36 }
 0x2f7   : > { %7718 = vmatpush1.bf16.msra.mxu1 %v14269_v39  ;;  %v1311_v35 = vld [vmem:[%s17189_s0 + $0x3e8] sm:$0xff] }
 0x2f8   : > { %7719 = vmatprep.subr.bf16.mxu1 %v14278_v43  ;;  %v1435_v38 = vld [vmem:[%s17189_s0 + $0x7c8] sm:$0xff]  ;;  %v14309_v43 = vcombine.low %v1427_v25, %v1431_v32  ;;  %v14190_v46 = vcombine.high %v1307_v49, %v1311_v35 }
 0x2f9   : > { %7679 = vmatpush1.bf16.msra.mxu0 %v14149_v56  ;;  %v1439_v39 = vld [vmem:[%s17189_s0 + $0x7e8] sm:$0xff] }
 0x2fa   : > { %7680 = vmatprep.subr.bf16.mxu0 %v14158_v62  ;;  %v14318_v47 = vcombine.high %v1435_v38, %v1439_v39  ;;  %v1443_v48 = vld [vmem:[%s17189_s0 + $0x808] sm:$0xff]  ;;  %v14189_v62 = vcombine.low %v1307_v49, %v1311_v35 }
 0x2fb   : > { %7720 = vmatpush1.bf16.msra.mxu1 %v14277_v57  ;;  %v1447_v55 = vld [vmem:[%s17189_s0 + $0x828] sm:$0xff] }
 0x2fc   : > { %7721 = vmatprep.subr.bf16.mxu1 %v14286_v1  ;;  %v1571_v56 = vld [vmem:[%s17189_s0 + $0xc08] sm:$0xff]  ;;  %v14317_v1 = vcombine.low %v1435_v38, %v1439_v39  ;;  %v14326_v3 = vcombine.high %v1443_v48, %v1447_v55 }
 0x2fd   : > { %7681 = vmatpush1.bf16.msra.mxu0 %v14157_v5  ;;  %v1575_v57 = vld [vmem:[%s17189_s0 + $0xc28] sm:$0xff] }
 0x2fe   : > { %7682 = vmatprep.subr.bf16.mxu0 %v14166_v0  ;;  %v14454_v8 = vcombine.high %v1571_v56, %v1575_v57  ;;  %v1451_v53 = vld [vmem:[%s17189_s0 + $0x848] sm:$0xff]  ;;  %v14325_v0 = vcombine.low %v1443_v48, %v1447_v55 }
 0x2ff   : > { %7722 = vmatpush1.bf16.msra.mxu1 %v14285_v9  ;;  %v1455_v54 = vld [vmem:[%s17189_s0 + $0x868] sm:$0xff] }
 0x300   : > { %7723 = vmatprep.subr.bf16.mxu1 %v14294_v11  ;;  %v1579_v5 = vld [vmem:[%s17189_s0 + $0xc48] sm:$0xff]  ;;  %v14453_v11 = vcombine.low %v1571_v56, %v1575_v57  ;;  %v14334_v12 = vcombine.high %v1451_v53, %v1455_v54 }
 0x301   : > { %7683 = vmatpush1.bf16.msra.mxu0 %v14165_v16  ;;  %v1583_v9 = vld [vmem:[%s17189_s0 + $0xc68] sm:$0xff] }
 0x302   : > { %7684 = vmatprep.subr.bf16.mxu0 %v14174_v20  ;;  %v14462_v13 = vcombine.high %v1579_v5, %v1583_v9  ;;  %v1459_v14 = vld [vmem:[%s17189_s0 + $0x888] sm:$0xff]  ;;  %v14333_v20 = vcombine.low %v1451_v53, %v1455_v54 }
 0x303   : > { %7724 = vmatpush1.bf16.msra.mxu1 %v14293_v17  ;;  %v1463_v42 = vld [vmem:[%s17189_s0 + $0x8a8] sm:$0xff] }
 0x304   : > { %7725 = vmatprep.subr.bf16.mxu1 %v14302_v21  ;;  %v1587_v16 = vld [vmem:[%s17189_s0 + $0xc88] sm:$0xff]  ;;  %v14461_v21 = vcombine.low %v1579_v5, %v1583_v9  ;;  %v14342_v24 = vcombine.high %v1459_v14, %v1463_v42 }
 0x305   : > { %7685 = vmatpush1.bf16.msra.mxu0 %v14173_v44  ;;  %v1591_v17 = vld [vmem:[%s17189_s0 + $0xca8] sm:$0xff] }
 0x306   : > { %7686 = vmatprep.subr.bf16.mxu0 %v14182_v45  ;;  %v14470_v36 = vcombine.high %v1587_v16, %v1591_v17  ;;  %v1467_v25 = vld [vmem:[%s17189_s0 + $0x8c8] sm:$0xff]  ;;  %v14341_v45 = vcombine.low %v1459_v14, %v1463_v42 }
 0x307   : > { %7726 = vmatpush1.bf16.msra.mxu1 %v14301_v29  ;;  %v1471_v32 = vld [vmem:[%s17189_s0 + $0x8e8] sm:$0xff] }
 0x308   : > { %7727 = vmatprep.subr.bf16.mxu1 %v14310_v37  ;;  %v1595_v44 = vld [vmem:[%s17189_s0 + $0xcc8] sm:$0xff]  ;;  %v14469_v37 = vcombine.low %v1587_v16, %v1591_v17  ;;  %v14350_v49 = vcombine.high %v1467_v25, %v1471_v32 }
 0x309   : > { %7687 = vmatpush1.bf16.msra.mxu0 %v14181_v41  ;;  %v1599_v29 = vld [vmem:[%s17189_s0 + $0xce8] sm:$0xff] }
 0x30a   : > { %7688 = vmatprep.subr.bf16.mxu0 %v14190_v46  ;;  %v14478_v35 = vcombine.high %v1595_v44, %v1599_v29  ;;  %v1475_v38 = vld [vmem:[%s17189_s0 + $0x908] sm:$0xff]  ;;  %v14349_v46 = vcombine.low %v1467_v25, %v1471_v32 }
 0x30b   : > { %7728 = vmatpush1.bf16.msra.mxu1 %v14309_v43  ;;  %v1479_v39 = vld [vmem:[%s17189_s0 + $0x928] sm:$0xff] }
 0x30c   : > { %7729 = vmatprep.subr.bf16.mxu1 %v14318_v47  ;;  %v1603_v41 = vld [vmem:[%s17189_s0 + $0xd08] sm:$0xff]  ;;  %v14477_v47 = vcombine.low %v1595_v44, %v1599_v29  ;;  %v14358_v48 = vcombine.high %v1475_v38, %v1479_v39 }
 0x30d   : > { %7689 = vmatpush1.bf16.msra.mxu0 %v14189_v62  ;;  %v1607_v43 = vld [vmem:[%s17189_s0 + $0xd28] sm:$0xff] }
 0x30e   : > { %7740 = vmatprep.subr.bf16.mxu0 %v14326_v3  ;;  %v14486_v55 = vcombine.high %v1603_v41, %v1607_v43  ;;  %v1483_v56 = vld [vmem:[%s17189_s0 + $0x948] sm:$0xff]  ;;  %v14357_v3 = vcombine.low %v1475_v38, %v1479_v39 }
 0x30f   : > { %7730 = vmatpush1.bf16.msra.mxu1 %v14317_v1  ;;  %v1487_v57 = vld [vmem:[%s17189_s0 + $0x968] sm:$0xff] }
 0x310   : > { %7781 = vmatprep.subr.bf16.mxu1 %v14454_v8  ;;  %7691 = vmatmul.mubr.bf16.vlgmr.msra.gmra.mrb[16].mxu0 %v17393_v18  ;;  %v1611_v62 = vld [vmem:[%s17189_s0 + $0xd48] sm:$0xff]  ;;  %v14485_v8 = vcombine.low %v1603_v41, %v1607_v43  ;;  %v14366_v53 = vcombine.high %v1483_v56, %v1487_v57 }
 0x311   : > { %7741 = vmatpush1.bf16.msra.mxu0 %v14325_v0  ;;  %7772 = vmatprep.mubr.bf16.mxu0 %v17401_v31  ;;  %v1615_v1 = vld [vmem:[%s17189_s0 + $0xd68] sm:$0xff] }
 0x312   : > { %7732 = vmatmul.mubr.bf16.vlgmr.msra.gmra.mrb[16].mxu1 %v17397_v22  ;;  %7742 = vmatprep.subr.bf16.mxu0 %v14334_v12  ;;  %v14494_v54 = vcombine.high %v1611_v62, %v1615_v1  ;;  %v1491_v5 = vld [vmem:[%s17189_s0 + $0x988] sm:$0xff]  ;;  %v14365_v12 = vcombine.low %v1483_v56, %v1487_v57 }
 0x313   : > { %7782 = vmatpush1.bf16.msra.mxu1 %v14453_v11  ;;  %7813 = vmatprep.mubr.bf16.mxu1 %v17406_v34  ;;  %v1495_v9 = vld [vmem:[%s17189_s0 + $0x9a8] sm:$0xff] }
 0x314   : > { %7783 = vmatprep.subr.bf16.mxu1 %v14462_v13  ;;  %v1619_v0 = vld [vmem:[%s17189_s0 + $0xd88] sm:$0xff]  ;;  %v14493_v13 = vcombine.low %v1611_v62, %v1615_v1  ;;  %v14374_v14 = vcombine.high %v1491_v5, %v1495_v9 }
 0x315   : > { %7743 = vmatpush1.bf16.msra.mxu0 %v14333_v20  ;;  %v1623_v11 = vld [vmem:[%s17189_s0 + $0xda8] sm:$0xff] }
 0x316   : > { %7744 = vmatprep.subr.bf16.mxu0 %v14342_v24  ;;  %v14502_v16 = vcombine.high %v1619_v0, %v1623_v11  ;;  %v1499_v17 = vld [vmem:[%s17189_s0 + $0x9c8] sm:$0xff] }
 0x317   : > { %7784 = vmatpush1.bf16.msra.mxu1 %v14461_v21  ;;  %v1503_v20 = vld [vmem:[%s17189_s0 + $0x9e8] sm:$0xff] }
 0x318   : > { %7785 = vmatprep.subr.bf16.mxu1 %v14470_v36  ;;  %v1627_v25 = vld [vmem:[%s17189_s0 + $0xdc8] sm:$0xff]  ;;  %v14382_v39 = vcombine.high %v1499_v17, %v1503_v20  ;;  %v14381_v56 = vcombine.low %v1499_v17, %v1503_v20 }
 0x319   : > { %7745 = vmatpush1.bf16.msra.mxu0 %v14341_v45  ;;  %v1631_v32 = vld [vmem:[%s17189_s0 + $0xde8] sm:$0xff] }
 0x31a   : > { %7746 = vmatprep.subr.bf16.mxu0 %v14350_v49  ;;  %v14510_v43 = vcombine.high %v1627_v25, %v1631_v32  ;;  %v14509_v57 = vcombine.low %v1627_v25, %v1631_v32  ;;  %v1659_v25 = vld [vmem:[%s17189_s0 + $0xec8] sm:$0xff] }
 0x31b   : > { %7786 = vmatpush1.bf16.msra.mxu1 %v14469_v37  ;;  %v14373_v37 = vcombine.low %v1491_v5, %v1495_v9  ;;  %v1663_v32 = vld [vmem:[%s17189_s0 + $0xee8] sm:$0xff] }
 0x31c   : > { %7787 = vmatprep.subr.bf16.mxu1 %v14478_v35 }
 0x31d   : > { %7747 = vmatpush1.bf16.msra.mxu0 %v14349_v46  ;;  %v1507_v46 = vld [vmem:[%s17189_s0 + $0xa08] sm:$0xff] }
 0x31e   : > { %7748 = vmatprep.subr.bf16.mxu0 %v14358_v48  ;;  %v1635_v48 = vld [vmem:[%s17189_s0 + $0xe08] sm:$0xff] }
 0x31f   : > { %7788 = vmatpush1.bf16.msra.mxu1 %v14477_v47  ;;  %v1511_v47 = vld [vmem:[%s17189_s0 + $0xa28] sm:$0xff] }
 0x320   : > { %7789 = vmatprep.subr.bf16.mxu1 %v14486_v55  ;;  %v1639_v55 = vld [vmem:[%s17189_s0 + $0xe28] sm:$0xff]  ;;  %v14390_v62 = vcombine.high %v1507_v46, %v1511_v47  ;;  %v14389_v5 = vcombine.low %v1507_v46, %v1511_v47 }
 0x321   : > { %7749 = vmatpush1.bf16.msra.mxu0 %v14357_v3  ;;  %v7446_v42 = vpop.f32.mrb[4].mxu0  ;;  %v14518_v1 = vcombine.high %v1635_v48, %v1639_v55  ;;  %v1515_v3 = vld [vmem:[%s17189_s0 + $0xa48] sm:$0xff]  ;;  %v14517_v9 = vcombine.low %v1635_v48, %v1639_v55 }
 0x322   : > { %7750 = vmatprep.subr.bf16.mxu0 %v14366_v53  ;;  %v7447_v21 = vadd.f32 %v7446_v42, %v17727_v40  ;;  %v7448_v36 = vpop.f32.mrb[5].mxu0  ;;  %v14501_v40 = vcombine.low %v1619_v0, %v1623_v11  ;;  %v1643_v53 = vld [vmem:[%s17189_s0 + $0xe48] sm:$0xff] }
 0x323   : > { %7790 = vmatpush1.bf16.msra.mxu1 %v14485_v8  ;;  %v7487_v24 = vpop.f32.mrb[4].mxu1  ;;  %v7449_v44 = vadd.f32 %v7448_v36, %v17729_v2  ;;  %v7450_v45 = vpop.f32.mrb[6].mxu0  ;;  %v1519_v8 = vld [vmem:[%s17189_s0 + $0xa68] sm:$0xff] }
 0x324   : > { %7791 = vmatprep.subr.bf16.mxu1 %v14494_v54  ;;  %v7489_v29 = vpop.f32.mrb[5].mxu1  ;;  %v17801_v49 = vadd.f32 %v7487_v24, %v7447_v21  ;;  %v7451_v38 = vpop.f32.mrb[7].mxu0  ;;  %v1647_v54 = vld [vmem:[%s17189_s0 + $0xe68] sm:$0xff]  ;;  %v14398_v0 = vcombine.high %v1515_v3, %v1519_v8 }
 0x325   : > { %7751 = vmatpush1.bf16.msra.mxu0 %v14365_v12  ;;  %v7491_v35 = vpop.f32.mrb[6].mxu1  ;;  %v17803_v41 = vadd.f32 %v7489_v29, %v7449_v44  ;;  %v14526_v11 = vcombine.high %v1643_v53, %v1647_v54  ;;  %v1523_v12 = vld [vmem:[%s17189_s0 + $0xa88] sm:$0xff]  ;;  %v14525_v17 = vcombine.low %v1643_v53, %v1647_v54 }
 0x326   : > { %7752 = vmatprep.subr.bf16.mxu0 %v14374_v14  ;;  %v7492_v2 = vpop.f32.mrb[7].mxu1  ;;  %v1651_v14 = vld [vmem:[%s17189_s0 + $0xe88] sm:$0xff] }
 0x327   : > { %7792 = vmatpush1.bf16.msra.mxu1 %v14493_v13  ;;  %v1527_v13 = vld [vmem:[%s17189_s0 + $0xaa8] sm:$0xff] }
 0x328   : > { %7793 = vmatprep.subr.bf16.mxu1 %v14502_v16  ;;  %v1655_v42 = vld [vmem:[%s17189_s0 + $0xea8] sm:$0xff]  ;;  %v14397_v16 = vcombine.low %v1515_v3, %v1519_v8  ;;  %v14406_v20 = vcombine.high %v1523_v12, %v1527_v13  ;;  %v14405_v44 = vcombine.low %v1523_v12, %v1527_v13 }
 0x329   : > { %7753 = vmatpush1.bf16.msra.mxu0 %v14373_v37  ;;  %v14534_v21 = vcombine.high %v1651_v14, %v1655_v42  ;;  %v1531_v24 = vld [vmem:[%s17189_s0 + $0xac8] sm:$0xff]  ;;  %v14533_v29 = vcombine.low %v1651_v14, %v1655_v42  ;;  %v14542_v37 = vcombine.high %v1659_v25, %v1663_v32 }
 0x32a   : > { %7754 = vmatprep.subr.bf16.mxu0 %v14382_v39  ;;  %v1535_v36 = vld [vmem:[%s17189_s0 + $0xae8] sm:$0xff] }
 0x32b   : > { %7794 = vmatpush1.bf16.msra.mxu1 %v14501_v40  ;;  %v14414_v45 = vcombine.high %v1531_v24, %v1535_v36  ;;  %v1539_v35 = vld [vmem:[%s17189_s0 + $0xb08] sm:$0xff]  ;;  %v14413_v2 = vcombine.low %v1531_v24, %v1535_v36 }
 0x32c   : > { %7795 = vmatprep.subr.bf16.mxu1 %v14510_v43  ;;  %v1543_v38 = vld [vmem:[%s17189_s0 + $0xb28] sm:$0xff]  ;;  %v14541_v43 = vcombine.low %v1659_v25, %v1663_v32 }
 0x32d   : > { %7755 = vmatpush1.bf16.msra.mxu0 %v14381_v56  ;;  %v1667_v40 = vld [vmem:[%s17189_s0 + $0xf08] sm:$0xff]  ;;  %v14422_v46 = vcombine.high %v1539_v35, %v1543_v38 }
 0x32e   : > { %7756 = vmatprep.subr.bf16.mxu0 %v14390_v62  ;;  %v1671_v39 = vld [vmem:[%s17189_s0 + $0xf28] sm:$0xff]  ;;  %v14421_v62 = vcombine.low %v1539_v35, %v1543_v38 }
 0x32f   : > { %7796 = vmatpush1.bf16.msra.mxu1 %v14509_v57  ;;  %v14550_v47 = vcombine.high %v1667_v40, %v1671_v39  ;;  %v1547_v48 = vld [vmem:[%s17189_s0 + $0xb48] sm:$0xff] }
 0x330   : > { %7797 = vmatprep.subr.bf16.mxu1 %v14518_v1  ;;  %v1551_v55 = vld [vmem:[%s17189_s0 + $0xb68] sm:$0xff]  ;;  %v14549_v1 = vcombine.low %v1667_v40, %v1671_v39 }
 0x331   : > { %7757 = vmatpush1.bf16.msra.mxu0 %v14389_v5  ;;  %v1675_v56 = vld [vmem:[%s17189_s0 + $0xf48] sm:$0xff]  ;;  %v14430_v3 = vcombine.high %v1547_v48, %v1551_v55 }
 0x332   : > { %7758 = vmatprep.subr.bf16.mxu0 %v14398_v0  ;;  %v1679_v57 = vld [vmem:[%s17189_s0 + $0xf68] sm:$0xff]  ;;  %v14429_v0 = vcombine.low %v1547_v48, %v1551_v55 }
 0x333   : > { %7798 = vmatpush1.bf16.msra.mxu1 %v14517_v9  ;;  %v14558_v8 = vcombine.high %v1675_v56, %v1679_v57  ;;  %v1555_v53 = vld [vmem:[%s17189_s0 + $0xb88] sm:$0xff] }
 0x334   : > { %7799 = vmatprep.subr.bf16.mxu1 %v14526_v11  ;;  %v1559_v54 = vld [vmem:[%s17189_s0 + $0xba8] sm:$0xff]  ;;  %v14557_v11 = vcombine.low %v1675_v56, %v1679_v57 }
 0x335   : > { %7759 = vmatpush1.bf16.msra.mxu0 %v14397_v16  ;;  %v1683_v5 = vld [vmem:[%s17189_s0 + $0xf88] sm:$0xff]  ;;  %v14438_v12 = vcombine.high %v1555_v53, %v1559_v54 }
 0x336   : > { %7760 = vmatprep.subr.bf16.mxu0 %v14406_v20  ;;  %v1687_v9 = vld [vmem:[%s17189_s0 + $0xfa8] sm:$0xff]  ;;  %v14437_v20 = vcombine.low %v1555_v53, %v1559_v54 }
 0x337   : > { %7800 = vmatpush1.bf16.msra.mxu1 %v14525_v17  ;;  %v14566_v13 = vcombine.high %v1683_v5, %v1687_v9  ;;  %v1563_v14 = vld [vmem:[%s17189_s0 + $0xbc8] sm:$0xff] }
 0x338   : > { %7801 = vmatprep.subr.bf16.mxu1 %v14534_v21  ;;  %v1567_v42 = vld [vmem:[%s17189_s0 + $0xbe8] sm:$0xff]  ;;  %v14565_v21 = vcombine.low %v1683_v5, %v1687_v9 }
 0x339   : > { %7761 = vmatpush1.bf16.msra.mxu0 %v14405_v44  ;;  %v1691_v16 = vld [vmem:[%s17189_s0 + $0xfc8] sm:$0xff]  ;;  %v14446_v24 = vcombine.high %v1563_v14, %v1567_v42 }
 0x33a   : > { %7762 = vmatprep.subr.bf16.mxu0 %v14414_v45  ;;  %v1695_v17 = vld [vmem:[%s17189_s0 + $0xfe8] sm:$0xff]  ;;  %v14445_v45 = vcombine.low %v1563_v14, %v1567_v42 }
 0x33b   : > { %7802 = vmatpush1.bf16.msra.mxu1 %v14533_v29  ;;  %v14574_v36 = vcombine.high %v1691_v16, %v1695_v17  ;;  %v1699_v25 = vld [vmem:[%s17189_s0 + $0x1008] sm:$0xff] }
 0x33c   : > { %7803 = vmatprep.subr.bf16.mxu1 %v14542_v37  ;;  %v1703_v32 = vld [vmem:[%s17189_s0 + $0x1028] sm:$0xff]  ;;  %v14573_v37 = vcombine.low %v1691_v16, %v1695_v17 }
 0x33d   : > { %7763 = vmatpush1.bf16.msra.mxu0 %v14413_v2  ;;  %v1827_v44 = vld [vmem:[%s17189_s0 + $0x1408] sm:$0xff]  ;;  %v14582_v35 = vcombine.high %v1699_v25, %v1703_v32 }
 0x33e   : > { %7764 = vmatprep.subr.bf16.mxu0 %v14422_v46  ;;  %v1831_v29 = vld [vmem:[%s17189_s0 + $0x1428] sm:$0xff]  ;;  %v14581_v46 = vcombine.low %v1699_v25, %v1703_v32 }
 0x33f   : > { %7804 = vmatpush1.bf16.msra.mxu1 %v14541_v43  ;;  %v14710_v38 = vcombine.high %v1827_v44, %v1831_v29  ;;  %v1707_v40 = vld [vmem:[%s17189_s0 + $0x1048] sm:$0xff] }
 0x340   : > { %7805 = vmatprep.subr.bf16.mxu1 %v14550_v47  ;;  %v1711_v39 = vld [vmem:[%s17189_s0 + $0x1068] sm:$0xff]  ;;  %v14709_v47 = vcombine.low %v1827_v44, %v1831_v29 }
 0x341   : > { %7765 = vmatpush1.bf16.msra.mxu0 %v14421_v62  ;;  %v1835_v2 = vld [vmem:[%s17189_s0 + $0x1448] sm:$0xff]  ;;  %v14590_v48 = vcombine.high %v1707_v40, %v1711_v39 }
 0x342   : > { %7766 = vmatprep.subr.bf16.mxu0 %v14430_v3  ;;  %v1839_v43 = vld [vmem:[%s17189_s0 + $0x1468] sm:$0xff]  ;;  %v14589_v3 = vcombine.low %v1707_v40, %v1711_v39 }
 0x343   : > { %7806 = vmatpush1.bf16.msra.mxu1 %v14549_v1  ;;  %v14718_v55 = vcombine.high %v1835_v2, %v1839_v43  ;;  %v1715_v56 = vld [vmem:[%s17189_s0 + $0x1088] sm:$0xff] }
 0x344   : > { %7807 = vmatprep.subr.bf16.mxu1 %v14558_v8  ;;  %v1719_v57 = vld [vmem:[%s17189_s0 + $0x10a8] sm:$0xff]  ;;  %v14717_v8 = vcombine.low %v1835_v2, %v1839_v43 }
 0x345   : > { %7767 = vmatpush1.bf16.msra.mxu0 %v14429_v0  ;;  %v1843_v62 = vld [vmem:[%s17189_s0 + $0x1488] sm:$0xff]  ;;  %v14598_v53 = vcombine.high %v1715_v56, %v1719_v57 }
 0x346   : > { %7768 = vmatprep.subr.bf16.mxu0 %v14438_v12  ;;  %v1847_v1 = vld [vmem:[%s17189_s0 + $0x14a8] sm:$0xff]  ;;  %v14597_v12 = vcombine.low %v1715_v56, %v1719_v57 }
 0x347   : > { %7808 = vmatpush1.bf16.msra.mxu1 %v14557_v11  ;;  %v14726_v54 = vcombine.high %v1843_v62, %v1847_v1  ;;  %v1723_v5 = vld [vmem:[%s17189_s0 + $0x10c8] sm:$0xff] }
 0x348   : > { %7809 = vmatprep.subr.bf16.mxu1 %v14566_v13  ;;  %v1727_v9 = vld [vmem:[%s17189_s0 + $0x10e8] sm:$0xff]  ;;  %v14725_v13 = vcombine.low %v1843_v62, %v1847_v1 }
 0x349   : > { %7769 = vmatpush1.bf16.msra.mxu0 %v14437_v20  ;;  %v1851_v0 = vld [vmem:[%s17189_s0 + $0x14c8] sm:$0xff]  ;;  %v14606_v14 = vcombine.high %v1723_v5, %v1727_v9 }
 0x34a   : > { %7770 = vmatprep.subr.bf16.mxu0 %v14446_v24  ;;  %v1855_v11 = vld [vmem:[%s17189_s0 + $0x14e8] sm:$0xff]  ;;  %v14605_v24 = vcombine.low %v1723_v5, %v1727_v9 }
 0x34b   : > { %7810 = vmatpush1.bf16.msra.mxu1 %v14565_v21  ;;  %v14734_v42 = vcombine.high %v1851_v0, %v1855_v11  ;;  %v1731_v16 = vld [vmem:[%s17189_s0 + $0x1108] sm:$0xff] }
 0x34c   : > { %7811 = vmatprep.subr.bf16.mxu1 %v14574_v36  ;;  %v1735_v17 = vld [vmem:[%s17189_s0 + $0x1128] sm:$0xff]  ;;  %v14733_v36 = vcombine.low %v1851_v0, %v1855_v11 }
 0x34d   : > { %7771 = vmatpush1.bf16.msra.mxu0 %v14445_v45  ;;  %v1859_v20 = vld [vmem:[%s17189_s0 + $0x1508] sm:$0xff]  ;;  %v14614_v25 = vcombine.high %v1731_v16, %v1735_v17 }
 0x34e   : > { %7822 = vmatprep.subr.bf16.mxu0 %v14582_v35  ;;  %v1863_v21 = vld [vmem:[%s17189_s0 + $0x1528] sm:$0xff]  ;;  %v14613_v35 = vcombine.low %v1731_v16, %v1735_v17 }
 0x34f   : > { %7812 = vmatpush1.bf16.msra.mxu1 %v14573_v37  ;;  %v14742_v32 = vcombine.high %v1859_v20, %v1863_v21  ;;  %v1739_v44 = vld [vmem:[%s17189_s0 + $0x1148] sm:$0xff] }
 0x350   : > { %7863 = vmatprep.subr.bf16.mxu1 %v14710_v38  ;;  %7773 = vmatmul.mubr.bf16.vlgmr.msra.gmra.mrb[20].mxu0 %v17523_v60  ;;  %v1743_v29 = vld [vmem:[%s17189_s0 + $0x1168] sm:$0xff]  ;;  %v14741_v38 = vcombine.low %v1859_v20, %v1863_v21 }
 0x351   : > { %7823 = vmatpush1.bf16.msra.mxu0 %v14581_v46  ;;  %7854 = vmatprep.mubr.bf16.mxu0 %v17535_v4  ;;  %v1867_v45 = vld [vmem:[%s17189_s0 + $0x1548] sm:$0xff]  ;;  %v14622_v40 = vcombine.high %v1739_v44, %v1743_v29 }
 0x352   : > { %7814 = vmatmul.mubr.bf16.vlgmr.msra.gmra.mrb[20].mxu1 %v17529_v50  ;;  %7824 = vmatprep.subr.bf16.mxu0 %v14590_v48  ;;  %v1871_v37 = vld [vmem:[%s17189_s0 + $0x1568] sm:$0xff]  ;;  %v14621_v48 = vcombine.low %v1739_v44, %v1743_v29 }
 0x353   : > { %7864 = vmatpush1.bf16.msra.mxu1 %v14709_v47  ;;  %7895 = vmatprep.mubr.bf16.mxu1 %v17540_v10  ;;  %v14750_v39 = vcombine.high %v1867_v45, %v1871_v37  ;;  %v1747_v2 = vld [vmem:[%s17189_s0 + $0x1188] sm:$0xff] }
 0x354   : > { %7865 = vmatprep.subr.bf16.mxu1 %v14718_v55  ;;  %v1751_v43 = vld [vmem:[%s17189_s0 + $0x11a8] sm:$0xff]  ;;  %v14749_v55 = vcombine.low %v1867_v45, %v1871_v37 }
 0x355   : > { %7825 = vmatpush1.bf16.msra.mxu0 %v14589_v3  ;;  %v1875_v46 = vld [vmem:[%s17189_s0 + $0x1588] sm:$0xff]  ;;  %v14630_v56 = vcombine.high %v1747_v2, %v1751_v43 }
 0x356   : > { %7826 = vmatprep.subr.bf16.mxu0 %v14598_v53  ;;  %v1879_v47 = vld [vmem:[%s17189_s0 + $0x15a8] sm:$0xff] }
 0x357   : > { %7866 = vmatpush1.bf16.msra.mxu1 %v14717_v8  ;;  %v14758_v62 = vcombine.high %v1875_v46, %v1879_v47  ;;  %v1755_v1 = vld [vmem:[%s17189_s0 + $0x11c8] sm:$0xff] }
 0x358   : > { %7867 = vmatprep.subr.bf16.mxu1 %v14726_v54  ;;  %v1759_v3 = vld [vmem:[%s17189_s0 + $0x11e8] sm:$0xff] }
 0x359   : > { %7827 = vmatpush1.bf16.msra.mxu0 %v14597_v12  ;;  %v1883_v5 = vld [vmem:[%s17189_s0 + $0x15c8] sm:$0xff]  ;;  %v14638_v17 = vcombine.high %v1755_v1, %v1759_v3  ;;  %v14637_v44 = vcombine.low %v1755_v1, %v1759_v3 }
 0x35a   : > { %7828 = vmatprep.subr.bf16.mxu0 %v14606_v14  ;;  %v1887_v9 = vld [vmem:[%s17189_s0 + $0x15e8] sm:$0xff] }
 0x35b   : > { %7868 = vmatpush1.bf16.msra.mxu1 %v14725_v13  ;;  %v14629_v13 = vcombine.low %v1747_v2, %v1751_v43  ;;  %v14766_v21 = vcombine.high %v1883_v5, %v1887_v9  ;;  %v14765_v29 = vcombine.low %v1883_v5, %v1887_v9  ;;  %v1915_v5 = vld [vmem:[%s17189_s0 + $0x16c8] sm:$0xff] }
 0x35c   : > { %7869 = vmatprep.subr.bf16.mxu1 %v14734_v42  ;;  %v1919_v9 = vld [vmem:[%s17189_s0 + $0x16e8] sm:$0xff] }
 0x35d   : > { %7829 = vmatpush1.bf16.msra.mxu0 %v14605_v24  ;;  %v1763_v24 = vld [vmem:[%s17189_s0 + $0x1208] sm:$0xff] }
 0x35e   : > { %7830 = vmatprep.subr.bf16.mxu0 %v14614_v25  ;;  %v1891_v25 = vld [vmem:[%s17189_s0 + $0x1608] sm:$0xff] }
 0x35f   : > { %7870 = vmatpush1.bf16.msra.mxu1 %v14733_v36  ;;  %v1767_v36 = vld [vmem:[%s17189_s0 + $0x1228] sm:$0xff] }
 0x360   : > { %7871 = vmatprep.subr.bf16.mxu1 %v14742_v32  ;;  %v1895_v32 = vld [vmem:[%s17189_s0 + $0x1628] sm:$0xff]  ;;  %v14646_v45 = vcombine.high %v1763_v24, %v1767_v36  ;;  %v14645_v2 = vcombine.low %v1763_v24, %v1767_v36 }
 0x361   : > { %7831 = vmatpush1.bf16.msra.mxu0 %v14613_v35  ;;  %v14774_v37 = vcombine.high %v1891_v25, %v1895_v32  ;;  %v1771_v35 = vld [vmem:[%s17189_s0 + $0x1248] sm:$0xff]  ;;  %v14773_v43 = vcombine.low %v1891_v25, %v1895_v32 }
 0x362   : > { %7832 = vmatprep.subr.bf16.mxu0 %v14622_v40  ;;  %v1899_v40 = vld [vmem:[%s17189_s0 + $0x1648] sm:$0xff] }
 0x363   : > { %7872 = vmatpush1.bf16.msra.mxu1 %v14741_v38  ;;  %v7528_v57 = vpop.f32.mrb[8].mxu0  ;;  %v1775_v38 = vld [vmem:[%s17189_s0 + $0x1268] sm:$0xff] }
 0x364   : > { %7873 = vmatprep.subr.bf16.mxu1 %v14750_v39  ;;  %v7529_v8 = vadd.f32 %v7528_v57, %v17801_v49  ;;  %v7530_v54 = vpop.f32.mrb[9].mxu0  ;;  %v14757_v49 = vcombine.low %v1875_v46, %v1879_v47  ;;  %v1903_v39 = vld [vmem:[%s17189_s0 + $0x1668] sm:$0xff]  ;;  %v14654_v46 = vcombine.high %v1771_v35, %v1775_v38 }
 0x365   : > { %v7569_v53 = vpop.f32.mrb[8].mxu1  ;;  %v7531_v0 = vadd.f32 %v7530_v54, %v17803_v41  ;;  %v7532_v12 = vpop.f32.mrb[10].mxu0  ;;  %7833 = vmatpush1.bf16.msra.mxu0 %v14621_v48  ;;  %v14782_v47 = vcombine.high %v1899_v40, %v1903_v39  ;;  %v1779_v48 = vld [vmem:[%s17189_s0 + $0x1288] sm:$0xff]  ;;  %v14781_v1 = vcombine.low %v1899_v40, %v1903_v39 }
 0x366   : > { %v7571_v11 = vpop.f32.mrb[9].mxu1  ;;  %v17875_v14 = vadd.f32 %v7569_v53, %v7529_v8  ;;  %v7533_v16 = vpop.f32.mrb[11].mxu0  ;;  %7834 = vmatprep.subr.bf16.mxu0 %v14630_v56  ;;  %v1907_v56 = vld [vmem:[%s17189_s0 + $0x1688] sm:$0xff] }
 0x367   : > { %v7573_v42 = vpop.f32.mrb[10].mxu1  ;;  %7874 = vmatpush1.bf16.msra.mxu1 %v14749_v55  ;;  %v17877_v20 = vadd.f32 %v7571_v11, %v7531_v0  ;;  %v1783_v55 = vld [vmem:[%s17189_s0 + $0x12a8] sm:$0xff] }
 0x368   : > { %v7574_v41 = vpop.f32.mrb[11].mxu1  ;;  %7875 = vmatprep.subr.bf16.mxu1 %v14758_v62  ;;  %v1911_v57 = vld [vmem:[%s17189_s0 + $0x16a8] sm:$0xff]  ;;  %v14653_v62 = vcombine.low %v1771_v35, %v1775_v38  ;;  %v14662_v3 = vcombine.high %v1779_v48, %v1783_v55  ;;  %v14661_v0 = vcombine.low %v1779_v48, %v1783_v55 }
 0x369   : > { %7835 = vmatpush1.bf16.msra.mxu0 %v14629_v13  ;;  %v14790_v8 = vcombine.high %v1907_v56, %v1911_v57  ;;  %v1787_v53 = vld [vmem:[%s17189_s0 + $0x12c8] sm:$0xff]  ;;  %v14789_v11 = vcombine.low %v1907_v56, %v1911_v57  ;;  %v14798_v13 = vcombine.high %v1915_v5, %v1919_v9 }
 0x36a   : > { %7836 = vmatprep.subr.bf16.mxu0 %v14638_v17  ;;  %v1791_v54 = vld [vmem:[%s17189_s0 + $0x12e8] sm:$0xff] }
 0x36b   : > { %7876 = vmatpush1.bf16.msra.mxu1 %v14757_v49  ;;  %v14670_v12 = vcombine.high %v1787_v53, %v1791_v54  ;;  %v1795_v42 = vld [vmem:[%s17189_s0 + $0x1308] sm:$0xff]  ;;  %v14669_v41 = vcombine.low %v1787_v53, %v1791_v54 }
 0x36c   : > { %7877 = vmatprep.subr.bf16.mxu1 %v14766_v21  ;;  %v1799_v16 = vld [vmem:[%s17189_s0 + $0x1328] sm:$0xff]  ;;  %v14797_v21 = vcombine.low %v1915_v5, %v1919_v9 }
 0x36d   : > { %7837 = vmatpush1.bf16.msra.mxu0 %v14637_v44  ;;  %v1923_v49 = vld [vmem:[%s17189_s0 + $0x1708] sm:$0xff]  ;;  %v14678_v24 = vcombine.high %v1795_v42, %v1799_v16 }
 0x36e   : > { %7838 = vmatprep.subr.bf16.mxu0 %v14646_v45  ;;  %v1927_v17 = vld [vmem:[%s17189_s0 + $0x1728] sm:$0xff]  ;;  %v14677_v45 = vcombine.low %v1795_v42, %v1799_v16 }
 0x36f   : > { %7878 = vmatpush1.bf16.msra.mxu1 %v14765_v29  ;;  %v14806_v36 = vcombine.high %v1923_v49, %v1927_v17  ;;  %v1803_v25 = vld [vmem:[%s17189_s0 + $0x1348] sm:$0xff] }
 0x370   : > { %7879 = vmatprep.subr.bf16.mxu1 %v14774_v37  ;;  %v1807_v32 = vld [vmem:[%s17189_s0 + $0x1368] sm:$0xff]  ;;  %v14805_v37 = vcombine.low %v1923_v49, %v1927_v17 }
 0x371   : > { %7839 = vmatpush1.bf16.msra.mxu0 %v14645_v2  ;;  %v1931_v44 = vld [vmem:[%s17189_s0 + $0x1748] sm:$0xff]  ;;  %v14686_v35 = vcombine.high %v1803_v25, %v1807_v32 }
 0x372   : > { %7840 = vmatprep.subr.bf16.mxu0 %v14654_v46  ;;  %v1935_v29 = vld [vmem:[%s17189_s0 + $0x1768] sm:$0xff]  ;;  %v14685_v46 = vcombine.low %v1803_v25, %v1807_v32 }
 0x373   : > { %7880 = vmatpush1.bf16.msra.mxu1 %v14773_v43  ;;  %v14814_v38 = vcombine.high %v1931_v44, %v1935_v29  ;;  %v1811_v40 = vld [vmem:[%s17189_s0 + $0x1388] sm:$0xff] }
 0x374   : > { %7881 = vmatprep.subr.bf16.mxu1 %v14782_v47  ;;  %v1815_v39 = vld [vmem:[%s17189_s0 + $0x13a8] sm:$0xff]  ;;  %v14813_v47 = vcombine.low %v1931_v44, %v1935_v29 }
 0x375   : > { %7841 = vmatpush1.bf16.msra.mxu0 %v14653_v62  ;;  %v1939_v2 = vld [vmem:[%s17189_s0 + $0x1788] sm:$0xff]  ;;  %v14694_v48 = vcombine.high %v1811_v40, %v1815_v39 }
 0x376   : > { %7842 = vmatprep.subr.bf16.mxu0 %v14662_v3  ;;  %v1943_v43 = vld [vmem:[%s17189_s0 + $0x17a8] sm:$0xff]  ;;  %v14693_v3 = vcombine.low %v1811_v40, %v1815_v39 }
 0x377   : > { %7882 = vmatpush1.bf16.msra.mxu1 %v14781_v1  ;;  %v14822_v55 = vcombine.high %v1939_v2, %v1943_v43  ;;  %v1819_v56 = vld [vmem:[%s17189_s0 + $0x13c8] sm:$0xff] }
 0x378   : > { %7883 = vmatprep.subr.bf16.mxu1 %v14790_v8  ;;  %v1823_v57 = vld [vmem:[%s17189_s0 + $0x13e8] sm:$0xff]  ;;  %v14821_v8 = vcombine.low %v1939_v2, %v1943_v43 }
 0x379   : > { %7843 = vmatpush1.bf16.msra.mxu0 %v14661_v0  ;;  %v1947_v62 = vld [vmem:[%s17189_s0 + $0x17c8] sm:$0xff]  ;;  %v14702_v53 = vcombine.high %v1819_v56, %v1823_v57 }
 0x37a   : > { %7844 = vmatprep.subr.bf16.mxu0 %v14670_v12  ;;  %v1951_v1 = vld [vmem:[%s17189_s0 + $0x17e8] sm:$0xff]  ;;  %v14701_v12 = vcombine.low %v1819_v56, %v1823_v57 }
 0x37b   : > { %7884 = vmatpush1.bf16.msra.mxu1 %v14789_v11  ;;  %v14830_v54 = vcombine.high %v1947_v62, %v1951_v1  ;;  %v1955_v5 = vld [vmem:[%s17189_s0 + $0x1808] sm:$0xff] }
 0x37c   : > { %7885 = vmatprep.subr.bf16.mxu1 %v14798_v13  ;;  %v1959_v9 = vld [vmem:[%s17189_s0 + $0x1828] sm:$0xff]  ;;  %v14829_v13 = vcombine.low %v1947_v62, %v1951_v1 }
 0x37d   : > { %7845 = vmatpush1.bf16.msra.mxu0 %v14669_v41  ;;  %v2083_v0 = vld [vmem:[%s17189_s0 + $0x1c08] sm:$0xff]  ;;  %v14838_v42 = vcombine.high %v1955_v5, %v1959_v9 }
 0x37e   : > { %7846 = vmatprep.subr.bf16.mxu0 %v14678_v24  ;;  %v2087_v11 = vld [vmem:[%s17189_s0 + $0x1c28] sm:$0xff]  ;;  %v14837_v24 = vcombine.low %v1955_v5, %v1959_v9 }
 0x37f   : > { %7886 = vmatpush1.bf16.msra.mxu1 %v14797_v21  ;;  %v14966_v16 = vcombine.high %v2083_v0, %v2087_v11  ;;  %v1963_v49 = vld [vmem:[%s17189_s0 + $0x1848] sm:$0xff] }
 0x380   : > { %7887 = vmatprep.subr.bf16.mxu1 %v14806_v36  ;;  %v1967_v17 = vld [vmem:[%s17189_s0 + $0x1868] sm:$0xff]  ;;  %v14965_v36 = vcombine.low %v2083_v0, %v2087_v11 }
 0x381   : > { %7847 = vmatpush1.bf16.msra.mxu0 %v14677_v45  ;;  %v2091_v41 = vld [vmem:[%s17189_s0 + $0x1c48] sm:$0xff]  ;;  %v14846_v25 = vcombine.high %v1963_v49, %v1967_v17 }
 0x382   : > { %7848 = vmatprep.subr.bf16.mxu0 %v14686_v35  ;;  %v2095_v21 = vld [vmem:[%s17189_s0 + $0x1c68] sm:$0xff]  ;;  %v14845_v35 = vcombine.low %v1963_v49, %v1967_v17 }
 0x383   : > { %7888 = vmatpush1.bf16.msra.mxu1 %v14805_v37  ;;  %v14974_v32 = vcombine.high %v2091_v41, %v2095_v21  ;;  %v1971_v44 = vld [vmem:[%s17189_s0 + $0x1888] sm:$0xff] }
 0x384   : > { %7889 = vmatprep.subr.bf16.mxu1 %v14814_v38  ;;  %v1975_v29 = vld [vmem:[%s17189_s0 + $0x18a8] sm:$0xff]  ;;  %v14973_v38 = vcombine.low %v2091_v41, %v2095_v21 }
 0x385   : > { %7849 = vmatpush1.bf16.msra.mxu0 %v14685_v46  ;;  %v2099_v45 = vld [vmem:[%s17189_s0 + $0x1c88] sm:$0xff]  ;;  %v14854_v40 = vcombine.high %v1971_v44, %v1975_v29 }
 0x386   : > { %7850 = vmatprep.subr.bf16.mxu0 %v14694_v48  ;;  %v2103_v37 = vld [vmem:[%s17189_s0 + $0x1ca8] sm:$0xff]  ;;  %v14853_v48 = vcombine.low %v1971_v44, %v1975_v29 }
 0x387   : > { %7890 = vmatpush1.bf16.msra.mxu1 %v14813_v47  ;;  %v14982_v39 = vcombine.high %v2099_v45, %v2103_v37  ;;  %v1979_v2 = vld [vmem:[%s17189_s0 + $0x18c8] sm:$0xff] }
 0x388   : > { %7891 = vmatprep.subr.bf16.mxu1 %v14822_v55  ;;  %v1983_v43 = vld [vmem:[%s17189_s0 + $0x18e8] sm:$0xff]  ;;  %v14981_v55 = vcombine.low %v2099_v45, %v2103_v37 }
 0x389   : > { %7851 = vmatpush1.bf16.msra.mxu0 %v14693_v3  ;;  %v2107_v46 = vld [vmem:[%s17189_s0 + $0x1cc8] sm:$0xff]  ;;  %v14862_v56 = vcombine.high %v1979_v2, %v1983_v43 }
 0x38a   : > { %7852 = vmatprep.subr.bf16.mxu0 %v14702_v53  ;;  %v2111_v47 = vld [vmem:[%s17189_s0 + $0x1ce8] sm:$0xff]  ;;  %v14861_v53 = vcombine.low %v1979_v2, %v1983_v43 }
 0x38b   : > { %7892 = vmatpush1.bf16.msra.mxu1 %v14821_v8  ;;  %v14990_v57 = vcombine.high %v2107_v46, %v2111_v47  ;;  %v1987_v62 = vld [vmem:[%s17189_s0 + $0x1908] sm:$0xff] }
 0x38c   : > { %7893 = vmatprep.subr.bf16.mxu1 %v14830_v54  ;;  %v1991_v1 = vld [vmem:[%s17189_s0 + $0x1928] sm:$0xff]  ;;  %v14989_v54 = vcombine.low %v2107_v46, %v2111_v47  ;;  %v1162_v46 = vld [vmem:[#allocation2] sm:$0xff] }
 0x38d   : > { %7853 = vmatpush1.bf16.msra.mxu0 %v14701_v12  ;;  %v2115_v3 = vld [vmem:[%s17189_s0 + $0x1d08] sm:$0xff]  ;;  %v14870_v5 = vcombine.high %v1987_v62, %v1991_v1 }
 0x38e   : > { %7904 = vmatprep.subr.bf16.mxu0 %v14838_v42  ;;  %v2119_v8 = vld [vmem:[%s17189_s0 + $0x1d28] sm:$0xff]  ;;  %v14869_v42 = vcombine.low %v1987_v62, %v1991_v1 }
 0x38f   : > { %7894 = vmatpush1.bf16.msra.mxu1 %v14829_v13  ;;  %v14998_v9 = vcombine.high %v2115_v3, %v2119_v8  ;;  %v1995_v0 = vld [vmem:[%s17189_s0 + $0x1948] sm:$0xff] }
 0x390   : > { %7945 = vmatprep.subr.bf16.mxu1 %v14966_v16  ;;  %7855 = vmatmul.mubr.bf16.vlgmr.msra.gmra.mrb[24].mxu0 %v17614_v15  ;;  %v1999_v11 = vld [vmem:[%s17189_s0 + $0x1968] sm:$0xff]  ;;  %v14997_v16 = vcombine.low %v2115_v3, %v2119_v8 }
 0x391   : > { %7905 = vmatpush1.bf16.msra.mxu0 %v14837_v24  ;;  %7936 = vmatprep.mubr.bf16.mxu0 %v17623_v26  ;;  %v2123_v12 = vld [vmem:[%s17189_s0 + $0x1d48] sm:$0xff]  ;;  %v14878_v49 = vcombine.high %v1995_v0, %v1999_v11 }
 0x392   : > { %7896 = vmatmul.mubr.bf16.vlgmr.msra.gmra.mrb[24].mxu1 %v17619_v19  ;;  %7906 = vmatprep.subr.bf16.mxu0 %v14846_v25  ;;  %v2127_v13 = vld [vmem:[%s17189_s0 + $0x1d68] sm:$0xff]  ;;  %v14877_v25 = vcombine.low %v1995_v0, %v1999_v11 }
 0x393   : > { %7946 = vmatpush1.bf16.msra.mxu1 %v14965_v36  ;;  %7977 = vmatprep.mubr.bf16.mxu1 %v17628_v30  ;;  %v15006_v17 = vcombine.high %v2123_v12, %v2127_v13  ;;  %v2003_v41 = vld [vmem:[%s17189_s0 + $0x1988] sm:$0xff] }
 0x394   : > { %7947 = vmatprep.subr.bf16.mxu1 %v14974_v32  ;;  %v2007_v21 = vld [vmem:[%s17189_s0 + $0x19a8] sm:$0xff]  ;;  %v15005_v32 = vcombine.low %v2123_v12, %v2127_v13 }
 0x395   : > { %7907 = vmatpush1.bf16.msra.mxu0 %v14845_v35  ;;  %v2131_v24 = vld [vmem:[%s17189_s0 + $0x1d88] sm:$0xff]  ;;  %v14886_v44 = vcombine.high %v2003_v41, %v2007_v21 }
 0x396   : > { %7908 = vmatprep.subr.bf16.mxu0 %v14854_v40  ;;  %v2135_v36 = vld [vmem:[%s17189_s0 + $0x1da8] sm:$0xff] }
 0x397   : > { %7948 = vmatpush1.bf16.msra.mxu1 %v14973_v38  ;;  %v15014_v45 = vcombine.high %v2131_v24, %v2135_v36  ;;  %v2011_v37 = vld [vmem:[%s17189_s0 + $0x19c8] sm:$0xff]  ;;  %v15013_v3 = vcombine.low %v2131_v24, %v2135_v36 }
 0x398   : > { %7949 = vmatprep.subr.bf16.mxu1 %v14982_v39  ;;  %v2015_v35 = vld [vmem:[%s17189_s0 + $0x19e8] sm:$0xff] }
 0x399   : > { %7909 = vmatpush1.bf16.msra.mxu0 %v14853_v48  ;;  %v2139_v2 = vld [vmem:[%s17189_s0 + $0x1dc8] sm:$0xff]  ;;  %v14894_v8 = vcombine.high %v2011_v37, %v2015_v35 }
 0x39a   : > { %7910 = vmatprep.subr.bf16.mxu0 %v14862_v56  ;;  %v2143_v43 = vld [vmem:[%s17189_s0 + $0x1de8] sm:$0xff]  ;;  %v14885_v56 = vcombine.low %v2003_v41, %v2007_v21 }
 0x39b   : > { %7950 = vmatpush1.bf16.msra.mxu1 %v14981_v55  ;;  %v1163_v62 = vld [vmem:[#allocation2 + $0x8] sm:$0xff] }
 0x39c   : > { %7951 = vmatprep.subr.bf16.mxu1 %v14990_v57  ;;  %v2147_v11 = vld [vmem:[%s17189_s0 + $0x1e08] sm:$0xff] }
 0x39d   : > { %7911 = vmatpush1.bf16.msra.mxu0 %v14861_v53  ;;  %v2151_v12 = vld [vmem:[%s17189_s0 + $0x1e28] sm:$0xff] }
 0x39e   : > { %7912 = vmatprep.subr.bf16.mxu0 %v14870_v5  ;;  %v2019_v5 = vld [vmem:[%s17189_s0 + $0x1a08] sm:$0xff] }
 0x39f   : > { %7952 = vmatpush1.bf16.msra.mxu1 %v14989_v54  ;;  %v2027_v41 = vld [vmem:[%s17189_s0 + $0x1a48] sm:$0xff] }
 0x3a0   : > { %7953 = vmatprep.subr.bf16.mxu1 %v14998_v9  ;;  %v2023_v9 = vld [vmem:[%s17189_s0 + $0x1a28] sm:$0xff] }
 0x3a1   : > { %7913 = vmatpush1.bf16.msra.mxu0 %v14869_v42  ;;  %v14893_v42 = vcombine.low %v2011_v37, %v2015_v35  ;;  %v2031_v21 = vld [vmem:[%s17189_s0 + $0x1a68] sm:$0xff] }
 0x3a2   : > { %7914 = vmatprep.subr.bf16.mxu0 %v14878_v49  ;;  %v14902_v49 = vcombine.high %v2019_v5, %v2023_v9  ;;  %v2155_v24 = vld [vmem:[%s17189_s0 + $0x1e48] sm:$0xff] }
 0x3a3   : > { %7954 = vmatpush1.bf16.msra.mxu1 %v14997_v16  ;;  %v7610_v29 = vpop.f32.mrb[12].mxu0  ;;  %v15021_v16 = vcombine.low %v2139_v2, %v2143_v43  ;;  %v2159_v36 = vld [vmem:[%s17189_s0 + $0x1e68] sm:$0xff] }
 0x3a4   : > { %7955 = vmatprep.subr.bf16.mxu1 %v15006_v17  ;;  %v7611_v38 = vadd.f32 %v7610_v29, %v17875_v14  ;;  %v7612_v39 = vpop.f32.mrb[13].mxu0  ;;  %v15030_v17 = vcombine.high %v2147_v11, %v2151_v12  ;;  %v15038_v29 = vcombine.high %v2155_v24, %v2159_v36  ;;  %v2039_v37 = vld [vmem:[%s17189_s0 + $0x1aa8] sm:$0xff] }
 0x3a5   : > { %v7651_v40 = vpop.f32.mrb[12].mxu1  ;;  %v7613_v47 = vadd.f32 %v7612_v39, %v17877_v20  ;;  %v7614_v55 = vpop.f32.mrb[14].mxu0  ;;  %7915 = vmatpush1.bf16.msra.mxu0 %v14877_v25  ;;  %v15022_v20 = vcombine.high %v2139_v2, %v2143_v43  ;;  %v14901_v25 = vcombine.low %v2019_v5, %v2023_v9  ;;  %v2163_v35 = vld [vmem:[%s17189_s0 + $0x1e88] sm:$0xff]  ;;  %v15037_v39 = vcombine.low %v2155_v24, %v2159_v36 }
 0x3a6   : > { %v7653_v48 = vpop.f32.mrb[13].mxu1  ;;  %v7652_v57 = vadd.f32 %v7651_v40, %v7611_v38  ;;  %v7615_v14 = vpop.f32.mrb[15].mxu0  ;;  %7916 = vmatprep.subr.bf16.mxu0 %v14886_v44  ;;  %v14910_v44 = vcombine.high %v2027_v41, %v2031_v21  ;;  %v2167_v38 = vld [vmem:[%s17189_s0 + $0x1ea8] sm:$0xff]  ;;  %v14909_v40 = vcombine.low %v2027_v41, %v2031_v21 }
 0x3a7   : > { %v7655_v1 = vpop.f32.mrb[14].mxu1  ;;  %7956 = vmatpush1.bf16.msra.mxu1 %v15005_v32  ;;  %v7654_v53 = vadd.f32 %v7653_v48, %v7613_v47  ;;  %v15029_v32 = vcombine.low %v2147_v11, %v2151_v12  ;;  %v15046_v43 = vcombine.high %v2163_v35, %v2167_v38  ;;  %v2047_v47 = vld [vmem:[%s17189_s0 + $0x1ae8] sm:$0xff] }
 0x3a8   : > { %v7656_v54 = vpop.f32.mrb[15].mxu1  ;;  %7957 = vmatprep.subr.bf16.mxu1 %v15014_v45  ;;  %v8642_v0 = vadd.f32 %v7652_v57, %v1162_v46  ;;  %v2035_v45 = vld [vmem:[%s17189_s0 + $0x1a88] sm:$0xff]  ;;  %v15045_v57 = vcombine.low %v2163_v35, %v2167_v38 }
 0x3a9   : > { %v8643_v13 = vadd.f32 %v7654_v53, %v1163_v62  ;;  %7917 = vmatpush1.bf16.msra.mxu0 %v14885_v56  ;;  %v14918_v2 = vcombine.high %v2035_v45, %v2039_v37  ;;  %v2043_v46 = vld [vmem:[%s17189_s0 + $0x1ac8] sm:$0xff]  ;;  %v14917_v56 = vcombine.low %v2035_v45, %v2039_v37 }
 0x3aa   : > { %8650 = vst [vmem:[#allocation2] sm:$0xff] %v8642_v0  ;;  %7918 = vmatprep.subr.bf16.mxu0 %v14894_v8  ;;  %v2171_v48 = vld [vmem:[%s17189_s0 + $0x1ec8] sm:$0xff]  ;;  %v14926_v62 = vcombine.high %v2043_v46, %v2047_v47  ;;  %v14925_v54 = vcombine.low %v2043_v46, %v2047_v47  ;;  %v1188_v46 = vld [vmem:[%s17189_s0 + $0x10] sm:$0xff] }
 0x3ab   : > { %7958 = vmatpush1.bf16.msra.mxu1 %v15013_v3  ;;  %8651 = vst [vmem:[#allocation2 + $0x8] sm:$0xff] %v8643_v13  ;;  %v2175_v55 = vld [vmem:[%s17189_s0 + $0x1ee8] sm:$0xff]  ;;  %v1192_v47 = vld [vmem:[%s17189_s0 + $0x30] sm:$0xff] }
 0x3ac   : > { %7959 = vmatprep.subr.bf16.mxu1 %v15022_v20  ;;  %v15054_v1 = vcombine.high %v2171_v48, %v2175_v55  ;;  %v2051_v14 = vld [vmem:[%s17189_s0 + $0x1b08] sm:$0xff]  ;;  %v15053_v20 = vcombine.low %v2171_v48, %v2175_v55  ;;  %v1316_v48 = vld [vmem:[%s17189_s0 + $0x410] sm:$0xff] }
 0x3ad   : > { %7919 = vmatpush1.bf16.msra.mxu0 %v14893_v42  ;;  %v2055_v3 = vld [vmem:[%s17189_s0 + $0x1b28] sm:$0xff]  ;;  %v1320_v55 = vld [vmem:[%s17189_s0 + $0x430] sm:$0xff] }
 0x3ae   : > { %7920 = vmatprep.subr.bf16.mxu0 %v14902_v49  ;;  %v2179_v8 = vld [vmem:[%s17189_s0 + $0x1f08] sm:$0xff]  ;;  %v14934_v5 = vcombine.high %v2051_v14, %v2055_v3  ;;  %v14933_v42 = vcombine.low %v2051_v14, %v2055_v3  ;;  %v1196_v14 = vld [vmem:[%s17189_s0 + $0x50] sm:$0xff] }
 0x3af   : > { %7960 = vmatpush1.bf16.msra.mxu1 %v15021_v16  ;;  %v2183_v53 = vld [vmem:[%s17189_s0 + $0x1f28] sm:$0xff]  ;;  %v1200_v3 = vld [vmem:[%s17189_s0 + $0x70] sm:$0xff] }
 0x3b0   : > { %7961 = vmatprep.subr.bf16.mxu1 %v15030_v17  ;;  %v15062_v9 = vcombine.high %v2179_v8, %v2183_v53  ;;  %v2059_v0 = vld [vmem:[%s17189_s0 + $0x1b48] sm:$0xff]  ;;  %v15061_v16 = vcombine.low %v2179_v8, %v2183_v53  ;;  %v1324_v8 = vld [vmem:[%s17189_s0 + $0x450] sm:$0xff] }
 0x3b1   : > { %7921 = vmatpush1.bf16.msra.mxu0 %v14901_v25  ;;  %v2063_v11 = vld [vmem:[%s17189_s0 + $0x1b68] sm:$0xff]  ;;  %v1328_v53 = vld [vmem:[%s17189_s0 + $0x470] sm:$0xff] }
 0x3b2   : > { %7922 = vmatprep.subr.bf16.mxu0 %v14910_v44  ;;  %v2187_v12 = vld [vmem:[%s17189_s0 + $0x1f48] sm:$0xff]  ;;  %v14942_v49 = vcombine.high %v2059_v0, %v2063_v11  ;;  %v14941_v25 = vcombine.low %v2059_v0, %v2063_v11  ;;  %v1204_v0 = vld [vmem:[%s17189_s0 + $0x90] sm:$0xff] }
 0x3b3   : > { %7962 = vmatpush1.bf16.msra.mxu1 %v15029_v32  ;;  %v2191_v13 = vld [vmem:[%s17189_s0 + $0x1f68] sm:$0xff]  ;;  %v1208_v11 = vld [vmem:[%s17189_s0 + $0xb0] sm:$0xff] }
 0x3b4   : > { %7963 = vmatprep.subr.bf16.mxu1 %v15038_v29  ;;  %v15070_v17 = vcombine.high %v2187_v12, %v2191_v13  ;;  %v2067_v41 = vld [vmem:[%s17189_s0 + $0x1b88] sm:$0xff]  ;;  %v15069_v32 = vcombine.low %v2187_v12, %v2191_v13  ;;  %v1332_v12 = vld [vmem:[%s17189_s0 + $0x490] sm:$0xff] }
 0x3b5   : > { %7923 = vmatpush1.bf16.msra.mxu0 %v14909_v40  ;;  %v2071_v21 = vld [vmem:[%s17189_s0 + $0x1ba8] sm:$0xff]  ;;  %v1336_v13 = vld [vmem:[%s17189_s0 + $0x4b0] sm:$0xff] }
 0x3b6   : > { %7924 = vmatprep.subr.bf16.mxu0 %v14918_v2  ;;  %v2195_v24 = vld [vmem:[%s17189_s0 + $0x1f88] sm:$0xff]  ;;  %v14950_v44 = vcombine.high %v2067_v41, %v2071_v21  ;;  %v14949_v40 = vcombine.low %v2067_v41, %v2071_v21  ;;  %v1212_v41 = vld [vmem:[%s17189_s0 + $0xd0] sm:$0xff] }
 0x3b7   : > { %7964 = vmatpush1.bf16.msra.mxu1 %v15037_v39  ;;  %v2199_v36 = vld [vmem:[%s17189_s0 + $0x1fa8] sm:$0xff]  ;;  %v1216_v21 = vld [vmem:[%s17189_s0 + $0xf0] sm:$0xff] }
 0x3b8   : > { %7965 = vmatprep.subr.bf16.mxu1 %v15046_v43  ;;  %v15078_v29 = vcombine.high %v2195_v24, %v2199_v36  ;;  %v2075_v45 = vld [vmem:[%s17189_s0 + $0x1bc8] sm:$0xff]  ;;  %v15077_v39 = vcombine.low %v2195_v24, %v2199_v36  ;;  %v1340_v24 = vld [vmem:[%s17189_s0 + $0x4d0] sm:$0xff] }
 0x3b9   : > { %7925 = vmatpush1.bf16.msra.mxu0 %v14917_v56  ;;  %v2079_v37 = vld [vmem:[%s17189_s0 + $0x1be8] sm:$0xff]  ;;  %v1344_v36 = vld [vmem:[%s17189_s0 + $0x4f0] sm:$0xff] }
 0x3ba   : > { %7926 = vmatprep.subr.bf16.mxu0 %v14926_v62  ;;  %v2203_v35 = vld [vmem:[%s17189_s0 + $0x1fc8] sm:$0xff]  ;;  %v14958_v2 = vcombine.high %v2075_v45, %v2079_v37  ;;  %v14957_v56 = vcombine.low %v2075_v45, %v2079_v37  ;;  %v14072_v62 = vcombine.high %v1188_v46, %v1192_v47  ;;  %v1220_v45 = vld [vmem:[%s17189_s0 + $0x110] sm:$0xff] }
 0x3bb   : > { %7966 = vmatpush1.bf16.msra.mxu1 %v15045_v57  ;;  %v2207_v38 = vld [vmem:[%s17189_s0 + $0x1fe8] sm:$0xff]  ;;  %v1224_v37 = vld [vmem:[%s17189_s0 + $0x130] sm:$0xff] }
 0x3bc   : > { %7967 = vmatprep.subr.bf16.mxu1 %v15054_v1  ;;  %v15086_v43 = vcombine.high %v2203_v35, %v2207_v38  ;;  %v15085_v57 = vcombine.low %v2203_v35, %v2207_v38  ;;  %v14200_v1 = vcombine.high %v1316_v48, %v1320_v55  ;;  %v1348_v35 = vld [vmem:[%s17189_s0 + $0x510] sm:$0xff] }
 0x3bd   : > { %7927 = vmatpush1.bf16.msra.mxu0 %v14925_v54  ;;  %v14071_v54 = vcombine.low %v1188_v46, %v1192_v47  ;;  %v1352_v38 = vld [vmem:[%s17189_s0 + $0x530] sm:$0xff] }
 0x3be   : > { %7928 = vmatprep.subr.bf16.mxu0 %v14934_v5  ;;  %v14080_v5 = vcombine.high %v1196_v14, %v1200_v3  ;;  %v1228_v46 = vld [vmem:[%s17189_s0 + $0x150] sm:$0xff] }
 0x3bf   : > { %7968 = vmatpush1.bf16.msra.mxu1 %v15053_v20  ;;  %v14199_v20 = vcombine.low %v1316_v48, %v1320_v55  ;;  %v1232_v47 = vld [vmem:[%s17189_s0 + $0x170] sm:$0xff] }
 0x3c0   : > { %7969 = vmatprep.subr.bf16.mxu1 %v15062_v9  ;;  %v14208_v9 = vcombine.high %v1324_v8, %v1328_v53  ;;  %v1356_v48 = vld [vmem:[%s17189_s0 + $0x550] sm:$0xff] }
 0x3c1   : > { %7929 = vmatpush1.bf16.msra.mxu0 %v14933_v42  ;;  %v14079_v42 = vcombine.low %v1196_v14, %v1200_v3  ;;  %v1360_v55 = vld [vmem:[%s17189_s0 + $0x570] sm:$0xff] }
 0x3c2   : > { %7930 = vmatprep.subr.bf16.mxu0 %v14942_v49  ;;  %v14088_v49 = vcombine.high %v1204_v0, %v1208_v11  ;;  %v1236_v14 = vld [vmem:[%s17189_s0 + $0x190] sm:$0xff] }
 0x3c3   : > { %7970 = vmatpush1.bf16.msra.mxu1 %v15061_v16  ;;  %v14207_v16 = vcombine.low %v1324_v8, %v1328_v53  ;;  %v1240_v3 = vld [vmem:[%s17189_s0 + $0x1b0] sm:$0xff] }
 0x3c4   : > { %7971 = vmatprep.subr.bf16.mxu1 %v15070_v17  ;;  %v14216_v17 = vcombine.high %v1332_v12, %v1336_v13  ;;  %v1364_v8 = vld [vmem:[%s17189_s0 + $0x590] sm:$0xff] }
 0x3c5   : > { %7931 = vmatpush1.bf16.msra.mxu0 %v14941_v25  ;;  %v14087_v25 = vcombine.low %v1204_v0, %v1208_v11  ;;  %v1368_v53 = vld [vmem:[%s17189_s0 + $0x5b0] sm:$0xff] }
 0x3c6   : > { %7932 = vmatprep.subr.bf16.mxu0 %v14950_v44  ;;  %v14096_v44 = vcombine.high %v1212_v41, %v1216_v21  ;;  %v14248_v0 = vcombine.high %v1364_v8, %v1368_v53  ;;  %v1244_v11 = vld [vmem:[%s17189_s0 + $0x1d0] sm:$0xff] }
 0x3c7   : > { %7972 = vmatpush1.bf16.msra.mxu1 %v15069_v32  ;;  %v14215_v32 = vcombine.low %v1332_v12, %v1336_v13  ;;  %v1248_v12 = vld [vmem:[%s17189_s0 + $0x1f0] sm:$0xff] }
 0x3c8   : > { %7973 = vmatprep.subr.bf16.mxu1 %v15078_v29  ;;  %v14224_v29 = vcombine.high %v1340_v24, %v1344_v36 }
 0x3c9   : > { %7933 = vmatpush1.bf16.msra.mxu0 %v14949_v40  ;;  %v14095_v40 = vcombine.low %v1212_v41, %v1216_v21 }
 0x3ca   : > { %7934 = vmatprep.subr.bf16.mxu0 %v14958_v2  ;;  %v14104_v2 = vcombine.high %v1220_v45, %v1224_v37 }
 0x3cb   : > { %7974 = vmatpush1.bf16.msra.mxu1 %v15077_v39  ;;  %v14223_v39 = vcombine.low %v1340_v24, %v1344_v36  ;;  %v14119_v24 = vcombine.low %v1236_v14, %v1240_v3 }
 0x3cc   : > { %7975 = vmatprep.subr.bf16.mxu1 %v15086_v43  ;;  %v14232_v43 = vcombine.high %v1348_v35, %v1352_v38 }
 0x3cd   : > { %7935 = vmatpush1.bf16.msra.mxu0 %v14957_v56  ;;  %v14103_v56 = vcombine.low %v1220_v45, %v1224_v37 }
 0x3ce   : > { %7986 = vmatprep.subr.bf16.mxu0 %v14072_v62  ;;  %v14112_v62 = vcombine.high %v1228_v46, %v1232_v47 }
 0x3cf   : > { %7976 = vmatpush1.bf16.msra.mxu1 %v15085_v57  ;;  %v14231_v57 = vcombine.low %v1348_v35, %v1352_v38  ;;  %v1252_v35 = vld [vmem:[%s17189_s0 + $0x210] sm:$0xff] }
 0x3d0   : > { %8027 = vmatprep.subr.bf16.mxu1 %v14200_v1  ;;  %7937 = vmatmul.mubr.bf16.vlgmr.msra.gmra.mrb[28].mxu0 %v17693_v23  ;;  %v14240_v1 = vcombine.high %v1356_v48, %v1360_v55  ;;  %v1256_v38 = vld [vmem:[%s17189_s0 + $0x230] sm:$0xff] }
 0x3d1   : > { %7987 = vmatpush1.bf16.msra.mxu0 %v14071_v54  ;;  %8018 = vmatprep.mubr.bf16.mxu0 %v17303_v27  ;;  %v14111_v54 = vcombine.low %v1228_v46, %v1232_v47  ;;  %v14136_v46 = vcombine.high %v1252_v35, %v1256_v38 }
 0x3d2   : > { %7978 = vmatmul.mubr.bf16.vlgmr.msra.gmra.mrb[28].mxu1 %v17697_v33  ;;  %7988 = vmatprep.subr.bf16.mxu0 %v14080_v5  ;;  %v14120_v5 = vcombine.high %v1236_v14, %v1240_v3 }
 0x3d3   : > { %8028 = vmatpush1.bf16.msra.mxu1 %v14199_v20  ;;  %8059 = vmatprep.mubr.bf16.mxu1 %v17305_v28  ;;  %v14239_v20 = vcombine.low %v1356_v48, %v1360_v55  ;;  %v1260_v48 = vld [vmem:[%s17189_s0 + $0x250] sm:$0xff] }
 0x3d4   : > { %8029 = vmatprep.subr.bf16.mxu1 %v14208_v9  ;;  %v1264_v55 = vld [vmem:[%s17189_s0 + $0x270] sm:$0xff] }
 0x3d5   : > { %7989 = vmatpush1.bf16.msra.mxu0 %v14079_v42  ;;  %v14144_v14 = vcombine.high %v1260_v48, %v1264_v55 }
 0x3d6   : > { %7990 = vmatprep.subr.bf16.mxu0 %v14088_v49  ;;  %v1376_v49 = vld [vmem:[%s17189_s0 + $0x5f0] sm:$0xff] }
 0x3d7   : > { %8030 = vmatpush1.bf16.msra.mxu1 %v14207_v16  ;;  %v1372_v16 = vld [vmem:[%s17189_s0 + $0x5d0] sm:$0xff] }
 0x3d8   : > { %8031 = vmatprep.subr.bf16.mxu1 %v14216_v17  ;;  %v14256_v37 = vcombine.high %v1372_v16, %v1376_v49 }
 0x3d9   : > { %7991 = vmatpush1.bf16.msra.mxu0 %v14087_v25 }
 0x3da   : > { %7992 = vmatprep.subr.bf16.mxu0 %v14096_v44  ;;  %v14247_v44 = vcombine.low %v1364_v8, %v1368_v53  ;;  %v1268_v8 = vld [vmem:[%s17189_s0 + $0x290] sm:$0xff] }
 0x3db   : > { %8032 = vmatpush1.bf16.msra.mxu1 %v14215_v32  ;;  %v1272_v53 = vld [vmem:[%s17189_s0 + $0x2b0] sm:$0xff] }
 0x3dc   : > { %8033 = vmatprep.subr.bf16.mxu1 %v14224_v29  ;;  %v14128_v29 = vcombine.high %v1244_v11, %v1248_v12 }
 0x3dd   : > { %7993 = vmatpush1.bf16.msra.mxu0 %v14095_v40  ;;  %v1380_v40 = vld [vmem:[%s17189_s0 + $0x610] sm:$0xff] }
 0x3de   : > { %7994 = vmatprep.subr.bf16.mxu0 %v14104_v2  ;;  %v14127_v2 = vcombine.low %v1244_v11, %v1248_v12  ;;  %v1276_v12 = vld [vmem:[%s17189_s0 + $0x2d0] sm:$0xff] }
 0x3df   : > { %8034 = vmatpush1.bf16.msra.mxu1 %v14223_v39  ;;  %v1384_v39 = vld [vmem:[%s17189_s0 + $0x630] sm:$0xff] }
 0x3e0   : > { %8035 = vmatprep.subr.bf16.mxu1 %v14232_v43  ;;  %v14255_v43 = vcombine.low %v1372_v16, %v1376_v49  ;;  %v14264_v47 = vcombine.high %v1380_v40, %v1384_v39  ;;  %v1408_v16 = vld [vmem:[%s17189_s0 + $0x6f0] sm:$0xff]  ;;  %v14151_v49 = vcombine.low %v1268_v8, %v1272_v53 }
 0x3e1   : > { %7995 = vmatpush1.bf16.msra.mxu0 %v14103_v56  ;;  %v1388_v56 = vld [vmem:[%s17189_s0 + $0x650] sm:$0xff] }
 0x3e2   : > { %7996 = vmatprep.subr.bf16.mxu0 %v14112_v62  ;;  %v14135_v62 = vcombine.low %v1252_v35, %v1256_v38 }
 0x3e3   : > { %8036 = vmatpush1.bf16.msra.mxu1 %v14231_v57  ;;  %v7692_v9 = vpop.f32.mrb[16].mxu0  ;;  %v1392_v57 = vld [vmem:[%s17189_s0 + $0x670] sm:$0xff] }
 0x3e4   : > { %8037 = vmatprep.subr.bf16.mxu1 %v14240_v1  ;;  %v7694_v42 = vpop.f32.mrb[17].mxu0  ;;  %v14263_v1 = vcombine.low %v1380_v40, %v1384_v39  ;;  %v14272_v3 = vcombine.high %v1388_v56, %v1392_v57  ;;  %v1292_v40 = vld [vmem:[%s17189_s0 + $0x350] sm:$0xff] }
 0x3e5   : > { %v7733_v13 = vpop.f32.mrb[16].mxu1  ;;  %v7696_v21 = vpop.f32.mrb[18].mxu0  ;;  %7997 = vmatpush1.bf16.msra.mxu0 %v14111_v54  ;;  %v1396_v54 = vld [vmem:[%s17189_s0 + $0x690] sm:$0xff] }
 0x3e6   : > { %v18017_v17 = vadd.f32 %v7733_v13, %v7692_v9  ;;  %v7735_v41 = vpop.f32.mrb[17].mxu1  ;;  %v7697_v32 = vpop.f32.mrb[19].mxu0  ;;  %7998 = vmatprep.subr.bf16.mxu0 %v14120_v5  ;;  %v14143_v5 = vcombine.low %v1260_v48, %v1264_v55  ;;  %v14271_v9 = vcombine.low %v1388_v56, %v1392_v57  ;;  %v1280_v13 = vld [vmem:[%s17189_s0 + $0x2f0] sm:$0xff] }
 0x3e7   : > { %v18019_v36 = vadd.f32 %v7735_v41, %v7694_v42  ;;  %v7737_v25 = vpop.f32.mrb[18].mxu1  ;;  %8038 = vmatpush1.bf16.msra.mxu1 %v14239_v20  ;;  %v1400_v20 = vld [vmem:[%s17189_s0 + $0x6b0] sm:$0xff]  ;;  %v14160_v21 = vcombine.high %v1276_v12, %v1280_v13 }
 0x3e8   : > { %v7738_v45 = vpop.f32.mrb[19].mxu1  ;;  %8039 = vmatprep.subr.bf16.mxu1 %v14248_v0  ;;  %v14152_v0 = vcombine.high %v1268_v8, %v1272_v53  ;;  %v14280_v11 = vcombine.high %v1396_v54, %v1400_v20  ;;  %v1404_v42 = vld [vmem:[%s17189_s0 + $0x6d0] sm:$0xff]  ;;  %v14279_v41 = vcombine.low %v1396_v54, %v1400_v20 }
 0x3e9   : > { %7999 = vmatpush1.bf16.msra.mxu0 %v14119_v24  ;;  %v14288_v24 = vcombine.high %v1404_v42, %v1408_v16  ;;  %v1284_v25 = vld [vmem:[%s17189_s0 + $0x310] sm:$0xff]  ;;  %v14159_v45 = vcombine.low %v1276_v12, %v1280_v13 }
 0x3ea   : > { %8000 = vmatprep.subr.bf16.mxu0 %v14128_v29  ;;  %v1288_v32 = vld [vmem:[%s17189_s0 + $0x330] sm:$0xff] }
 0x3eb   : > { %8040 = vmatpush1.bf16.msra.mxu1 %v14247_v44  ;;  %v1412_v44 = vld [vmem:[%s17189_s0 + $0x710] sm:$0xff]  ;;  %v14168_v35 = vcombine.high %v1284_v25, %v1288_v32 }
 0x3ec   : > { %8041 = vmatprep.subr.bf16.mxu1 %v14256_v37  ;;  %v1416_v29 = vld [vmem:[%s17189_s0 + $0x730] sm:$0xff]  ;;  %v14287_v37 = vcombine.low %v1404_v42, %v1408_v16 }
 0x3ed   : > { %8001 = vmatpush1.bf16.msra.mxu0 %v14127_v2  ;;  %v14296_v38 = vcombine.high %v1412_v44, %v1416_v29  ;;  %v1296_v39 = vld [vmem:[%s17189_s0 + $0x370] sm:$0xff] }
 0x3ee   : > { %8002 = vmatprep.subr.bf16.mxu0 %v14136_v46  ;;  %v1420_v2 = vld [vmem:[%s17189_s0 + $0x750] sm:$0xff]  ;;  %v14167_v46 = vcombine.low %v1284_v25, %v1288_v32  ;;  %v14176_v48 = vcombine.high %v1292_v40, %v1296_v39 }
 0x3ef   : > { %8042 = vmatpush1.bf16.msra.mxu1 %v14255_v43  ;;  %v1424_v43 = vld [vmem:[%s17189_s0 + $0x770] sm:$0xff] }
 0x3f0   : > { %8043 = vmatprep.subr.bf16.mxu1 %v14264_v47  ;;  %v14295_v47 = vcombine.low %v1412_v44, %v1416_v29  ;;  %v14304_v55 = vcombine.high %v1420_v2, %v1424_v43  ;;  %v1300_v56 = vld [vmem:[%s17189_s0 + $0x390] sm:$0xff] }
 0x3f1   : > { %8003 = vmatpush1.bf16.msra.mxu0 %v14135_v62  ;;  %v1304_v57 = vld [vmem:[%s17189_s0 + $0x3b0] sm:$0xff] }
 0x3f2   : > { %8004 = vmatprep.subr.bf16.mxu0 %v14144_v14  ;;  %v1428_v62 = vld [vmem:[%s17189_s0 + $0x790] sm:$0xff]  ;;  %v14175_v14 = vcombine.low %v1292_v40, %v1296_v39  ;;  %v14184_v8 = vcombine.high %v1300_v56, %v1304_v57 }
 0x3f3   : > { %8044 = vmatpush1.bf16.msra.mxu1 %v14263_v1  ;;  %v1432_v1 = vld [vmem:[%s17189_s0 + $0x7b0] sm:$0xff] }
 0x3f4   : > { %8045 = vmatprep.subr.bf16.mxu1 %v14272_v3  ;;  %v14303_v3 = vcombine.low %v1420_v2, %v1424_v43  ;;  %v14312_v53 = vcombine.high %v1428_v62, %v1432_v1  ;;  %v1308_v54 = vld [vmem:[%s17189_s0 + $0x3d0] sm:$0xff] }
 0x3f5   : > { %8005 = vmatpush1.bf16.msra.mxu0 %v14143_v5  ;;  %v1312_v20 = vld [vmem:[%s17189_s0 + $0x3f0] sm:$0xff] }
 0x3f6   : > { %8006 = vmatprep.subr.bf16.mxu0 %v14152_v0  ;;  %v1436_v5 = vld [vmem:[%s17189_s0 + $0x7d0] sm:$0xff]  ;;  %v14183_v0 = vcombine.low %v1300_v56, %v1304_v57  ;;  %v14192_v12 = vcombine.high %v1308_v54, %v1312_v20 }
 0x3f7   : > { %8046 = vmatpush1.bf16.msra.mxu1 %v14271_v9  ;;  %v1440_v9 = vld [vmem:[%s17189_s0 + $0x7f0] sm:$0xff] }
 0x3f8   : > { %8047 = vmatprep.subr.bf16.mxu1 %v14280_v11  ;;  %v14311_v11 = vcombine.low %v1428_v62, %v1432_v1  ;;  %v14320_v13 = vcombine.high %v1436_v5, %v1440_v9  ;;  %v1444_v42 = vld [vmem:[%s17189_s0 + $0x810] sm:$0xff] }
 0x3f9   : > { %8007 = vmatpush1.bf16.msra.mxu0 %v14151_v49  ;;  %v1448_v16 = vld [vmem:[%s17189_s0 + $0x830] sm:$0xff] }
 0x3fa   : > { %8008 = vmatprep.subr.bf16.mxu0 %v14160_v21  ;;  %v1572_v49 = vld [vmem:[%s17189_s0 + $0xc10] sm:$0xff]  ;;  %v14191_v21 = vcombine.low %v1308_v54, %v1312_v20  ;;  %v14328_v25 = vcombine.high %v1444_v42, %v1448_v16 }
 0x3fb   : > { %8048 = vmatpush1.bf16.msra.mxu1 %v14279_v41  ;;  %v1576_v41 = vld [vmem:[%s17189_s0 + $0xc30] sm:$0xff] }
 0x3fc   : > { %8049 = vmatprep.subr.bf16.mxu1 %v14288_v24  ;;  %v14319_v24 = vcombine.low %v1436_v5, %v1440_v9  ;;  %v14456_v32 = vcombine.high %v1572_v49, %v1576_v41  ;;  %v1452_v44 = vld [vmem:[%s17189_s0 + $0x850] sm:$0xff] }
 0x3fd   : > { %8009 = vmatpush1.bf16.msra.mxu0 %v14159_v45  ;;  %v1456_v29 = vld [vmem:[%s17189_s0 + $0x870] sm:$0xff] }
 0x3fe   : > { %8010 = vmatprep.subr.bf16.mxu0 %v14168_v35  ;;  %v1580_v45 = vld [vmem:[%s17189_s0 + $0xc50] sm:$0xff]  ;;  %v14327_v35 = vcombine.low %v1444_v42, %v1448_v16  ;;  %v14336_v40 = vcombine.high %v1452_v44, %v1456_v29 }
 0x3ff   : > { %8050 = vmatpush1.bf16.msra.mxu1 %v14287_v37  ;;  %v1584_v37 = vld [vmem:[%s17189_s0 + $0xc70] sm:$0xff] }
 0x400   : > { %8051 = vmatprep.subr.bf16.mxu1 %v14296_v38  ;;  %v14455_v38 = vcombine.low %v1572_v49, %v1576_v41  ;;  %v14464_v39 = vcombine.high %v1580_v45, %v1584_v37  ;;  %v1460_v2 = vld [vmem:[%s17189_s0 + $0x890] sm:$0xff] }
 0x401   : > { %8011 = vmatpush1.bf16.msra.mxu0 %v14167_v46  ;;  %v1464_v43 = vld [vmem:[%s17189_s0 + $0x8b0] sm:$0xff] }
 0x402   : > { %8012 = vmatprep.subr.bf16.mxu0 %v14176_v48  ;;  %v1588_v46 = vld [vmem:[%s17189_s0 + $0xc90] sm:$0xff]  ;;  %v14335_v48 = vcombine.low %v1452_v44, %v1456_v29  ;;  %v14344_v56 = vcombine.high %v1460_v2, %v1464_v43 }
 0x403   : > { %8052 = vmatpush1.bf16.msra.mxu1 %v14295_v47  ;;  %v1592_v47 = vld [vmem:[%s17189_s0 + $0xcb0] sm:$0xff] }
 0x404   : > { %8053 = vmatprep.subr.bf16.mxu1 %v14304_v55  ;;  %v14463_v55 = vcombine.low %v1580_v45, %v1584_v37  ;;  %v14472_v57 = vcombine.high %v1588_v46, %v1592_v47  ;;  %v1468_v62 = vld [vmem:[%s17189_s0 + $0x8d0] sm:$0xff] }
 0x405   : > { %8013 = vmatpush1.bf16.msra.mxu0 %v14175_v14  ;;  %v1472_v1 = vld [vmem:[%s17189_s0 + $0x8f0] sm:$0xff] }
 0x406   : > { %8014 = vmatprep.subr.bf16.mxu0 %v14184_v8  ;;  %v1596_v14 = vld [vmem:[%s17189_s0 + $0xcd0] sm:$0xff]  ;;  %v14343_v8 = vcombine.low %v1460_v2, %v1464_v43  ;;  %v14352_v54 = vcombine.high %v1468_v62, %v1472_v1 }
 0x407   : > { %8054 = vmatpush1.bf16.msra.mxu1 %v14303_v3  ;;  %v1600_v3 = vld [vmem:[%s17189_s0 + $0xcf0] sm:$0xff] }
 0x408   : > { %8055 = vmatprep.subr.bf16.mxu1 %v14312_v53  ;;  %v14471_v53 = vcombine.low %v1588_v46, %v1592_v47  ;;  %v14480_v20 = vcombine.high %v1596_v14, %v1600_v3  ;;  %v1476_v5 = vld [vmem:[%s17189_s0 + $0x910] sm:$0xff] }
 0x409   : > { %8015 = vmatpush1.bf16.msra.mxu0 %v14183_v0  ;;  %v1480_v9 = vld [vmem:[%s17189_s0 + $0x930] sm:$0xff] }
 0x40a   : > { %8016 = vmatprep.subr.bf16.mxu0 %v14192_v12  ;;  %v1604_v0 = vld [vmem:[%s17189_s0 + $0xd10] sm:$0xff]  ;;  %v14351_v12 = vcombine.low %v1468_v62, %v1472_v1  ;;  %v14360_v42 = vcombine.high %v1476_v5, %v1480_v9 }
 0x40b   : > { %8056 = vmatpush1.bf16.msra.mxu1 %v14311_v11  ;;  %v1608_v11 = vld [vmem:[%s17189_s0 + $0xd30] sm:$0xff] }
 0x40c   : > { %8057 = vmatprep.subr.bf16.mxu1 %v14320_v13  ;;  %v14479_v13 = vcombine.low %v1596_v14, %v1600_v3  ;;  %v14488_v16 = vcombine.high %v1604_v0, %v1608_v11  ;;  %v1484_v49 = vld [vmem:[%s17189_s0 + $0x950] sm:$0xff] }
 0x40d   : > { %8017 = vmatpush1.bf16.msra.mxu0 %v14191_v21  ;;  %v1488_v41 = vld [vmem:[%s17189_s0 + $0x970] sm:$0xff] }
 0x40e   : > { %8068 = vmatprep.subr.bf16.mxu0 %v14328_v25  ;;  %v1612_v21 = vld [vmem:[%s17189_s0 + $0xd50] sm:$0xff]  ;;  %v14359_v25 = vcombine.low %v1476_v5, %v1480_v9  ;;  %v14368_v44 = vcombine.high %v1484_v49, %v1488_v41 }
 0x40f   : > { %8058 = vmatpush1.bf16.msra.mxu1 %v14319_v24  ;;  %v1616_v24 = vld [vmem:[%s17189_s0 + $0xd70] sm:$0xff] }
 0x410   : > { %8109 = vmatprep.subr.bf16.mxu1 %v14456_v32  ;;  %8019 = vmatmul.mubr.bf16.vlgmr.msra.gmra.mrb[32].mxu0 %v17393_v18  ;;  %v14487_v32 = vcombine.low %v1604_v0, %v1608_v11  ;;  %v14496_v29 = vcombine.high %v1612_v21, %v1616_v24  ;;  %v1492_v45 = vld [vmem:[%s17189_s0 + $0x990] sm:$0xff] }
 0x411   : > { %8069 = vmatpush1.bf16.msra.mxu0 %v14327_v35  ;;  %8100 = vmatprep.mubr.bf16.mxu0 %v17401_v31  ;;  %v1496_v37 = vld [vmem:[%s17189_s0 + $0x9b0] sm:$0xff] }
 0x412   : > { %8060 = vmatmul.mubr.bf16.vlgmr.msra.gmra.mrb[32].mxu1 %v17397_v22  ;;  %8070 = vmatprep.subr.bf16.mxu0 %v14336_v40  ;;  %v1620_v35 = vld [vmem:[%s17189_s0 + $0xd90] sm:$0xff]  ;;  %v14367_v40 = vcombine.low %v1484_v49, %v1488_v41  ;;  %v14376_v2 = vcombine.high %v1492_v45, %v1496_v37 }
 0x413   : > { %8110 = vmatpush1.bf16.msra.mxu1 %v14455_v38  ;;  %8141 = vmatprep.mubr.bf16.mxu1 %v17406_v34  ;;  %v1624_v38 = vld [vmem:[%s17189_s0 + $0xdb0] sm:$0xff] }
 0x414   : > { %8111 = vmatprep.subr.bf16.mxu1 %v14464_v39  ;;  %v14495_v39 = vcombine.low %v1612_v21, %v1616_v24  ;;  %v14504_v46 = vcombine.high %v1620_v35, %v1624_v38  ;;  %v1500_v47 = vld [vmem:[%s17189_s0 + $0x9d0] sm:$0xff] }
 0x415   : > { %8071 = vmatpush1.bf16.msra.mxu0 %v14335_v48  ;;  %v1504_v48 = vld [vmem:[%s17189_s0 + $0x9f0] sm:$0xff] }
 0x416   : > { %8072 = vmatprep.subr.bf16.mxu0 %v14344_v56  ;;  %v1628_v62 = vld [vmem:[%s17189_s0 + $0xdd0] sm:$0xff]  ;;  %v14384_v9 = vcombine.high %v1500_v47, %v1504_v48  ;;  %v14383_v49 = vcombine.low %v1500_v47, %v1504_v48 }
 0x417   : > { %8112 = vmatpush1.bf16.msra.mxu1 %v14463_v55  ;;  %v1632_v1 = vld [vmem:[%s17189_s0 + $0xdf0] sm:$0xff] }
 0x418   : > { %8113 = vmatprep.subr.bf16.mxu1 %v14472_v57  ;;  %v14512_v11 = vcombine.high %v1628_v62, %v1632_v1  ;;  %v14511_v41 = vcombine.low %v1628_v62, %v1632_v1  ;;  %v1660_v62 = vld [vmem:[%s17189_s0 + $0xed0] sm:$0xff] }
 0x419   : > { %8073 = vmatpush1.bf16.msra.mxu0 %v14343_v8  ;;  %v1664_v1 = vld [vmem:[%s17189_s0 + $0xef0] sm:$0xff] }
 0x41a   : > { %8074 = vmatprep.subr.bf16.mxu0 %v14352_v54 }
 0x41b   : > { %8114 = vmatpush1.bf16.msra.mxu1 %v14471_v53  ;;  %v14375_v53 = vcombine.low %v1492_v45, %v1496_v37 }
 0x41c   : > { %8115 = vmatprep.subr.bf16.mxu1 %v14480_v20 }
 0x41d   : > { %8075 = vmatpush1.bf16.msra.mxu0 %v14351_v12  ;;  %v1508_v12 = vld [vmem:[%s17189_s0 + $0xa10] sm:$0xff] }
 0x41e   : > { %8076 = vmatprep.subr.bf16.mxu0 %v14360_v42  ;;  %v1636_v42 = vld [vmem:[%s17189_s0 + $0xe10] sm:$0xff] }
 0x41f   : > { %8116 = vmatpush1.bf16.msra.mxu1 %v14479_v13  ;;  %v1512_v13 = vld [vmem:[%s17189_s0 + $0xa30] sm:$0xff] }
 0x420   : > { %8117 = vmatprep.subr.bf16.mxu1 %v14488_v16  ;;  %v1640_v16 = vld [vmem:[%s17189_s0 + $0xe30] sm:$0xff]  ;;  %v14392_v21 = vcombine.high %v1508_v12, %v1512_v13  ;;  %v14391_v45 = vcombine.low %v1508_v12, %v1512_v13 }
 0x421   : > { %8077 = vmatpush1.bf16.msra.mxu0 %v14359_v25  ;;  %v14520_v24 = vcombine.high %v1636_v42, %v1640_v16  ;;  %v1516_v25 = vld [vmem:[%s17189_s0 + $0xa50] sm:$0xff]  ;;  %v14519_v37 = vcombine.low %v1636_v42, %v1640_v16 }
 0x422   : > { %8078 = vmatprep.subr.bf16.mxu0 %v14368_v44  ;;  %v1644_v44 = vld [vmem:[%s17189_s0 + $0xe50] sm:$0xff] }
 0x423   : > { %8118 = vmatpush1.bf16.msra.mxu1 %v14487_v32  ;;  %v7774_v43 = vpop.f32.mrb[20].mxu0  ;;  %v1520_v32 = vld [vmem:[%s17189_s0 + $0xa70] sm:$0xff] }
 0x424   : > { %8119 = vmatprep.subr.bf16.mxu1 %v14496_v29  ;;  %v7775_v55 = vadd.f32 %v7774_v43, %v18017_v17  ;;  %v7776_v57 = vpop.f32.mrb[21].mxu0  ;;  %v14503_v17 = vcombine.low %v1620_v35, %v1624_v38  ;;  %v1648_v29 = vld [vmem:[%s17189_s0 + $0xe70] sm:$0xff]  ;;  %v14400_v35 = vcombine.high %v1516_v25, %v1520_v32 }
 0x425   : > { %v7815_v56 = vpop.f32.mrb[20].mxu1  ;;  %v7777_v14 = vadd.f32 %v7776_v57, %v18019_v36  ;;  %v7778_v8 = vpop.f32.mrb[22].mxu0  ;;  %8079 = vmatpush1.bf16.msra.mxu0 %v14367_v40  ;;  %v14528_v38 = vcombine.high %v1644_v44, %v1648_v29  ;;  %v1524_v40 = vld [vmem:[%s17189_s0 + $0xa90] sm:$0xff]  ;;  %v14527_v47 = vcombine.low %v1644_v44, %v1648_v29 }
 0x426   : > { %v7817_v3 = vpop.f32.mrb[21].mxu1  ;;  %v18091_v54 = vadd.f32 %v7815_v56, %v7775_v55  ;;  %v7779_v5 = vpop.f32.mrb[23].mxu0  ;;  %8080 = vmatprep.subr.bf16.mxu0 %v14376_v2  ;;  %v1652_v2 = vld [vmem:[%s17189_s0 + $0xe90] sm:$0xff] }
 0x427   : > { %v7819_v20 = vpop.f32.mrb[22].mxu1  ;;  %8120 = vmatpush1.bf16.msra.mxu1 %v14495_v39  ;;  %v18093_v0 = vadd.f32 %v7817_v3, %v7777_v14  ;;  %v1528_v39 = vld [vmem:[%s17189_s0 + $0xab0] sm:$0xff] }
 0x428   : > { %v7820_v36 = vpop.f32.mrb[23].mxu1  ;;  %8121 = vmatprep.subr.bf16.mxu1 %v14504_v46  ;;  %v1656_v43 = vld [vmem:[%s17189_s0 + $0xeb0] sm:$0xff]  ;;  %v14399_v46 = vcombine.low %v1516_v25, %v1520_v32  ;;  %v14408_v48 = vcombine.high %v1524_v40, %v1528_v39  ;;  %v14407_v14 = vcombine.low %v1524_v40, %v1528_v39 }
 0x429   : > { %8081 = vmatpush1.bf16.msra.mxu0 %v14375_v53  ;;  %v14536_v55 = vcombine.high %v1652_v2, %v1656_v43  ;;  %v1532_v56 = vld [vmem:[%s17189_s0 + $0xad0] sm:$0xff]  ;;  %v14535_v3 = vcombine.low %v1652_v2, %v1656_v43  ;;  %v14544_v53 = vcombine.high %v1660_v62, %v1664_v1 }
 0x42a   : > { %8082 = vmatprep.subr.bf16.mxu0 %v14384_v9  ;;  %v1536_v57 = vld [vmem:[%s17189_s0 + $0xaf0] sm:$0xff] }
 0x42b   : > { %8122 = vmatpush1.bf16.msra.mxu1 %v14503_v17  ;;  %v14416_v8 = vcombine.high %v1532_v56, %v1536_v57  ;;  %v1540_v20 = vld [vmem:[%s17189_s0 + $0xb10] sm:$0xff]  ;;  %v14415_v36 = vcombine.low %v1532_v56, %v1536_v57 }
 0x42c   : > { %8123 = vmatprep.subr.bf16.mxu1 %v14512_v11  ;;  %v1544_v5 = vld [vmem:[%s17189_s0 + $0xb30] sm:$0xff]  ;;  %v14543_v11 = vcombine.low %v1660_v62, %v1664_v1 }
 0x42d   : > { %8083 = vmatpush1.bf16.msra.mxu0 %v14383_v49  ;;  %v1668_v17 = vld [vmem:[%s17189_s0 + $0xf10] sm:$0xff]  ;;  %v14424_v12 = vcombine.high %v1540_v20, %v1544_v5 }
 0x42e   : > { %8084 = vmatprep.subr.bf16.mxu0 %v14392_v21  ;;  %v1672_v9 = vld [vmem:[%s17189_s0 + $0xf30] sm:$0xff]  ;;  %v14423_v21 = vcombine.low %v1540_v20, %v1544_v5 }
 0x42f   : > { %8124 = vmatpush1.bf16.msra.mxu1 %v14511_v41  ;;  %v14552_v13 = vcombine.high %v1668_v17, %v1672_v9  ;;  %v1548_v42 = vld [vmem:[%s17189_s0 + $0xb50] sm:$0xff] }
 0x430   : > { %8125 = vmatprep.subr.bf16.mxu1 %v14520_v24  ;;  %v1552_v16 = vld [vmem:[%s17189_s0 + $0xb70] sm:$0xff]  ;;  %v14551_v24 = vcombine.low %v1668_v17, %v1672_v9 }
 0x431   : > { %8085 = vmatpush1.bf16.msra.mxu0 %v14391_v45  ;;  %v1676_v49 = vld [vmem:[%s17189_s0 + $0xf50] sm:$0xff]  ;;  %v14432_v25 = vcombine.high %v1548_v42, %v1552_v16 }
 0x432   : > { %8086 = vmatprep.subr.bf16.mxu0 %v14400_v35  ;;  %v1680_v41 = vld [vmem:[%s17189_s0 + $0xf70] sm:$0xff]  ;;  %v14431_v35 = vcombine.low %v1548_v42, %v1552_v16 }
 0x433   : > { %8126 = vmatpush1.bf16.msra.mxu1 %v14519_v37  ;;  %v14560_v32 = vcombine.high %v1676_v49, %v1680_v41  ;;  %v1556_v44 = vld [vmem:[%s17189_s0 + $0xb90] sm:$0xff] }
 0x434   : > { %8127 = vmatprep.subr.bf16.mxu1 %v14528_v38  ;;  %v1560_v29 = vld [vmem:[%s17189_s0 + $0xbb0] sm:$0xff]  ;;  %v14559_v38 = vcombine.low %v1676_v49, %v1680_v41 }
 0x435   : > { %8087 = vmatpush1.bf16.msra.mxu0 %v14399_v46  ;;  %v1684_v45 = vld [vmem:[%s17189_s0 + $0xf90] sm:$0xff]  ;;  %v14440_v40 = vcombine.high %v1556_v44, %v1560_v29 }
 0x436   : > { %8088 = vmatprep.subr.bf16.mxu0 %v14408_v48  ;;  %v1688_v37 = vld [vmem:[%s17189_s0 + $0xfb0] sm:$0xff]  ;;  %v14439_v48 = vcombine.low %v1556_v44, %v1560_v29 }
 0x437   : > { %8128 = vmatpush1.bf16.msra.mxu1 %v14527_v47  ;;  %v14568_v39 = vcombine.high %v1684_v45, %v1688_v37  ;;  %v1564_v2 = vld [vmem:[%s17189_s0 + $0xbd0] sm:$0xff] }
 0x438   : > { %8129 = vmatprep.subr.bf16.mxu1 %v14536_v55  ;;  %v1568_v43 = vld [vmem:[%s17189_s0 + $0xbf0] sm:$0xff]  ;;  %v14567_v55 = vcombine.low %v1684_v45, %v1688_v37 }
 0x439   : > { %8089 = vmatpush1.bf16.msra.mxu0 %v14407_v14  ;;  %v1692_v46 = vld [vmem:[%s17189_s0 + $0xfd0] sm:$0xff]  ;;  %v14448_v56 = vcombine.high %v1564_v2, %v1568_v43 }
 0x43a   : > { %8090 = vmatprep.subr.bf16.mxu0 %v14416_v8  ;;  %v1696_v47 = vld [vmem:[%s17189_s0 + $0xff0] sm:$0xff]  ;;  %v14447_v8 = vcombine.low %v1564_v2, %v1568_v43 }
 0x43b   : > { %8130 = vmatpush1.bf16.msra.mxu1 %v14535_v3  ;;  %v14576_v57 = vcombine.high %v1692_v46, %v1696_v47  ;;  %v1700_v62 = vld [vmem:[%s17189_s0 + $0x1010] sm:$0xff] }
 0x43c   : > { %8131 = vmatprep.subr.bf16.mxu1 %v14544_v53  ;;  %v1704_v1 = vld [vmem:[%s17189_s0 + $0x1030] sm:$0xff]  ;;  %v14575_v53 = vcombine.low %v1692_v46, %v1696_v47 }
 0x43d   : > { %8091 = vmatpush1.bf16.msra.mxu0 %v14415_v36  ;;  %v1828_v14 = vld [vmem:[%s17189_s0 + $0x1410] sm:$0xff]  ;;  %v14584_v20 = vcombine.high %v1700_v62, %v1704_v1 }
 0x43e   : > { %8092 = vmatprep.subr.bf16.mxu0 %v14424_v12  ;;  %v1832_v3 = vld [vmem:[%s17189_s0 + $0x1430] sm:$0xff]  ;;  %v14583_v12 = vcombine.low %v1700_v62, %v1704_v1 }
 0x43f   : > { %8132 = vmatpush1.bf16.msra.mxu1 %v14543_v11  ;;  %v14712_v5 = vcombine.high %v1828_v14, %v1832_v3  ;;  %v1708_v17 = vld [vmem:[%s17189_s0 + $0x1050] sm:$0xff] }
 0x440   : > { %8133 = vmatprep.subr.bf16.mxu1 %v14552_v13  ;;  %v1712_v9 = vld [vmem:[%s17189_s0 + $0x1070] sm:$0xff]  ;;  %v14711_v13 = vcombine.low %v1828_v14, %v1832_v3 }
 0x441   : > { %8093 = vmatpush1.bf16.msra.mxu0 %v14423_v21  ;;  %v1836_v36 = vld [vmem:[%s17189_s0 + $0x1450] sm:$0xff]  ;;  %v14592_v42 = vcombine.high %v1708_v17, %v1712_v9 }
 0x442   : > { %8094 = vmatprep.subr.bf16.mxu0 %v14432_v25  ;;  %v1840_v11 = vld [vmem:[%s17189_s0 + $0x1470] sm:$0xff]  ;;  %v14591_v25 = vcombine.low %v1708_v17, %v1712_v9 }
 0x443   : > { %8134 = vmatpush1.bf16.msra.mxu1 %v14551_v24  ;;  %v14720_v16 = vcombine.high %v1836_v36, %v1840_v11  ;;  %v1716_v49 = vld [vmem:[%s17189_s0 + $0x1090] sm:$0xff] }
 0x444   : > { %8135 = vmatprep.subr.bf16.mxu1 %v14560_v32  ;;  %v1720_v41 = vld [vmem:[%s17189_s0 + $0x10b0] sm:$0xff]  ;;  %v14719_v32 = vcombine.low %v1836_v36, %v1840_v11 }
 0x445   : > { %8095 = vmatpush1.bf16.msra.mxu0 %v14431_v35  ;;  %v1844_v21 = vld [vmem:[%s17189_s0 + $0x1490] sm:$0xff]  ;;  %v14600_v44 = vcombine.high %v1716_v49, %v1720_v41 }
 0x446   : > { %8096 = vmatprep.subr.bf16.mxu0 %v14440_v40  ;;  %v1848_v24 = vld [vmem:[%s17189_s0 + $0x14b0] sm:$0xff]  ;;  %v14599_v40 = vcombine.low %v1716_v49, %v1720_v41 }
 0x447   : > { %8136 = vmatpush1.bf16.msra.mxu1 %v14559_v38  ;;  %v14728_v29 = vcombine.high %v1844_v21, %v1848_v24  ;;  %v1724_v45 = vld [vmem:[%s17189_s0 + $0x10d0] sm:$0xff] }
 0x448   : > { %8137 = vmatprep.subr.bf16.mxu1 %v14568_v39  ;;  %v1728_v37 = vld [vmem:[%s17189_s0 + $0x10f0] sm:$0xff]  ;;  %v14727_v39 = vcombine.low %v1844_v21, %v1848_v24 }
 0x449   : > { %8097 = vmatpush1.bf16.msra.mxu0 %v14439_v48  ;;  %v1852_v35 = vld [vmem:[%s17189_s0 + $0x14d0] sm:$0xff]  ;;  %v14608_v2 = vcombine.high %v1724_v45, %v1728_v37 }
 0x44a   : > { %8098 = vmatprep.subr.bf16.mxu0 %v14448_v56  ;;  %v1856_v38 = vld [vmem:[%s17189_s0 + $0x14f0] sm:$0xff]  ;;  %v14607_v56 = vcombine.low %v1724_v45, %v1728_v37 }
 0x44b   : > { %8138 = vmatpush1.bf16.msra.mxu1 %v14567_v55  ;;  %v14736_v43 = vcombine.high %v1852_v35, %v1856_v38  ;;  %v1732_v46 = vld [vmem:[%s17189_s0 + $0x1110] sm:$0xff] }
 0x44c   : > { %8139 = vmatprep.subr.bf16.mxu1 %v14576_v57  ;;  %v1736_v47 = vld [vmem:[%s17189_s0 + $0x1130] sm:$0xff]  ;;  %v14735_v57 = vcombine.low %v1852_v35, %v1856_v38 }
 0x44d   : > { %8099 = vmatpush1.bf16.msra.mxu0 %v14447_v8  ;;  %v1860_v48 = vld [vmem:[%s17189_s0 + $0x1510] sm:$0xff]  ;;  %v14616_v62 = vcombine.high %v1732_v46, %v1736_v47 }
 0x44e   : > { %8150 = vmatprep.subr.bf16.mxu0 %v14584_v20  ;;  %v1864_v55 = vld [vmem:[%s17189_s0 + $0x1530] sm:$0xff]  ;;  %v14615_v20 = vcombine.low %v1732_v46, %v1736_v47 }
 0x44f   : > { %8140 = vmatpush1.bf16.msra.mxu1 %v14575_v53  ;;  %v14744_v1 = vcombine.high %v1860_v48, %v1864_v55  ;;  %v1740_v14 = vld [vmem:[%s17189_s0 + $0x1150] sm:$0xff] }
 0x450   : > { %8191 = vmatprep.subr.bf16.mxu1 %v14712_v5  ;;  %8101 = vmatmul.mubr.bf16.vlgmr.msra.gmra.mrb[36].mxu0 %v17523_v60  ;;  %v1744_v3 = vld [vmem:[%s17189_s0 + $0x1170] sm:$0xff]  ;;  %v14743_v5 = vcombine.low %v1860_v48, %v1864_v55 }
 0x451   : > { %8151 = vmatpush1.bf16.msra.mxu0 %v14583_v12  ;;  %8182 = vmatprep.mubr.bf16.mxu0 %v17535_v4  ;;  %v1868_v8 = vld [vmem:[%s17189_s0 + $0x1550] sm:$0xff]  ;;  %v14624_v17 = vcombine.high %v1740_v14, %v1744_v3 }
 0x452   : > { %8142 = vmatmul.mubr.bf16.vlgmr.msra.gmra.mrb[36].mxu1 %v17529_v50  ;;  %8152 = vmatprep.subr.bf16.mxu0 %v14592_v42  ;;  %v1872_v53 = vld [vmem:[%s17189_s0 + $0x1570] sm:$0xff]  ;;  %v14623_v42 = vcombine.low %v1740_v14, %v1744_v3 }
 0x453   : > { %8192 = vmatpush1.bf16.msra.mxu1 %v14711_v13  ;;  %8223 = vmatprep.mubr.bf16.mxu1 %v17540_v10  ;;  %v14752_v9 = vcombine.high %v1868_v8, %v1872_v53  ;;  %v1748_v36 = vld [vmem:[%s17189_s0 + $0x1190] sm:$0xff] }
 0x454   : > { %8193 = vmatprep.subr.bf16.mxu1 %v14720_v16  ;;  %v1752_v11 = vld [vmem:[%s17189_s0 + $0x11b0] sm:$0xff]  ;;  %v14751_v16 = vcombine.low %v1868_v8, %v1872_v53 }
 0x455   : > { %8153 = vmatpush1.bf16.msra.mxu0 %v14591_v25  ;;  %v1876_v12 = vld [vmem:[%s17189_s0 + $0x1590] sm:$0xff]  ;;  %v14632_v49 = vcombine.high %v1748_v36, %v1752_v11 }
 0x456   : > { %8154 = vmatprep.subr.bf16.mxu0 %v14600_v44  ;;  %v1880_v13 = vld [vmem:[%s17189_s0 + $0x15b0] sm:$0xff] }
 0x457   : > { %8194 = vmatpush1.bf16.msra.mxu1 %v14719_v32  ;;  %v14760_v21 = vcombine.high %v1876_v12, %v1880_v13  ;;  %v1756_v24 = vld [vmem:[%s17189_s0 + $0x11d0] sm:$0xff] }
 0x458   : > { %8195 = vmatprep.subr.bf16.mxu1 %v14728_v29  ;;  %v1760_v25 = vld [vmem:[%s17189_s0 + $0x11f0] sm:$0xff] }
 0x459   : > { %8155 = vmatpush1.bf16.msra.mxu0 %v14599_v40  ;;  %v1884_v45 = vld [vmem:[%s17189_s0 + $0x15d0] sm:$0xff]  ;;  %v14640_v47 = vcombine.high %v1756_v24, %v1760_v25  ;;  %v14639_v14 = vcombine.low %v1756_v24, %v1760_v25 }
 0x45a   : > { %8156 = vmatprep.subr.bf16.mxu0 %v14608_v2  ;;  %v1888_v37 = vld [vmem:[%s17189_s0 + $0x15f0] sm:$0xff] }
 0x45b   : > { %8196 = vmatpush1.bf16.msra.mxu1 %v14727_v39  ;;  %v14631_v39 = vcombine.low %v1748_v36, %v1752_v11  ;;  %v14768_v55 = vcombine.high %v1884_v45, %v1888_v37  ;;  %v14767_v3 = vcombine.low %v1884_v45, %v1888_v37  ;;  %v1916_v45 = vld [vmem:[%s17189_s0 + $0x16d0] sm:$0xff] }
 0x45c   : > { %8197 = vmatprep.subr.bf16.mxu1 %v14736_v43  ;;  %v1920_v37 = vld [vmem:[%s17189_s0 + $0x16f0] sm:$0xff] }
 0x45d   : > { %8157 = vmatpush1.bf16.msra.mxu0 %v14607_v56  ;;  %v1764_v56 = vld [vmem:[%s17189_s0 + $0x1210] sm:$0xff] }
 0x45e   : > { %8158 = vmatprep.subr.bf16.mxu0 %v14616_v62  ;;  %v1892_v62 = vld [vmem:[%s17189_s0 + $0x1610] sm:$0xff] }
 0x45f   : > { %8198 = vmatpush1.bf16.msra.mxu1 %v14735_v57  ;;  %v1768_v57 = vld [vmem:[%s17189_s0 + $0x1230] sm:$0xff] }
 0x460   : > { %8199 = vmatprep.subr.bf16.mxu1 %v14744_v1  ;;  %v1896_v1 = vld [vmem:[%s17189_s0 + $0x1630] sm:$0xff]  ;;  %v14648_v8 = vcombine.high %v1764_v56, %v1768_v57  ;;  %v14647_v36 = vcombine.low %v1764_v56, %v1768_v57 }
 0x461   : > { %8159 = vmatpush1.bf16.msra.mxu0 %v14615_v20  ;;  %v14776_v53 = vcombine.high %v1892_v62, %v1896_v1  ;;  %v1772_v20 = vld [vmem:[%s17189_s0 + $0x1250] sm:$0xff]  ;;  %v14775_v11 = vcombine.low %v1892_v62, %v1896_v1 }
 0x462   : > { %8160 = vmatprep.subr.bf16.mxu0 %v14624_v17  ;;  %v1900_v17 = vld [vmem:[%s17189_s0 + $0x1650] sm:$0xff] }
 0x463   : > { %8200 = vmatpush1.bf16.msra.mxu1 %v14743_v5  ;;  %v7856_v41 = vpop.f32.mrb[24].mxu0  ;;  %v1776_v5 = vld [vmem:[%s17189_s0 + $0x1270] sm:$0xff] }
 0x464   : > { %8201 = vmatprep.subr.bf16.mxu1 %v14752_v9  ;;  %v7857_v32 = vadd.f32 %v7856_v41, %v18091_v54  ;;  %v7858_v29 = vpop.f32.mrb[25].mxu0  ;;  %v14759_v54 = vcombine.low %v1876_v12, %v1880_v13  ;;  %v1904_v9 = vld [vmem:[%s17189_s0 + $0x1670] sm:$0xff]  ;;  %v14656_v12 = vcombine.high %v1772_v20, %v1776_v5 }
 0x465   : > { %v7897_v44 = vpop.f32.mrb[24].mxu1  ;;  %v7859_v35 = vadd.f32 %v7858_v29, %v18093_v0  ;;  %v7860_v40 = vpop.f32.mrb[26].mxu0  ;;  %8161 = vmatpush1.bf16.msra.mxu0 %v14623_v42  ;;  %v14784_v13 = vcombine.high %v1900_v17, %v1904_v9  ;;  %v1780_v42 = vld [vmem:[%s17189_s0 + $0x1290] sm:$0xff]  ;;  %v14783_v24 = vcombine.low %v1900_v17, %v1904_v9 }
 0x466   : > { %v7899_v38 = vpop.f32.mrb[25].mxu1  ;;  %v18165_v2 = vadd.f32 %v7897_v44, %v7857_v32  ;;  %v7861_v46 = vpop.f32.mrb[27].mxu0  ;;  %8162 = vmatprep.subr.bf16.mxu0 %v14632_v49  ;;  %v1908_v49 = vld [vmem:[%s17189_s0 + $0x1690] sm:$0xff] }
 0x467   : > { %v7901_v43 = vpop.f32.mrb[26].mxu1  ;;  %8202 = vmatpush1.bf16.msra.mxu1 %v14751_v16  ;;  %v18167_v48 = vadd.f32 %v7899_v38, %v7859_v35  ;;  %v1784_v16 = vld [vmem:[%s17189_s0 + $0x12b0] sm:$0xff] }
 0x468   : > { %v7902_v0 = vpop.f32.mrb[27].mxu1  ;;  %8203 = vmatprep.subr.bf16.mxu1 %v14760_v21  ;;  %v1912_v41 = vld [vmem:[%s17189_s0 + $0x16b0] sm:$0xff]  ;;  %v14655_v21 = vcombine.low %v1772_v20, %v1776_v5  ;;  %v14664_v25 = vcombine.high %v1780_v42, %v1784_v16  ;;  %v14663_v35 = vcombine.low %v1780_v42, %v1784_v16 }
 0x469   : > { %8163 = vmatpush1.bf16.msra.mxu0 %v14631_v39  ;;  %v14792_v32 = vcombine.high %v1908_v49, %v1912_v41  ;;  %v1788_v44 = vld [vmem:[%s17189_s0 + $0x12d0] sm:$0xff]  ;;  %v14791_v38 = vcombine.low %v1908_v49, %v1912_v41  ;;  %v14800_v39 = vcombine.high %v1916_v45, %v1920_v37 }
 0x46a   : > { %8164 = vmatprep.subr.bf16.mxu0 %v14640_v47  ;;  %v1792_v29 = vld [vmem:[%s17189_s0 + $0x12f0] sm:$0xff] }
 0x46b   : > { %8204 = vmatpush1.bf16.msra.mxu1 %v14759_v54  ;;  %v14672_v40 = vcombine.high %v1788_v44, %v1792_v29  ;;  %v1796_v43 = vld [vmem:[%s17189_s0 + $0x1310] sm:$0xff]  ;;  %v14671_v0 = vcombine.low %v1788_v44, %v1792_v29 }
 0x46c   : > { %8205 = vmatprep.subr.bf16.mxu1 %v14768_v55  ;;  %v1800_v46 = vld [vmem:[%s17189_s0 + $0x1330] sm:$0xff]  ;;  %v14799_v55 = vcombine.low %v1916_v45, %v1920_v37 }
 0x46d   : > { %8165 = vmatpush1.bf16.msra.mxu0 %v14639_v14  ;;  %v1924_v54 = vld [vmem:[%s17189_s0 + $0x1710] sm:$0xff]  ;;  %v14680_v56 = vcombine.high %v1796_v43, %v1800_v46 }
 0x46e   : > { %8166 = vmatprep.subr.bf16.mxu0 %v14648_v8  ;;  %v1928_v47 = vld [vmem:[%s17189_s0 + $0x1730] sm:$0xff]  ;;  %v14679_v8 = vcombine.low %v1796_v43, %v1800_v46 }
 0x46f   : > { %8206 = vmatpush1.bf16.msra.mxu1 %v14767_v3  ;;  %v14808_v57 = vcombine.high %v1924_v54, %v1928_v47  ;;  %v1804_v62 = vld [vmem:[%s17189_s0 + $0x1350] sm:$0xff] }
 0x470   : > { %8207 = vmatprep.subr.bf16.mxu1 %v14776_v53  ;;  %v1808_v1 = vld [vmem:[%s17189_s0 + $0x1370] sm:$0xff]  ;;  %v14807_v53 = vcombine.low %v1924_v54, %v1928_v47 }
 0x471   : > { %8167 = vmatpush1.bf16.msra.mxu0 %v14647_v36  ;;  %v1932_v14 = vld [vmem:[%s17189_s0 + $0x1750] sm:$0xff]  ;;  %v14688_v20 = vcombine.high %v1804_v62, %v1808_v1 }
 0x472   : > { %8168 = vmatprep.subr.bf16.mxu0 %v14656_v12  ;;  %v1936_v3 = vld [vmem:[%s17189_s0 + $0x1770] sm:$0xff]  ;;  %v14687_v12 = vcombine.low %v1804_v62, %v1808_v1 }
 0x473   : > { %8208 = vmatpush1.bf16.msra.mxu1 %v14775_v11  ;;  %v14816_v5 = vcombine.high %v1932_v14, %v1936_v3  ;;  %v1812_v17 = vld [vmem:[%s17189_s0 + $0x1390] sm:$0xff] }
 0x474   : > { %8209 = vmatprep.subr.bf16.mxu1 %v14784_v13  ;;  %v1816_v9 = vld [vmem:[%s17189_s0 + $0x13b0] sm:$0xff]  ;;  %v14815_v13 = vcombine.low %v1932_v14, %v1936_v3 }
 0x475   : > { %8169 = vmatpush1.bf16.msra.mxu0 %v14655_v21  ;;  %v1940_v36 = vld [vmem:[%s17189_s0 + $0x1790] sm:$0xff]  ;;  %v14696_v42 = vcombine.high %v1812_v17, %v1816_v9 }
 0x476   : > { %8170 = vmatprep.subr.bf16.mxu0 %v14664_v25  ;;  %v1944_v11 = vld [vmem:[%s17189_s0 + $0x17b0] sm:$0xff]  ;;  %v14695_v25 = vcombine.low %v1812_v17, %v1816_v9 }
 0x477   : > { %8210 = vmatpush1.bf16.msra.mxu1 %v14783_v24  ;;  %v14824_v16 = vcombine.high %v1940_v36, %v1944_v11  ;;  %v1820_v49 = vld [vmem:[%s17189_s0 + $0x13d0] sm:$0xff] }
 0x478   : > { %8211 = vmatprep.subr.bf16.mxu1 %v14792_v32  ;;  %v1824_v41 = vld [vmem:[%s17189_s0 + $0x13f0] sm:$0xff]  ;;  %v14823_v32 = vcombine.low %v1940_v36, %v1944_v11 }
 0x479   : > { %8171 = vmatpush1.bf16.msra.mxu0 %v14663_v35  ;;  %v1948_v21 = vld [vmem:[%s17189_s0 + $0x17d0] sm:$0xff]  ;;  %v14704_v44 = vcombine.high %v1820_v49, %v1824_v41 }
 0x47a   : > { %8172 = vmatprep.subr.bf16.mxu0 %v14672_v40  ;;  %v1952_v24 = vld [vmem:[%s17189_s0 + $0x17f0] sm:$0xff]  ;;  %v14703_v40 = vcombine.low %v1820_v49, %v1824_v41 }
 0x47b   : > { %8212 = vmatpush1.bf16.msra.mxu1 %v14791_v38  ;;  %v14832_v29 = vcombine.high %v1948_v21, %v1952_v24  ;;  %v1956_v45 = vld [vmem:[%s17189_s0 + $0x1810] sm:$0xff] }
 0x47c   : > { %8213 = vmatprep.subr.bf16.mxu1 %v14800_v39  ;;  %v1960_v37 = vld [vmem:[%s17189_s0 + $0x1830] sm:$0xff]  ;;  %v14831_v39 = vcombine.low %v1948_v21, %v1952_v24 }
 0x47d   : > { %8173 = vmatpush1.bf16.msra.mxu0 %v14671_v0  ;;  %v2084_v35 = vld [vmem:[%s17189_s0 + $0x1c10] sm:$0xff]  ;;  %v14840_v43 = vcombine.high %v1956_v45, %v1960_v37 }
 0x47e   : > { %8174 = vmatprep.subr.bf16.mxu0 %v14680_v56  ;;  %v2088_v38 = vld [vmem:[%s17189_s0 + $0x1c30] sm:$0xff]  ;;  %v14839_v56 = vcombine.low %v1956_v45, %v1960_v37 }
 0x47f   : > { %8214 = vmatpush1.bf16.msra.mxu1 %v14799_v55  ;;  %v14968_v46 = vcombine.high %v2084_v35, %v2088_v38  ;;  %v1964_v54 = vld [vmem:[%s17189_s0 + $0x1850] sm:$0xff] }
 0x480   : > { %8215 = vmatprep.subr.bf16.mxu1 %v14808_v57  ;;  %v1968_v47 = vld [vmem:[%s17189_s0 + $0x1870] sm:$0xff]  ;;  %v14967_v57 = vcombine.low %v2084_v35, %v2088_v38 }
 0x481   : > { %8175 = vmatpush1.bf16.msra.mxu0 %v14679_v8  ;;  %v2092_v0 = vld [vmem:[%s17189_s0 + $0x1c50] sm:$0xff]  ;;  %v14848_v62 = vcombine.high %v1964_v54, %v1968_v47 }
 0x482   : > { %8176 = vmatprep.subr.bf16.mxu0 %v14688_v20  ;;  %v2096_v55 = vld [vmem:[%s17189_s0 + $0x1c70] sm:$0xff]  ;;  %v14847_v20 = vcombine.low %v1964_v54, %v1968_v47 }
 0x483   : > { %8216 = vmatpush1.bf16.msra.mxu1 %v14807_v53  ;;  %v14976_v1 = vcombine.high %v2092_v0, %v2096_v55  ;;  %v1972_v14 = vld [vmem:[%s17189_s0 + $0x1890] sm:$0xff] }
 0x484   : > { %8217 = vmatprep.subr.bf16.mxu1 %v14816_v5  ;;  %v1976_v3 = vld [vmem:[%s17189_s0 + $0x18b0] sm:$0xff]  ;;  %v14975_v5 = vcombine.low %v2092_v0, %v2096_v55 }
 0x485   : > { %8177 = vmatpush1.bf16.msra.mxu0 %v14687_v12  ;;  %v2100_v8 = vld [vmem:[%s17189_s0 + $0x1c90] sm:$0xff]  ;;  %v14856_v17 = vcombine.high %v1972_v14, %v1976_v3 }
 0x486   : > { %8178 = vmatprep.subr.bf16.mxu0 %v14696_v42  ;;  %v2104_v53 = vld [vmem:[%s17189_s0 + $0x1cb0] sm:$0xff]  ;;  %v14855_v42 = vcombine.low %v1972_v14, %v1976_v3 }
 0x487   : > { %8218 = vmatpush1.bf16.msra.mxu1 %v14815_v13  ;;  %v14984_v9 = vcombine.high %v2100_v8, %v2104_v53  ;;  %v1980_v36 = vld [vmem:[%s17189_s0 + $0x18d0] sm:$0xff] }
 0x488   : > { %8219 = vmatprep.subr.bf16.mxu1 %v14824_v16  ;;  %v1984_v11 = vld [vmem:[%s17189_s0 + $0x18f0] sm:$0xff]  ;;  %v14983_v16 = vcombine.low %v2100_v8, %v2104_v53 }
 0x489   : > { %8179 = vmatpush1.bf16.msra.mxu0 %v14695_v25  ;;  %v2108_v12 = vld [vmem:[%s17189_s0 + $0x1cd0] sm:$0xff]  ;;  %v14864_v49 = vcombine.high %v1980_v36, %v1984_v11 }
 0x48a   : > { %8180 = vmatprep.subr.bf16.mxu0 %v14704_v44  ;;  %v2112_v13 = vld [vmem:[%s17189_s0 + $0x1cf0] sm:$0xff]  ;;  %v14863_v44 = vcombine.low %v1980_v36, %v1984_v11 }
 0x48b   : > { %8220 = vmatpush1.bf16.msra.mxu1 %v14823_v32  ;;  %v14992_v41 = vcombine.high %v2108_v12, %v2112_v13  ;;  %v1988_v21 = vld [vmem:[%s17189_s0 + $0x1910] sm:$0xff] }
 0x48c   : > { %8221 = vmatprep.subr.bf16.mxu1 %v14832_v29  ;;  %v1992_v24 = vld [vmem:[%s17189_s0 + $0x1930] sm:$0xff]  ;;  %v14991_v29 = vcombine.low %v2108_v12, %v2112_v13 }
 0x48d   : > { %8181 = vmatpush1.bf16.msra.mxu0 %v14703_v40  ;;  %v2116_v25 = vld [vmem:[%s17189_s0 + $0x1d10] sm:$0xff]  ;;  %v14872_v45 = vcombine.high %v1988_v21, %v1992_v24 }
 0x48e   : > { %8232 = vmatprep.subr.bf16.mxu0 %v14840_v43  ;;  %v2120_v32 = vld [vmem:[%s17189_s0 + $0x1d30] sm:$0xff]  ;;  %v14871_v43 = vcombine.low %v1988_v21, %v1992_v24  ;;  %v1165_v21 = vld [vmem:[#allocation2 + $0x18] sm:$0xff] }
 0x48f   : > { %8222 = vmatpush1.bf16.msra.mxu1 %v14831_v39  ;;  %v15000_v37 = vcombine.high %v2116_v25, %v2120_v32  ;;  %v1996_v35 = vld [vmem:[%s17189_s0 + $0x1950] sm:$0xff] }
 0x490   : > { %8273 = vmatprep.subr.bf16.mxu1 %v14968_v46  ;;  %8183 = vmatmul.mubr.bf16.vlgmr.msra.gmra.mrb[40].mxu0 %v17614_v15  ;;  %v2000_v38 = vld [vmem:[%s17189_s0 + $0x1970] sm:$0xff]  ;;  %v14999_v46 = vcombine.low %v2116_v25, %v2120_v32 }
 0x491   : > { %8233 = vmatpush1.bf16.msra.mxu0 %v14839_v56  ;;  %8264 = vmatprep.mubr.bf16.mxu0 %v17623_v26  ;;  %v2124_v40 = vld [vmem:[%s17189_s0 + $0x1d50] sm:$0xff]  ;;  %v14880_v54 = vcombine.high %v1996_v35, %v2000_v38 }
 0x492   : > { %8224 = vmatmul.mubr.bf16.vlgmr.msra.gmra.mrb[40].mxu1 %v17619_v19  ;;  %8234 = vmatprep.subr.bf16.mxu0 %v14848_v62  ;;  %v2128_v39 = vld [vmem:[%s17189_s0 + $0x1d70] sm:$0xff]  ;;  %v14879_v62 = vcombine.low %v1996_v35, %v2000_v38 }
 0x493   : > { %8274 = vmatpush1.bf16.msra.mxu1 %v14967_v57  ;;  %8305 = vmatprep.mubr.bf16.mxu1 %v17628_v30  ;;  %v15008_v47 = vcombine.high %v2124_v40, %v2128_v39  ;;  %v2004_v0 = vld [vmem:[%s17189_s0 + $0x1990] sm:$0xff] }
 0x494   : > { %8275 = vmatprep.subr.bf16.mxu1 %v14976_v1  ;;  %v2008_v55 = vld [vmem:[%s17189_s0 + $0x19b0] sm:$0xff]  ;;  %v15007_v1 = vcombine.low %v2124_v40, %v2128_v39 }
 0x495   : > { %8235 = vmatpush1.bf16.msra.mxu0 %v14847_v20  ;;  %v2132_v56 = vld [vmem:[%s17189_s0 + $0x1d90] sm:$0xff]  ;;  %v14888_v14 = vcombine.high %v2004_v0, %v2008_v55 }
 0x496   : > { %8236 = vmatprep.subr.bf16.mxu0 %v14856_v17  ;;  %v2136_v57 = vld [vmem:[%s17189_s0 + $0x1db0] sm:$0xff] }
 0x497   : > { %8276 = vmatpush1.bf16.msra.mxu1 %v14975_v5  ;;  %v15016_v8 = vcombine.high %v2132_v56, %v2136_v57  ;;  %v2012_v53 = vld [vmem:[%s17189_s0 + $0x19d0] sm:$0xff]  ;;  %v15015_v25 = vcombine.low %v2132_v56, %v2136_v57 }
 0x498   : > { %8277 = vmatprep.subr.bf16.mxu1 %v14984_v9  ;;  %v2016_v20 = vld [vmem:[%s17189_s0 + $0x19f0] sm:$0xff] }
 0x499   : > { %8237 = vmatpush1.bf16.msra.mxu0 %v14855_v42  ;;  %v2140_v36 = vld [vmem:[%s17189_s0 + $0x1dd0] sm:$0xff]  ;;  %v14896_v32 = vcombine.high %v2012_v53, %v2016_v20 }
 0x49a   : > { %8238 = vmatprep.subr.bf16.mxu0 %v14864_v49  ;;  %v2144_v11 = vld [vmem:[%s17189_s0 + $0x1df0] sm:$0xff]  ;;  %v14887_v49 = vcombine.low %v2004_v0, %v2008_v55 }
 0x49b   : > { %8278 = vmatpush1.bf16.msra.mxu1 %v14983_v16  ;;  %v1164_v12 = vld [vmem:[#allocation2 + $0x10] sm:$0xff] }
 0x49c   : > { %8279 = vmatprep.subr.bf16.mxu1 %v14992_v41  ;;  %v2148_v38 = vld [vmem:[%s17189_s0 + $0x1e10] sm:$0xff] }
 0x49d   : > { %8239 = vmatpush1.bf16.msra.mxu0 %v14863_v44  ;;  %v2152_v40 = vld [vmem:[%s17189_s0 + $0x1e30] sm:$0xff] }
 0x49e   : > { %8240 = vmatprep.subr.bf16.mxu0 %v14872_v45  ;;  %v2020_v45 = vld [vmem:[%s17189_s0 + $0x1a10] sm:$0xff] }
 0x49f   : > { %8280 = vmatpush1.bf16.msra.mxu1 %v14991_v29  ;;  %v2028_v0 = vld [vmem:[%s17189_s0 + $0x1a50] sm:$0xff] }
 0x4a0   : > { %8281 = vmatprep.subr.bf16.mxu1 %v15000_v37  ;;  %v2024_v37 = vld [vmem:[%s17189_s0 + $0x1a30] sm:$0xff] }
 0x4a1   : > { %8241 = vmatpush1.bf16.msra.mxu0 %v14871_v43  ;;  %v14895_v43 = vcombine.low %v2012_v53, %v2016_v20  ;;  %v2032_v55 = vld [vmem:[%s17189_s0 + $0x1a70] sm:$0xff] }
 0x4a2   : > { %8242 = vmatprep.subr.bf16.mxu0 %v14880_v54  ;;  %v14904_v54 = vcombine.high %v2020_v45, %v2024_v37  ;;  %v2156_v56 = vld [vmem:[%s17189_s0 + $0x1e50] sm:$0xff] }
 0x4a3   : > { %8282 = vmatpush1.bf16.msra.mxu1 %v14999_v46  ;;  %v7938_v3 = vpop.f32.mrb[28].mxu0  ;;  %v15023_v46 = vcombine.low %v2140_v36, %v2144_v11  ;;  %v2160_v57 = vld [vmem:[%s17189_s0 + $0x1e70] sm:$0xff] }
 0x4a4   : > { %8283 = vmatprep.subr.bf16.mxu1 %v15008_v47  ;;  %v7939_v5 = vadd.f32 %v7938_v3, %v18165_v2  ;;  %v7940_v9 = vpop.f32.mrb[29].mxu0  ;;  %v15032_v47 = vcombine.high %v2148_v38, %v2152_v40  ;;  %v15040_v3 = vcombine.high %v2156_v56, %v2160_v57  ;;  %v2040_v53 = vld [vmem:[%s17189_s0 + $0x1ab0] sm:$0xff] }
 0x4a5   : > { %v7979_v17 = vpop.f32.mrb[28].mxu1  ;;  %v7941_v13 = vadd.f32 %v7940_v9, %v18167_v48  ;;  %v7942_v16 = vpop.f32.mrb[30].mxu0  ;;  %8243 = vmatpush1.bf16.msra.mxu0 %v14879_v62  ;;  %v15024_v48 = vcombine.high %v2140_v36, %v2144_v11  ;;  %v14903_v62 = vcombine.low %v2020_v45, %v2024_v37  ;;  %v2164_v20 = vld [vmem:[%s17189_s0 + $0x1e90] sm:$0xff]  ;;  %v15039_v9 = vcombine.low %v2156_v56, %v2160_v57 }
 0x4a6   : > { %v7981_v42 = vpop.f32.mrb[29].mxu1  ;;  %v7980_v41 = vadd.f32 %v7979_v17, %v7939_v5  ;;  %v7943_v2 = vpop.f32.mrb[31].mxu0  ;;  %8244 = vmatprep.subr.bf16.mxu0 %v14888_v14  ;;  %v14912_v14 = vcombine.high %v2028_v0, %v2032_v55  ;;  %v2168_v5 = vld [vmem:[%s17189_s0 + $0x1eb0] sm:$0xff]  ;;  %v14911_v17 = vcombine.low %v2028_v0, %v2032_v55 }
 0x4a7   : > { %v7983_v24 = vpop.f32.mrb[30].mxu1  ;;  %8284 = vmatpush1.bf16.msra.mxu1 %v15007_v1  ;;  %v7982_v44 = vadd.f32 %v7981_v42, %v7941_v13  ;;  %v15031_v1 = vcombine.low %v2148_v38, %v2152_v40  ;;  %v15048_v11 = vcombine.high %v2164_v20, %v2168_v5  ;;  %v2048_v13 = vld [vmem:[%s17189_s0 + $0x1af0] sm:$0xff] }
 0x4a8   : > { %v7984_v29 = vpop.f32.mrb[31].mxu1  ;;  %8285 = vmatprep.subr.bf16.mxu1 %v15016_v8  ;;  %v8644_v35 = vadd.f32 %v7980_v41, %v1164_v12  ;;  %v2036_v8 = vld [vmem:[%s17189_s0 + $0x1a90] sm:$0xff]  ;;  %v15047_v41 = vcombine.low %v2164_v20, %v2168_v5 }
 0x4a9   : > { %v8645_v39 = vadd.f32 %v7982_v44, %v1165_v21  ;;  %8245 = vmatpush1.bf16.msra.mxu0 %v14887_v49  ;;  %v14920_v36 = vcombine.high %v2036_v8, %v2040_v53  ;;  %v2044_v12 = vld [vmem:[%s17189_s0 + $0x1ad0] sm:$0xff]  ;;  %v14919_v49 = vcombine.low %v2036_v8, %v2040_v53 }
 0x4aa   : > { %8652 = vst [vmem:[#allocation2 + $0x10] sm:$0xff] %v8644_v35  ;;  %8246 = vmatprep.subr.bf16.mxu0 %v14896_v32  ;;  %v2172_v42 = vld [vmem:[%s17189_s0 + $0x1ed0] sm:$0xff]  ;;  %v14928_v21 = vcombine.high %v2044_v12, %v2048_v13  ;;  %v14927_v29 = vcombine.low %v2044_v12, %v2048_v13  ;;  %v1189_v12 = vld [vmem:[%s17189_s0 + $0x18] sm:$0xff] }
 0x4ab   : > { %8286 = vmatpush1.bf16.msra.mxu1 %v15015_v25  ;;  %8653 = vst [vmem:[#allocation2 + $0x18] sm:$0xff] %v8645_v39  ;;  %v2176_v16 = vld [vmem:[%s17189_s0 + $0x1ef0] sm:$0xff]  ;;  %v1193_v13 = vld [vmem:[%s17189_s0 + $0x38] sm:$0xff] }
 0x4ac   : > { %8287 = vmatprep.subr.bf16.mxu1 %v15024_v48  ;;  %v15056_v24 = vcombine.high %v2172_v42, %v2176_v16  ;;  %v2052_v2 = vld [vmem:[%s17189_s0 + $0x1b10] sm:$0xff]  ;;  %v15055_v48 = vcombine.low %v2172_v42, %v2176_v16  ;;  %v1317_v42 = vld [vmem:[%s17189_s0 + $0x418] sm:$0xff] }
 0x4ad   : > { %8247 = vmatpush1.bf16.msra.mxu0 %v14895_v43  ;;  %v2056_v25 = vld [vmem:[%s17189_s0 + $0x1b30] sm:$0xff]  ;;  %v1321_v16 = vld [vmem:[%s17189_s0 + $0x438] sm:$0xff] }
 0x4ae   : > { %8248 = vmatprep.subr.bf16.mxu0 %v14904_v54  ;;  %v2180_v32 = vld [vmem:[%s17189_s0 + $0x1f10] sm:$0xff]  ;;  %v14936_v45 = vcombine.high %v2052_v2, %v2056_v25  ;;  %v14935_v43 = vcombine.low %v2052_v2, %v2056_v25  ;;  %v1197_v2 = vld [vmem:[%s17189_s0 + $0x58] sm:$0xff] }
 0x4af   : > { %8288 = vmatpush1.bf16.msra.mxu1 %v15023_v46  ;;  %v2184_v44 = vld [vmem:[%s17189_s0 + $0x1f30] sm:$0xff]  ;;  %v1201_v25 = vld [vmem:[%s17189_s0 + $0x78] sm:$0xff] }
 0x4b0   : > { %8289 = vmatprep.subr.bf16.mxu1 %v15032_v47  ;;  %v15064_v37 = vcombine.high %v2180_v32, %v2184_v44  ;;  %v2060_v35 = vld [vmem:[%s17189_s0 + $0x1b50] sm:$0xff]  ;;  %v15063_v46 = vcombine.low %v2180_v32, %v2184_v44  ;;  %v1325_v32 = vld [vmem:[%s17189_s0 + $0x458] sm:$0xff] }
 0x4b1   : > { %8249 = vmatpush1.bf16.msra.mxu0 %v14903_v62  ;;  %v2064_v38 = vld [vmem:[%s17189_s0 + $0x1b70] sm:$0xff]  ;;  %v1329_v44 = vld [vmem:[%s17189_s0 + $0x478] sm:$0xff] }
 0x4b2   : > { %8250 = vmatprep.subr.bf16.mxu0 %v14912_v14  ;;  %v2188_v40 = vld [vmem:[%s17189_s0 + $0x1f50] sm:$0xff]  ;;  %v14944_v54 = vcombine.high %v2060_v35, %v2064_v38  ;;  %v14943_v62 = vcombine.low %v2060_v35, %v2064_v38  ;;  %v1205_v35 = vld [vmem:[%s17189_s0 + $0x98] sm:$0xff] }
 0x4b3   : > { %8290 = vmatpush1.bf16.msra.mxu1 %v15031_v1  ;;  %v2192_v39 = vld [vmem:[%s17189_s0 + $0x1f70] sm:$0xff]  ;;  %v1209_v38 = vld [vmem:[%s17189_s0 + $0xb8] sm:$0xff] }
 0x4b4   : > { %8291 = vmatprep.subr.bf16.mxu1 %v15040_v3  ;;  %v15072_v47 = vcombine.high %v2188_v40, %v2192_v39  ;;  %v2068_v0 = vld [vmem:[%s17189_s0 + $0x1b90] sm:$0xff]  ;;  %v15071_v1 = vcombine.low %v2188_v40, %v2192_v39  ;;  %v1333_v40 = vld [vmem:[%s17189_s0 + $0x498] sm:$0xff] }
 0x4b5   : > { %8251 = vmatpush1.bf16.msra.mxu0 %v14911_v17  ;;  %v2072_v55 = vld [vmem:[%s17189_s0 + $0x1bb0] sm:$0xff]  ;;  %v1337_v39 = vld [vmem:[%s17189_s0 + $0x4b8] sm:$0xff] }
 0x4b6   : > { %8252 = vmatprep.subr.bf16.mxu0 %v14920_v36  ;;  %v2196_v56 = vld [vmem:[%s17189_s0 + $0x1f90] sm:$0xff]  ;;  %v14952_v14 = vcombine.high %v2068_v0, %v2072_v55  ;;  %v14951_v17 = vcombine.low %v2068_v0, %v2072_v55  ;;  %v1213_v0 = vld [vmem:[%s17189_s0 + $0xd8] sm:$0xff] }
 0x4b7   : > { %8292 = vmatpush1.bf16.msra.mxu1 %v15039_v9  ;;  %v2200_v57 = vld [vmem:[%s17189_s0 + $0x1fb0] sm:$0xff]  ;;  %v1217_v55 = vld [vmem:[%s17189_s0 + $0xf8] sm:$0xff] }
 0x4b8   : > { %8293 = vmatprep.subr.bf16.mxu1 %v15048_v11  ;;  %v15080_v3 = vcombine.high %v2196_v56, %v2200_v57  ;;  %v2076_v8 = vld [vmem:[%s17189_s0 + $0x1bd0] sm:$0xff]  ;;  %v15079_v9 = vcombine.low %v2196_v56, %v2200_v57  ;;  %v1341_v56 = vld [vmem:[%s17189_s0 + $0x4d8] sm:$0xff] }
 0x4b9   : > { %8253 = vmatpush1.bf16.msra.mxu0 %v14919_v49  ;;  %v2080_v53 = vld [vmem:[%s17189_s0 + $0x1bf0] sm:$0xff]  ;;  %v1345_v57 = vld [vmem:[%s17189_s0 + $0x4f8] sm:$0xff] }
 0x4ba   : > { %8254 = vmatprep.subr.bf16.mxu0 %v14928_v21  ;;  %v2204_v20 = vld [vmem:[%s17189_s0 + $0x1fd0] sm:$0xff]  ;;  %v14960_v36 = vcombine.high %v2076_v8, %v2080_v53  ;;  %v14959_v49 = vcombine.low %v2076_v8, %v2080_v53  ;;  %v14074_v21 = vcombine.high %v1189_v12, %v1193_v13  ;;  %v1221_v8 = vld [vmem:[%s17189_s0 + $0x118] sm:$0xff] }
 0x4bb   : > { %8294 = vmatpush1.bf16.msra.mxu1 %v15047_v41  ;;  %v2208_v5 = vld [vmem:[%s17189_s0 + $0x1ff0] sm:$0xff]  ;;  %v1225_v53 = vld [vmem:[%s17189_s0 + $0x138] sm:$0xff] }
 0x4bc   : > { %8295 = vmatprep.subr.bf16.mxu1 %v15056_v24  ;;  %v15088_v11 = vcombine.high %v2204_v20, %v2208_v5  ;;  %v15087_v41 = vcombine.low %v2204_v20, %v2208_v5  ;;  %v14202_v24 = vcombine.high %v1317_v42, %v1321_v16  ;;  %v1349_v20 = vld [vmem:[%s17189_s0 + $0x518] sm:$0xff]  ;;  %v14097_v5 = vcombine.low %v1213_v0, %v1217_v55 }
 0x4bd   : > { %8255 = vmatpush1.bf16.msra.mxu0 %v14927_v29  ;;  %v14073_v29 = vcombine.low %v1189_v12, %v1193_v13  ;;  %v1357_v12 = vld [vmem:[%s17189_s0 + $0x558] sm:$0xff] }
 0x4be   : > { %8256 = vmatprep.subr.bf16.mxu0 %v14936_v45  ;;  %v14082_v45 = vcombine.high %v1197_v2, %v1201_v25  ;;  %v1361_v13 = vld [vmem:[%s17189_s0 + $0x578] sm:$0xff] }
 0x4bf   : > { %8296 = vmatpush1.bf16.msra.mxu1 %v15055_v48  ;;  %v14201_v48 = vcombine.low %v1317_v42, %v1321_v16  ;;  %v14105_v42 = vcombine.low %v1221_v8, %v1225_v53 }
 0x4c0   : > { %8297 = vmatprep.subr.bf16.mxu1 %v15064_v37  ;;  %v14210_v37 = vcombine.high %v1325_v32, %v1329_v44 }
 0x4c1   : > { %8257 = vmatpush1.bf16.msra.mxu0 %v14935_v43  ;;  %v14081_v43 = vcombine.low %v1197_v2, %v1201_v25  ;;  %v1365_v2 = vld [vmem:[%s17189_s0 + $0x598] sm:$0xff] }
 0x4c2   : > { %8258 = vmatprep.subr.bf16.mxu0 %v14944_v54  ;;  %v14090_v54 = vcombine.high %v1205_v35, %v1209_v38  ;;  %v1369_v25 = vld [vmem:[%s17189_s0 + $0x5b8] sm:$0xff] }
 0x4c3   : > { %8298 = vmatpush1.bf16.msra.mxu1 %v15063_v46  ;;  %v14209_v46 = vcombine.low %v1325_v32, %v1329_v44  ;;  %v14241_v44 = vcombine.low %v1357_v12, %v1361_v13 }
 0x4c4   : > { %8299 = vmatprep.subr.bf16.mxu1 %v15072_v47  ;;  %v14218_v47 = vcombine.high %v1333_v40, %v1337_v39 }
 0x4c5   : > { %8259 = vmatpush1.bf16.msra.mxu0 %v14943_v62  ;;  %v14089_v62 = vcombine.low %v1205_v35, %v1209_v38  ;;  %v1249_v35 = vld [vmem:[%s17189_s0 + $0x1f8] sm:$0xff] }
 0x4c6   : > { %8260 = vmatprep.subr.bf16.mxu0 %v14952_v14  ;;  %v14098_v14 = vcombine.high %v1213_v0, %v1217_v55 }
 0x4c7   : > { %8300 = vmatpush1.bf16.msra.mxu1 %v15071_v1  ;;  %v14217_v1 = vcombine.low %v1333_v40, %v1337_v39  ;;  %v1373_v39 = vld [vmem:[%s17189_s0 + $0x5d8] sm:$0xff] }
 0x4c8   : > { %8301 = vmatprep.subr.bf16.mxu1 %v15080_v3  ;;  %v14226_v3 = vcombine.high %v1341_v56, %v1345_v57 }
 0x4c9   : > { %8261 = vmatpush1.bf16.msra.mxu0 %v14951_v17  ;;  %v14106_v17 = vcombine.high %v1221_v8, %v1225_v53  ;;  %v1253_v8 = vld [vmem:[%s17189_s0 + $0x218] sm:$0xff] }
 0x4ca   : > { %8262 = vmatprep.subr.bf16.mxu0 %v14960_v36  ;;  %v1229_v36 = vld [vmem:[%s17189_s0 + $0x158] sm:$0xff] }
 0x4cb   : > { %8302 = vmatpush1.bf16.msra.mxu1 %v15079_v9  ;;  %v1257_v53 = vld [vmem:[%s17189_s0 + $0x238] sm:$0xff] }
 0x4cc   : > { %8303 = vmatprep.subr.bf16.mxu1 %v15088_v11  ;;  %v1233_v11 = vld [vmem:[%s17189_s0 + $0x178] sm:$0xff] }
 0x4cd   : > { %8263 = vmatpush1.bf16.msra.mxu0 %v14959_v49  ;;  %v14114_v49 = vcombine.high %v1229_v36, %v1233_v11  ;;  %v14113_v32 = vcombine.low %v1229_v36, %v1233_v11  ;;  %v1261_v36 = vld [vmem:[%s17189_s0 + $0x258] sm:$0xff] }
 0x4ce   : > { %8314 = vmatprep.subr.bf16.mxu0 %v14074_v21  ;;  %v1237_v21 = vld [vmem:[%s17189_s0 + $0x198] sm:$0xff] }
 0x4cf   : > { %8304 = vmatpush1.bf16.msra.mxu1 %v15087_v41  ;;  %v14242_v41 = vcombine.high %v1357_v12, %v1361_v13  ;;  %v1265_v11 = vld [vmem:[%s17189_s0 + $0x278] sm:$0xff] }
 0x4d0   : > { %8355 = vmatprep.subr.bf16.mxu1 %v14202_v24  ;;  %8265 = vmatmul.mubr.bf16.vlgmr.msra.gmra.mrb[44].mxu0 %v17693_v23  ;;  %v1241_v24 = vld [vmem:[%s17189_s0 + $0x1b8] sm:$0xff] }
 0x4d1   : > { %8315 = vmatpush1.bf16.msra.mxu0 %v14073_v29  ;;  %8346 = vmatprep.mubr.bf16.mxu0 %v17303_v27  ;;  %v1353_v27 = vld [vmem:[%s17189_s0 + $0x538] sm:$0xff]  ;;  %v14122_v29 = vcombine.high %v1237_v21, %v1241_v24  ;;  %v14121_v0 = vcombine.low %v1237_v21, %v1241_v24 }
 0x4d2   : > { %8306 = vmatmul.mubr.bf16.vlgmr.msra.gmra.mrb[44].mxu1 %v17697_v33  ;;  %8316 = vmatprep.subr.bf16.mxu0 %v14082_v45  ;;  %v14234_v9 = vcombine.high %v1349_v20, %v1353_v27  ;;  %v14233_v16 = vcombine.low %v1349_v20, %v1353_v27  ;;  %v14250_v45 = vcombine.high %v1365_v2, %v1369_v25  ;;  %v1381_v20 = vld [vmem:[%s17189_s0 + $0x618] sm:$0xff] }
 0x4d3   : > { %8356 = vmatpush1.bf16.msra.mxu1 %v14201_v48  ;;  %8387 = vmatprep.mubr.bf16.mxu1 %v17305_v28  ;;  %v14225_v28 = vcombine.low %v1341_v56, %v1345_v57  ;;  %v1385_v27 = vld [vmem:[%s17189_s0 + $0x638] sm:$0xff] }
 0x4d4   : > { %8357 = vmatprep.subr.bf16.mxu1 %v14210_v37  ;;  %v1245_v37 = vld [vmem:[%s17189_s0 + $0x1d8] sm:$0xff] }
 0x4d5   : > { %8317 = vmatpush1.bf16.msra.mxu0 %v14081_v43  ;;  %v1377_v43 = vld [vmem:[%s17189_s0 + $0x5f8] sm:$0xff] }
 0x4d6   : > { %8318 = vmatprep.subr.bf16.mxu0 %v14090_v54  ;;  %v1389_v12 = vld [vmem:[%s17189_s0 + $0x658] sm:$0xff] }
 0x4d7   : > { %8358 = vmatpush1.bf16.msra.mxu1 %v14209_v46  ;;  %v1393_v13 = vld [vmem:[%s17189_s0 + $0x678] sm:$0xff] }
 0x4d8   : > { %8359 = vmatprep.subr.bf16.mxu1 %v14218_v47  ;;  %v1269_v21 = vld [vmem:[%s17189_s0 + $0x298] sm:$0xff] }
 0x4d9   : > { %8319 = vmatpush1.bf16.msra.mxu0 %v14089_v62  ;;  %v14249_v62 = vcombine.low %v1365_v2, %v1369_v25  ;;  %v1273_v24 = vld [vmem:[%s17189_s0 + $0x2b8] sm:$0xff] }
 0x4da   : > { %8320 = vmatprep.subr.bf16.mxu0 %v14098_v14  ;;  %v1397_v2 = vld [vmem:[%s17189_s0 + $0x698] sm:$0xff] }
 0x4db   : > { %8360 = vmatpush1.bf16.msra.mxu1 %v14217_v1  ;;  %v14130_v1 = vcombine.high %v1245_v37, %v1249_v35  ;;  %v1401_v25 = vld [vmem:[%s17189_s0 + $0x6b8] sm:$0xff] }
 0x4dc   : > { %8361 = vmatprep.subr.bf16.mxu1 %v14226_v3  ;;  %v14258_v3 = vcombine.high %v1373_v39, %v1377_v43 }
 0x4dd   : > { %8321 = vmatpush1.bf16.msra.mxu0 %v14097_v5  ;;  %v14129_v5 = vcombine.low %v1245_v37, %v1249_v35  ;;  %v1281_v37 = vld [vmem:[%s17189_s0 + $0x2f8] sm:$0xff] }
 0x4de   : > { %8322 = vmatprep.subr.bf16.mxu0 %v14106_v17  ;;  %v14138_v17 = vcombine.high %v1253_v8, %v1257_v53  ;;  %v1405_v35 = vld [vmem:[%s17189_s0 + $0x6d8] sm:$0xff] }
 0x4df   : > { %8362 = vmatpush1.bf16.msra.mxu1 %v14225_v28  ;;  %v14257_v28 = vcombine.low %v1373_v39, %v1377_v43  ;;  %v14281_v39 = vcombine.low %v1397_v2, %v1401_v25 }
 0x4e0   : > { %8363 = vmatprep.subr.bf16.mxu1 %v14234_v9  ;;  %v14266_v9 = vcombine.high %v1381_v20, %v1385_v27 }
 0x4e1   : > { %8323 = vmatpush1.bf16.msra.mxu0 %v14105_v42  ;;  %v14137_v42 = vcombine.low %v1253_v8, %v1257_v53  ;;  %v1293_v8 = vld [vmem:[%s17189_s0 + $0x358] sm:$0xff] }
 0x4e2   : > { %8324 = vmatprep.subr.bf16.mxu0 %v14114_v49  ;;  %v14146_v49 = vcombine.high %v1261_v36, %v1265_v11  ;;  %v1297_v53 = vld [vmem:[%s17189_s0 + $0x378] sm:$0xff] }
 0x4e3   : > { %8364 = vmatpush1.bf16.msra.mxu1 %v14233_v16  ;;  %v8020_v48 = vpop.f32.mrb[32].mxu0  ;;  %v14265_v16 = vcombine.low %v1381_v20, %v1385_v27  ;;  %v1421_v20 = vld [vmem:[%s17189_s0 + $0x758] sm:$0xff] }
 0x4e4   : > { %8365 = vmatprep.subr.bf16.mxu1 %v14242_v41  ;;  %v8022_v40 = vpop.f32.mrb[33].mxu0  ;;  %v14274_v41 = vcombine.high %v1389_v12, %v1393_v13  ;;  %v1425_v27 = vld [vmem:[%s17189_s0 + $0x778] sm:$0xff] }
 0x4e5   : > { %v8061_v38 = vpop.f32.mrb[32].mxu1  ;;  %v8024_v47 = vpop.f32.mrb[34].mxu0  ;;  %8325 = vmatpush1.bf16.msra.mxu0 %v14113_v32  ;;  %v14145_v32 = vcombine.low %v1261_v36, %v1265_v11  ;;  %v1301_v36 = vld [vmem:[%s17189_s0 + $0x398] sm:$0xff] }
 0x4e6   : > { %v18307_v46 = vadd.f32 %v8061_v38, %v8020_v48  ;;  %v8063_v54 = vpop.f32.mrb[33].mxu1  ;;  %v8025_v57 = vpop.f32.mrb[35].mxu0  ;;  %8326 = vmatprep.subr.bf16.mxu0 %v14122_v29  ;;  %v14154_v29 = vcombine.high %v1269_v21, %v1273_v24  ;;  %v14282_v48 = vcombine.high %v1397_v2, %v1401_v25  ;;  %v1409_v38 = vld [vmem:[%s17189_s0 + $0x6f8] sm:$0xff] }
 0x4e7   : > { %v18309_v55 = vadd.f32 %v8063_v54, %v8022_v40  ;;  %v8065_v56 = vpop.f32.mrb[34].mxu1  ;;  %8366 = vmatpush1.bf16.msra.mxu1 %v14241_v44  ;;  %v14273_v44 = vcombine.low %v1389_v12, %v1393_v13  ;;  %v14153_v40 = vcombine.low %v1269_v21, %v1273_v24  ;;  %v14290_v54 = vcombine.high %v1405_v35, %v1409_v38  ;;  %v1285_v47 = vld [vmem:[%s17189_s0 + $0x318] sm:$0xff] }
 0x4e8   : > { %v8066_v14 = vpop.f32.mrb[35].mxu1  ;;  %8367 = vmatprep.subr.bf16.mxu1 %v14250_v45  ;;  %v1277_v45 = vld [vmem:[%s17189_s0 + $0x2d8] sm:$0xff] }
 0x4e9   : > { %8327 = vmatpush1.bf16.msra.mxu0 %v14121_v0  ;;  %v14162_v43 = vcombine.high %v1277_v45, %v1281_v37  ;;  %v1289_v0 = vld [vmem:[%s17189_s0 + $0x338] sm:$0xff] }
 0x4ea   : > { %8328 = vmatprep.subr.bf16.mxu0 %v14130_v1  ;;  %v1413_v56 = vld [vmem:[%s17189_s0 + $0x718] sm:$0xff]  ;;  %v14289_v1 = vcombine.low %v1405_v35, %v1409_v38  ;;  %v14170_v14 = vcombine.high %v1285_v47, %v1289_v0 }
 0x4eb   : > { %8368 = vmatpush1.bf16.msra.mxu1 %v14249_v62  ;;  %v1417_v57 = vld [vmem:[%s17189_s0 + $0x738] sm:$0xff]  ;;  %v14161_v62 = vcombine.low %v1277_v45, %v1281_v37 }
 0x4ec   : > { %8369 = vmatprep.subr.bf16.mxu1 %v14258_v3  ;;  %v14298_v3 = vcombine.high %v1413_v56, %v1417_v57  ;;  %v1305_v11 = vld [vmem:[%s17189_s0 + $0x3b8] sm:$0xff] }
 0x4ed   : > { %8329 = vmatpush1.bf16.msra.mxu0 %v14129_v5  ;;  %v14169_v5 = vcombine.low %v1285_v47, %v1289_v0  ;;  %v1429_v12 = vld [vmem:[%s17189_s0 + $0x798] sm:$0xff] }
 0x4ee   : > { %8330 = vmatprep.subr.bf16.mxu0 %v14138_v17  ;;  %v14178_v17 = vcombine.high %v1293_v8, %v1297_v53  ;;  %v1433_v13 = vld [vmem:[%s17189_s0 + $0x7b8] sm:$0xff] }
 0x4ef   : > { %8370 = vmatpush1.bf16.msra.mxu1 %v14257_v28  ;;  %v14297_v28 = vcombine.low %v1413_v56, %v1417_v57  ;;  %v1309_v21 = vld [vmem:[%s17189_s0 + $0x3d8] sm:$0xff] }
 0x4f0   : > { %8371 = vmatprep.subr.bf16.mxu1 %v14266_v9  ;;  %v14306_v9 = vcombine.high %v1421_v20, %v1425_v27  ;;  %v1313_v24 = vld [vmem:[%s17189_s0 + $0x3f8] sm:$0xff] }
 0x4f1   : > { %8331 = vmatpush1.bf16.msra.mxu0 %v14137_v42  ;;  %v14177_v42 = vcombine.low %v1293_v8, %v1297_v53  ;;  %v1437_v2 = vld [vmem:[%s17189_s0 + $0x7d8] sm:$0xff] }
 0x4f2   : > { %8332 = vmatprep.subr.bf16.mxu0 %v14146_v49  ;;  %v14186_v49 = vcombine.high %v1301_v36, %v1305_v11  ;;  %v1441_v25 = vld [vmem:[%s17189_s0 + $0x7f8] sm:$0xff] }
 0x4f3   : > { %8372 = vmatpush1.bf16.msra.mxu1 %v14265_v16  ;;  %v14305_v16 = vcombine.low %v1421_v20, %v1425_v27  ;;  %v1445_v45 = vld [vmem:[%s17189_s0 + $0x818] sm:$0xff] }
 0x4f4   : > { %8373 = vmatprep.subr.bf16.mxu1 %v14274_v41  ;;  %v14314_v41 = vcombine.high %v1429_v12, %v1433_v13  ;;  %v1449_v37 = vld [vmem:[%s17189_s0 + $0x838] sm:$0xff] }
 0x4f5   : > { %8333 = vmatpush1.bf16.msra.mxu0 %v14145_v32  ;;  %v14185_v32 = vcombine.low %v1301_v36, %v1305_v11  ;;  %v1573_v35 = vld [vmem:[%s17189_s0 + $0xc18] sm:$0xff] }
 0x4f6   : > { %8334 = vmatprep.subr.bf16.mxu0 %v14154_v29  ;;  %v14194_v29 = vcombine.high %v1309_v21, %v1313_v24  ;;  %v1577_v38 = vld [vmem:[%s17189_s0 + $0xc38] sm:$0xff] }
 0x4f7   : > { %8374 = vmatpush1.bf16.msra.mxu1 %v14273_v44  ;;  %v14313_v44 = vcombine.low %v1429_v12, %v1433_v13  ;;  %v1453_v47 = vld [vmem:[%s17189_s0 + $0x858] sm:$0xff] }
 0x4f8   : > { %8375 = vmatprep.subr.bf16.mxu1 %v14282_v48  ;;  %v14322_v48 = vcombine.high %v1437_v2, %v1441_v25  ;;  %v1457_v0 = vld [vmem:[%s17189_s0 + $0x878] sm:$0xff] }
 0x4f9   : > { %8335 = vmatpush1.bf16.msra.mxu0 %v14153_v40  ;;  %v14193_v40 = vcombine.low %v1309_v21, %v1313_v24  ;;  %v1581_v56 = vld [vmem:[%s17189_s0 + $0xc58] sm:$0xff] }
 0x4fa   : > { %8336 = vmatprep.subr.bf16.mxu0 %v14162_v43  ;;  %v14330_v43 = vcombine.high %v1445_v45, %v1449_v37  ;;  %v1585_v57 = vld [vmem:[%s17189_s0 + $0xc78] sm:$0xff] }
 0x4fb   : > { %8376 = vmatpush1.bf16.msra.mxu1 %v14281_v39  ;;  %v14321_v39 = vcombine.low %v1437_v2, %v1441_v25  ;;  %v1461_v8 = vld [vmem:[%s17189_s0 + $0x898] sm:$0xff] }
 0x4fc   : > { %8377 = vmatprep.subr.bf16.mxu1 %v14290_v54  ;;  %v14458_v54 = vcombine.high %v1573_v35, %v1577_v38  ;;  %v1465_v53 = vld [vmem:[%s17189_s0 + $0x8b8] sm:$0xff] }
 0x4fd   : > { %8337 = vmatpush1.bf16.msra.mxu0 %v14161_v62  ;;  %v14329_v62 = vcombine.low %v1445_v45, %v1449_v37  ;;  %v1589_v20 = vld [vmem:[%s17189_s0 + $0xc98] sm:$0xff] }
 0x4fe   : > { %8338 = vmatprep.subr.bf16.mxu0 %v14170_v14  ;;  %v14338_v14 = vcombine.high %v1453_v47, %v1457_v0  ;;  %v1593_v27 = vld [vmem:[%s17189_s0 + $0xcb8] sm:$0xff] }
 0x4ff   : > { %8378 = vmatpush1.bf16.msra.mxu1 %v14289_v1  ;;  %v14457_v1 = vcombine.low %v1573_v35, %v1577_v38  ;;  %v1469_v36 = vld [vmem:[%s17189_s0 + $0x8d8] sm:$0xff]  ;;  %v14473_v13 = vcombine.low %v1589_v20, %v1593_v27 }
 0x500   : > { %8379 = vmatprep.subr.bf16.mxu1 %v14298_v3  ;;  %v14466_v3 = vcombine.high %v1581_v56, %v1585_v57  ;;  %v1473_v11 = vld [vmem:[%s17189_s0 + $0x8f8] sm:$0xff] }
 0x501   : > { %8339 = vmatpush1.bf16.msra.mxu0 %v14169_v5  ;;  %v14337_v5 = vcombine.low %v1453_v47, %v1457_v0  ;;  %v1601_v12 = vld [vmem:[%s17189_s0 + $0xcf8] sm:$0xff]  ;;  %v14353_v24 = vcombine.low %v1469_v36, %v1473_v11 }
 0x502   : > { %8340 = vmatprep.subr.bf16.mxu0 %v14178_v17  ;;  %v14346_v17 = vcombine.high %v1461_v8, %v1465_v53  ;;  %v1605_v21 = vld [vmem:[%s17189_s0 + $0xd18] sm:$0xff] }
 0x503   : > { %8380 = vmatpush1.bf16.msra.mxu1 %v14297_v28  ;;  %v14465_v28 = vcombine.low %v1581_v56, %v1585_v57 }
 0x504   : > { %8381 = vmatprep.subr.bf16.mxu1 %v14306_v9  ;;  %v14474_v9 = vcombine.high %v1589_v20, %v1593_v27  ;;  %v1629_v20 = vld [vmem:[%s17189_s0 + $0xdd8] sm:$0xff] }
 0x505   : > { %8341 = vmatpush1.bf16.msra.mxu0 %v14177_v42  ;;  %v14354_v42 = vcombine.high %v1469_v36, %v1473_v11  ;;  %v1633_v27 = vld [vmem:[%s17189_s0 + $0xdf8] sm:$0xff] }
 0x506   : > { %8342 = vmatprep.subr.bf16.mxu0 %v14186_v49  ;;  %v1477_v49 = vld [vmem:[%s17189_s0 + $0x918] sm:$0xff] }
 0x507   : > { %8382 = vmatpush1.bf16.msra.mxu1 %v14305_v16 }
 0x508   : > { %8383 = vmatprep.subr.bf16.mxu1 %v14314_v41  ;;  %v1481_v41 = vld [vmem:[%s17189_s0 + $0x938] sm:$0xff] }
 0x509   : > { %8343 = vmatpush1.bf16.msra.mxu0 %v14185_v32  ;;  %v14362_v2 = vcombine.high %v1477_v49, %v1481_v41  ;;  %v1485_v32 = vld [vmem:[%s17189_s0 + $0x958] sm:$0xff]  ;;  %v14361_v45 = vcombine.low %v1477_v49, %v1481_v41 }
 0x50a   : > { %8344 = vmatprep.subr.bf16.mxu0 %v14194_v29  ;;  %v1613_v29 = vld [vmem:[%s17189_s0 + $0xd58] sm:$0xff] }
 0x50b   : > { %8384 = vmatpush1.bf16.msra.mxu1 %v14313_v44  ;;  %v1489_v44 = vld [vmem:[%s17189_s0 + $0x978] sm:$0xff] }
 0x50c   : > { %8385 = vmatprep.subr.bf16.mxu1 %v14322_v48  ;;  %v1617_v48 = vld [vmem:[%s17189_s0 + $0xd78] sm:$0xff]  ;;  %v14370_v35 = vcombine.high %v1485_v32, %v1489_v44  ;;  %v14369_v47 = vcombine.low %v1485_v32, %v1489_v44 }
 0x50d   : > { %8345 = vmatpush1.bf16.msra.mxu0 %v14193_v40  ;;  %v14498_v38 = vcombine.high %v1613_v29, %v1617_v48  ;;  %v1493_v40 = vld [vmem:[%s17189_s0 + $0x998] sm:$0xff]  ;;  %v14497_v0 = vcombine.low %v1613_v29, %v1617_v48 }
 0x50e   : > { %8396 = vmatprep.subr.bf16.mxu0 %v14330_v43  ;;  %v1621_v43 = vld [vmem:[%s17189_s0 + $0xd98] sm:$0xff] }
 0x50f   : > { %8386 = vmatpush1.bf16.msra.mxu1 %v14321_v39  ;;  %v1497_v39 = vld [vmem:[%s17189_s0 + $0x9b8] sm:$0xff] }
 0x510   : > { %8437 = vmatprep.subr.bf16.mxu1 %v14458_v54  ;;  %8347 = vmatmul.mubr.bf16.vlgmr.msra.gmra.mrb[48].mxu0 %v17393_v18  ;;  %v1597_v18 = vld [vmem:[%s17189_s0 + $0xcd8] sm:$0xff]  ;;  %v14378_v56 = vcombine.high %v1493_v40, %v1497_v39 }
 0x511   : > { %8397 = vmatpush1.bf16.msra.mxu0 %v14329_v62  ;;  %8428 = vmatprep.mubr.bf16.mxu0 %v17401_v31  ;;  %v14482_v16 = vcombine.high %v1597_v18, %v1601_v12  ;;  %v1609_v31 = vld [vmem:[%s17189_s0 + $0xd38] sm:$0xff] }
 0x512   : > { %8388 = vmatmul.mubr.bf16.vlgmr.msra.gmra.mrb[48].mxu1 %v17397_v22  ;;  %8398 = vmatprep.subr.bf16.mxu0 %v14338_v14  ;;  %v14345_v22 = vcombine.low %v1461_v8, %v1465_v53  ;;  %v14490_v25 = vcombine.high %v1605_v21, %v1609_v31  ;;  %v14489_v37 = vcombine.low %v1605_v21, %v1609_v31  ;;  %v1625_v54 = vld [vmem:[%s17189_s0 + $0xdb8] sm:$0xff] }
 0x513   : > { %8438 = vmatpush1.bf16.msra.mxu1 %v14457_v1  ;;  %8469 = vmatprep.mubr.bf16.mxu1 %v17406_v34  ;;  %v14481_v34 = vcombine.low %v1597_v18, %v1601_v12  ;;  %v14506_v62 = vcombine.high %v1621_v43, %v1625_v54  ;;  %v1501_v1 = vld [vmem:[%s17189_s0 + $0x9d8] sm:$0xff]  ;;  %v14513_v31 = vcombine.low %v1629_v20, %v1633_v27 }
 0x514   : > { %8439 = vmatprep.subr.bf16.mxu1 %v14466_v3  ;;  %v1505_v14 = vld [vmem:[%s17189_s0 + $0x9f8] sm:$0xff] }
 0x515   : > { %8399 = vmatpush1.bf16.msra.mxu0 %v14337_v5  ;;  %v14386_v12 = vcombine.high %v1501_v1, %v1505_v14  ;;  %v1637_v49 = vld [vmem:[%s17189_s0 + $0xe18] sm:$0xff]  ;;  %v14385_v21 = vcombine.low %v1501_v1, %v1505_v14 }
 0x516   : > { %8400 = vmatprep.subr.bf16.mxu0 %v14346_v17  ;;  %v1641_v41 = vld [vmem:[%s17189_s0 + $0xe38] sm:$0xff] }
 0x517   : > { %8440 = vmatpush1.bf16.msra.mxu1 %v14465_v28  ;;  %v1645_v32 = vld [vmem:[%s17189_s0 + $0xe58] sm:$0xff]  ;;  %v14521_v48 = vcombine.low %v1637_v49, %v1641_v41 }
 0x518   : > { %8441 = vmatprep.subr.bf16.mxu1 %v14474_v9  ;;  %v14377_v9 = vcombine.low %v1493_v40, %v1497_v39  ;;  %v1649_v44 = vld [vmem:[%s17189_s0 + $0xe78] sm:$0xff] }
 0x519   : > { %8401 = vmatpush1.bf16.msra.mxu0 %v14345_v22  ;;  %v1653_v40 = vld [vmem:[%s17189_s0 + $0xe98] sm:$0xff] }
 0x51a   : > { %8402 = vmatprep.subr.bf16.mxu0 %v14354_v42  ;;  %v1509_v42 = vld [vmem:[%s17189_s0 + $0xa18] sm:$0xff] }
 0x51b   : > { %8442 = vmatpush1.bf16.msra.mxu1 %v14473_v13  ;;  %v14514_v13 = vcombine.high %v1629_v20, %v1633_v27  ;;  %v1657_v39 = vld [vmem:[%s17189_s0 + $0xeb8] sm:$0xff] }
 0x51c   : > { %8443 = vmatprep.subr.bf16.mxu1 %v14482_v16  ;;  %v1513_v16 = vld [vmem:[%s17189_s0 + $0xa38] sm:$0xff] }
 0x51d   : > { %8403 = vmatpush1.bf16.msra.mxu0 %v14353_v24  ;;  %v14394_v24 = vcombine.high %v1509_v42, %v1513_v16  ;;  %v14393_v29 = vcombine.low %v1509_v42, %v1513_v16  ;;  %v1665_v1 = vld [vmem:[%s17189_s0 + $0xef8] sm:$0xff] }
 0x51e   : > { %8404 = vmatprep.subr.bf16.mxu0 %v14362_v2  ;;  %v1517_v2 = vld [vmem:[%s17189_s0 + $0xa58] sm:$0xff] }
 0x51f   : > { %8444 = vmatpush1.bf16.msra.mxu1 %v14481_v34  ;;  %v14522_v34 = vcombine.high %v1637_v49, %v1641_v41  ;;  %v1541_v20 = vld [vmem:[%s17189_s0 + $0xb18] sm:$0xff] }
 0x520   : > { %8445 = vmatprep.subr.bf16.mxu1 %v14490_v25  ;;  %v1521_v25 = vld [vmem:[%s17189_s0 + $0xa78] sm:$0xff] }
 0x521   : > { %8405 = vmatpush1.bf16.msra.mxu0 %v14361_v45  ;;  %v14402_v45 = vcombine.high %v1517_v2, %v1521_v25  ;;  %v1545_v27 = vld [vmem:[%s17189_s0 + $0xb38] sm:$0xff] }
 0x522   : > { %8406 = vmatprep.subr.bf16.mxu0 %v14370_v35  ;;  %v1525_v35 = vld [vmem:[%s17189_s0 + $0xa98] sm:$0xff]  ;;  %v14425_v42 = vcombine.low %v1541_v20, %v1545_v27 }
 0x523   : > { %8446 = vmatpush1.bf16.msra.mxu1 %v14489_v37  ;;  %v8102_v57 = vpop.f32.mrb[36].mxu0  ;;  %v14530_v37 = vcombine.high %v1645_v32, %v1649_v44 }
 0x524   : > { %8447 = vmatprep.subr.bf16.mxu1 %v14498_v38  ;;  %v8103_v3 = vadd.f32 %v8102_v57, %v18307_v46  ;;  %v8104_v53 = vpop.f32.mrb[37].mxu0  ;;  %v14505_v46 = vcombine.low %v1621_v43, %v1625_v54  ;;  %v1529_v38 = vld [vmem:[%s17189_s0 + $0xab8] sm:$0xff]  ;;  %v14401_v43 = vcombine.low %v1517_v2, %v1521_v25  ;;  %v14529_v54 = vcombine.low %v1645_v32, %v1649_v44 }
 0x525   : > { %v8143_v8 = vpop.f32.mrb[36].mxu1  ;;  %v8105_v5 = vadd.f32 %v8104_v53, %v18309_v55  ;;  %v8106_v17 = vpop.f32.mrb[38].mxu0  ;;  %8407 = vmatpush1.bf16.msra.mxu0 %v14369_v47  ;;  %v14410_v47 = vcombine.high %v1525_v35, %v1529_v38  ;;  %v1537_v57 = vld [vmem:[%s17189_s0 + $0xaf8] sm:$0xff]  ;;  %v14409_v14 = vcombine.low %v1525_v35, %v1529_v38 }
 0x526   : > { %v8145_v28 = vpop.f32.mrb[37].mxu1  ;;  %v18381_v36 = vadd.f32 %v8143_v8, %v8103_v3  ;;  %v8107_v18 = vpop.f32.mrb[39].mxu0  ;;  %8408 = vmatprep.subr.bf16.mxu0 %v14378_v56  ;;  %v1533_v56 = vld [vmem:[%s17189_s0 + $0xad8] sm:$0xff]  ;;  %v14537_v3 = vcombine.low %v1653_v40, %v1657_v39 }
 0x527   : > { %v8147_v11 = vpop.f32.mrb[38].mxu1  ;;  %8448 = vmatpush1.bf16.msra.mxu1 %v14497_v0  ;;  %v18383_v22 = vadd.f32 %v8145_v28, %v8105_v5  ;;  %v14538_v0 = vcombine.high %v1653_v40, %v1657_v39  ;;  %v14418_v8 = vcombine.high %v1533_v56, %v1537_v57  ;;  %v1669_v5 = vld [vmem:[%s17189_s0 + $0xf18] sm:$0xff]  ;;  %v14417_v17 = vcombine.low %v1533_v56, %v1537_v57 }
 0x528   : > { %v8148_v55 = vpop.f32.mrb[39].mxu1  ;;  %8449 = vmatprep.subr.bf16.mxu1 %v14506_v62  ;;  %v1661_v62 = vld [vmem:[%s17189_s0 + $0xed8] sm:$0xff]  ;;  %v14426_v11 = vcombine.high %v1541_v20, %v1545_v27 }
 0x529   : > { %8409 = vmatpush1.bf16.msra.mxu0 %v14377_v9  ;;  %v14546_v53 = vcombine.high %v1661_v62, %v1665_v1  ;;  %v1673_v28 = vld [vmem:[%s17189_s0 + $0xf38] sm:$0xff]  ;;  %v14545_v9 = vcombine.low %v1661_v62, %v1665_v1 }
 0x52a   : > { %8410 = vmatprep.subr.bf16.mxu0 %v14386_v12  ;;  %v14554_v18 = vcombine.high %v1669_v5, %v1673_v28  ;;  %v1553_v12 = vld [vmem:[%s17189_s0 + $0xb78] sm:$0xff]  ;;  %v14553_v16 = vcombine.low %v1669_v5, %v1673_v28 }
 0x52b   : > { %8450 = vmatpush1.bf16.msra.mxu1 %v14505_v46  ;;  %v1549_v46 = vld [vmem:[%s17189_s0 + $0xb58] sm:$0xff] }
 0x52c   : > { %8451 = vmatprep.subr.bf16.mxu1 %v14514_v13  ;;  %v1677_v55 = vld [vmem:[%s17189_s0 + $0xf58] sm:$0xff]  ;;  %v14434_v49 = vcombine.high %v1549_v46, %v1553_v12  ;;  %v14433_v2 = vcombine.low %v1549_v46, %v1553_v12 }
 0x52d   : > { %8411 = vmatpush1.bf16.msra.mxu0 %v14385_v21  ;;  %v1681_v13 = vld [vmem:[%s17189_s0 + $0xf78] sm:$0xff] }
 0x52e   : > { %8412 = vmatprep.subr.bf16.mxu0 %v14394_v24  ;;  %v14562_v41 = vcombine.high %v1677_v55, %v1681_v13  ;;  %v1557_v21 = vld [vmem:[%s17189_s0 + $0xb98] sm:$0xff]  ;;  %v14561_v25 = vcombine.low %v1677_v55, %v1681_v13 }
 0x52f   : > { %8452 = vmatpush1.bf16.msra.mxu1 %v14513_v31  ;;  %v1561_v31 = vld [vmem:[%s17189_s0 + $0xbb8] sm:$0xff] }
 0x530   : > { %8453 = vmatprep.subr.bf16.mxu1 %v14522_v34  ;;  %v1685_v24 = vld [vmem:[%s17189_s0 + $0xf98] sm:$0xff]  ;;  %v14442_v32 = vcombine.high %v1557_v21, %v1561_v31  ;;  %v14441_v35 = vcombine.low %v1557_v21, %v1561_v31 }
 0x531   : > { %8413 = vmatpush1.bf16.msra.mxu0 %v14393_v29  ;;  %v1689_v34 = vld [vmem:[%s17189_s0 + $0xfb8] sm:$0xff] }
 0x532   : > { %8414 = vmatprep.subr.bf16.mxu0 %v14402_v45  ;;  %v14570_v44 = vcombine.high %v1685_v24, %v1689_v34  ;;  %v1565_v29 = vld [vmem:[%s17189_s0 + $0xbd8] sm:$0xff]  ;;  %v14569_v38 = vcombine.low %v1685_v24, %v1689_v34 }
 0x533   : > { %8454 = vmatpush1.bf16.msra.mxu1 %v14521_v48  ;;  %v1569_v48 = vld [vmem:[%s17189_s0 + $0xbf8] sm:$0xff] }
 0x534   : > { %8455 = vmatprep.subr.bf16.mxu1 %v14530_v37  ;;  %v1693_v45 = vld [vmem:[%s17189_s0 + $0xfd8] sm:$0xff]  ;;  %v14450_v40 = vcombine.high %v1565_v29, %v1569_v48  ;;  %v14449_v56 = vcombine.low %v1565_v29, %v1569_v48 }
 0x535   : > { %8415 = vmatpush1.bf16.msra.mxu0 %v14401_v43  ;;  %v1697_v37 = vld [vmem:[%s17189_s0 + $0xff8] sm:$0xff] }
 0x536   : > { %8416 = vmatprep.subr.bf16.mxu0 %v14410_v47  ;;  %v14578_v39 = vcombine.high %v1693_v45, %v1697_v37  ;;  %v1701_v43 = vld [vmem:[%s17189_s0 + $0x1018] sm:$0xff]  ;;  %v14577_v57 = vcombine.low %v1693_v45, %v1697_v37 }
 0x537   : > { %8456 = vmatpush1.bf16.msra.mxu1 %v14529_v54  ;;  %v1705_v54 = vld [vmem:[%s17189_s0 + $0x1038] sm:$0xff] }
 0x538   : > { %8457 = vmatprep.subr.bf16.mxu1 %v14538_v0  ;;  %v1829_v47 = vld [vmem:[%s17189_s0 + $0x1418] sm:$0xff]  ;;  %v14586_v62 = vcombine.high %v1701_v43, %v1705_v54  ;;  %v14585_v20 = vcombine.low %v1701_v43, %v1705_v54 }
 0x539   : > { %8417 = vmatpush1.bf16.msra.mxu0 %v14409_v14  ;;  %v1833_v0 = vld [vmem:[%s17189_s0 + $0x1438] sm:$0xff] }
 0x53a   : > { %8418 = vmatprep.subr.bf16.mxu0 %v14418_v8  ;;  %v14714_v1 = vcombine.high %v1829_v47, %v1833_v0  ;;  %v1709_v14 = vld [vmem:[%s17189_s0 + $0x1058] sm:$0xff]  ;;  %v14713_v27 = vcombine.low %v1829_v47, %v1833_v0 }
 0x53b   : > { %8458 = vmatpush1.bf16.msra.mxu1 %v14537_v3  ;;  %v1713_v3 = vld [vmem:[%s17189_s0 + $0x1078] sm:$0xff] }
 0x53c   : > { %8459 = vmatprep.subr.bf16.mxu1 %v14546_v53  ;;  %v1837_v8 = vld [vmem:[%s17189_s0 + $0x1458] sm:$0xff]  ;;  %v14594_v5 = vcombine.high %v1709_v14, %v1713_v3  ;;  %v14593_v46 = vcombine.low %v1709_v14, %v1713_v3 }
 0x53d   : > { %8419 = vmatpush1.bf16.msra.mxu0 %v14417_v17  ;;  %v1841_v53 = vld [vmem:[%s17189_s0 + $0x1478] sm:$0xff] }
 0x53e   : > { %8420 = vmatprep.subr.bf16.mxu0 %v14426_v11  ;;  %v14722_v28 = vcombine.high %v1837_v8, %v1841_v53  ;;  %v1717_v17 = vld [vmem:[%s17189_s0 + $0x1098] sm:$0xff]  ;;  %v14721_v12 = vcombine.low %v1837_v8, %v1841_v53 }
 0x53f   : > { %8460 = vmatpush1.bf16.msra.mxu1 %v14545_v9  ;;  %v1721_v9 = vld [vmem:[%s17189_s0 + $0x10b8] sm:$0xff] }
 0x540   : > { %8461 = vmatprep.subr.bf16.mxu1 %v14554_v18  ;;  %v1845_v11 = vld [vmem:[%s17189_s0 + $0x1498] sm:$0xff]  ;;  %v14602_v55 = vcombine.high %v1717_v17, %v1721_v9 }
 0x541   : > { %8421 = vmatpush1.bf16.msra.mxu0 %v14425_v42  ;;  %v1849_v18 = vld [vmem:[%s17189_s0 + $0x14b8] sm:$0xff] }
 0x542   : > { %8422 = vmatprep.subr.bf16.mxu0 %v14434_v49  ;;  %v14730_v13 = vcombine.high %v1845_v11, %v1849_v18  ;;  %v1725_v42 = vld [vmem:[%s17189_s0 + $0x10d8] sm:$0xff] }
 0x543   : > { %8462 = vmatpush1.bf16.msra.mxu1 %v14553_v16  ;;  %v1729_v16 = vld [vmem:[%s17189_s0 + $0x10f8] sm:$0xff] }
 0x544   : > { %8463 = vmatprep.subr.bf16.mxu1 %v14562_v41  ;;  %v1857_v49 = vld [vmem:[%s17189_s0 + $0x14f8] sm:$0xff]  ;;  %v14729_v41 = vcombine.low %v1845_v11, %v1849_v18  ;;  %v14610_v21 = vcombine.high %v1725_v42, %v1729_v16 }
 0x545   : > { %8423 = vmatpush1.bf16.msra.mxu0 %v14433_v2  ;;  %v1733_v24 = vld [vmem:[%s17189_s0 + $0x1118] sm:$0xff] }
 0x546   : > { %8424 = vmatprep.subr.bf16.mxu0 %v14442_v32  ;;  %v1737_v34 = vld [vmem:[%s17189_s0 + $0x1138] sm:$0xff] }
 0x547   : > { %8464 = vmatpush1.bf16.msra.mxu1 %v14561_v25  ;;  %v1861_v2 = vld [vmem:[%s17189_s0 + $0x1518] sm:$0xff]  ;;  %v14609_v25 = vcombine.low %v1725_v42, %v1729_v16  ;;  %v14618_v32 = vcombine.high %v1733_v24, %v1737_v34 }
 0x548   : > { %8465 = vmatprep.subr.bf16.mxu1 %v14570_v44  ;;  %v1741_v29 = vld [vmem:[%s17189_s0 + $0x1158] sm:$0xff] }
 0x549   : > { %8425 = vmatpush1.bf16.msra.mxu0 %v14441_v35  ;;  %v1745_v48 = vld [vmem:[%s17189_s0 + $0x1178] sm:$0xff]  ;;  %v14617_v35 = vcombine.low %v1733_v24, %v1737_v34 }
 0x54a   : > { %8426 = vmatprep.subr.bf16.mxu0 %v14450_v40  ;;  %v1869_v45 = vld [vmem:[%s17189_s0 + $0x1558] sm:$0xff]  ;;  %v14626_v40 = vcombine.high %v1741_v29, %v1745_v48 }
 0x54b   : > { %8466 = vmatpush1.bf16.msra.mxu1 %v14569_v38  ;;  %v1873_v37 = vld [vmem:[%s17189_s0 + $0x1578] sm:$0xff] }
 0x54c   : > { %8467 = vmatprep.subr.bf16.mxu1 %v14578_v39  ;;  %v14754_v39 = vcombine.high %v1869_v45, %v1873_v37  ;;  %v1749_v43 = vld [vmem:[%s17189_s0 + $0x1198] sm:$0xff] }
 0x54d   : > { %8427 = vmatpush1.bf16.msra.mxu0 %v14449_v56  ;;  %v1753_v54 = vld [vmem:[%s17189_s0 + $0x11b8] sm:$0xff]  ;;  %v14625_v56 = vcombine.low %v1741_v29, %v1745_v48 }
 0x54e   : > { %8478 = vmatprep.subr.bf16.mxu0 %v14586_v62  ;;  %v1877_v47 = vld [vmem:[%s17189_s0 + $0x1598] sm:$0xff]  ;;  %v14634_v62 = vcombine.high %v1749_v43, %v1753_v54  ;;  %v14633_v18 = vcombine.low %v1749_v43, %v1753_v54 }
 0x54f   : > { %8468 = vmatpush1.bf16.msra.mxu1 %v14577_v57  ;;  %v1881_v0 = vld [vmem:[%s17189_s0 + $0x15b8] sm:$0xff]  ;;  %v14753_v57 = vcombine.low %v1869_v45, %v1873_v37 }
 0x550   : > { %8519 = vmatprep.subr.bf16.mxu1 %v14714_v1  ;;  %8429 = vmatmul.mubr.bf16.vlgmr.msra.gmra.mrb[52].mxu0 %v17523_v60  ;;  %v1853_v60 = vld [vmem:[%s17189_s0 + $0x14d8] sm:$0xff]  ;;  %v14762_v14 = vcombine.high %v1877_v47, %v1881_v0 }
 0x551   : > { %8479 = vmatpush1.bf16.msra.mxu0 %v14585_v20  ;;  %8510 = vmatprep.mubr.bf16.mxu0 %v17535_v4  ;;  %v14738_v31 = vcombine.high %v1853_v60, %v1857_v49  ;;  %v1865_v4 = vld [vmem:[%s17189_s0 + $0x1538] sm:$0xff] }
 0x552   : > { %8470 = vmatmul.mubr.bf16.vlgmr.msra.gmra.mrb[52].mxu1 %v17529_v50  ;;  %8480 = vmatprep.subr.bf16.mxu0 %v14594_v5  ;;  %v14601_v50 = vcombine.low %v1717_v17, %v1721_v9  ;;  %v14746_v44 = vcombine.high %v1861_v2, %v1865_v4  ;;  %v14745_v38 = vcombine.low %v1861_v2, %v1865_v4  ;;  %v1757_v3 = vld [vmem:[%s17189_s0 + $0x11d8] sm:$0xff] }
 0x553   : > { %8520 = vmatpush1.bf16.msra.mxu1 %v14713_v27  ;;  %8551 = vmatprep.mubr.bf16.mxu1 %v17540_v10  ;;  %v14737_v10 = vcombine.low %v1853_v60, %v1857_v49  ;;  %v1761_v8 = vld [vmem:[%s17189_s0 + $0x11f8] sm:$0xff] }
 0x554   : > { %8521 = vmatprep.subr.bf16.mxu1 %v14722_v28  ;;  %v1885_v5 = vld [vmem:[%s17189_s0 + $0x15d8] sm:$0xff] }
 0x555   : > { %8481 = vmatpush1.bf16.msra.mxu0 %v14593_v46  ;;  %v1889_v28 = vld [vmem:[%s17189_s0 + $0x15f8] sm:$0xff] }
 0x556   : > { %8482 = vmatprep.subr.bf16.mxu0 %v14602_v55  ;;  %v14770_v16 = vcombine.high %v1885_v5, %v1889_v28  ;;  %v1765_v60 = vld [vmem:[%s17189_s0 + $0x1218] sm:$0xff] }
 0x557   : > { %8522 = vmatpush1.bf16.msra.mxu1 %v14721_v12  ;;  %v1769_v49 = vld [vmem:[%s17189_s0 + $0x1238] sm:$0xff] }
 0x558   : > { %8523 = vmatprep.subr.bf16.mxu1 %v14730_v13  ;;  %v14642_v13 = vcombine.high %v1757_v3, %v1761_v8  ;;  %v14650_v24 = vcombine.high %v1765_v60, %v1769_v49  ;;  %v1773_v2 = vld [vmem:[%s17189_s0 + $0x1258] sm:$0xff] }
 0x559   : > { %8483 = vmatpush1.bf16.msra.mxu0 %v14601_v50  ;;  %v1893_v50 = vld [vmem:[%s17189_s0 + $0x1618] sm:$0xff] }
 0x55a   : > { %8484 = vmatprep.subr.bf16.mxu0 %v14610_v21  ;;  %v14641_v21 = vcombine.low %v1757_v3, %v1761_v8  ;;  %v1777_v4 = vld [vmem:[%s17189_s0 + $0x1278] sm:$0xff] }
 0x55b   : > { %8524 = vmatpush1.bf16.msra.mxu1 %v14729_v41  ;;  %v1897_v41 = vld [vmem:[%s17189_s0 + $0x1638] sm:$0xff]  ;;  %v14658_v29 = vcombine.high %v1773_v2, %v1777_v4 }
 0x55c   : > { %8525 = vmatprep.subr.bf16.mxu1 %v14738_v31  ;;  %v14769_v31 = vcombine.low %v1885_v5, %v1889_v28  ;;  %v14778_v34 = vcombine.high %v1893_v50, %v1897_v41  ;;  %v1781_v45 = vld [vmem:[%s17189_s0 + $0x1298] sm:$0xff] }
 0x55d   : > { %8485 = vmatpush1.bf16.msra.mxu0 %v14609_v25  ;;  %v1901_v25 = vld [vmem:[%s17189_s0 + $0x1658] sm:$0xff] }
 0x55e   : > { %8486 = vmatprep.subr.bf16.mxu0 %v14618_v32  ;;  %v14649_v32 = vcombine.low %v1765_v60, %v1769_v49  ;;  %v1785_v37 = vld [vmem:[%s17189_s0 + $0x12b8] sm:$0xff] }
 0x55f   : > { %8526 = vmatpush1.bf16.msra.mxu1 %v14737_v10  ;;  %v1905_v10 = vld [vmem:[%s17189_s0 + $0x1678] sm:$0xff]  ;;  %v14666_v43 = vcombine.high %v1781_v45, %v1785_v37 }
 0x560   : > { %8527 = vmatprep.subr.bf16.mxu1 %v14746_v44  ;;  %v14777_v44 = vcombine.low %v1893_v50, %v1897_v41  ;;  %v14786_v48 = vcombine.high %v1901_v25, %v1905_v10  ;;  %v1797_v8 = vld [vmem:[%s17189_s0 + $0x1318] sm:$0xff] }
 0x561   : > { %8487 = vmatpush1.bf16.msra.mxu0 %v14617_v35  ;;  %v1909_v35 = vld [vmem:[%s17189_s0 + $0x1698] sm:$0xff] }
 0x562   : > { %8488 = vmatprep.subr.bf16.mxu0 %v14626_v40  ;;  %v14657_v40 = vcombine.low %v1773_v2, %v1777_v4  ;;  %v1813_v60 = vld [vmem:[%s17189_s0 + $0x1398] sm:$0xff] }
 0x563   : > { %8528 = vmatpush1.bf16.msra.mxu1 %v14745_v38  ;;  %v8184_v1 = vpop.f32.mrb[40].mxu0  ;;  %v1913_v38 = vld [vmem:[%s17189_s0 + $0x16b8] sm:$0xff] }
 0x564   : > { %8529 = vmatprep.subr.bf16.mxu1 %v14754_v39  ;;  %v8185_v53 = vadd.f32 %v8184_v1, %v18381_v36  ;;  %v8186_v27 = vpop.f32.mrb[41].mxu0  ;;  %v14761_v36 = vcombine.low %v1877_v47, %v1881_v0  ;;  %v14785_v39 = vcombine.low %v1901_v25, %v1905_v10  ;;  %v14794_v54 = vcombine.high %v1909_v35, %v1913_v38  ;;  %v1789_v47 = vld [vmem:[%s17189_s0 + $0x12d8] sm:$0xff] }
 0x565   : > { %v8225_v20 = vpop.f32.mrb[40].mxu1  ;;  %v8187_v17 = vadd.f32 %v8186_v27, %v18383_v22  ;;  %v8188_v11 = vpop.f32.mrb[42].mxu0  ;;  %8489 = vmatpush1.bf16.msra.mxu0 %v14625_v56  ;;  %v1793_v0 = vld [vmem:[%s17189_s0 + $0x12f8] sm:$0xff]  ;;  %v14793_v1 = vcombine.low %v1909_v35, %v1913_v38 }
 0x566   : > { %v8227_v9 = vpop.f32.mrb[41].mxu1  ;;  %v18455_v46 = vadd.f32 %v8225_v20, %v8185_v53  ;;  %v8189_v55 = vpop.f32.mrb[43].mxu0  ;;  %8490 = vmatprep.subr.bf16.mxu0 %v14634_v62  ;;  %v1917_v56 = vld [vmem:[%s17189_s0 + $0x16d8] sm:$0xff]  ;;  %v14665_v62 = vcombine.low %v1781_v45, %v1785_v37  ;;  %v14673_v5 = vcombine.low %v1789_v47, %v1793_v0 }
 0x567   : > { %v8229_v12 = vpop.f32.mrb[42].mxu1  ;;  %8530 = vmatpush1.bf16.msra.mxu1 %v14753_v57  ;;  %v18457_v42 = vadd.f32 %v8227_v9, %v8187_v17  ;;  %v1921_v57 = vld [vmem:[%s17189_s0 + $0x16f8] sm:$0xff] }
 0x568   : > { %v8230_v22 = vpop.f32.mrb[43].mxu1  ;;  %8531 = vmatprep.subr.bf16.mxu1 %v14762_v14  ;;  %v14674_v14 = vcombine.high %v1789_v47, %v1793_v0  ;;  %v14802_v3 = vcombine.high %v1917_v56, %v1921_v57  ;;  %v1801_v53 = vld [vmem:[%s17189_s0 + $0x1338] sm:$0xff]  ;;  %v14801_v28 = vcombine.low %v1917_v56, %v1921_v57 }
 0x569   : > { %8491 = vmatpush1.bf16.msra.mxu0 %v14633_v18  ;;  %v1925_v20 = vld [vmem:[%s17189_s0 + $0x1718] sm:$0xff]  ;;  %v14682_v17 = vcombine.high %v1797_v8, %v1801_v53 }
 0x56a   : > { %8492 = vmatprep.subr.bf16.mxu0 %v14642_v13  ;;  %v1929_v27 = vld [vmem:[%s17189_s0 + $0x1738] sm:$0xff] }
 0x56b   : > { %8532 = vmatpush1.bf16.msra.mxu1 %v14761_v36  ;;  %v14810_v9 = vcombine.high %v1925_v20, %v1929_v27  ;;  %v1805_v11 = vld [vmem:[%s17189_s0 + $0x1358] sm:$0xff]  ;;  %v14681_v36 = vcombine.low %v1797_v8, %v1801_v53  ;;  %v14809_v13 = vcombine.low %v1925_v20, %v1929_v27 }
 0x56c   : > { %8533 = vmatprep.subr.bf16.mxu1 %v14770_v16  ;;  %v1809_v18 = vld [vmem:[%s17189_s0 + $0x1378] sm:$0xff] }
 0x56d   : > { %8493 = vmatpush1.bf16.msra.mxu0 %v14641_v21  ;;  %v1933_v12 = vld [vmem:[%s17189_s0 + $0x1758] sm:$0xff]  ;;  %v14690_v22 = vcombine.high %v1805_v11, %v1809_v18  ;;  %v14689_v21 = vcombine.low %v1805_v11, %v1809_v18 }
 0x56e   : > { %8494 = vmatprep.subr.bf16.mxu0 %v14650_v24  ;;  %v1937_v55 = vld [vmem:[%s17189_s0 + $0x1778] sm:$0xff] }
 0x56f   : > { %8534 = vmatpush1.bf16.msra.mxu1 %v14769_v31  ;;  %v14818_v16 = vcombine.high %v1933_v12, %v1937_v55  ;;  %v1817_v49 = vld [vmem:[%s17189_s0 + $0x13b8] sm:$0xff]  ;;  %v14817_v31 = vcombine.low %v1933_v12, %v1937_v55 }
 0x570   : > { %8535 = vmatprep.subr.bf16.mxu1 %v14778_v34  ;;  %v1941_v50 = vld [vmem:[%s17189_s0 + $0x1798] sm:$0xff]  ;;  %v14698_v24 = vcombine.high %v1813_v60, %v1817_v49 }
 0x571   : > { %8495 = vmatpush1.bf16.msra.mxu0 %v14649_v32  ;;  %v1945_v41 = vld [vmem:[%s17189_s0 + $0x17b8] sm:$0xff]  ;;  %v14697_v32 = vcombine.low %v1813_v60, %v1817_v49 }
 0x572   : > { %8496 = vmatprep.subr.bf16.mxu0 %v14658_v29  ;;  %v14826_v34 = vcombine.high %v1941_v50, %v1945_v41  ;;  %v1821_v2 = vld [vmem:[%s17189_s0 + $0x13d8] sm:$0xff] }
 0x573   : > { %8536 = vmatpush1.bf16.msra.mxu1 %v14777_v44  ;;  %v1825_v4 = vld [vmem:[%s17189_s0 + $0x13f8] sm:$0xff]  ;;  %v14825_v44 = vcombine.low %v1941_v50, %v1945_v41 }
 0x574   : > { %8537 = vmatprep.subr.bf16.mxu1 %v14786_v48  ;;  %v1949_v25 = vld [vmem:[%s17189_s0 + $0x17d8] sm:$0xff]  ;;  %v14706_v29 = vcombine.high %v1821_v2, %v1825_v4 }
 0x575   : > { %8497 = vmatpush1.bf16.msra.mxu0 %v14657_v40  ;;  %v1953_v10 = vld [vmem:[%s17189_s0 + $0x17f8] sm:$0xff]  ;;  %v14705_v40 = vcombine.low %v1821_v2, %v1825_v4 }
 0x576   : > { %8498 = vmatprep.subr.bf16.mxu0 %v14666_v43  ;;  %v14834_v48 = vcombine.high %v1949_v25, %v1953_v10  ;;  %v1957_v45 = vld [vmem:[%s17189_s0 + $0x1818] sm:$0xff] }
 0x577   : > { %8538 = vmatpush1.bf16.msra.mxu1 %v14785_v39  ;;  %v1961_v37 = vld [vmem:[%s17189_s0 + $0x1838] sm:$0xff]  ;;  %v14833_v39 = vcombine.low %v1949_v25, %v1953_v10 }
 0x578   : > { %8539 = vmatprep.subr.bf16.mxu1 %v14794_v54  ;;  %v2085_v35 = vld [vmem:[%s17189_s0 + $0x1c18] sm:$0xff]  ;;  %v14842_v43 = vcombine.high %v1957_v45, %v1961_v37 }
 0x579   : > { %8499 = vmatpush1.bf16.msra.mxu0 %v14665_v62  ;;  %v2089_v38 = vld [vmem:[%s17189_s0 + $0x1c38] sm:$0xff]  ;;  %v14841_v62 = vcombine.low %v1957_v45, %v1961_v37 }
 0x57a   : > { %8500 = vmatprep.subr.bf16.mxu0 %v14674_v14  ;;  %v14970_v54 = vcombine.high %v2085_v35, %v2089_v38  ;;  %v1965_v47 = vld [vmem:[%s17189_s0 + $0x1858] sm:$0xff] }
 0x57b   : > { %8540 = vmatpush1.bf16.msra.mxu1 %v14793_v1  ;;  %v1969_v0 = vld [vmem:[%s17189_s0 + $0x1878] sm:$0xff]  ;;  %v14969_v1 = vcombine.low %v2085_v35, %v2089_v38 }
 0x57c   : > { %8541 = vmatprep.subr.bf16.mxu1 %v14802_v3  ;;  %v2093_v56 = vld [vmem:[%s17189_s0 + $0x1c58] sm:$0xff]  ;;  %v14850_v14 = vcombine.high %v1965_v47, %v1969_v0 }
 0x57d   : > { %8501 = vmatpush1.bf16.msra.mxu0 %v14673_v5  ;;  %v2097_v57 = vld [vmem:[%s17189_s0 + $0x1c78] sm:$0xff]  ;;  %v14849_v5 = vcombine.low %v1965_v47, %v1969_v0 }
 0x57e   : > { %8502 = vmatprep.subr.bf16.mxu0 %v14682_v17  ;;  %v14978_v3 = vcombine.high %v2093_v56, %v2097_v57  ;;  %v1973_v8 = vld [vmem:[%s17189_s0 + $0x1898] sm:$0xff] }
 0x57f   : > { %8542 = vmatpush1.bf16.msra.mxu1 %v14801_v28  ;;  %v1977_v53 = vld [vmem:[%s17189_s0 + $0x18b8] sm:$0xff]  ;;  %v14977_v28 = vcombine.low %v2093_v56, %v2097_v57 }
 0x580   : > { %8543 = vmatprep.subr.bf16.mxu1 %v14810_v9  ;;  %v2101_v20 = vld [vmem:[%s17189_s0 + $0x1c98] sm:$0xff]  ;;  %v14858_v17 = vcombine.high %v1973_v8, %v1977_v53 }
 0x581   : > { %8503 = vmatpush1.bf16.msra.mxu0 %v14681_v36  ;;  %v2105_v27 = vld [vmem:[%s17189_s0 + $0x1cb8] sm:$0xff] }
 0x582   : > { %8504 = vmatprep.subr.bf16.mxu0 %v14690_v22  ;;  %v14986_v9 = vcombine.high %v2101_v20, %v2105_v27  ;;  %v1981_v11 = vld [vmem:[%s17189_s0 + $0x18d8] sm:$0xff]  ;;  %v14985_v55 = vcombine.low %v2101_v20, %v2105_v27  ;;  %v1167_v20 = vld [vmem:[#allocation2 + $0x28] sm:$0xff] }
 0x583   : > { %8544 = vmatpush1.bf16.msra.mxu1 %v14809_v13  ;;  %v1985_v18 = vld [vmem:[%s17189_s0 + $0x18f8] sm:$0xff] }
 0x584   : > { %8545 = vmatprep.subr.bf16.mxu1 %v14818_v16  ;;  %v2113_v12 = vld [vmem:[%s17189_s0 + $0x1cf8] sm:$0xff]  ;;  %v14866_v36 = vcombine.high %v1981_v11, %v1985_v18  ;;  %v14865_v49 = vcombine.low %v1981_v11, %v1985_v18 }
 0x585   : > { %8505 = vmatpush1.bf16.msra.mxu0 %v14689_v21  ;;  %v1989_v22 = vld [vmem:[%s17189_s0 + $0x1918] sm:$0xff] }
 0x586   : > { %8506 = vmatprep.subr.bf16.mxu0 %v14698_v24  ;;  %v1993_v16 = vld [vmem:[%s17189_s0 + $0x1938] sm:$0xff] }
 0x587   : > { %8546 = vmatpush1.bf16.msra.mxu1 %v14817_v31  ;;  %v2117_v60 = vld [vmem:[%s17189_s0 + $0x1d18] sm:$0xff]  ;;  %v14874_v50 = vcombine.high %v1989_v22, %v1993_v16  ;;  %v14873_v2 = vcombine.low %v1989_v22, %v1993_v16 }
 0x588   : > { %8547 = vmatprep.subr.bf16.mxu1 %v14826_v34  ;;  %v1997_v21 = vld [vmem:[%s17189_s0 + $0x1958] sm:$0xff] }
 0x589   : > { %8507 = vmatpush1.bf16.msra.mxu0 %v14697_v32  ;;  %v2001_v31 = vld [vmem:[%s17189_s0 + $0x1978] sm:$0xff] }
 0x58a   : > { %8508 = vmatprep.subr.bf16.mxu0 %v14706_v29  ;;  %v2125_v24 = vld [vmem:[%s17189_s0 + $0x1d58] sm:$0xff]  ;;  %v14882_v25 = vcombine.high %v1997_v21, %v2001_v31  ;;  %v14881_v45 = vcombine.low %v1997_v21, %v2001_v31 }
 0x58b   : > { %8548 = vmatpush1.bf16.msra.mxu1 %v14825_v44  ;;  %v2129_v34 = vld [vmem:[%s17189_s0 + $0x1d78] sm:$0xff] }
 0x58c   : > { %8549 = vmatprep.subr.bf16.mxu1 %v14834_v48  ;;  %v15010_v10 = vcombine.high %v2125_v24, %v2129_v34  ;;  %v2005_v32 = vld [vmem:[%s17189_s0 + $0x1998] sm:$0xff]  ;;  %v15009_v37 = vcombine.low %v2125_v24, %v2129_v34 }
 0x58d   : > { %8509 = vmatpush1.bf16.msra.mxu0 %v14705_v40  ;;  %v2009_v44 = vld [vmem:[%s17189_s0 + $0x19b8] sm:$0xff] }
 0x58e   : > { %8560 = vmatprep.subr.bf16.mxu0 %v14842_v43  ;;  %v2133_v29 = vld [vmem:[%s17189_s0 + $0x1d98] sm:$0xff]  ;;  %v14890_v35 = vcombine.high %v2005_v32, %v2009_v44 }
 0x58f   : > { %8550 = vmatpush1.bf16.msra.mxu1 %v14833_v39  ;;  %v2137_v48 = vld [vmem:[%s17189_s0 + $0x1db8] sm:$0xff] }
 0x590   : > { %8601 = vmatprep.subr.bf16.mxu1 %v14970_v54  ;;  %8511 = vmatmul.mubr.bf16.vlgmr.msra.gmra.mrb[56].mxu0 %v17614_v15  ;;  %v2109_v15 = vld [vmem:[%s17189_s0 + $0x1cd8] sm:$0xff]  ;;  %v15018_v40 = vcombine.high %v2133_v29, %v2137_v48 }
 0x591   : > { %8561 = vmatpush1.bf16.msra.mxu0 %v14841_v62  ;;  %8592 = vmatprep.mubr.bf16.mxu0 %v17623_v26  ;;  %v14994_v13 = vcombine.high %v2109_v15, %v2113_v12  ;;  %v2121_v26 = vld [vmem:[%s17189_s0 + $0x1d38] sm:$0xff]  ;;  %v1166_v62 = vld [vmem:[#allocation2 + $0x20] sm:$0xff] }
 0x592   : > { %8552 = vmatmul.mubr.bf16.vlgmr.msra.gmra.mrb[56].mxu1 %v17619_v19  ;;  %8562 = vmatprep.subr.bf16.mxu0 %v14850_v14  ;;  %v14857_v19 = vcombine.low %v1973_v8, %v1977_v53  ;;  %v15002_v41 = vcombine.high %v2117_v60, %v2121_v26  ;;  %v15001_v4 = vcombine.low %v2117_v60, %v2121_v26  ;;  %v2013_v39 = vld [vmem:[%s17189_s0 + $0x19d8] sm:$0xff] }
 0x593   : > { %8602 = vmatpush1.bf16.msra.mxu1 %v14969_v1  ;;  %8633 = vmatprep.mubr.bf16.mxu1 %v17628_v30  ;;  %v14993_v30 = vcombine.low %v2109_v15, %v2113_v12  ;;  %v2017_v43 = vld [vmem:[%s17189_s0 + $0x19f8] sm:$0xff]  ;;  %v14889_v8 = vcombine.low %v2005_v32, %v2009_v44 }
 0x594   : > { %8603 = vmatprep.subr.bf16.mxu1 %v14978_v3  ;;  %v2141_v56 = vld [vmem:[%s17189_s0 + $0x1dd8] sm:$0xff] }
 0x595   : > { %8563 = vmatpush1.bf16.msra.mxu0 %v14849_v5  ;;  %v2145_v57 = vld [vmem:[%s17189_s0 + $0x1df8] sm:$0xff]  ;;  %v15017_v5 = vcombine.low %v2133_v29, %v2137_v48 }
 0x596   : > { %8564 = vmatprep.subr.bf16.mxu0 %v14858_v17  ;;  %v2021_v11 = vld [vmem:[%s17189_s0 + $0x1a18] sm:$0xff] }
 0x597   : > { %8604 = vmatpush1.bf16.msra.mxu1 %v14977_v28  ;;  %v14898_v28 = vcombine.high %v2013_v39, %v2017_v43  ;;  %v2025_v18 = vld [vmem:[%s17189_s0 + $0x1a38] sm:$0xff] }
 0x598   : > { %8605 = vmatprep.subr.bf16.mxu1 %v14986_v9  ;;  %v2149_v12 = vld [vmem:[%s17189_s0 + $0x1e18] sm:$0xff]  ;;  %v14906_v22 = vcombine.high %v2021_v11, %v2025_v18 }
 0x599   : > { %8565 = vmatpush1.bf16.msra.mxu0 %v14857_v19  ;;  %v2153_v19 = vld [vmem:[%s17189_s0 + $0x1e38] sm:$0xff] }
 0x59a   : > { %8566 = vmatprep.subr.bf16.mxu0 %v14866_v36  ;;  %v14897_v36 = vcombine.low %v2013_v39, %v2017_v43  ;;  %v15034_v16 = vcombine.high %v2149_v12, %v2153_v19  ;;  %v2029_v60 = vld [vmem:[%s17189_s0 + $0x1a58] sm:$0xff] }
 0x59b   : > { %8606 = vmatpush1.bf16.msra.mxu1 %v14985_v55  ;;  %v2033_v26 = vld [vmem:[%s17189_s0 + $0x1a78] sm:$0xff] }
 0x59c   : > { %8607 = vmatprep.subr.bf16.mxu1 %v14994_v13  ;;  %v15025_v13 = vcombine.low %v2141_v56, %v2145_v57  ;;  %v14914_v21 = vcombine.high %v2029_v60, %v2033_v26  ;;  %v2037_v24 = vld [vmem:[%s17189_s0 + $0x1a98] sm:$0xff] }
 0x59d   : > { %8567 = vmatpush1.bf16.msra.mxu0 %v14865_v49  ;;  %v2157_v49 = vld [vmem:[%s17189_s0 + $0x1e58] sm:$0xff] }
 0x59e   : > { %8568 = vmatprep.subr.bf16.mxu0 %v14874_v50  ;;  %v14905_v50 = vcombine.low %v2021_v11, %v2025_v18  ;;  %v2041_v34 = vld [vmem:[%s17189_s0 + $0x1ab8] sm:$0xff] }
 0x59f   : > { %8608 = vmatpush1.bf16.msra.mxu1 %v14993_v30  ;;  %v2161_v30 = vld [vmem:[%s17189_s0 + $0x1e78] sm:$0xff]  ;;  %v14922_v32 = vcombine.high %v2037_v24, %v2041_v34 }
 0x5a0   : > { %8609 = vmatprep.subr.bf16.mxu1 %v15002_v41  ;;  %v15033_v41 = vcombine.low %v2149_v12, %v2153_v19  ;;  %v15042_v31 = vcombine.high %v2157_v49, %v2161_v30  ;;  %v2045_v29 = vld [vmem:[%s17189_s0 + $0x1ad8] sm:$0xff] }
 0x5a1   : > { %8569 = vmatpush1.bf16.msra.mxu0 %v14873_v2  ;;  %v2165_v2 = vld [vmem:[%s17189_s0 + $0x1e98] sm:$0xff] }
 0x5a2   : > { %8570 = vmatprep.subr.bf16.mxu0 %v14882_v25  ;;  %v14913_v25 = vcombine.low %v2029_v60, %v2033_v26  ;;  %v2049_v48 = vld [vmem:[%s17189_s0 + $0x1af8] sm:$0xff] }
 0x5a3   : > { %8610 = vmatpush1.bf16.msra.mxu1 %v15001_v4  ;;  %v8266_v38 = vpop.f32.mrb[44].mxu0  ;;  %v2169_v4 = vld [vmem:[%s17189_s0 + $0x1eb8] sm:$0xff] }
 0x5a4   : > { %8611 = vmatprep.subr.bf16.mxu1 %v15010_v10  ;;  %v8267_v54 = vadd.f32 %v8266_v38, %v18455_v46  ;;  %v8268_v0 = vpop.f32.mrb[45].mxu0  ;;  %v15041_v10 = vcombine.low %v2157_v49, %v2161_v30  ;;  %v15050_v44 = vcombine.high %v2165_v2, %v2169_v4  ;;  %v15049_v38 = vcombine.low %v2165_v2, %v2169_v4  ;;  %v2053_v43 = vld [vmem:[%s17189_s0 + $0x1b18] sm:$0xff] }
 0x5a5   : > { %v8307_v47 = vpop.f32.mrb[44].mxu1  ;;  %v8269_v1 = vadd.f32 %v8268_v0, %v18457_v42  ;;  %v8270_v3 = vpop.f32.mrb[46].mxu0  ;;  %8571 = vmatpush1.bf16.msra.mxu0 %v14881_v45  ;;  %v15026_v42 = vcombine.high %v2141_v56, %v2145_v57  ;;  %v2173_v45 = vld [vmem:[%s17189_s0 + $0x1ed8] sm:$0xff]  ;;  %v14929_v56 = vcombine.low %v2045_v29, %v2049_v48 }
 0x5a6   : > { %v8309_v14 = vpop.f32.mrb[45].mxu1  ;;  %v8308_v53 = vadd.f32 %v8307_v47, %v8267_v54  ;;  %v8271_v46 = vpop.f32.mrb[47].mxu0  ;;  %8572 = vmatprep.subr.bf16.mxu0 %v14890_v35  ;;  %v14921_v35 = vcombine.low %v2037_v24, %v2041_v34  ;;  %v2057_v54 = vld [vmem:[%s17189_s0 + $0x1b38] sm:$0xff] }
 0x5a7   : > { %v8311_v27 = vpop.f32.mrb[46].mxu1  ;;  %8612 = vmatpush1.bf16.msra.mxu1 %v15009_v37  ;;  %v8310_v17 = vadd.f32 %v8309_v14, %v8269_v1  ;;  %v2177_v37 = vld [vmem:[%s17189_s0 + $0x1ef8] sm:$0xff] }
 0x5a8   : > { %v8312_v9 = vpop.f32.mrb[47].mxu1  ;;  %8613 = vmatprep.subr.bf16.mxu1 %v15018_v40  ;;  %v8646_v15 = vadd.f32 %v8308_v53, %v1166_v62  ;;  %v14930_v40 = vcombine.high %v2045_v29, %v2049_v48  ;;  %v15058_v39 = vcombine.high %v2173_v45, %v2177_v37  ;;  %v2181_v47 = vld [vmem:[%s17189_s0 + $0x1f18] sm:$0xff]  ;;  %v15057_v57 = vcombine.low %v2173_v45, %v2177_v37 }
 0x5a9   : > { %v8647_v55 = vadd.f32 %v8310_v17, %v1167_v20  ;;  %8573 = vmatpush1.bf16.msra.mxu0 %v14889_v8  ;;  %v2185_v0 = vld [vmem:[%s17189_s0 + $0x1f38] sm:$0xff]  ;;  %v14938_v62 = vcombine.high %v2053_v43, %v2057_v54  ;;  %v14937_v20 = vcombine.low %v2053_v43, %v2057_v54 }
 0x5aa   : > { %8654 = vst [vmem:[#allocation2 + $0x20] sm:$0xff] %v8646_v15  ;;  %8574 = vmatprep.subr.bf16.mxu0 %v14898_v28  ;;  %v15066_v1 = vcombine.high %v2181_v47, %v2185_v0  ;;  %v2061_v14 = vld [vmem:[%s17189_s0 + $0x1b58] sm:$0xff]  ;;  %v15065_v27 = vcombine.low %v2181_v47, %v2185_v0 }
 0x5ab   : > { %8614 = vmatpush1.bf16.msra.mxu1 %v15017_v5  ;;  %8655 = vst [vmem:[#allocation2 + $0x28] sm:$0xff] %v8647_v55  ;;  %v2065_v3 = vld [vmem:[%s17189_s0 + $0x1b78] sm:$0xff] }
 0x5ac   : > { %8615 = vmatprep.subr.bf16.mxu1 %v15026_v42  ;;  %v2189_v8 = vld [vmem:[%s17189_s0 + $0x1f58] sm:$0xff]  ;;  %v14946_v46 = vcombine.high %v2061_v14, %v2065_v3  ;;  %v14945_v11 = vcombine.low %v2061_v14, %v2065_v3 }
 0x5ad   : > { %8575 = vmatpush1.bf16.msra.mxu0 %v14897_v36  ;;  %v2193_v53 = vld [vmem:[%s17189_s0 + $0x1f78] sm:$0xff] }
 0x5ae   : > { %8576 = vmatprep.subr.bf16.mxu0 %v14906_v22  ;;  %v15074_v5 = vcombine.high %v2189_v8, %v2193_v53  ;;  %v2069_v28 = vld [vmem:[%s17189_s0 + $0x1b98] sm:$0xff]  ;;  %v15073_v18 = vcombine.low %v2189_v8, %v2193_v53 }
 0x5af   : > { %8616 = vmatpush1.bf16.msra.mxu1 %v15025_v13  ;;  %v2073_v17 = vld [vmem:[%s17189_s0 + $0x1bb8] sm:$0xff] }
 0x5b0   : > { %8617 = vmatprep.subr.bf16.mxu1 %v15034_v16  ;;  %v2197_v9 = vld [vmem:[%s17189_s0 + $0x1f98] sm:$0xff]  ;;  %v14954_v15 = vcombine.high %v2069_v28, %v2073_v17  ;;  %v14953_v22 = vcombine.low %v2069_v28, %v2073_v17  ;;  %v1168_v28 = vld [vmem:[#allocation2 + $0x30] sm:$0xff] }
 0x5b1   : > { %8577 = vmatpush1.bf16.msra.mxu0 %v14905_v50  ;;  %v2201_v42 = vld [vmem:[%s17189_s0 + $0x1fb8] sm:$0xff] }
 0x5b2   : > { %8578 = vmatprep.subr.bf16.mxu0 %v14914_v21  ;;  %v15082_v12 = vcombine.high %v2197_v9, %v2201_v42  ;;  %v2077_v19 = vld [vmem:[%s17189_s0 + $0x1bd8] sm:$0xff]  ;;  %v15081_v16 = vcombine.low %v2197_v9, %v2201_v42 }
 0x5b3   : > { %8618 = vmatpush1.bf16.msra.mxu1 %v15033_v41  ;;  %v2081_v55 = vld [vmem:[%s17189_s0 + $0x1bf8] sm:$0xff] }
 0x5b4   : > { %8619 = vmatprep.subr.bf16.mxu1 %v15042_v31  ;;  %v2205_v36 = vld [vmem:[%s17189_s0 + $0x1fd8] sm:$0xff]  ;;  %v14962_v60 = vcombine.high %v2077_v19, %v2081_v55  ;;  %v14961_v49 = vcombine.low %v2077_v19, %v2081_v55 }
 0x5b5   : > { %8579 = vmatpush1.bf16.msra.mxu0 %v14913_v25  ;;  %v2209_v13 = vld [vmem:[%s17189_s0 + $0x1ff8] sm:$0xff]  ;;  %s19567_s0 = scalar_lea.vmem (!%p15091_p9), [#allocation16], %s17187_s12 }
 0x5b6   : > { %8580 = vmatprep.subr.bf16.mxu0 %v14922_v32  ;;  %v15090_v26 = vcombine.high %v2205_v36, %v2209_v13  ;;  %v15089_v30 = vcombine.low %v2205_v36, %v2209_v13  ;;  %s19570_s15 = smov (!%p15091_p9), %s19567_s0 }
 0x5b7   : > { %8620 = vmatpush1.bf16.msra.mxu1 %v15041_v10 }
 0x5b8   : > { %8621 = vmatprep.subr.bf16.mxu1 %v15050_v44 }
 0x5b9   : > { %8581 = vmatpush1.bf16.msra.mxu0 %v14921_v35 }
 0x5ba   : > { %8582 = vmatprep.subr.bf16.mxu0 %v14930_v40 }
 0x5bb   : > { %8622 = vmatpush1.bf16.msra.mxu1 %v15049_v38 }
 0x5bc   : > { %8623 = vmatprep.subr.bf16.mxu1 %v15058_v39 }
 0x5bd   : > { %8583 = vmatpush1.bf16.msra.mxu0 %v14929_v56 }
 0x5be   : > { %8584 = vmatprep.subr.bf16.mxu0 %v14938_v62 }
 0x5bf   : > { %8624 = vmatpush1.bf16.msra.mxu1 %v15057_v57 }
 0x5c0   : > { %8625 = vmatprep.subr.bf16.mxu1 %v15066_v1 }
 0x5c1   : > { %8585 = vmatpush1.bf16.msra.mxu0 %v14937_v20 }
 0x5c2   : > { %8586 = vmatprep.subr.bf16.mxu0 %v14946_v46 }
 0x5c3   : > { %8626 = vmatpush1.bf16.msra.mxu1 %v15065_v27 }
 0x5c4   : > { %8627 = vmatprep.subr.bf16.mxu1 %v15074_v5 }
 0x5c5   : > { %8587 = vmatpush1.bf16.msra.mxu0 %v14945_v11 }
 0x5c6   : > { %8588 = vmatprep.subr.bf16.mxu0 %v14954_v15 }
 0x5c7   : > { %8628 = vmatpush1.bf16.msra.mxu1 %v15073_v18  ;;  %v1169_v18 = vld [vmem:[#allocation2 + $0x38] sm:$0xff] }
 0x5c8   : > { %8629 = vmatprep.subr.bf16.mxu1 %v15082_v12 }
 0x5c9   : > { %8589 = vmatpush1.bf16.msra.mxu0 %v14953_v22  ;;  %v8836_v22 = vld [vmem:[%s17203_s19] sm:$0xff] (!%p15091_p9) }
 0x5ca   : > { %8590 = vmatprep.subr.bf16.mxu0 %v14962_v60  ;;  %v9092_v60 = vld [vmem:[%s17203_s19 + $0x800] sm:$0xff] (!%p15091_p9) }
 0x5cb   : > { %8630 = vmatpush1.bf16.msra.mxu1 %v15081_v16  ;;  %v8840_v16 = vld [vmem:[%s17203_s19 + $0x20] sm:$0xff] (!%p15091_p9) }
 0x5cc   : > { %8631 = vmatprep.subr.bf16.mxu1 %v15090_v26  ;;  %v15093_v26 = vcombine.high (!%p15091_p9), %v8836_v22, %v8840_v16 }
 0x5cd   : > { %8591 = vmatpush1.bf16.msra.mxu0 %v14961_v49  ;;  %v9096_v49 = vld [vmem:[%s17203_s19 + $0x820] sm:$0xff] (!%p15091_p9) }
 0x5cf   : > { %8632 = vmatpush1.bf16.msra.mxu1 %v15089_v30  ;;  %v15092_v30 = vcombine.low (!%p15091_p9), %v8836_v22, %v8840_v16  ;;  %v8896_v16 = vld [vmem:[%s17203_s19 + $0x1e0] sm:$0xff] (!%p15091_p9) }
 0x5d0   : > { %8593 = vmatmul.mubr.bf16.vlgmr.msra.gmra.mrb[60].mxu0 %v17693_v23  ;;  %11950 = vmatprep.subr.bf16.mxu1 (!%p15091_p9), %v15093_v26  ;;  %v18602_v26 = vld [vmem:[%s19564_s4] sm:$0xff] (!%p15091_p9) }
 0x5d2   : > { %8634 = vmatmul.mubr.bf16.vlgmr.msra.gmra.mrb[60].mxu1 %v17697_v33 }
 0x5d3   : > { %11951 = vmatpush1.bf16.msra.mxu1 (!%p15091_p9), %v15092_v30 }
 0x5e3   : > { %v8348_v50 = vpop.f32.mrb[48].mxu0 }
 0x5e4   : > { %v8350_v21 = vpop.f32.mrb[49].mxu0 }
 0x5e5   : > { %v8389_v41 = vpop.f32.mrb[48].mxu1  ;;  %v8352_v34 = vpop.f32.mrb[50].mxu0 }
 0x5e6   : > { %v8390_v31 = vadd.f32 %v8389_v41, %v8348_v50  ;;  %v8391_v24 = vpop.f32.mrb[49].mxu1  ;;  %v8353_v25 = vpop.f32.mrb[51].mxu0  ;;  %v8844_v50 = vld [vmem:[%s17203_s19 + $0x40] sm:$0xff] (!%p15091_p9) }
 0x5e7   : > { %v8392_v2 = vadd.f32 %v8391_v24, %v8350_v21  ;;  %v8393_v4 = vpop.f32.mrb[50].mxu1  ;;  %v8848_v41 = vld [vmem:[%s17203_s19 + $0x60] sm:$0xff] (!%p15091_p9)  ;;  %v15349_v21 = vcombine.high (!%p15091_p9), %v9092_v60, %v9096_v49 }
 0x5e8   : > { %v8394_v10 = vpop.f32.mrb[51].mxu1  ;;  %v15101_v24 = vcombine.high (!%p15091_p9), %v8844_v50, %v8848_v41  ;;  %v9100_v34 = vld [vmem:[%s17203_s19 + $0x840] sm:$0xff] (!%p15091_p9) }
 0x5e9   : > { %v8852_v4 = vld [vmem:[%s17203_s19 + $0x80] sm:$0xff] (!%p15091_p9)  ;;  %12032 = vmatprep.subr.bf16.mxu0 (!%p15091_p9), %v15349_v21 }
 0x5ea   : > { %v8856_v10 = vld [vmem:[%s17203_s19 + $0xa0] sm:$0xff] (!%p15091_p9)  ;;  %11952 = vmatprep.subr.bf16.mxu1 (!%p15091_p9), %v15101_v24  ;;  %v8667_v24 = vld [vmem:[#allocation2 + $0x28] sm:$0xff] (!%p15091_p9) }
 0x5eb   : > { %v9152_v21 = vld [vmem:[%s17203_s19 + $0x9e0] sm:$0xff] (!%p15091_p9) }
 0x623   : > { %v8430_v32 = vpop.f32.mrb[52].mxu0 }
 0x624   : > { %v8431_v44 = vadd.f32 %v8430_v32, %v8390_v31  ;;  %v8432_v48 = vpop.f32.mrb[53].mxu0  ;;  %v15348_v31 = vcombine.low (!%p15091_p9), %v9092_v60, %v9096_v49  ;;  %v9108_v32 = vld [vmem:[%s17203_s19 + $0x880] sm:$0xff] (!%p15091_p9)  ;;  %v18606_v49 = vld [vmem:[%s19565_s21] sm:$0xff] (!%p15091_p9) }
 0x625   : > { %v8471_v29 = vpop.f32.mrb[52].mxu1  ;;  %v8433_v45 = vadd.f32 %v8432_v48, %v8392_v2  ;;  %v8434_v35 = vpop.f32.mrb[54].mxu0  ;;  %v9104_v2 = vld [vmem:[%s17203_s19 + $0x860] sm:$0xff] (!%p15091_p9) }
 0x626   : > { %v8473_v37 = vpop.f32.mrb[53].mxu1  ;;  %v8472_v23 = vadd.f32 %v8471_v29, %v8431_v44  ;;  %v8435_v33 = vpop.f32.mrb[55].mxu0  ;;  %v15357_v25 = vcombine.high (!%p15091_p9), %v9100_v34, %v9104_v2  ;;  %v9112_v44 = vld [vmem:[%s17203_s19 + $0x8a0] sm:$0xff] (!%p15091_p9)  ;;  %v15100_v29 = vcombine.low (!%p15091_p9), %v8844_v50, %v8848_v41  ;;  %12033 = vmatpush1.bf16.msra.mxu0 (!%p15091_p9), %v15348_v31  ;;  %v15356_v48 = vcombine.low (!%p15091_p9), %v9100_v34, %v9104_v2 }
 0x627   : > { %v8475_v38 = vpop.f32.mrb[54].mxu1  ;;  %v8474_v40 = vadd.f32 %v8473_v37, %v8433_v45  ;;  %v15109_v45 = vcombine.high (!%p15091_p9), %v8852_v4, %v8856_v10  ;;  %v15365_v37 = vcombine.high (!%p15091_p9), %v9108_v32, %v9112_v44  ;;  %v8860_v35 = vld [vmem:[%s17203_s19 + $0xc0] sm:$0xff] (!%p15091_p9)  ;;  %v8729_v31 = vrot.slane (!%p15091_p9), %v18602_v26, %v17270_v51 }
 0x628   : > { %v8476_v39 = vpop.f32.mrb[55].mxu1  ;;  %12034 = vmatprep.subr.bf16.mxu0 (!%p15091_p9), %v15357_v25  ;;  %v9116_v38 = vld [vmem:[%s17203_s19 + $0x8c0] sm:$0xff] (!%p15091_p9)  ;;  %11953 = vmatpush1.bf16.msra.mxu1 (!%p15091_p9), %v15100_v29  ;;  %v8745_v34 = vrot.slane (!%p15091_p9), %v18602_v26, %v17338_v6 }
 0x629   : > { %v9120_v33 = vld [vmem:[%s17203_s19 + $0x8e0] sm:$0xff] (!%p15091_p9)  ;;  %11954 = vmatprep.subr.bf16.mxu1 (!%p15091_p9), %v15109_v45  ;;  %v15364_v39 = vcombine.low (!%p15091_p9), %v9108_v32, %v9112_v44 }
 0x62a   : > { %12035 = vmatpush1.bf16.msra.mxu0 (!%p15091_p9), %v15356_v48  ;;  %v9148_v41 = vld [vmem:[%s17203_s19 + $0x9c0] sm:$0xff] (!%p15091_p9) }
 0x62b   : > { %12036 = vmatprep.subr.bf16.mxu0 (!%p15091_p9), %v15365_v37  ;;  %v15405_v29 = vcombine.high (!%p15091_p9), %v9148_v41, %v9152_v21  ;;  %v8900_v48 = vld [vmem:[%s17203_s19 + $0x200] sm:$0xff] (!%p15091_p9) }
 0x62c   : > { %v8904_v45 = vld [vmem:[%s17203_s19 + $0x220] sm:$0xff] (!%p15091_p9) }
 0x62e   : > { %12037 = vmatpush1.bf16.msra.mxu0 (!%p15091_p9), %v15364_v39 }
 0x663   : > { %v8512_v43 = vpop.f32.mrb[56].mxu0 }
 0x664   : > { %v8513_v54 = vadd.f32 %v8512_v43, %v8472_v23  ;;  %v8514_v0 = vpop.f32.mrb[57].mxu0  ;;  %v8864_v23 = vld [vmem:[%s17203_s19 + $0xe0] sm:$0xff] (!%p15091_p9) }
 0x665   : > { %v8553_v47 = vpop.f32.mrb[56].mxu1  ;;  %v8515_v56 = vadd.f32 %v8514_v0, %v8474_v40  ;;  %v8516_v62 = vpop.f32.mrb[58].mxu0  ;;  %v15108_v40 = vcombine.low (!%p15091_p9), %v8852_v4, %v8856_v10  ;;  %v15117_v43 = vcombine.high (!%p15091_p9), %v8860_v35, %v8864_v23  ;;  %v8872_v0 = vld [vmem:[%s17203_s19 + $0x120] sm:$0xff] (!%p15091_p9)  ;;  %v8779_v4 = vrot.slane (!%p15091_p9), %v18606_v49, %v17270_v51 }
 0x666   : > { %v8555_v57 = vpop.f32.mrb[57].mxu1  ;;  %v8554_v1 = vadd.f32 %v8553_v47, %v8513_v54  ;;  %v8517_v3 = vpop.f32.mrb[59].mxu0  ;;  %v15373_v54 = vcombine.high (!%p15091_p9), %v9116_v38, %v9120_v33  ;;  %v8868_v47 = vld [vmem:[%s17203_s19 + $0x100] sm:$0xff] (!%p15091_p9)  ;;  %v15116_v62 = vcombine.low (!%p15091_p9), %v8860_v35, %v8864_v23  ;;  %v8795_v10 = vrot.slane (!%p15091_p9), %v18606_v49, %v17338_v6 }
 0x667   : > { %v8557_v14 = vpop.f32.mrb[58].mxu1  ;;  %v8556_v8 = vadd.f32 %v8555_v57, %v8515_v56  ;;  %v9124_v56 = vld [vmem:[%s17203_s19 + $0x900] sm:$0xff] (!%p15091_p9)  ;;  %11955 = vmatpush1.bf16.msra.mxu1 (!%p15091_p9), %v15108_v40 }
 0x668   : > { %v8558_v53 = vpop.f32.mrb[59].mxu1  ;;  %v9128_v57 = vld [vmem:[%s17203_s19 + $0x920] sm:$0xff] (!%p15091_p9)  ;;  %11956 = vmatprep.subr.bf16.mxu1 (!%p15091_p9), %v15117_v43  ;;  %v15125_v14 = vcombine.high (!%p15091_p9), %v8868_v47, %v8872_v0  ;;  %12038 = vmatprep.subr.bf16.mxu0 (!%p15091_p9), %v15373_v54  ;;  %v15404_v43 = vcombine.low (!%p15091_p9), %v9148_v41, %v9152_v21  ;;  %v15157_v54 = vcombine.high (!%p15091_p9), %v8900_v48, %v8904_v45 }
 0x669   : > { %v15381_v3 = vcombine.high (!%p15091_p9), %v9124_v56, %v9128_v57  ;;  %v8880_v53 = vld [vmem:[%s17203_s19 + $0x160] sm:$0xff] (!%p15091_p9) }
 0x66a   : > { %v9156_v23 = vld [vmem:[%s17203_s19 + $0xa00] sm:$0xff] (!%p15091_p9) }
 0x66b   : > { %11957 = vmatpush1.bf16.msra.mxu1 (!%p15091_p9), %v15116_v62  ;;  %v8936_v41 = vld [vmem:[%s17203_s19 + $0x320] sm:$0xff] (!%p15091_p9) }
 0x66c   : > { %11958 = vmatprep.subr.bf16.mxu1 (!%p15091_p9), %v15125_v14  ;;  %v9168_v14 = vld [vmem:[%s17203_s19 + $0xa60] sm:$0xff] (!%p15091_p9) }
 0x66d   : > { %v9188_v21 = vld [vmem:[%s17203_s19 + $0xb00] sm:$0xff] (!%p15091_p9) }
 0x6a3   : > { %v8594_v20 = vpop.f32.mrb[60].mxu0 }
 0x6a4   : > { %v8595_v27 = vadd.f32 %v8594_v20, %v8554_v1  ;;  %v8596_v5 = vpop.f32.mrb[61].mxu0  ;;  %v15372_v1 = vcombine.low (!%p15091_p9), %v9116_v38, %v9120_v33  ;;  %v9132_v20 = vld [vmem:[%s17203_s19 + $0x940] sm:$0xff] (!%p15091_p9) }
 0x6a5   : > { %v8635_v46 = vpop.f32.mrb[60].mxu1  ;;  %v8597_v17 = vadd.f32 %v8596_v5, %v8556_v8  ;;  %v8598_v42 = vpop.f32.mrb[62].mxu0  ;;  %8661 = sbr.rel (%p15091_p9) target bundleno = 2768 (0xad0), region = 128  ;;  %v8876_v8 = vld [vmem:[%s17203_s19 + $0x140] sm:$0xff] (!%p15091_p9)  ;;  %v15380_v5 = vcombine.low (!%p15091_p9), %v9124_v56, %v9128_v57 }
 0x6a6   : > { %v8637_v9 = vpop.f32.mrb[61].mxu1  ;;  %v8636_v11 = vadd.f32 %v8635_v46, %v8595_v27  ;;  %v8599_v12 = vpop.f32.mrb[63].mxu0  ;;  %v9136_v27 = vld [vmem:[%s17203_s19 + $0x960] sm:$0xff] (!%p15091_p9)  ;;  %v15124_v46 = vcombine.low (!%p15091_p9), %v8868_v47, %v8872_v0  ;;  %12039 = vmatpush1.bf16.msra.mxu0 (!%p15091_p9), %v15372_v1 }
 0x6a7   : > { %v8639_v15 = vpop.f32.mrb[62].mxu1  ;;  %v8638_v19 = vadd.f32 %v8637_v9, %v8597_v17  ;;  %12040 = vmatprep.subr.bf16.mxu0 (!%p15091_p9), %v15381_v3  ;;  %v15389_v17 = vcombine.high (!%p15091_p9), %v9132_v20, %v9136_v27  ;;  %v8884_v9 = vld [vmem:[%s17203_s19 + $0x180] sm:$0xff] (!%p15091_p9)  ;;  %v15388_v12 = vcombine.low (!%p15091_p9), %v9132_v20, %v9136_v27  ;;  %v15156_v3 = vcombine.low (!%p15091_p9), %v8900_v48, %v8904_v45 }
 0x6a8   : > { %v8640_v55 = vpop.f32.mrb[63].mxu1  ;;  %v8648_v36 = vadd.f32 %v8636_v11, %v1168_v28  ;;  %v15133_v28 = vcombine.high (!%p15091_p9), %v8876_v8, %v8880_v53  ;;  %v8888_v42 = vld [vmem:[%s17203_s19 + $0x1a0] sm:$0xff] (!%p15091_p9)  ;;  %11959 = vmatpush1.bf16.msra.mxu1 (!%p15091_p9), %v15124_v46  ;;  %v15132_v15 = vcombine.low (!%p15091_p9), %v8876_v8, %v8880_v53 }
 0x6a9   : > { %v8649_v13 = vadd.f32 %v8638_v19, %v1169_v18  ;;  %v9140_v11 = vld [vmem:[%s17203_s19 + $0x980] sm:$0xff] (!%p15091_p9)  ;;  %v15141_v19 = vcombine.high (!%p15091_p9), %v8884_v9, %v8888_v42  ;;  %v15140_v50 = vcombine.low (!%p15091_p9), %v8884_v9, %v8888_v42 }
 0x6aa   : > { %8656 = vst [vmem:[#allocation2 + $0x30] sm:$0xff] %v8648_v36  ;;  %v9144_v18 = vld [vmem:[%s17203_s19 + $0x9a0] sm:$0xff] (!%p15091_p9)  ;;  %12041 = vmatpush1.bf16.msra.mxu0 (!%p15091_p9), %v15380_v5  ;;  %11960 = vmatprep.subr.bf16.mxu1 (!%p15091_p9), %v15133_v28  ;;  %v8663_v36 = vld [vmem:[#allocation2 + $0x8] sm:$0xff] (!%p15091_p9) }
 0x6ab   : > { %8657 = vst [vmem:[#allocation2 + $0x38] sm:$0xff] %v8649_v13  ;;  %v8892_v55 = vld [vmem:[%s17203_s19 + $0x1c0] sm:$0xff] (!%p15091_p9)  ;;  %v18595_v13 = vld [vmem:[%s19563_s3] sm:$0xff] (!%p15091_p9)  ;;  %12042 = vmatprep.subr.bf16.mxu0 (!%p15091_p9), %v15389_v17  ;;  %v15397_v22 = vcombine.high (!%p15091_p9), %v9140_v11, %v9144_v18  ;;  %v15396_v32 = vcombine.low (!%p15091_p9), %v9140_v11, %v9144_v18 }
 0x6ac   : > { %v8679_v60 = vrot.slane %v18595_v13, %v17270_v51  ;;  %v8695_v30 = vrot.slane %v18595_v13, %v17338_v6  ;;  %11961 = vmatpush1.bf16.msra.mxu1 %v15132_v15  ;;  %v15149_v44 = vcombine.high %v8892_v55, %v8896_v16  ;;  %v9160_v38 = vld [vmem:[%s17203_s19 + $0xa20] sm:$0xff]  ;;  %v15148_v33 = vcombine.low %v8892_v55, %v8896_v16 }
 0x6ad   : > { %11962 = vmatprep.subr.bf16.mxu1 %v15141_v19  ;;  %v15413_v47 = vcombine.high %v9156_v23, %v9160_v38  ;;  %v8908_v0 = vld [vmem:[%s17203_s19 + $0x240] sm:$0xff]  ;;  %v15412_v20 = vcombine.low %v9156_v23, %v9160_v38 }
 0x6ae   : > { %v8713_v2 = vadd.f32 %v8679_v60, %v8663_v36  ;;  %v8717_v25 = vadd.f32 %v8695_v30, %v8667_v24  ;;  %12043 = vmatpush1.bf16.msra.mxu0 %v15388_v12  ;;  %v8912_v56 = vld [vmem:[%s17203_s19 + $0x260] sm:$0xff] }
 0x6af   : > { %12044 = vmatprep.subr.bf16.mxu0 %v15397_v22  ;;  %v9164_v1 = vld [vmem:[%s17203_s19 + $0xa40] sm:$0xff]  ;;  %v15165_v27 = vcombine.high %v8908_v0, %v8912_v56  ;;  %v15164_v42 = vcombine.low %v8908_v0, %v8912_v56  ;;  %v8725_v0 = vrot.slane %v18602_v26, %v17324_v58  ;;  %v8665_v56 = vld [vmem:[#allocation2 + $0x18] sm:$0xff] }
 0x6b0   : > { %v8763_v37 = vmul.f32 %v8729_v31, %v8713_v2  ;;  %v8767_v35 = vmul.f32 %v8745_v34, %v8717_v25  ;;  %11963 = vmatpush1.bf16.msra.mxu1 %v15140_v50  ;;  %v15421_v46 = vcombine.high %v9164_v1, %v9168_v14  ;;  %v8916_v5 = vld [vmem:[%s17203_s19 + $0x280] sm:$0xff]  ;;  %v15420_v11 = vcombine.low %v9164_v1, %v9168_v14 }
 0x6b1   : > { %11964 = vmatprep.subr.bf16.mxu1 %v15149_v44  ;;  %v8920_v28 = vld [vmem:[%s17203_s19 + $0x2a0] sm:$0xff]  ;;  %v8675_v2 = vrot.slane %v18595_v13, %v17324_v58  ;;  %v8691_v44 = vrot.slane %v18595_v13, %v17327_v59  ;;  %v8741_v1 = vrot.slane %v18602_v26, %v17327_v59  ;;  %v8687_v14 = vrot.slane %v18595_v13, %v17273_v52 }
 0x6b2   : > { %v8813_v40 = vadd.f32 %v8779_v4, %v8763_v37  ;;  %v8817_v39 = vadd.f32 %v8795_v10, %v8767_v35  ;;  %12045 = vmatpush1.bf16.msra.mxu0 %v15396_v32  ;;  %v9172_v17 = vld [vmem:[%s17203_s19 + $0xa80] sm:$0xff]  ;;  %v15173_v18 = vcombine.high %v8916_v5, %v8920_v28  ;;  %v15172_v22 = vcombine.low %v8916_v5, %v8920_v28  ;;  %v8662_v32 = vld [vmem:[#allocation2] sm:$0xff] }
 0x6b3   : > { %12046 = vmatprep.subr.bf16.mxu0 %v15405_v29  ;;  %v9176_v9 = vld [vmem:[%s17203_s19 + $0xaa0] sm:$0xff]  ;;  %v8666_v37 = vld [vmem:[#allocation2 + $0x20] sm:$0xff]  ;;  %v8703_v5 = vrot.slane %v18595_v13, %v17341_v7 }
 0x6b4   : > { %v8821_v57 = vmax.f32 %v8813_v40, 0.0  ;;  %v8825_v62 = vmax.f32 %v8817_v39, 0.0  ;;  %11965 = vmatpush1.bf16.msra.mxu1 %v15148_v33  ;;  %v15429_v15 = vcombine.high %v9172_v17, %v9176_v9  ;;  %v8924_v12 = vld [vmem:[%s17203_s19 + $0x2c0] sm:$0xff]  ;;  %v15428_v16 = vcombine.low %v9172_v17, %v9176_v9 }
 0x6b5   : > { %11966 = vmatprep.subr.bf16.mxu1 %v15157_v54  ;;  %v8928_v19 = vld [vmem:[%s17203_s19 + $0x2e0] sm:$0xff]  ;;  %v8715_v9 = vadd.f32 %v8687_v14, %v8665_v56 }
 0x6b6   : > { %v18628_v8 = vpack.c.bf16 %v8821_v57, %v8821_v57  ;;  %v18630_v53 = vpack.c.bf16 %v8825_v62, %v8825_v62  ;;  %12047 = vmatpush1.bf16.msra.mxu0 %v15404_v43  ;;  %v9180_v55 = vld [vmem:[%s17203_s19 + $0xac0] sm:$0xff]  ;;  %v15181_v60 = vcombine.high %v8924_v12, %v8928_v19  ;;  %v15180_v4 = vcombine.low %v8924_v12, %v8928_v19 }
 0x6b7   : > { %12048 = vmatprep.subr.bf16.mxu0 %v15413_v47  ;;  %v9184_v36 = vld [vmem:[%s17203_s19 + $0xae0] sm:$0xff]  ;;  %v8712_v47 = vadd.f32 %v8675_v2, %v8662_v32  ;;  %v8716_v62 = vadd.f32 %v8691_v44, %v8666_v37  ;;  %v8775_v12 = vrot.slane %v18606_v49, %v17324_v58 }
 0x6b8   : > { %11982 = vmatprep.mubr.bf16.mxu1 %v18628_v8  ;;  %12064 = vmatprep.mubr.bf16.mxu0 %v18630_v53  ;;  %v15437_v30 = vcombine.high %v9180_v55, %v9184_v36  ;;  %v8932_v50 = vld [vmem:[%s17203_s19 + $0x300] sm:$0xff]  ;;  %v15436_v29 = vcombine.low %v9180_v55, %v9184_v36  ;;  %v8753_v55 = vrot.slane %v18602_v26, %v17341_v7 }
 0x6b9   : > { %11967 = vmatpush1.bf16.msra.mxu1 %v15156_v3  ;;  %v9192_v31 = vld [vmem:[%s17203_s19 + $0xb20] sm:$0xff]  ;;  %v15189_v48 = vcombine.high %v8932_v50, %v8936_v41  ;;  %v15188_v45 = vcombine.low %v8932_v50, %v8936_v41  ;;  %v8683_v3 = vrot.slane %v18595_v13, %v17333_v63  ;;  %v8787_v41 = vrot.slane %v18606_v49, %v17273_v52 }
 0x6ba   : > { %12049 = vmatpush1.bf16.msra.mxu0 %v15412_v20  ;;  %11968 = vmatprep.subr.bf16.mxu1 %v15165_v27  ;;  %v18647_v24 = vld [vmem:[%s17203_s19 + $0x340] sm:$0xff]  ;;  %v15445_v35 = vcombine.high %v9188_v21, %v9192_v31  ;;  %v15444_v23 = vcombine.low %v9188_v21, %v9192_v31  ;;  %v8669_v20 = vld [vmem:[#allocation2 + $0x38] sm:$0xff]  ;;  %v8749_v21 = vrot.slane %v18602_v26, %v17330_v61 }
 0x6bb   : > { %12050 = vmatprep.subr.bf16.mxu0 %v15421_v46  ;;  %v18650_v34 = vld [vmem:[%s17203_s19 + $0x360] sm:$0xff]  ;;  %v8733_v46 = vrot.slane %v18602_v26, %v17333_v63  ;;  %v8719_v19 = vadd.f32 %v8703_v5, %v8669_v20 }
 0x6bc   : > { %v18655_v25 = vld [vmem:[%s17203_s19 + $0xb40] sm:$0xff]  ;;  %v15197_v38 = vcombine.high %v18647_v24, %v18650_v34  ;;  %v15196_v33 = vcombine.low %v18647_v24, %v18650_v34 }
 0x6bd   : > { %11969 = vmatpush1.bf16.msra.mxu1 %v15164_v42  ;;  %v18658_v10 = vld [vmem:[%s17203_s19 + $0xb60] sm:$0xff]  ;;  %v8737_v42 = vrot.slane %v18602_v26, %v17273_v52  ;;  %v8769_v44 = vmul.f32 %v8753_v55, %v8719_v19  ;;  %v8803_v26 = vrot.slane %v18606_v49, %v17341_v7 }
 0x6be   : > { %12051 = vmatpush1.bf16.msra.mxu0 %v15420_v11  ;;  %11970 = vmatprep.subr.bf16.mxu1 %v15173_v18  ;;  %v18667_v40 = vld [vmem:[%s17203_s19 + $0x380] sm:$0xff]  ;;  %v15453_v43 = vcombine.high %v18655_v25, %v18658_v10  ;;  %v15452_v54 = vcombine.low %v18655_v25, %v18658_v10  ;;  %v8783_v18 = vrot.slane %v18606_v49, %v17333_v63 }
 0x6bf   : > { %12052 = vmatprep.subr.bf16.mxu0 %v15429_v15  ;;  %v18670_v39 = vld [vmem:[%s17203_s19 + $0x3a0] sm:$0xff]  ;;  %v8762_v15 = vmul.f32 %v8725_v0, %v8712_v47  ;;  %v8765_v34 = vmul.f32 %v8737_v42, %v8715_v9  ;;  %v8799_v25 = vrot.slane %v18606_v49, %v17330_v61 }
 0x6c0   : > { %v8664_v57 = vld [vmem:[#allocation2 + $0x10] sm:$0xff]  ;;  %v15205_v27 = vcombine.high %v18667_v40, %v18670_v39 }
 0x6c1   : > { %11971 = vmatpush1.bf16.msra.mxu1 %v15172_v22  ;;  %v9204_v28 = vld [vmem:[%s17203_s19 + $0xb80] sm:$0xff]  ;;  %v8714_v11 = vadd.f32 %v8683_v3, %v8664_v57  ;;  %v8766_v22 = vmul.f32 %v8741_v1, %v8716_v62  ;;  %v8812_v32 = vadd.f32 %v8775_v12, %v8762_v15  ;;  %v8815_v47 = vadd.f32 %v8787_v41, %v8765_v34 }
 0x6c2   : > { %12053 = vmatpush1.bf16.msra.mxu0 %v15428_v16  ;;  %11972 = vmatprep.subr.bf16.mxu1 %v15181_v60  ;;  %v9208_v17 = vld [vmem:[%s17203_s19 + $0xba0] sm:$0xff]  ;;  %v8791_v16 = vrot.slane %v18606_v49, %v17327_v59 }
 0x6c3   : > { %12054 = vmatprep.subr.bf16.mxu0 %v15437_v30  ;;  %v8668_v36 = vld [vmem:[#allocation2 + $0x30] sm:$0xff]  ;;  %v8764_v60 = vmul.f32 %v8733_v46, %v8714_v11  ;;  %v8699_v30 = vrot.slane %v18595_v13, %v17330_v61  ;;  %v15461_v50 = vcombine.high %v9204_v28, %v9208_v17  ;;  %v15460_v37 = vcombine.low %v9204_v28, %v9208_v17 }
 0x6c4   : > { %v8956_v31 = vld [vmem:[%s17203_s19 + $0x3c0] sm:$0xff]  ;;  %v8820_v56 = vmax.f32 %v8812_v32, 0.0  ;;  %v8823_v20 = vmax.f32 %v8815_v47, 0.0 }
 0x6c5   : > { %11973 = vmatpush1.bf16.msra.mxu1 %v15180_v4  ;;  %v8960_v24 = vld [vmem:[%s17203_s19 + $0x3e0] sm:$0xff]  ;;  %v18710_v2 = vadd.f32 %v8783_v18, %v8764_v60  ;;  %v8718_v4 = vadd.f32 %v8699_v30, %v8668_v36 }
 0x6c6   : > { %12055 = vmatpush1.bf16.msra.mxu0 %v15436_v29  ;;  %11974 = vmatprep.subr.bf16.mxu1 %v15189_v48  ;;  %v9212_v13 = vld [vmem:[%s17203_s19 + $0xbc0] sm:$0xff]  ;;  %v15204_v29 = vcombine.low %v18667_v40, %v18670_v39  ;;  %v8816_v48 = vadd.f32 %v8791_v16, %v8766_v22  ;;  %v8819_v40 = vadd.f32 %v8803_v26, %v8769_v44 }
 0x6c7   : > { %12056 = vmatprep.subr.bf16.mxu0 %v15445_v35  ;;  %v9216_v10 = vld [vmem:[%s17203_s19 + $0xbe0] sm:$0xff]  ;;  %v15213_v35 = vcombine.high %v8956_v31, %v8960_v24  ;;  %v15212_v39 = vcombine.low %v8956_v31, %v8960_v24  ;;  %v18736_v19 = vpack.c.bf16 %v8823_v20, %v8823_v20 }
 0x6c8   : > { %v9220_v49 = vld [vmem:[%s17203_s19 + $0xc00] sm:$0xff]  ;;  %v15468_v57 = vcombine.low %v9212_v13, %v9216_v10  ;;  %v8827_v28 = vmax.f32 %v8819_v40, 0.0 }
 0x6c9   : > { %11975 = vmatpush1.bf16.msra.mxu1 %v15188_v45  ;;  %v8768_v45 = vmul.f32 %v8749_v21, %v8718_v4  ;;  %v8972_v14 = vld [vmem:[%s17203_s19 + $0x440] sm:$0xff] }
 0x6ca   : > { %12057 = vmatpush1.bf16.msra.mxu0 %v15444_v23  ;;  %11976 = vmatprep.subr.bf16.mxu1 %v15197_v38  ;;  %v15469_v23 = vcombine.high %v9212_v13, %v9216_v10  ;;  %v8964_v38 = vld [vmem:[%s17203_s19 + $0x400] sm:$0xff]  ;;  %v18741_v22 = vpack.c.bf16 %v8827_v28, %v8827_v28 }
 0x6cb   : > { %12058 = vmatprep.subr.bf16.mxu0 %v15453_v43  ;;  %v8968_v43 = vld [vmem:[%s17203_s19 + $0x420] sm:$0xff]  ;;  %v18722_v0 = vadd.f32 %v8799_v25, %v8768_v45 }
 0x6cc   : > { %v15221_v62 = vcombine.high %v8964_v38, %v8968_v43  ;;  %v8976_v3 = vld [vmem:[%s17203_s19 + $0x460] sm:$0xff]  ;;  %v15220_v17 = vcombine.low %v8964_v38, %v8968_v43 }
 0x6cd   : > { %11977 = vmatpush1.bf16.msra.mxu1 %v15196_v33  ;;  %v9224_v33 = vld [vmem:[%s17203_s19 + $0xc20] sm:$0xff]  ;;  %v15229_v11 = vcombine.high %v8972_v14, %v8976_v3  ;;  %v15228_v16 = vcombine.low %v8972_v14, %v8976_v3 }
 0x6ce   : > { %12059 = vmatpush1.bf16.msra.mxu0 %v15452_v54  ;;  %11978 = vmatprep.subr.bf16.mxu1 %v15205_v27  ;;  %v8824_v54 = vmax.f32 %v8816_v48, 0.0  ;;  %v15477_v1 = vcombine.high %v9220_v49, %v9224_v33  ;;  %v18728_v27 = vpack.c.bf16 %v8820_v56, %v8820_v56  ;;  %v9228_v46 = vld [vmem:[%s17203_s19 + $0xc40] sm:$0xff]  ;;  %v15476_v42 = vcombine.low %v9220_v49, %v9224_v33 }
 0x6cf   : > { %12060 = vmatprep.subr.bf16.mxu0 %v15461_v50  ;;  %v9232_v5 = vld [vmem:[%s17203_s19 + $0xc60] sm:$0xff] }
 0x6d0   : > { %v18732_v9 = vpack.c.bf16 %v8824_v54, %v8824_v54  ;;  %v15485_v18 = vcombine.high %v9228_v46, %v9232_v5  ;;  %v8980_v15 = vld [vmem:[%s17203_s19 + $0x480] sm:$0xff]  ;;  %v15484_v60 = vcombine.low %v9228_v46, %v9232_v5 }
 0x6d1   : > { %11979 = vmatpush1.bf16.msra.mxu1 %v15204_v29  ;;  %v8984_v12 = vld [vmem:[%s17203_s19 + $0x4a0] sm:$0xff] }
 0x6d2   : > { %12061 = vmatpush1.bf16.msra.mxu0 %v15460_v37  ;;  %11980 = vmatprep.subr.bf16.mxu1 %v15213_v35  ;;  %v9236_v55 = vld [vmem:[%s17203_s19 + $0xc80] sm:$0xff]  ;;  %v15237_v30 = vcombine.high %v8980_v15, %v8984_v12  ;;  %v15236_v34 = vcombine.low %v8980_v15, %v8984_v12 }
 0x6d3   : > { %12062 = vmatprep.subr.bf16.mxu0 %v15469_v23  ;;  %v9240_v36 = vld [vmem:[%s17203_s19 + $0xca0] sm:$0xff] }
 0x6d4   : > { %v8988_v50 = vld [vmem:[%s17203_s19 + $0x4c0] sm:$0xff]  ;;  %v15493_v31 = vcombine.high %v9236_v55, %v9240_v36  ;;  %v15492_v4 = vcombine.low %v9236_v55, %v9240_v36 }
 0x6d5   : > { %11981 = vmatpush1.bf16.msra.mxu1 %v15212_v39  ;;  %v8992_v41 = vld [vmem:[%s17203_s19 + $0x4e0] sm:$0xff] }
 0x6d6   : > { %12063 = vmatpush1.bf16.msra.mxu0 %v15468_v57  ;;  %11991 = vmatprep.subr.bf16.mxu1 %v15221_v62  ;;  %v9244_v21 = vld [vmem:[%s17203_s19 + $0xcc0] sm:$0xff]  ;;  %v15245_v25 = vcombine.high %v8988_v50, %v8992_v41  ;;  %v15244_v29 = vcombine.low %v8988_v50, %v8992_v41 }
 0x6d7   : > { %12073 = vmatprep.subr.bf16.mxu0 %v15477_v1  ;;  %v9248_v24 = vld [vmem:[%s17203_s19 + $0xce0] sm:$0xff] }
 0x6d8   : > { %11983 = vmatmul.mubr.bf16.vlgmr.msra.gmra.mrb[0].mxu1 %v18728_v27  ;;  %v8996_v13 = vld [vmem:[%s17203_s19 + $0x500] sm:$0xff]  ;;  %v15501_v44 = vcombine.high %v9244_v21, %v9248_v24  ;;  %v15500_v48 = vcombine.low %v9244_v21, %v9248_v24 }
 0x6d9   : > { %11992 = vmatpush1.bf16.msra.mxu1 %v15220_v17  ;;  %12065 = vmatmul.mubr.bf16.vlgmr.msra.gmra.mrb[0].mxu0 %v18732_v9  ;;  %v9000_v10 = vld [vmem:[%s17203_s19 + $0x520] sm:$0xff] }
 0x6da   : > { %12074 = vmatpush1.bf16.msra.mxu0 %v15476_v42  ;;  %11993 = vmatprep.subr.bf16.mxu1 %v15229_v11  ;;  %v9252_v32 = vld [vmem:[%s17203_s19 + $0xd00] sm:$0xff]  ;;  %v15253_v45 = vcombine.high %v8996_v13, %v9000_v10  ;;  %v15252_v47 = vcombine.low %v8996_v13, %v9000_v10 }
 0x6db   : > { %12075 = vmatprep.subr.bf16.mxu0 %v15485_v18  ;;  %12023 = vmatprep.mubr.bf16.mxu1 %v18736_v19  ;;  %v9256_v26 = vld [vmem:[%s17203_s19 + $0xd20] sm:$0xff] }
 0x6dc   : > { %12105 = vmatprep.mubr.bf16.mxu0 %v18741_v22  ;;  %v9004_v37 = vld [vmem:[%s17203_s19 + $0x540] sm:$0xff]  ;;  %v15509_v38 = vcombine.high %v9252_v32, %v9256_v26  ;;  %v15508_v49 = vcombine.low %v9252_v32, %v9256_v26 }
 0x6dd   : > { %11994 = vmatpush1.bf16.msra.mxu1 %v15228_v16  ;;  %v9008_v35 = vld [vmem:[%s17203_s19 + $0x560] sm:$0xff] }
 0x6de   : > { %12076 = vmatpush1.bf16.msra.mxu0 %v15484_v60  ;;  %11995 = vmatprep.subr.bf16.mxu1 %v15237_v30  ;;  %v9260_v23 = vld [vmem:[%s17203_s19 + $0xd40] sm:$0xff]  ;;  %v15261_v33 = vcombine.high %v9004_v37, %v9008_v35  ;;  %v15260_v62 = vcombine.low %v9004_v37, %v9008_v35 }
 0x6df   : > { %12077 = vmatprep.subr.bf16.mxu0 %v15493_v31  ;;  %v9264_v43 = vld [vmem:[%s17203_s19 + $0xd60] sm:$0xff] }
 0x6e0   : > { %v9012_v56 = vld [vmem:[%s17203_s19 + $0x580] sm:$0xff]  ;;  %v15517_v54 = vcombine.high %v9260_v23, %v9264_v43  ;;  %v15516_v1 = vcombine.low %v9260_v23, %v9264_v43 }
 0x6e1   : > { %11996 = vmatpush1.bf16.msra.mxu1 %v15236_v34  ;;  %v9016_v40 = vld [vmem:[%s17203_s19 + $0x5a0] sm:$0xff] }
 0x6e2   : > { %12078 = vmatpush1.bf16.msra.mxu0 %v15492_v4  ;;  %11997 = vmatprep.subr.bf16.mxu1 %v15245_v25  ;;  %v9268_v39 = vld [vmem:[%s17203_s19 + $0xd80] sm:$0xff]  ;;  %v15269_v14 = vcombine.high %v9012_v56, %v9016_v40  ;;  %v15268_v17 = vcombine.low %v9012_v56, %v9016_v40 }
 0x6e3   : > { %12079 = vmatprep.subr.bf16.mxu0 %v15501_v44  ;;  %v9272_v57 = vld [vmem:[%s17203_s19 + $0xda0] sm:$0xff] }
 0x6e4   : > { %v9020_v3 = vld [vmem:[%s17203_s19 + $0x5c0] sm:$0xff]  ;;  %v15525_v5 = vcombine.high %v9268_v39, %v9272_v57  ;;  %v15524_v42 = vcombine.low %v9268_v39, %v9272_v57 }
 0x6e5   : > { %11998 = vmatpush1.bf16.msra.mxu1 %v15244_v29  ;;  %v9024_v20 = vld [vmem:[%s17203_s19 + $0x5e0] sm:$0xff] }
 0x6e6   : > { %12080 = vmatpush1.bf16.msra.mxu0 %v15500_v48  ;;  %11999 = vmatprep.subr.bf16.mxu1 %v15253_v45  ;;  %v9276_v46 = vld [vmem:[%s17203_s19 + $0xdc0] sm:$0xff]  ;;  %v15277_v11 = vcombine.high %v9020_v3, %v9024_v20  ;;  %v15276_v16 = vcombine.low %v9020_v3, %v9024_v20 }
 0x6e7   : > { %12081 = vmatprep.subr.bf16.mxu0 %v15509_v38  ;;  %v9280_v28 = vld [vmem:[%s17203_s19 + $0xde0] sm:$0xff] }
 0x6e8   : > { %v9028_v18 = vld [vmem:[%s17203_s19 + $0x600] sm:$0xff]  ;;  %v15533_v55 = vcombine.high %v9276_v46, %v9280_v28  ;;  %v15532_v60 = vcombine.low %v9276_v46, %v9280_v28 }
 0x6e9   : > { %12000 = vmatpush1.bf16.msra.mxu1 %v15252_v47  ;;  %v9032_v15 = vld [vmem:[%s17203_s19 + $0x620] sm:$0xff] }
 0x6ea   : > { %12082 = vmatpush1.bf16.msra.mxu0 %v15508_v49  ;;  %12001 = vmatprep.subr.bf16.mxu1 %v15261_v33  ;;  %v9284_v12 = vld [vmem:[%s17203_s19 + $0xe00] sm:$0xff]  ;;  %v15285_v30 = vcombine.high %v9028_v18, %v9032_v15  ;;  %v15284_v34 = vcombine.low %v9028_v18, %v9032_v15 }
 0x6eb   : > { %12083 = vmatprep.subr.bf16.mxu0 %v15517_v54  ;;  %v9288_v36 = vld [vmem:[%s17203_s19 + $0xe20] sm:$0xff] }
 0x6ec   : > { %v9036_v50 = vld [vmem:[%s17203_s19 + $0x640] sm:$0xff]  ;;  %v15541_v31 = vcombine.high %v9284_v12, %v9288_v36  ;;  %v15540_v4 = vcombine.low %v9284_v12, %v9288_v36 }
 0x6ed   : > { %12002 = vmatpush1.bf16.msra.mxu1 %v15260_v62  ;;  %v9040_v41 = vld [vmem:[%s17203_s19 + $0x660] sm:$0xff] }
 0x6ee   : > { %12084 = vmatpush1.bf16.msra.mxu0 %v15516_v1  ;;  %12003 = vmatprep.subr.bf16.mxu1 %v15269_v14  ;;  %v9292_v21 = vld [vmem:[%s17203_s19 + $0xe40] sm:$0xff]  ;;  %v15293_v25 = vcombine.high %v9036_v50, %v9040_v41  ;;  %v15292_v29 = vcombine.low %v9036_v50, %v9040_v41 }
 0x6ef   : > { %12085 = vmatprep.subr.bf16.mxu0 %v15525_v5  ;;  %v9296_v24 = vld [vmem:[%s17203_s19 + $0xe60] sm:$0xff] }
 0x6f0   : > { %v9044_v13 = vld [vmem:[%s17203_s19 + $0x680] sm:$0xff]  ;;  %v15549_v44 = vcombine.high %v9292_v21, %v9296_v24  ;;  %v15548_v48 = vcombine.low %v9292_v21, %v9296_v24 }
 0x6f1   : > { %12004 = vmatpush1.bf16.msra.mxu1 %v15268_v17  ;;  %v9048_v10 = vld [vmem:[%s17203_s19 + $0x6a0] sm:$0xff] }
 0x6f2   : > { %12086 = vmatpush1.bf16.msra.mxu0 %v15524_v42  ;;  %12005 = vmatprep.subr.bf16.mxu1 %v15277_v11  ;;  %v9300_v32 = vld [vmem:[%s17203_s19 + $0xe80] sm:$0xff]  ;;  %v15301_v45 = vcombine.high %v9044_v13, %v9048_v10  ;;  %v15300_v47 = vcombine.low %v9044_v13, %v9048_v10  ;;  %v8837_v13 = vld [vmem:[%s17203_s19 + $0x8] sm:$0xff] }
 0x6f3   : > { %12087 = vmatprep.subr.bf16.mxu0 %v15533_v55  ;;  %v9304_v26 = vld [vmem:[%s17203_s19 + $0xea0] sm:$0xff]  ;;  %v8841_v10 = vld [vmem:[%s17203_s19 + $0x28] sm:$0xff] }
 0x6f4   : > { %v9052_v37 = vld [vmem:[%s17203_s19 + $0x6c0] sm:$0xff]  ;;  %v15557_v38 = vcombine.high %v9300_v32, %v9304_v26  ;;  %v15556_v49 = vcombine.low %v9300_v32, %v9304_v26  ;;  %v8838_v32 = vld [vmem:[%s17203_s19 + $0x10] sm:$0xff] }
 0x6f5   : > { %12006 = vmatpush1.bf16.msra.mxu1 %v15276_v16  ;;  %v9056_v35 = vld [vmem:[%s17203_s19 + $0x6e0] sm:$0xff]  ;;  %v8842_v26 = vld [vmem:[%s17203_s19 + $0x30] sm:$0xff] }
 0x6f6   : > { %12088 = vmatpush1.bf16.msra.mxu0 %v15532_v60  ;;  %12007 = vmatprep.subr.bf16.mxu1 %v15285_v30  ;;  %v9308_v23 = vld [vmem:[%s17203_s19 + $0xec0] sm:$0xff]  ;;  %v15309_v33 = vcombine.high %v9052_v37, %v9056_v35  ;;  %v15308_v62 = vcombine.low %v9052_v37, %v9056_v35  ;;  %v15095_v35 = vcombine.high %v8837_v13, %v8841_v10 }
 0x6f7   : > { %12089 = vmatprep.subr.bf16.mxu0 %v15541_v31  ;;  %v9312_v43 = vld [vmem:[%s17203_s19 + $0xee0] sm:$0xff] }
 0x6f8   : > { %v9060_v56 = vld [vmem:[%s17203_s19 + $0x700] sm:$0xff]  ;;  %v15565_v54 = vcombine.high %v9308_v23, %v9312_v43  ;;  %v15564_v1 = vcombine.low %v9308_v23, %v9312_v43  ;;  %v8845_v23 = vld [vmem:[%s17203_s19 + $0x48] sm:$0xff]  ;;  %v8846_v43 = vld [vmem:[%s17203_s19 + $0x50] sm:$0xff] }
 0x6f9   : > { %12008 = vmatpush1.bf16.msra.mxu1 %v15284_v34  ;;  %v9064_v40 = vld [vmem:[%s17203_s19 + $0x720] sm:$0xff] }
 0x6fa   : > { %12090 = vmatpush1.bf16.msra.mxu0 %v15540_v4  ;;  %12009 = vmatprep.subr.bf16.mxu1 %v15293_v25  ;;  %v9316_v39 = vld [vmem:[%s17203_s19 + $0xf00] sm:$0xff]  ;;  %v15317_v14 = vcombine.high %v9060_v56, %v9064_v40  ;;  %v15316_v17 = vcombine.low %v9060_v56, %v9064_v40 }
 0x6fb   : > { %12091 = vmatprep.subr.bf16.mxu0 %v15549_v44  ;;  %v9320_v57 = vld [vmem:[%s17203_s19 + $0xf20] sm:$0xff] }
 0x6fc   : > { %v9068_v3 = vld [vmem:[%s17203_s19 + $0x740] sm:$0xff]  ;;  %v15573_v5 = vcombine.high %v9316_v39, %v9320_v57  ;;  %v15572_v42 = vcombine.low %v9316_v39, %v9320_v57  ;;  %v8853_v39 = vld [vmem:[%s17203_s19 + $0x88] sm:$0xff]  ;;  %v8854_v57 = vld [vmem:[%s17203_s19 + $0x90] sm:$0xff] }
 0x6fd   : > { %12010 = vmatpush1.bf16.msra.mxu1 %v15292_v29  ;;  %v9072_v20 = vld [vmem:[%s17203_s19 + $0x760] sm:$0xff]  ;;  %v8822_v29 = vmax.f32 %v18710_v2, 0.0  ;;  %v15094_v2 = vcombine.low %v8837_v13, %v8841_v10 }
 0x6fe   : > { %12092 = vmatpush1.bf16.msra.mxu0 %v15548_v48  ;;  %12011 = vmatprep.subr.bf16.mxu1 %v15301_v45  ;;  %v9324_v46 = vld [vmem:[%s17203_s19 + $0xf40] sm:$0xff]  ;;  %v15325_v11 = vcombine.high %v9068_v3, %v9072_v20  ;;  %v15324_v16 = vcombine.low %v9068_v3, %v9072_v20  ;;  %v8826_v45 = vmax.f32 %v18722_v0, 0.0  ;;  %v15096_v0 = vcombine.low %v8838_v32, %v8842_v26 }
 0x6ff   : > { %12093 = vmatprep.subr.bf16.mxu0 %v15557_v38  ;;  %v9328_v28 = vld [vmem:[%s17203_s19 + $0xf60] sm:$0xff]  ;;  %v8849_v38 = vld [vmem:[%s17203_s19 + $0x68] sm:$0xff] }
 0x700   : > { %v9076_v18 = vld [vmem:[%s17203_s19 + $0x780] sm:$0xff]  ;;  %v15581_v55 = vcombine.high %v9324_v46, %v9328_v28  ;;  %v15580_v60 = vcombine.low %v9324_v46, %v9328_v28  ;;  %v18810_v56 = vpack.c.bf16 %v8826_v45, %v8826_v45  ;;  %v15103_v40 = vcombine.high %v8845_v23, %v8849_v38  ;;  %v8865_v28 = vld [vmem:[%s17203_s19 + $0xe8] sm:$0xff] }
 0x701   : > { %12012 = vmatpush1.bf16.msra.mxu1 %v15300_v47  ;;  %v9080_v15 = vld [vmem:[%s17203_s19 + $0x7a0] sm:$0xff]  ;;  %v15097_v47 = vcombine.high %v8838_v32, %v8842_v26  ;;  %v8889_v26 = vld [vmem:[%s17203_s19 + $0x1a8] sm:$0xff] }
 0x702   : > { %12094 = vmatpush1.bf16.msra.mxu0 %v15556_v49  ;;  %12013 = vmatprep.subr.bf16.mxu1 %v15309_v33  ;;  %v9332_v12 = vld [vmem:[%s17203_s19 + $0xf80] sm:$0xff]  ;;  %v15333_v30 = vcombine.high %v9076_v18, %v9080_v15  ;;  %v15332_v34 = vcombine.low %v9076_v18, %v9080_v15  ;;  %v8850_v49 = vld [vmem:[%s17203_s19 + $0x70] sm:$0xff]  ;;  %v18808_v33 = vpack.c.bf16 %v8822_v29, %v8822_v29 }
 0x703   : > { %12095 = vmatprep.subr.bf16.mxu0 %v15565_v54  ;;  %v9336_v36 = vld [vmem:[%s17203_s19 + $0xfa0] sm:$0xff]  ;;  %v8857_v54 = vld [vmem:[%s17203_s19 + $0xa8] sm:$0xff]  ;;  %v15104_v3 = vcombine.low %v8846_v43, %v8850_v49  ;;  %v8886_v29 = vld [vmem:[%s17203_s19 + $0x190] sm:$0xff] }
 0x704   : > { %v9084_v50 = vld [vmem:[%s17203_s19 + $0x7c0] sm:$0xff]  ;;  %v15589_v31 = vcombine.high %v9332_v12, %v9336_v36  ;;  %v15588_v4 = vcombine.low %v9332_v12, %v9336_v36  ;;  %v15111_v20 = vcombine.high %v8853_v39, %v8857_v54  ;;  %v8873_v36 = vld [vmem:[%s17203_s19 + $0x128] sm:$0xff] }
 0x705   : > { %12014 = vmatpush1.bf16.msra.mxu1 %v15308_v62  ;;  %v9088_v41 = vld [vmem:[%s17203_s19 + $0x7e0] sm:$0xff]  ;;  %v15105_v62 = vcombine.high %v8846_v43, %v8850_v49  ;;  %v8897_v43 = vld [vmem:[%s17203_s19 + $0x1e8] sm:$0xff]  ;;  %v8898_v49 = vld [vmem:[%s17203_s19 + $0x1f0] sm:$0xff] }
 0x706   : > { %12096 = vmatpush1.bf16.msra.mxu0 %v15564_v1  ;;  %12015 = vmatprep.subr.bf16.mxu1 %v15317_v14  ;;  %v9340_v21 = vld [vmem:[%s17203_s19 + $0xfc0] sm:$0xff]  ;;  %v15341_v25 = vcombine.high %v9084_v50, %v9088_v41  ;;  %v15340_v48 = vcombine.low %v9084_v50, %v9088_v41  ;;  %v8858_v1 = vld [vmem:[%s17203_s19 + $0xb0] sm:$0xff]  ;;  %v15102_v14 = vcombine.low %v8845_v23, %v8849_v38  ;;  %v8893_v38 = vld [vmem:[%s17203_s19 + $0x1c8] sm:$0xff] }
 0x707   : > { %12097 = vmatprep.subr.bf16.mxu0 %v15573_v5  ;;  %v9344_v24 = vld [vmem:[%s17203_s19 + $0xfe0] sm:$0xff]  ;;  %v15113_v46 = vcombine.high %v8854_v57, %v8858_v1  ;;  %v8861_v5 = vld [vmem:[%s17203_s19 + $0xc8] sm:$0xff]  ;;  %v15112_v18 = vcombine.low %v8854_v57, %v8858_v1  ;;  %v8906_v1 = vld [vmem:[%s17203_s19 + $0x230] sm:$0xff] }
 0x708   : > { %v15597_v44 = vcombine.high %v9340_v21, %v9344_v24  ;;  %v15596_v37 = vcombine.low %v9340_v21, %v9344_v24  ;;  %v15119_v15 = vcombine.high %v8861_v5, %v8865_v28  ;;  %v8881_v24 = vld [vmem:[%s17203_s19 + $0x168] sm:$0xff] }
 0x709   : > { %12016 = vmatpush1.bf16.msra.mxu1 %v15316_v17  ;;  %v8862_v17 = vld [vmem:[%s17203_s19 + $0xd0] sm:$0xff]  ;;  %v8905_v57 = vld [vmem:[%s17203_s19 + $0x228] sm:$0xff] }
 0x70a   : > { %12098 = vmatpush1.bf16.msra.mxu0 %v15572_v42  ;;  %12017 = vmatprep.subr.bf16.mxu1 %v15325_v11  ;;  %v8866_v42 = vld [vmem:[%s17203_s19 + $0xf0] sm:$0xff]  ;;  %v15110_v11 = vcombine.low %v8853_v39, %v8857_v54  ;;  %v8901_v54 = vld [vmem:[%s17203_s19 + $0x208] sm:$0xff] }
 0x70b   : > { %12099 = vmatprep.subr.bf16.mxu0 %v15581_v55  ;;  %v15121_v12 = vcombine.high %v8862_v17, %v8866_v42  ;;  %v8869_v55 = vld [vmem:[%s17203_s19 + $0x108] sm:$0xff]  ;;  %v15120_v50 = vcombine.low %v8862_v17, %v8866_v42  ;;  %v8910_v17 = vld [vmem:[%s17203_s19 + $0x250] sm:$0xff] }
 0x70c   : > { %v15127_v41 = vcombine.high %v8869_v55, %v8873_v36  ;;  %v8914_v42 = vld [vmem:[%s17203_s19 + $0x270] sm:$0xff] }
 0x70d   : > { %12018 = vmatpush1.bf16.msra.mxu1 %v15324_v16  ;;  %v8870_v16 = vld [vmem:[%s17203_s19 + $0x110] sm:$0xff] }
 0x70e   : > { %12100 = vmatpush1.bf16.msra.mxu0 %v15580_v60  ;;  %12019 = vmatprep.subr.bf16.mxu1 %v15333_v30  ;;  %v8874_v60 = vld [vmem:[%s17203_s19 + $0x130] sm:$0xff]  ;;  %v15118_v30 = vcombine.low %v8861_v5, %v8865_v28  ;;  %v8909_v5 = vld [vmem:[%s17203_s19 + $0x248] sm:$0xff] }
 0x70f   : > { %12101 = vmatprep.subr.bf16.mxu0 %v15589_v31  ;;  %v15129_v21 = vcombine.high %v8870_v16, %v8874_v60  ;;  %v8877_v31 = vld [vmem:[%s17203_s19 + $0x148] sm:$0xff]  ;;  %v15128_v13 = vcombine.low %v8870_v16, %v8874_v60  ;;  %v8918_v16 = vld [vmem:[%s17203_s19 + $0x290] sm:$0xff] }
 0x710   : > { %v15135_v10 = vcombine.high %v8877_v31, %v8881_v24  ;;  %v15134_v45 = vcombine.low %v8877_v31, %v8881_v24  ;;  %v8913_v28 = vld [vmem:[%s17203_s19 + $0x268] sm:$0xff]  ;;  %v8922_v60 = vld [vmem:[%s17203_s19 + $0x2b0] sm:$0xff] }
 0x711   : > { %12020 = vmatpush1.bf16.msra.mxu1 %v15332_v34  ;;  %v8878_v34 = vld [vmem:[%s17203_s19 + $0x150] sm:$0xff]  ;;  %v8925_v31 = vld [vmem:[%s17203_s19 + $0x2c8] sm:$0xff] }
 0x712   : > { %12102 = vmatpush1.bf16.msra.mxu0 %v15588_v4  ;;  %12021 = vmatprep.subr.bf16.mxu1 %v15341_v25  ;;  %v8882_v4 = vld [vmem:[%s17203_s19 + $0x170] sm:$0xff]  ;;  %v15126_v25 = vcombine.low %v8869_v55, %v8873_v36  ;;  %v8917_v55 = vld [vmem:[%s17203_s19 + $0x288] sm:$0xff] }
 0x713   : > { %12103 = vmatprep.subr.bf16.mxu0 %v15597_v44  ;;  %v15137_v32 = vcombine.high %v8878_v34, %v8882_v4  ;;  %v8885_v44 = vld [vmem:[%s17203_s19 + $0x188] sm:$0xff] }
 0x714   : > { %v8921_v36 = vld [vmem:[%s17203_s19 + $0x2a8] sm:$0xff] }
 0x715   : > { %12022 = vmatpush1.bf16.msra.mxu1 %v15340_v48  ;;  %v8890_v48 = vld [vmem:[%s17203_s19 + $0x1b0] sm:$0xff]  ;;  %v8929_v24 = vld [vmem:[%s17203_s19 + $0x2e8] sm:$0xff] }
 0x716   : > { %12104 = vmatpush1.bf16.msra.mxu0 %v15596_v37  ;;  %12114 = vmatprep.subr.bf16.mxu1 %v15095_v35  ;;  %v15136_v37 = vcombine.low %v8878_v34, %v8882_v4  ;;  %v15143_v35 = vcombine.high %v8885_v44, %v8889_v26  ;;  %v15145_v23 = vcombine.high %v8886_v29, %v8890_v48  ;;  %v8926_v34 = vld [vmem:[%s17203_s19 + $0x2d0] sm:$0xff] }
 0x717   : > { %12278 = vmatprep.subr.bf16.mxu0 %v15097_v47  ;;  %v8894_v47 = vld [vmem:[%s17203_s19 + $0x1d0] sm:$0xff] }
 0x718   : > { %12024 = vmatmul.mubr.bf16.vlgmr.msra.gmra.mrb[0].mxu1 %v18808_v33  ;;  %v15153_v39 = vcombine.high %v8894_v47, %v8898_v49  ;;  %v8930_v4 = vld [vmem:[%s17203_s19 + $0x2f0] sm:$0xff] }
 0x719   : > { %12106 = vmatmul.mubr.bf16.vlgmr.msra.gmra.mrb[0].mxu0 %v18810_v56  ;;  %12115 = vmatpush1.bf16.msra.mxu1 %v15094_v2  ;;  %v15142_v2 = vcombine.low %v8885_v44, %v8889_v26  ;;  %v8933_v44 = vld [vmem:[%s17203_s19 + $0x308] sm:$0xff] }
 0x71a   : > { %12279 = vmatpush1.bf16.msra.mxu0 %v15096_v0  ;;  %12116 = vmatprep.subr.bf16.mxu1 %v15103_v40  ;;  %v15144_v0 = vcombine.low %v8886_v29, %v8890_v48  ;;  %v15151_v40 = vcombine.high %v8893_v38, %v8897_v43  ;;  %v8937_v26 = vld [vmem:[%s17203_s19 + $0x328] sm:$0xff]  ;;  %v8934_v29 = vld [vmem:[%s17203_s19 + $0x310] sm:$0xff] }
 0x71b   : > { %12280 = vmatprep.subr.bf16.mxu0 %v15105_v62  ;;  %12146 = vmatprep.mubr.bf16.mxu1 %v18628_v8  ;;  %v8902_v62 = vld [vmem:[%s17203_s19 + $0x210] sm:$0xff] }
 0x71c   : > { %12310 = vmatprep.mubr.bf16.mxu0 %v18628_v8  ;;  %v8938_v48 = vld [vmem:[%s17203_s19 + $0x330] sm:$0xff] }
 0x71d   : > { %12117 = vmatpush1.bf16.msra.mxu1 %v15102_v14  ;;  %v15150_v14 = vcombine.low %v8893_v38, %v8897_v43  ;;  %v8941_v38 = vld [vmem:[%s17203_s19 + $0x348] sm:$0xff] }
 0x71e   : > { %12281 = vmatpush1.bf16.msra.mxu0 %v15104_v3  ;;  %12118 = vmatprep.subr.bf16.mxu1 %v15111_v20  ;;  %v15152_v3 = vcombine.low %v8894_v47, %v8898_v49  ;;  %v15159_v20 = vcombine.high %v8901_v54, %v8905_v57  ;;  %v8945_v43 = vld [vmem:[%s17203_s19 + $0x368] sm:$0xff]  ;;  %v8942_v47 = vld [vmem:[%s17203_s19 + $0x350] sm:$0xff] }
 0x71f   : > { %12282 = vmatprep.subr.bf16.mxu0 %v15113_v46  ;;  %v15161_v46 = vcombine.high %v8902_v62, %v8906_v1  ;;  %v8946_v49 = vld [vmem:[%s17203_s19 + $0x370] sm:$0xff] }
 0x721   : > { %12119 = vmatpush1.bf16.msra.mxu1 %v15110_v11  ;;  %v15158_v11 = vcombine.low %v8901_v54, %v8905_v57  ;;  %v8949_v54 = vld [vmem:[%s17203_s19 + $0x388] sm:$0xff] }
 0x722   : > { %12283 = vmatpush1.bf16.msra.mxu0 %v15112_v18  ;;  %12120 = vmatprep.subr.bf16.mxu1 %v15119_v15  ;;  %v15160_v18 = vcombine.low %v8902_v62, %v8906_v1  ;;  %v15167_v15 = vcombine.high %v8909_v5, %v8913_v28  ;;  %v8953_v57 = vld [vmem:[%s17203_s19 + $0x3a8] sm:$0xff]  ;;  %v8950_v62 = vld [vmem:[%s17203_s19 + $0x390] sm:$0xff] }
 0x723   : > { %12284 = vmatprep.subr.bf16.mxu0 %v15121_v12  ;;  %v15169_v12 = vcombine.high %v8910_v17, %v8914_v42  ;;  %v8954_v1 = vld [vmem:[%s17203_s19 + $0x3b0] sm:$0xff] }
 0x725   : > { %12121 = vmatpush1.bf16.msra.mxu1 %v15118_v30  ;;  %v15166_v30 = vcombine.low %v8909_v5, %v8913_v28  ;;  %v8957_v5 = vld [vmem:[%s17203_s19 + $0x3c8] sm:$0xff] }
 0x726   : > { %12285 = vmatpush1.bf16.msra.mxu0 %v15120_v50  ;;  %12122 = vmatprep.subr.bf16.mxu1 %v15127_v41  ;;  %v15168_v50 = vcombine.low %v8910_v17, %v8914_v42  ;;  %v15175_v41 = vcombine.high %v8917_v55, %v8921_v36  ;;  %v8961_v28 = vld [vmem:[%s17203_s19 + $0x3e8] sm:$0xff]  ;;  %v8958_v17 = vld [vmem:[%s17203_s19 + $0x3d0] sm:$0xff] }
 0x727   : > { %12286 = vmatprep.subr.bf16.mxu0 %v15129_v21  ;;  %v15177_v21 = vcombine.high %v8918_v16, %v8922_v60  ;;  %v8962_v42 = vld [vmem:[%s17203_s19 + $0x3f0] sm:$0xff] }
 0x729   : > { %12123 = vmatpush1.bf16.msra.mxu1 %v15126_v25  ;;  %v15174_v25 = vcombine.low %v8917_v55, %v8921_v36  ;;  %v8965_v55 = vld [vmem:[%s17203_s19 + $0x408] sm:$0xff] }
 0x72a   : > { %12287 = vmatpush1.bf16.msra.mxu0 %v15128_v13  ;;  %12124 = vmatprep.subr.bf16.mxu1 %v15135_v10  ;;  %v15176_v13 = vcombine.low %v8918_v16, %v8922_v60  ;;  %v15183_v10 = vcombine.high %v8925_v31, %v8929_v24  ;;  %v8969_v36 = vld [vmem:[%s17203_s19 + $0x428] sm:$0xff]  ;;  %v8966_v16 = vld [vmem:[%s17203_s19 + $0x410] sm:$0xff] }
 0x72b   : > { %12288 = vmatprep.subr.bf16.mxu0 %v15137_v32  ;;  %v15185_v32 = vcombine.high %v8926_v34, %v8930_v4  ;;  %v8970_v60 = vld [vmem:[%s17203_s19 + $0x430] sm:$0xff] }
 0x72d   : > { %12125 = vmatpush1.bf16.msra.mxu1 %v15134_v45  ;;  %v15182_v45 = vcombine.low %v8925_v31, %v8929_v24  ;;  %v8973_v31 = vld [vmem:[%s17203_s19 + $0x448] sm:$0xff] }
 0x72e   : > { %12289 = vmatpush1.bf16.msra.mxu0 %v15136_v37  ;;  %12126 = vmatprep.subr.bf16.mxu1 %v15143_v35  ;;  %v15184_v37 = vcombine.low %v8926_v34, %v8930_v4  ;;  %v15191_v35 = vcombine.high %v8933_v44, %v8937_v26  ;;  %v8977_v24 = vld [vmem:[%s17203_s19 + $0x468] sm:$0xff]  ;;  %v8974_v34 = vld [vmem:[%s17203_s19 + $0x450] sm:$0xff] }
 0x72f   : > { %12290 = vmatprep.subr.bf16.mxu0 %v15145_v23  ;;  %v15193_v23 = vcombine.high %v8934_v29, %v8938_v48  ;;  %v8978_v4 = vld [vmem:[%s17203_s19 + $0x470] sm:$0xff] }
 0x731   : > { %12127 = vmatpush1.bf16.msra.mxu1 %v15142_v2  ;;  %v15190_v2 = vcombine.low %v8933_v44, %v8937_v26  ;;  %v8981_v44 = vld [vmem:[%s17203_s19 + $0x488] sm:$0xff] }
 0x732   : > { %12291 = vmatpush1.bf16.msra.mxu0 %v15144_v0  ;;  %12128 = vmatprep.subr.bf16.mxu1 %v15151_v40  ;;  %v15192_v0 = vcombine.low %v8934_v29, %v8938_v48  ;;  %v15199_v40 = vcombine.high %v8941_v38, %v8945_v43  ;;  %v8985_v26 = vld [vmem:[%s17203_s19 + $0x4a8] sm:$0xff]  ;;  %v8982_v29 = vld [vmem:[%s17203_s19 + $0x490] sm:$0xff] }
 0x733   : > { %12292 = vmatprep.subr.bf16.mxu0 %v15153_v39  ;;  %v15201_v39 = vcombine.high %v8942_v47, %v8946_v49  ;;  %v8986_v48 = vld [vmem:[%s17203_s19 + $0x4b0] sm:$0xff] }
 0x735   : > { %12129 = vmatpush1.bf16.msra.mxu1 %v15150_v14  ;;  %v15198_v14 = vcombine.low %v8941_v38, %v8945_v43  ;;  %v8989_v38 = vld [vmem:[%s17203_s19 + $0x4c8] sm:$0xff] }
 0x736   : > { %12293 = vmatpush1.bf16.msra.mxu0 %v15152_v3  ;;  %12130 = vmatprep.subr.bf16.mxu1 %v15159_v20  ;;  %v15200_v3 = vcombine.low %v8942_v47, %v8946_v49  ;;  %v15207_v20 = vcombine.high %v8949_v54, %v8953_v57  ;;  %v8993_v43 = vld [vmem:[%s17203_s19 + $0x4e8] sm:$0xff]  ;;  %v8990_v47 = vld [vmem:[%s17203_s19 + $0x4d0] sm:$0xff] }
 0x737   : > { %12294 = vmatprep.subr.bf16.mxu0 %v15161_v46  ;;  %v15209_v46 = vcombine.high %v8950_v62, %v8954_v1  ;;  %v8994_v49 = vld [vmem:[%s17203_s19 + $0x4f0] sm:$0xff] }
 0x739   : > { %12131 = vmatpush1.bf16.msra.mxu1 %v15158_v11  ;;  %v15206_v11 = vcombine.low %v8949_v54, %v8953_v57  ;;  %v8997_v54 = vld [vmem:[%s17203_s19 + $0x508] sm:$0xff] }
 0x73a   : > { %12295 = vmatpush1.bf16.msra.mxu0 %v15160_v18  ;;  %12132 = vmatprep.subr.bf16.mxu1 %v15167_v15  ;;  %v15208_v18 = vcombine.low %v8950_v62, %v8954_v1  ;;  %v15215_v15 = vcombine.high %v8957_v5, %v8961_v28  ;;  %v9001_v57 = vld [vmem:[%s17203_s19 + $0x528] sm:$0xff]  ;;  %v8998_v62 = vld [vmem:[%s17203_s19 + $0x510] sm:$0xff] }
 0x73b   : > { %12296 = vmatprep.subr.bf16.mxu0 %v15169_v12  ;;  %v15217_v12 = vcombine.high %v8958_v17, %v8962_v42  ;;  %v9002_v1 = vld [vmem:[%s17203_s19 + $0x530] sm:$0xff] }
 0x73d   : > { %12133 = vmatpush1.bf16.msra.mxu1 %v15166_v30  ;;  %v15214_v30 = vcombine.low %v8957_v5, %v8961_v28  ;;  %v9005_v5 = vld [vmem:[%s17203_s19 + $0x548] sm:$0xff] }
 0x73e   : > { %12297 = vmatpush1.bf16.msra.mxu0 %v15168_v50  ;;  %12134 = vmatprep.subr.bf16.mxu1 %v15175_v41  ;;  %v15216_v50 = vcombine.low %v8958_v17, %v8962_v42  ;;  %v15223_v41 = vcombine.high %v8965_v55, %v8969_v36  ;;  %v9009_v28 = vld [vmem:[%s17203_s19 + $0x568] sm:$0xff]  ;;  %v9006_v17 = vld [vmem:[%s17203_s19 + $0x550] sm:$0xff] }
 0x73f   : > { %12298 = vmatprep.subr.bf16.mxu0 %v15177_v21  ;;  %v15225_v21 = vcombine.high %v8966_v16, %v8970_v60  ;;  %v9010_v42 = vld [vmem:[%s17203_s19 + $0x570] sm:$0xff] }
 0x741   : > { %12135 = vmatpush1.bf16.msra.mxu1 %v15174_v25  ;;  %v15222_v25 = vcombine.low %v8965_v55, %v8969_v36  ;;  %v9013_v55 = vld [vmem:[%s17203_s19 + $0x588] sm:$0xff] }
 0x742   : > { %12299 = vmatpush1.bf16.msra.mxu0 %v15176_v13  ;;  %12136 = vmatprep.subr.bf16.mxu1 %v15183_v10  ;;  %v15224_v13 = vcombine.low %v8966_v16, %v8970_v60  ;;  %v15231_v10 = vcombine.high %v8973_v31, %v8977_v24  ;;  %v9017_v36 = vld [vmem:[%s17203_s19 + $0x5a8] sm:$0xff]  ;;  %v9014_v16 = vld [vmem:[%s17203_s19 + $0x590] sm:$0xff] }
 0x743   : > { %12300 = vmatprep.subr.bf16.mxu0 %v15185_v32  ;;  %v15233_v32 = vcombine.high %v8974_v34, %v8978_v4  ;;  %v9018_v60 = vld [vmem:[%s17203_s19 + $0x5b0] sm:$0xff] }
 0x745   : > { %12137 = vmatpush1.bf16.msra.mxu1 %v15182_v45  ;;  %v15230_v45 = vcombine.low %v8973_v31, %v8977_v24  ;;  %v9021_v31 = vld [vmem:[%s17203_s19 + $0x5c8] sm:$0xff] }
 0x746   : > { %12301 = vmatpush1.bf16.msra.mxu0 %v15184_v37  ;;  %12138 = vmatprep.subr.bf16.mxu1 %v15191_v35  ;;  %v15232_v37 = vcombine.low %v8974_v34, %v8978_v4  ;;  %v15239_v35 = vcombine.high %v8981_v44, %v8985_v26  ;;  %v9025_v24 = vld [vmem:[%s17203_s19 + $0x5e8] sm:$0xff]  ;;  %v9022_v34 = vld [vmem:[%s17203_s19 + $0x5d0] sm:$0xff] }
 0x747   : > { %12302 = vmatprep.subr.bf16.mxu0 %v15193_v23  ;;  %v15241_v23 = vcombine.high %v8982_v29, %v8986_v48  ;;  %v9026_v4 = vld [vmem:[%s17203_s19 + $0x5f0] sm:$0xff] }
 0x749   : > { %12139 = vmatpush1.bf16.msra.mxu1 %v15190_v2  ;;  %v15238_v2 = vcombine.low %v8981_v44, %v8985_v26  ;;  %v9029_v44 = vld [vmem:[%s17203_s19 + $0x608] sm:$0xff] }
 0x74a   : > { %12303 = vmatpush1.bf16.msra.mxu0 %v15192_v0  ;;  %12140 = vmatprep.subr.bf16.mxu1 %v15199_v40  ;;  %v15240_v0 = vcombine.low %v8982_v29, %v8986_v48  ;;  %v15247_v40 = vcombine.high %v8989_v38, %v8993_v43  ;;  %v9033_v26 = vld [vmem:[%s17203_s19 + $0x628] sm:$0xff]  ;;  %v9030_v29 = vld [vmem:[%s17203_s19 + $0x610] sm:$0xff] }
 0x74b   : > { %12304 = vmatprep.subr.bf16.mxu0 %v15201_v39  ;;  %v15249_v39 = vcombine.high %v8990_v47, %v8994_v49  ;;  %v9034_v48 = vld [vmem:[%s17203_s19 + $0x630] sm:$0xff] }
 0x74d   : > { %12141 = vmatpush1.bf16.msra.mxu1 %v15198_v14  ;;  %v15246_v14 = vcombine.low %v8989_v38, %v8993_v43  ;;  %v9037_v38 = vld [vmem:[%s17203_s19 + $0x648] sm:$0xff] }
 0x74e   : > { %12305 = vmatpush1.bf16.msra.mxu0 %v15200_v3  ;;  %12142 = vmatprep.subr.bf16.mxu1 %v15207_v20  ;;  %v15248_v3 = vcombine.low %v8990_v47, %v8994_v49  ;;  %v15255_v20 = vcombine.high %v8997_v54, %v9001_v57  ;;  %v9041_v43 = vld [vmem:[%s17203_s19 + $0x668] sm:$0xff]  ;;  %v9038_v47 = vld [vmem:[%s17203_s19 + $0x650] sm:$0xff] }
 0x74f   : > { %12306 = vmatprep.subr.bf16.mxu0 %v15209_v46  ;;  %v15257_v46 = vcombine.high %v8998_v62, %v9002_v1  ;;  %v9042_v49 = vld [vmem:[%s17203_s19 + $0x670] sm:$0xff] }
 0x751   : > { %12143 = vmatpush1.bf16.msra.mxu1 %v15206_v11  ;;  %v15254_v11 = vcombine.low %v8997_v54, %v9001_v57  ;;  %v9045_v54 = vld [vmem:[%s17203_s19 + $0x688] sm:$0xff] }
 0x752   : > { %12307 = vmatpush1.bf16.msra.mxu0 %v15208_v18  ;;  %12144 = vmatprep.subr.bf16.mxu1 %v15215_v15  ;;  %v15256_v18 = vcombine.low %v8998_v62, %v9002_v1  ;;  %v15263_v15 = vcombine.high %v9005_v5, %v9009_v28  ;;  %v9049_v57 = vld [vmem:[%s17203_s19 + $0x6a8] sm:$0xff]  ;;  %v9046_v62 = vld [vmem:[%s17203_s19 + $0x690] sm:$0xff] }
 0x753   : > { %12308 = vmatprep.subr.bf16.mxu0 %v15217_v12  ;;  %v15265_v12 = vcombine.high %v9006_v17, %v9010_v42  ;;  %v9050_v1 = vld [vmem:[%s17203_s19 + $0x6b0] sm:$0xff] }
 0x755   : > { %12145 = vmatpush1.bf16.msra.mxu1 %v15214_v30  ;;  %v15262_v30 = vcombine.low %v9005_v5, %v9009_v28  ;;  %v9053_v5 = vld [vmem:[%s17203_s19 + $0x6c8] sm:$0xff] }
 0x756   : > { %12309 = vmatpush1.bf16.msra.mxu0 %v15216_v50  ;;  %12155 = vmatprep.subr.bf16.mxu1 %v15223_v41  ;;  %v15264_v50 = vcombine.low %v9006_v17, %v9010_v42  ;;  %v15271_v41 = vcombine.high %v9013_v55, %v9017_v36  ;;  %v9057_v28 = vld [vmem:[%s17203_s19 + $0x6e8] sm:$0xff]  ;;  %v9054_v17 = vld [vmem:[%s17203_s19 + $0x6d0] sm:$0xff] }
 0x757   : > { %12319 = vmatprep.subr.bf16.mxu0 %v15225_v21  ;;  %v15273_v21 = vcombine.high %v9014_v16, %v9018_v60  ;;  %v9058_v42 = vld [vmem:[%s17203_s19 + $0x6f0] sm:$0xff] }
 0x758   : > { %12147 = vmatmul.mubr.bf16.vlgmr.msra.gmra.mrb[4].mxu1 %v18728_v27 }
 0x759   : > { %12156 = vmatpush1.bf16.msra.mxu1 %v15222_v25  ;;  %12311 = vmatmul.mubr.bf16.vlgmr.msra.gmra.mrb[4].mxu0 %v18728_v27  ;;  %v15270_v25 = vcombine.low %v9013_v55, %v9017_v36  ;;  %v9061_v55 = vld [vmem:[%s17203_s19 + $0x708] sm:$0xff] }
 0x75a   : > { %12320 = vmatpush1.bf16.msra.mxu0 %v15224_v13  ;;  %12157 = vmatprep.subr.bf16.mxu1 %v15231_v10  ;;  %v15272_v13 = vcombine.low %v9014_v16, %v9018_v60  ;;  %v15279_v10 = vcombine.high %v9021_v31, %v9025_v24  ;;  %v9065_v36 = vld [vmem:[%s17203_s19 + $0x728] sm:$0xff]  ;;  %v9062_v16 = vld [vmem:[%s17203_s19 + $0x710] sm:$0xff] }
 0x75b   : > { %12321 = vmatprep.subr.bf16.mxu0 %v15233_v32  ;;  %12187 = vmatprep.mubr.bf16.mxu1 %v18736_v19  ;;  %v15281_v32 = vcombine.high %v9022_v34, %v9026_v4  ;;  %v9066_v60 = vld [vmem:[%s17203_s19 + $0x730] sm:$0xff] }
 0x75c   : > { %12351 = vmatprep.mubr.bf16.mxu0 %v18736_v19 }
 0x75d   : > { %12158 = vmatpush1.bf16.msra.mxu1 %v15230_v45  ;;  %v15278_v45 = vcombine.low %v9021_v31, %v9025_v24  ;;  %v9069_v31 = vld [vmem:[%s17203_s19 + $0x748] sm:$0xff] }
 0x75e   : > { %12322 = vmatpush1.bf16.msra.mxu0 %v15232_v37  ;;  %12159 = vmatprep.subr.bf16.mxu1 %v15239_v35  ;;  %v15280_v37 = vcombine.low %v9022_v34, %v9026_v4  ;;  %v15287_v35 = vcombine.high %v9029_v44, %v9033_v26  ;;  %v9073_v24 = vld [vmem:[%s17203_s19 + $0x768] sm:$0xff]  ;;  %v9070_v34 = vld [vmem:[%s17203_s19 + $0x750] sm:$0xff] }
 0x75f   : > { %12323 = vmatprep.subr.bf16.mxu0 %v15241_v23  ;;  %v15289_v23 = vcombine.high %v9030_v29, %v9034_v48  ;;  %v9074_v4 = vld [vmem:[%s17203_s19 + $0x770] sm:$0xff] }
 0x761   : > { %12160 = vmatpush1.bf16.msra.mxu1 %v15238_v2  ;;  %v15286_v2 = vcombine.low %v9029_v44, %v9033_v26  ;;  %v9077_v44 = vld [vmem:[%s17203_s19 + $0x788] sm:$0xff] }
 0x762   : > { %12324 = vmatpush1.bf16.msra.mxu0 %v15240_v0  ;;  %12161 = vmatprep.subr.bf16.mxu1 %v15247_v40  ;;  %v15288_v0 = vcombine.low %v9030_v29, %v9034_v48  ;;  %v15295_v40 = vcombine.high %v9037_v38, %v9041_v43  ;;  %v9081_v26 = vld [vmem:[%s17203_s19 + $0x7a8] sm:$0xff]  ;;  %v9078_v29 = vld [vmem:[%s17203_s19 + $0x790] sm:$0xff] }
 0x763   : > { %12325 = vmatprep.subr.bf16.mxu0 %v15249_v39  ;;  %v15297_v39 = vcombine.high %v9038_v47, %v9042_v49  ;;  %v9082_v48 = vld [vmem:[%s17203_s19 + $0x7b0] sm:$0xff] }
 0x765   : > { %12162 = vmatpush1.bf16.msra.mxu1 %v15246_v14  ;;  %v15294_v14 = vcombine.low %v9037_v38, %v9041_v43  ;;  %v9085_v38 = vld [vmem:[%s17203_s19 + $0x7c8] sm:$0xff] }
 0x766   : > { %12326 = vmatpush1.bf16.msra.mxu0 %v15248_v3  ;;  %12163 = vmatprep.subr.bf16.mxu1 %v15255_v20  ;;  %v15296_v3 = vcombine.low %v9038_v47, %v9042_v49  ;;  %v15303_v20 = vcombine.high %v9045_v54, %v9049_v57  ;;  %v9089_v43 = vld [vmem:[%s17203_s19 + $0x7e8] sm:$0xff]  ;;  %v9086_v47 = vld [vmem:[%s17203_s19 + $0x7d0] sm:$0xff] }
 0x767   : > { %12327 = vmatprep.subr.bf16.mxu0 %v15257_v46  ;;  %v15305_v46 = vcombine.high %v9046_v62, %v9050_v1  ;;  %v9090_v49 = vld [vmem:[%s17203_s19 + $0x7f0] sm:$0xff] }
 0x769   : > { %12164 = vmatpush1.bf16.msra.mxu1 %v15254_v11  ;;  %v15302_v11 = vcombine.low %v9045_v54, %v9049_v57  ;;  %v9093_v54 = vld [vmem:[%s17203_s19 + $0x808] sm:$0xff] }
 0x76a   : > { %12328 = vmatpush1.bf16.msra.mxu0 %v15256_v18  ;;  %12165 = vmatprep.subr.bf16.mxu1 %v15263_v15  ;;  %v15304_v18 = vcombine.low %v9046_v62, %v9050_v1  ;;  %v15311_v15 = vcombine.high %v9053_v5, %v9057_v28  ;;  %v9097_v57 = vld [vmem:[%s17203_s19 + $0x828] sm:$0xff]  ;;  %v9094_v62 = vld [vmem:[%s17203_s19 + $0x810] sm:$0xff] }
 0x76b   : > { %12329 = vmatprep.subr.bf16.mxu0 %v15265_v12  ;;  %v15313_v12 = vcombine.high %v9054_v17, %v9058_v42  ;;  %v9098_v1 = vld [vmem:[%s17203_s19 + $0x830] sm:$0xff] }
 0x76d   : > { %12166 = vmatpush1.bf16.msra.mxu1 %v15262_v30  ;;  %v15310_v30 = vcombine.low %v9053_v5, %v9057_v28  ;;  %v9101_v5 = vld [vmem:[%s17203_s19 + $0x848] sm:$0xff] }
 0x76e   : > { %12330 = vmatpush1.bf16.msra.mxu0 %v15264_v50  ;;  %12167 = vmatprep.subr.bf16.mxu1 %v15271_v41  ;;  %v15312_v50 = vcombine.low %v9054_v17, %v9058_v42  ;;  %v15319_v41 = vcombine.high %v9061_v55, %v9065_v36  ;;  %v9105_v28 = vld [vmem:[%s17203_s19 + $0x868] sm:$0xff]  ;;  %v9102_v17 = vld [vmem:[%s17203_s19 + $0x850] sm:$0xff] }
 0x76f   : > { %12331 = vmatprep.subr.bf16.mxu0 %v15273_v21  ;;  %v15321_v21 = vcombine.high %v9062_v16, %v9066_v60  ;;  %v9106_v42 = vld [vmem:[%s17203_s19 + $0x870] sm:$0xff] }
 0x771   : > { %12168 = vmatpush1.bf16.msra.mxu1 %v15270_v25  ;;  %v15318_v25 = vcombine.low %v9061_v55, %v9065_v36  ;;  %v9109_v55 = vld [vmem:[%s17203_s19 + $0x888] sm:$0xff] }
 0x772   : > { %12332 = vmatpush1.bf16.msra.mxu0 %v15272_v13  ;;  %12169 = vmatprep.subr.bf16.mxu1 %v15279_v10  ;;  %v15320_v13 = vcombine.low %v9062_v16, %v9066_v60  ;;  %v15327_v10 = vcombine.high %v9069_v31, %v9073_v24  ;;  %v9113_v36 = vld [vmem:[%s17203_s19 + $0x8a8] sm:$0xff]  ;;  %v9110_v16 = vld [vmem:[%s17203_s19 + $0x890] sm:$0xff] }
 0x773   : > { %12333 = vmatprep.subr.bf16.mxu0 %v15281_v32  ;;  %v15329_v32 = vcombine.high %v9070_v34, %v9074_v4  ;;  %v9114_v60 = vld [vmem:[%s17203_s19 + $0x8b0] sm:$0xff] }
 0x775   : > { %12170 = vmatpush1.bf16.msra.mxu1 %v15278_v45  ;;  %v15326_v45 = vcombine.low %v9069_v31, %v9073_v24  ;;  %v9117_v31 = vld [vmem:[%s17203_s19 + $0x8c8] sm:$0xff] }
 0x776   : > { %12334 = vmatpush1.bf16.msra.mxu0 %v15280_v37  ;;  %12171 = vmatprep.subr.bf16.mxu1 %v15287_v35  ;;  %v15328_v37 = vcombine.low %v9070_v34, %v9074_v4  ;;  %v15335_v35 = vcombine.high %v9077_v44, %v9081_v26  ;;  %v9121_v24 = vld [vmem:[%s17203_s19 + $0x8e8] sm:$0xff]  ;;  %v9118_v34 = vld [vmem:[%s17203_s19 + $0x8d0] sm:$0xff] }
 0x777   : > { %12335 = vmatprep.subr.bf16.mxu0 %v15289_v23  ;;  %v15337_v23 = vcombine.high %v9078_v29, %v9082_v48  ;;  %v9122_v4 = vld [vmem:[%s17203_s19 + $0x8f0] sm:$0xff] }
 0x779   : > { %12172 = vmatpush1.bf16.msra.mxu1 %v15286_v2  ;;  %v15334_v2 = vcombine.low %v9077_v44, %v9081_v26  ;;  %v9125_v44 = vld [vmem:[%s17203_s19 + $0x908] sm:$0xff] }
 0x77a   : > { %12336 = vmatpush1.bf16.msra.mxu0 %v15288_v0  ;;  %12173 = vmatprep.subr.bf16.mxu1 %v15295_v40  ;;  %v15336_v0 = vcombine.low %v9078_v29, %v9082_v48  ;;  %v15343_v40 = vcombine.high %v9085_v38, %v9089_v43  ;;  %v9129_v26 = vld [vmem:[%s17203_s19 + $0x928] sm:$0xff]  ;;  %v9126_v29 = vld [vmem:[%s17203_s19 + $0x910] sm:$0xff] }
 0x77b   : > { %12337 = vmatprep.subr.bf16.mxu0 %v15297_v39  ;;  %v15345_v39 = vcombine.high %v9086_v47, %v9090_v49  ;;  %v9130_v48 = vld [vmem:[%s17203_s19 + $0x930] sm:$0xff] }
 0x77d   : > { %12174 = vmatpush1.bf16.msra.mxu1 %v15294_v14  ;;  %v15342_v14 = vcombine.low %v9085_v38, %v9089_v43  ;;  %v9133_v38 = vld [vmem:[%s17203_s19 + $0x948] sm:$0xff] }
 0x77e   : > { %12338 = vmatpush1.bf16.msra.mxu0 %v15296_v3  ;;  %12175 = vmatprep.subr.bf16.mxu1 %v15303_v20  ;;  %v15344_v3 = vcombine.low %v9086_v47, %v9090_v49  ;;  %v15351_v20 = vcombine.high %v9093_v54, %v9097_v57  ;;  %v9137_v43 = vld [vmem:[%s17203_s19 + $0x968] sm:$0xff]  ;;  %v9134_v47 = vld [vmem:[%s17203_s19 + $0x950] sm:$0xff] }
 0x77f   : > { %12339 = vmatprep.subr.bf16.mxu0 %v15305_v46  ;;  %v15353_v46 = vcombine.high %v9094_v62, %v9098_v1  ;;  %v9138_v49 = vld [vmem:[%s17203_s19 + $0x970] sm:$0xff] }
 0x781   : > { %12176 = vmatpush1.bf16.msra.mxu1 %v15302_v11  ;;  %v15350_v11 = vcombine.low %v9093_v54, %v9097_v57  ;;  %v9141_v54 = vld [vmem:[%s17203_s19 + $0x988] sm:$0xff] }
 0x782   : > { %12340 = vmatpush1.bf16.msra.mxu0 %v15304_v18  ;;  %12177 = vmatprep.subr.bf16.mxu1 %v15311_v15  ;;  %v15352_v18 = vcombine.low %v9094_v62, %v9098_v1  ;;  %v15359_v15 = vcombine.high %v9101_v5, %v9105_v28  ;;  %v9145_v57 = vld [vmem:[%s17203_s19 + $0x9a8] sm:$0xff]  ;;  %v9142_v62 = vld [vmem:[%s17203_s19 + $0x990] sm:$0xff] }
 0x783   : > { %12341 = vmatprep.subr.bf16.mxu0 %v15313_v12  ;;  %v15361_v12 = vcombine.high %v9102_v17, %v9106_v42  ;;  %v9146_v1 = vld [vmem:[%s17203_s19 + $0x9b0] sm:$0xff] }
 0x785   : > { %12178 = vmatpush1.bf16.msra.mxu1 %v15310_v30  ;;  %v15358_v30 = vcombine.low %v9101_v5, %v9105_v28  ;;  %v9149_v5 = vld [vmem:[%s17203_s19 + $0x9c8] sm:$0xff] }
 0x786   : > { %12342 = vmatpush1.bf16.msra.mxu0 %v15312_v50  ;;  %12179 = vmatprep.subr.bf16.mxu1 %v15319_v41  ;;  %v15360_v50 = vcombine.low %v9102_v17, %v9106_v42  ;;  %v15367_v41 = vcombine.high %v9109_v55, %v9113_v36  ;;  %v9153_v28 = vld [vmem:[%s17203_s19 + $0x9e8] sm:$0xff]  ;;  %v9150_v17 = vld [vmem:[%s17203_s19 + $0x9d0] sm:$0xff] }
 0x787   : > { %12343 = vmatprep.subr.bf16.mxu0 %v15321_v21  ;;  %v15369_v21 = vcombine.high %v9110_v16, %v9114_v60  ;;  %v9154_v42 = vld [vmem:[%s17203_s19 + $0x9f0] sm:$0xff] }
 0x789   : > { %12180 = vmatpush1.bf16.msra.mxu1 %v15318_v25  ;;  %v15366_v25 = vcombine.low %v9109_v55, %v9113_v36  ;;  %v9157_v55 = vld [vmem:[%s17203_s19 + $0xa08] sm:$0xff] }
 0x78a   : > { %12344 = vmatpush1.bf16.msra.mxu0 %v15320_v13  ;;  %12181 = vmatprep.subr.bf16.mxu1 %v15327_v10  ;;  %v15368_v13 = vcombine.low %v9110_v16, %v9114_v60  ;;  %v15375_v10 = vcombine.high %v9117_v31, %v9121_v24  ;;  %v9161_v36 = vld [vmem:[%s17203_s19 + $0xa28] sm:$0xff]  ;;  %v9158_v16 = vld [vmem:[%s17203_s19 + $0xa10] sm:$0xff] }
 0x78b   : > { %12345 = vmatprep.subr.bf16.mxu0 %v15329_v32  ;;  %v15377_v32 = vcombine.high %v9118_v34, %v9122_v4  ;;  %v9162_v60 = vld [vmem:[%s17203_s19 + $0xa30] sm:$0xff] }
 0x78d   : > { %12182 = vmatpush1.bf16.msra.mxu1 %v15326_v45  ;;  %v15374_v45 = vcombine.low %v9117_v31, %v9121_v24  ;;  %v9165_v31 = vld [vmem:[%s17203_s19 + $0xa48] sm:$0xff] }
 0x78e   : > { %12346 = vmatpush1.bf16.msra.mxu0 %v15328_v37  ;;  %12183 = vmatprep.subr.bf16.mxu1 %v15335_v35  ;;  %v15376_v37 = vcombine.low %v9118_v34, %v9122_v4  ;;  %v15383_v35 = vcombine.high %v9125_v44, %v9129_v26  ;;  %v9169_v24 = vld [vmem:[%s17203_s19 + $0xa68] sm:$0xff]  ;;  %v9166_v34 = vld [vmem:[%s17203_s19 + $0xa50] sm:$0xff] }
 0x78f   : > { %12347 = vmatprep.subr.bf16.mxu0 %v15337_v23  ;;  %v15385_v23 = vcombine.high %v9126_v29, %v9130_v48  ;;  %v9170_v4 = vld [vmem:[%s17203_s19 + $0xa70] sm:$0xff] }
 0x791   : > { %12184 = vmatpush1.bf16.msra.mxu1 %v15334_v2  ;;  %v15382_v2 = vcombine.low %v9125_v44, %v9129_v26  ;;  %v9173_v44 = vld [vmem:[%s17203_s19 + $0xa88] sm:$0xff] }
 0x792   : > { %12348 = vmatpush1.bf16.msra.mxu0 %v15336_v0  ;;  %12185 = vmatprep.subr.bf16.mxu1 %v15343_v40  ;;  %v15384_v0 = vcombine.low %v9126_v29, %v9130_v48  ;;  %v15391_v40 = vcombine.high %v9133_v38, %v9137_v43  ;;  %v9177_v26 = vld [vmem:[%s17203_s19 + $0xaa8] sm:$0xff]  ;;  %v9174_v29 = vld [vmem:[%s17203_s19 + $0xa90] sm:$0xff] }
 0x793   : > { %12349 = vmatprep.subr.bf16.mxu0 %v15345_v39  ;;  %v15393_v39 = vcombine.high %v9134_v47, %v9138_v49  ;;  %v9178_v48 = vld [vmem:[%s17203_s19 + $0xab0] sm:$0xff] }
 0x795   : > { %12186 = vmatpush1.bf16.msra.mxu1 %v15342_v14  ;;  %v15390_v14 = vcombine.low %v9133_v38, %v9137_v43  ;;  %v9181_v38 = vld [vmem:[%s17203_s19 + $0xac8] sm:$0xff] }
 0x796   : > { %12350 = vmatpush1.bf16.msra.mxu0 %v15344_v3  ;;  %12196 = vmatprep.subr.bf16.mxu1 %v15351_v20  ;;  %v15392_v3 = vcombine.low %v9134_v47, %v9138_v49  ;;  %v15399_v20 = vcombine.high %v9141_v54, %v9145_v57  ;;  %v9185_v43 = vld [vmem:[%s17203_s19 + $0xae8] sm:$0xff]  ;;  %v9182_v47 = vld [vmem:[%s17203_s19 + $0xad0] sm:$0xff] }
 0x797   : > { %12360 = vmatprep.subr.bf16.mxu0 %v15353_v46  ;;  %v15401_v46 = vcombine.high %v9142_v62, %v9146_v1  ;;  %v9186_v49 = vld [vmem:[%s17203_s19 + $0xaf0] sm:$0xff] }
 0x798   : > { %12188 = vmatmul.mubr.bf16.vlgmr.msra.gmra.mrb[4].mxu1 %v18808_v33 }
 0x799   : > { %12197 = vmatpush1.bf16.msra.mxu1 %v15350_v11  ;;  %12352 = vmatmul.mubr.bf16.vlgmr.msra.gmra.mrb[4].mxu0 %v18808_v33  ;;  %v15398_v11 = vcombine.low %v9141_v54, %v9145_v57  ;;  %v9189_v54 = vld [vmem:[%s17203_s19 + $0xb08] sm:$0xff] }
 0x79a   : > { %12361 = vmatpush1.bf16.msra.mxu0 %v15352_v18  ;;  %12198 = vmatprep.subr.bf16.mxu1 %v15359_v15  ;;  %v15400_v18 = vcombine.low %v9142_v62, %v9146_v1  ;;  %v15407_v15 = vcombine.high %v9149_v5, %v9153_v28  ;;  %v9193_v57 = vld [vmem:[%s17203_s19 + $0xb28] sm:$0xff]  ;;  %v9190_v62 = vld [vmem:[%s17203_s19 + $0xb10] sm:$0xff] }
 0x79b   : > { %12362 = vmatprep.subr.bf16.mxu0 %v15361_v12  ;;  %12228 = vmatprep.mubr.bf16.mxu1 %v18630_v53  ;;  %v15409_v12 = vcombine.high %v9150_v17, %v9154_v42  ;;  %v9194_v1 = vld [vmem:[%s17203_s19 + $0xb30] sm:$0xff] }
 0x79c   : > { %12392 = vmatprep.mubr.bf16.mxu0 %v18630_v53 }
 0x79d   : > { %12199 = vmatpush1.bf16.msra.mxu1 %v15358_v30  ;;  %v15406_v30 = vcombine.low %v9149_v5, %v9153_v28  ;;  %v9197_v5 = vld [vmem:[%s17203_s19 + $0xb48] sm:$0xff] }
 0x79e   : > { %12363 = vmatpush1.bf16.msra.mxu0 %v15360_v50  ;;  %12200 = vmatprep.subr.bf16.mxu1 %v15367_v41  ;;  %v15408_v50 = vcombine.low %v9150_v17, %v9154_v42  ;;  %v15415_v41 = vcombine.high %v9157_v55, %v9161_v36  ;;  %v9201_v28 = vld [vmem:[%s17203_s19 + $0xb68] sm:$0xff]  ;;  %v9198_v17 = vld [vmem:[%s17203_s19 + $0xb50] sm:$0xff] }
 0x79f   : > { %12364 = vmatprep.subr.bf16.mxu0 %v15369_v21  ;;  %v15417_v21 = vcombine.high %v9158_v16, %v9162_v60  ;;  %v9202_v42 = vld [vmem:[%s17203_s19 + $0xb70] sm:$0xff] }
 0x7a1   : > { %12201 = vmatpush1.bf16.msra.mxu1 %v15366_v25  ;;  %v15414_v25 = vcombine.low %v9157_v55, %v9161_v36  ;;  %v9205_v55 = vld [vmem:[%s17203_s19 + $0xb88] sm:$0xff] }
 0x7a2   : > { %12365 = vmatpush1.bf16.msra.mxu0 %v15368_v13  ;;  %12202 = vmatprep.subr.bf16.mxu1 %v15375_v10  ;;  %v15416_v13 = vcombine.low %v9158_v16, %v9162_v60  ;;  %v15423_v10 = vcombine.high %v9165_v31, %v9169_v24  ;;  %v9209_v36 = vld [vmem:[%s17203_s19 + $0xba8] sm:$0xff]  ;;  %v9206_v16 = vld [vmem:[%s17203_s19 + $0xb90] sm:$0xff] }
 0x7a3   : > { %12366 = vmatprep.subr.bf16.mxu0 %v15377_v32  ;;  %v15425_v32 = vcombine.high %v9166_v34, %v9170_v4  ;;  %v9210_v60 = vld [vmem:[%s17203_s19 + $0xbb0] sm:$0xff] }
 0x7a5   : > { %12203 = vmatpush1.bf16.msra.mxu1 %v15374_v45  ;;  %v15422_v45 = vcombine.low %v9165_v31, %v9169_v24  ;;  %v9213_v31 = vld [vmem:[%s17203_s19 + $0xbc8] sm:$0xff] }
 0x7a6   : > { %12367 = vmatpush1.bf16.msra.mxu0 %v15376_v37  ;;  %12204 = vmatprep.subr.bf16.mxu1 %v15383_v35  ;;  %v15424_v37 = vcombine.low %v9166_v34, %v9170_v4  ;;  %v15431_v35 = vcombine.high %v9173_v44, %v9177_v26  ;;  %v9217_v24 = vld [vmem:[%s17203_s19 + $0xbe8] sm:$0xff]  ;;  %v9214_v34 = vld [vmem:[%s17203_s19 + $0xbd0] sm:$0xff] }
 0x7a7   : > { %12368 = vmatprep.subr.bf16.mxu0 %v15385_v23  ;;  %v15433_v23 = vcombine.high %v9174_v29, %v9178_v48  ;;  %v9218_v4 = vld [vmem:[%s17203_s19 + $0xbf0] sm:$0xff] }
 0x7a9   : > { %12205 = vmatpush1.bf16.msra.mxu1 %v15382_v2  ;;  %v15430_v2 = vcombine.low %v9173_v44, %v9177_v26  ;;  %v9221_v44 = vld [vmem:[%s17203_s19 + $0xc08] sm:$0xff] }
 0x7aa   : > { %12369 = vmatpush1.bf16.msra.mxu0 %v15384_v0  ;;  %12206 = vmatprep.subr.bf16.mxu1 %v15391_v40  ;;  %v15432_v0 = vcombine.low %v9174_v29, %v9178_v48  ;;  %v15439_v40 = vcombine.high %v9181_v38, %v9185_v43  ;;  %v9225_v26 = vld [vmem:[%s17203_s19 + $0xc28] sm:$0xff]  ;;  %v9222_v29 = vld [vmem:[%s17203_s19 + $0xc10] sm:$0xff] }
 0x7ab   : > { %12370 = vmatprep.subr.bf16.mxu0 %v15393_v39  ;;  %v15441_v39 = vcombine.high %v9182_v47, %v9186_v49  ;;  %v9226_v48 = vld [vmem:[%s17203_s19 + $0xc30] sm:$0xff] }
 0x7ad   : > { %12207 = vmatpush1.bf16.msra.mxu1 %v15390_v14  ;;  %v15438_v14 = vcombine.low %v9181_v38, %v9185_v43  ;;  %v9229_v38 = vld [vmem:[%s17203_s19 + $0xc48] sm:$0xff] }
 0x7ae   : > { %12371 = vmatpush1.bf16.msra.mxu0 %v15392_v3  ;;  %12208 = vmatprep.subr.bf16.mxu1 %v15399_v20  ;;  %v15440_v3 = vcombine.low %v9182_v47, %v9186_v49  ;;  %v15447_v20 = vcombine.high %v9189_v54, %v9193_v57  ;;  %v9233_v43 = vld [vmem:[%s17203_s19 + $0xc68] sm:$0xff]  ;;  %v9230_v47 = vld [vmem:[%s17203_s19 + $0xc50] sm:$0xff] }
 0x7af   : > { %12372 = vmatprep.subr.bf16.mxu0 %v15401_v46  ;;  %v15449_v46 = vcombine.high %v9190_v62, %v9194_v1  ;;  %v9234_v49 = vld [vmem:[%s17203_s19 + $0xc70] sm:$0xff] }
 0x7b1   : > { %12209 = vmatpush1.bf16.msra.mxu1 %v15398_v11  ;;  %v15446_v11 = vcombine.low %v9189_v54, %v9193_v57  ;;  %v9237_v54 = vld [vmem:[%s17203_s19 + $0xc88] sm:$0xff] }
 0x7b2   : > { %12373 = vmatpush1.bf16.msra.mxu0 %v15400_v18  ;;  %12210 = vmatprep.subr.bf16.mxu1 %v15407_v15  ;;  %v15448_v18 = vcombine.low %v9190_v62, %v9194_v1  ;;  %v15455_v15 = vcombine.high %v9197_v5, %v9201_v28  ;;  %v9241_v57 = vld [vmem:[%s17203_s19 + $0xca8] sm:$0xff]  ;;  %v9238_v62 = vld [vmem:[%s17203_s19 + $0xc90] sm:$0xff] }
 0x7b3   : > { %12374 = vmatprep.subr.bf16.mxu0 %v15409_v12  ;;  %v15457_v12 = vcombine.high %v9198_v17, %v9202_v42  ;;  %v9242_v1 = vld [vmem:[%s17203_s19 + $0xcb0] sm:$0xff] }
 0x7b5   : > { %12211 = vmatpush1.bf16.msra.mxu1 %v15406_v30  ;;  %v15454_v30 = vcombine.low %v9197_v5, %v9201_v28  ;;  %v9245_v5 = vld [vmem:[%s17203_s19 + $0xcc8] sm:$0xff] }
 0x7b6   : > { %12375 = vmatpush1.bf16.msra.mxu0 %v15408_v50  ;;  %12212 = vmatprep.subr.bf16.mxu1 %v15415_v41  ;;  %v15456_v50 = vcombine.low %v9198_v17, %v9202_v42  ;;  %v15463_v41 = vcombine.high %v9205_v55, %v9209_v36  ;;  %v9249_v28 = vld [vmem:[%s17203_s19 + $0xce8] sm:$0xff]  ;;  %v9246_v17 = vld [vmem:[%s17203_s19 + $0xcd0] sm:$0xff] }
 0x7b7   : > { %12376 = vmatprep.subr.bf16.mxu0 %v15417_v21  ;;  %v15465_v21 = vcombine.high %v9206_v16, %v9210_v60  ;;  %v9250_v42 = vld [vmem:[%s17203_s19 + $0xcf0] sm:$0xff] }
 0x7b9   : > { %12213 = vmatpush1.bf16.msra.mxu1 %v15414_v25  ;;  %v15462_v25 = vcombine.low %v9205_v55, %v9209_v36  ;;  %v9253_v55 = vld [vmem:[%s17203_s19 + $0xd08] sm:$0xff] }
 0x7ba   : > { %12377 = vmatpush1.bf16.msra.mxu0 %v15416_v13  ;;  %12214 = vmatprep.subr.bf16.mxu1 %v15423_v10  ;;  %v15464_v13 = vcombine.low %v9206_v16, %v9210_v60  ;;  %v15471_v10 = vcombine.high %v9213_v31, %v9217_v24  ;;  %v9257_v36 = vld [vmem:[%s17203_s19 + $0xd28] sm:$0xff]  ;;  %v9254_v16 = vld [vmem:[%s17203_s19 + $0xd10] sm:$0xff] }
 0x7bb   : > { %12378 = vmatprep.subr.bf16.mxu0 %v15425_v32  ;;  %v15473_v32 = vcombine.high %v9214_v34, %v9218_v4  ;;  %v9258_v60 = vld [vmem:[%s17203_s19 + $0xd30] sm:$0xff] }
 0x7bd   : > { %12215 = vmatpush1.bf16.msra.mxu1 %v15422_v45  ;;  %v15470_v45 = vcombine.low %v9213_v31, %v9217_v24  ;;  %v9261_v31 = vld [vmem:[%s17203_s19 + $0xd48] sm:$0xff] }
 0x7be   : > { %12379 = vmatpush1.bf16.msra.mxu0 %v15424_v37  ;;  %12216 = vmatprep.subr.bf16.mxu1 %v15431_v35  ;;  %v15472_v37 = vcombine.low %v9214_v34, %v9218_v4  ;;  %v15479_v35 = vcombine.high %v9221_v44, %v9225_v26  ;;  %v9265_v24 = vld [vmem:[%s17203_s19 + $0xd68] sm:$0xff]  ;;  %v9262_v34 = vld [vmem:[%s17203_s19 + $0xd50] sm:$0xff] }
 0x7bf   : > { %12380 = vmatprep.subr.bf16.mxu0 %v15433_v23  ;;  %v15481_v23 = vcombine.high %v9222_v29, %v9226_v48  ;;  %v9266_v4 = vld [vmem:[%s17203_s19 + $0xd70] sm:$0xff] }
 0x7c1   : > { %12217 = vmatpush1.bf16.msra.mxu1 %v15430_v2  ;;  %v15478_v2 = vcombine.low %v9221_v44, %v9225_v26  ;;  %v15521_v44 = vcombine.high %v9262_v34, %v9266_v4  ;;  %v9269_v26 = vld [vmem:[%s17203_s19 + $0xd88] sm:$0xff] }
 0x7c2   : > { %12381 = vmatpush1.bf16.msra.mxu0 %v15432_v0  ;;  %12218 = vmatprep.subr.bf16.mxu1 %v15439_v40  ;;  %v15480_v0 = vcombine.low %v9222_v29, %v9226_v48  ;;  %v15487_v40 = vcombine.high %v9229_v38, %v9233_v43  ;;  %v9273_v29 = vld [vmem:[%s17203_s19 + $0xda8] sm:$0xff] }
 0x7c3   : > { %12382 = vmatprep.subr.bf16.mxu0 %v15441_v39  ;;  %v15489_v39 = vcombine.high %v9230_v47, %v9234_v49 }
 0x7c5   : > { %12219 = vmatpush1.bf16.msra.mxu1 %v15438_v14  ;;  %v15486_v14 = vcombine.low %v9229_v38, %v9233_v43  ;;  %v15520_v38 = vcombine.low %v9262_v34, %v9266_v4  ;;  %v15527_v43 = vcombine.high %v9269_v26, %v9273_v29  ;;  %v9298_v34 = vld [vmem:[%s17203_s19 + $0xe70] sm:$0xff] }
 0x7c6   : > { %12383 = vmatpush1.bf16.msra.mxu0 %v15440_v3  ;;  %12220 = vmatprep.subr.bf16.mxu1 %v15447_v20  ;;  %v15488_v3 = vcombine.low %v9230_v47, %v9234_v49  ;;  %v15495_v20 = vcombine.high %v9237_v54, %v9241_v57 }
 0x7c7   : > { %12384 = vmatprep.subr.bf16.mxu0 %v15449_v46  ;;  %v15497_v46 = vcombine.high %v9238_v62, %v9242_v1 }
 0x7c9   : > { %12221 = vmatpush1.bf16.msra.mxu1 %v15446_v11  ;;  %v15494_v11 = vcombine.low %v9237_v54, %v9241_v57  ;;  %v9278_v57 = vld [vmem:[%s17203_s19 + $0xdd0] sm:$0xff] }
 0x7ca   : > { %12385 = vmatpush1.bf16.msra.mxu0 %v15448_v18  ;;  %12222 = vmatprep.subr.bf16.mxu1 %v15455_v15  ;;  %v15496_v18 = vcombine.low %v9238_v62, %v9242_v1  ;;  %v15503_v15 = vcombine.high %v9245_v5, %v9249_v28  ;;  %v9282_v62 = vld [vmem:[%s17203_s19 + $0xdf0] sm:$0xff] }
 0x7cb   : > { %12386 = vmatprep.subr.bf16.mxu0 %v15457_v12  ;;  %v15505_v12 = vcombine.high %v9246_v17, %v9250_v42 }
 0x7cd   : > { %12223 = vmatpush1.bf16.msra.mxu1 %v15454_v30  ;;  %v15502_v30 = vcombine.low %v9245_v5, %v9249_v28 }
 0x7ce   : > { %12387 = vmatpush1.bf16.msra.mxu0 %v15456_v50  ;;  %12224 = vmatprep.subr.bf16.mxu1 %v15463_v41  ;;  %v15504_v50 = vcombine.low %v9246_v17, %v9250_v42  ;;  %v15511_v41 = vcombine.high %v9253_v55, %v9257_v36 }
 0x7cf   : > { %12388 = vmatprep.subr.bf16.mxu0 %v15465_v21  ;;  %v15513_v21 = vcombine.high %v9254_v16, %v9258_v60 }
 0x7d1   : > { %12225 = vmatpush1.bf16.msra.mxu1 %v15462_v25  ;;  %v15510_v25 = vcombine.low %v9253_v55, %v9257_v36  ;;  %v9286_v36 = vld [vmem:[%s17203_s19 + $0xe10] sm:$0xff] }
 0x7d2   : > { %12389 = vmatpush1.bf16.msra.mxu0 %v15464_v13  ;;  %12226 = vmatprep.subr.bf16.mxu1 %v15471_v10  ;;  %v9348_v13 = vld [vmem:[%s19566_s14] sm:$0xff]  ;;  %v15512_v10 = vcombine.low %v9254_v16, %v9258_v60  ;;  %v9290_v16 = vld [vmem:[%s17203_s19 + $0xe30] sm:$0xff] }
 0x7d3   : > { %12390 = vmatprep.subr.bf16.mxu0 %v15473_v32  ;;  %v15519_v32 = vcombine.high %v9261_v31, %v9265_v24  ;;  %v9353_v48 = vrot.slane %v9348_v13, %v17324_v58 }
 0x7d5   : > { %12227 = vmatpush1.bf16.msra.mxu1 %v15470_v45  ;;  %v9270_v45 = vld [vmem:[%s17203_s19 + $0xd90] sm:$0xff] }
 0x7d6   : > { %12391 = vmatpush1.bf16.msra.mxu0 %v15472_v37  ;;  %12237 = vmatprep.subr.bf16.mxu1 %v15479_v35  ;;  %v9274_v37 = vld [vmem:[%s17203_s19 + $0xdb0] sm:$0xff]  ;;  %v9357_v35 = vrot.slane %v9348_v13, %v17270_v51 }
 0x7d7   : > { %12401 = vmatprep.subr.bf16.mxu0 %v15481_v23  ;;  %v15518_v23 = vcombine.low %v9261_v31, %v9265_v24  ;;  %v15529_v49 = vcombine.high %v9270_v45, %v9274_v37  ;;  %v15528_v28 = vcombine.low %v9270_v45, %v9274_v37  ;;  %v9297_v31 = vld [vmem:[%s17203_s19 + $0xe68] sm:$0xff]  ;;  %v9294_v24 = vld [vmem:[%s17203_s19 + $0xe50] sm:$0xff] }
 0x7d8   : > { %12229 = vmatmul.mubr.bf16.vlgmr.msra.gmra.mrb[4].mxu1 %v18732_v9  ;;  %v15552_v45 = vcombine.low %v9294_v24, %v9298_v34 }
 0x7d9   : > { %12238 = vmatpush1.bf16.msra.mxu1 %v15478_v2  ;;  %12393 = vmatmul.mubr.bf16.vlgmr.msra.gmra.mrb[4].mxu0 %v18732_v9  ;;  %v9277_v2 = vld [vmem:[%s17203_s19 + $0xdc8] sm:$0xff] }
 0x7da   : > { %12402 = vmatpush1.bf16.msra.mxu0 %v15480_v0  ;;  %12239 = vmatprep.subr.bf16.mxu1 %v15487_v40  ;;  %v9281_v0 = vld [vmem:[%s17203_s19 + $0xde8] sm:$0xff] }
 0x7db   : > { %12403 = vmatprep.subr.bf16.mxu0 %v15489_v39  ;;  %12269 = vmatprep.mubr.bf16.mxu1 %v18741_v22  ;;  %v15535_v17 = vcombine.high %v9277_v2, %v9281_v0  ;;  %v15534_v60 = vcombine.low %v9277_v2, %v9281_v0 }
 0x7dc   : > { %12433 = vmatprep.mubr.bf16.mxu0 %v18741_v22 }
 0x7dd   : > { %12240 = vmatpush1.bf16.msra.mxu1 %v15486_v14 }
 0x7de   : > { %12404 = vmatpush1.bf16.msra.mxu0 %v15488_v3  ;;  %12241 = vmatprep.subr.bf16.mxu1 %v15495_v20  ;;  %v15526_v20 = vcombine.low %v9269_v26, %v9273_v29  ;;  %v9302_v26 = vld [vmem:[%s17203_s19 + $0xe90] sm:$0xff] }
 0x7df   : > { %12405 = vmatprep.subr.bf16.mxu0 %v15497_v46  ;;  %v9306_v29 = vld [vmem:[%s17203_s19 + $0xeb0] sm:$0xff] }
 0x7e0   : > { %v15560_v2 = vcombine.low %v9302_v26, %v9306_v29 }
 0x7e1   : > { %12242 = vmatpush1.bf16.msra.mxu1 %v15494_v11 }
 0x7e2   : > { %12406 = vmatpush1.bf16.msra.mxu0 %v15496_v18  ;;  %12243 = vmatprep.subr.bf16.mxu1 %v15503_v15  ;;  %v15537_v18 = vcombine.high %v9278_v57, %v9282_v62  ;;  %v9285_v15 = vld [vmem:[%s17203_s19 + $0xe08] sm:$0xff] }
 0x7e3   : > { %12407 = vmatprep.subr.bf16.mxu0 %v15505_v12  ;;  %v9289_v12 = vld [vmem:[%s17203_s19 + $0xe28] sm:$0xff] }
 0x7e4   : > { %v15542_v4 = vcombine.low %v9285_v15, %v9289_v12 }
 0x7e5   : > { %12244 = vmatpush1.bf16.msra.mxu1 %v15502_v30  ;;  %v15536_v30 = vcombine.low %v9278_v57, %v9282_v62  ;;  %v9318_v57 = vld [vmem:[%s17203_s19 + $0xf10] sm:$0xff] }
 0x7e6   : > { %12408 = vmatpush1.bf16.msra.mxu0 %v15504_v50  ;;  %12245 = vmatprep.subr.bf16.mxu1 %v15511_v41  ;;  %v15543_v50 = vcombine.high %v9285_v15, %v9289_v12  ;;  %v15545_v41 = vcombine.high %v9286_v36, %v9290_v16  ;;  %v9322_v62 = vld [vmem:[%s17203_s19 + $0xf30] sm:$0xff] }
 0x7e7   : > { %12409 = vmatprep.subr.bf16.mxu0 %v15513_v21  ;;  %v9293_v21 = vld [vmem:[%s17203_s19 + $0xe48] sm:$0xff]  ;;  %v15576_v12 = vcombine.low %v9318_v57, %v9322_v62 }
 0x7e8   : > { %v15551_v13 = vcombine.high %v9293_v21, %v9297_v31 }
 0x7e9   : > { %12246 = vmatpush1.bf16.msra.mxu1 %v15510_v25  ;;  %v15544_v25 = vcombine.low %v9286_v36, %v9290_v16  ;;  %v9333_v16 = vld [vmem:[%s17203_s19 + $0xf88] sm:$0xff] }
 0x7ea   : > { %12410 = vmatpush1.bf16.msra.mxu0 %v15512_v10  ;;  %12247 = vmatprep.subr.bf16.mxu1 %v15519_v32  ;;  %v15553_v10 = vcombine.high %v9294_v24, %v9298_v34  ;;  %v9301_v32 = vld [vmem:[%s17203_s19 + $0xe88] sm:$0xff] }
 0x7eb   : > { %v12025_v47 = vpop.f32.mrb[0].mxu1  ;;  %12411 = vmatprep.subr.bf16.mxu0 %v15521_v44  ;;  %v9305_v44 = vld [vmem:[%s17203_s19 + $0xea8] sm:$0xff] }
 0x7ec   : > { %v15745_v40 = vadd.f32 %v12025_v47, %v9353_v48  ;;  %v12027_v39 = vpop.f32.mrb[1].mxu1  ;;  %v12107_v54 = vpop.f32.mrb[0].mxu0  ;;  %v15550_v48 = vcombine.low %v9293_v21, %v9297_v31  ;;  %v15559_v37 = vcombine.high %v9301_v32, %v9305_v44  ;;  %v9314_v47 = vld [vmem:[%s17203_s19 + $0xef0] sm:$0xff]  ;;  %v19088_v21 = vld [vmem:[%s19568_s26] sm:$0xff] }
 0x7ed   : > { %v15747_v1 = vadd.f32 %v12027_v39, %v9357_v35  ;;  %v12029_v14 = vpop.f32.mrb[2].mxu1  ;;  %12248 = vmatpush1.bf16.msra.mxu1 %v15518_v23  ;;  %v12109_v3 = vpop.f32.mrb[1].mxu0  ;;  %v15561_v35 = vcombine.high %v9302_v26, %v9306_v29  ;;  %v9309_v23 = vld [vmem:[%s17203_s19 + $0xec8] sm:$0xff]  ;;  %v9346_v26 = vld [vmem:[%s17203_s19 + $0xff0] sm:$0xff] }
 0x7ee   : > { %v19048_v46 = vadd.f32 %v15745_v40, %v12107_v54  ;;  %12412 = vmatpush1.bf16.msra.mxu0 %v15520_v38  ;;  %v12030_v5 = vpop.f32.mrb[3].mxu1  ;;  %12249 = vmatprep.subr.bf16.mxu1 %v15527_v43  ;;  %v12111_v42 = vpop.f32.mrb[2].mxu0  ;;  %v9313_v38 = vld [vmem:[%s17203_s19 + $0xee8] sm:$0xff]  ;;  %v9310_v43 = vld [vmem:[%s17203_s19 + $0xed0] sm:$0xff] }
 0x7ef   : > { %v19050_v11 = vadd.f32 %v15747_v1, %v12109_v3  ;;  %12413 = vmatprep.subr.bf16.mxu0 %v15529_v49  ;;  %v12112_v55 = vpop.f32.mrb[3].mxu0  ;;  %v15558_v49 = vcombine.low %v9301_v32, %v9305_v44  ;;  %v15567_v0 = vcombine.high %v9309_v23, %v9313_v38  ;;  %v15569_v40 = vcombine.high %v9310_v43, %v9314_v47  ;;  %v9317_v39 = vld [vmem:[%s17203_s19 + $0xf08] sm:$0xff]  ;;  %v9330_v42 = vld [vmem:[%s17203_s19 + $0xf70] sm:$0xff] }
 0x7f0   : > { %v9321_v54 = vld [vmem:[%s17203_s19 + $0xf28] sm:$0xff]  ;;  %v15566_v1 = vcombine.low %v9309_v23, %v9313_v38  ;;  %v15568_v14 = vcombine.low %v9310_v43, %v9314_v47  ;;  %v12665_v32 = vrot.slane %v19088_v21, %v17270_v51  ;;  %v9342_v44 = vld [vmem:[%s17203_s19 + $0xfd0] sm:$0xff]  ;;  %v8843_v23 = vld [vmem:[%s17203_s19 + $0x38] sm:$0xff] }
 0x7f1   : > { %12250 = vmatpush1.bf16.msra.mxu1 %v15526_v20  ;;  %v15575_v3 = vcombine.high %v9317_v39, %v9321_v54  ;;  %v15577_v20 = vcombine.high %v9318_v57, %v9322_v62  ;;  %v9325_v5 = vld [vmem:[%s17203_s19 + $0xf48] sm:$0xff]  ;;  %v15574_v15 = vcombine.low %v9317_v39, %v9321_v54  ;;  %v15600_v43 = vcombine.low %v9342_v44, %v9346_v26  ;;  %v15930_v54 = vld [vmem:[%s17218_s18] ss:$8 sps:$4 sm:$0xff]  }
 0x7f2   : > { %12414 = vmatpush1.bf16.msra.mxu0 %v15528_v28  ;;  %12251 = vmatprep.subr.bf16.mxu1 %v15535_v17  ;;  %v9329_v28 = vld [vmem:[%s17203_s19 + $0xf68] sm:$0xff]  ;;  %v9326_v17 = vld [vmem:[%s17203_s19 + $0xf50] sm:$0xff] }
 0x7f3   : > { %12415 = vmatprep.subr.bf16.mxu0 %v15537_v18  ;;  %v19078_v18 = vld [vmem:[%s19567_s0] sm:$0xff]  ;;  %v15583_v55 = vcombine.high %v9325_v5, %v9329_v28  ;;  %v15585_v36 = vcombine.high %v9326_v17, %v9330_v42  ;;  %v15582_v31 = vcombine.low %v9325_v5, %v9329_v28  ;;  %v15584_v24 = vcombine.low %v9326_v17, %v9330_v42  ;;  %v15935_v62 = vld [vmem:[%s17218_s18 + $0x14] ss:$8 sps:$4 sm:$0xff]   ;;  %v15933_v5 = vld [vmem:[%s17218_s18 + $0x10] ss:$8 sps:$4 sm:$0xff]  }
 0x7f4   : > { %v15938_v17 = vld [vmem:[%s17218_s18 + $0x24] ss:$8 sps:$4 sm:$0xff]  }
 0x7f5   : > { %12252 = vmatpush1.bf16.msra.mxu1 %v15534_v60  ;;  %v9337_v60 = vld [vmem:[%s17203_s19 + $0xfa8] sm:$0xff]  ;;  %v8863_v42 = vld [vmem:[%s17203_s19 + $0xd8] sm:$0xff] }
 0x7f6   : > { %12416 = vmatpush1.bf16.msra.mxu0 %v15536_v30  ;;  %12253 = vmatprep.subr.bf16.mxu1 %v15543_v50  ;;  %v12615_v30 = vrot.slane %v19078_v18, %v17270_v51  ;;  %v9334_v50 = vld [vmem:[%s17203_s19 + $0xf90] sm:$0xff]  ;;  %v15591_v34 = vcombine.high %v9333_v16, %v9337_v60  ;;  %v15590_v29 = vcombine.low %v9333_v16, %v9337_v60  ;;  %v15941_v16 = vld [vmem:[%s17218_s18 + $0x34] ss:$8 sps:$4 sm:$0xff]   ;;  %v8871_v60 = vld [vmem:[%s17203_s19 + $0x118] sm:$0xff] }
 0x7f7   : > { %12417 = vmatprep.subr.bf16.mxu0 %v15545_v41  ;;  %v9338_v41 = vld [vmem:[%s17203_s19 + $0xfb0] sm:$0xff] }
 0x7f9   : > { %12254 = vmatpush1.bf16.msra.mxu1 %v15542_v4  ;;  %v15593_v4 = vcombine.high %v9334_v50, %v9338_v41 }
 0x7fa   : > { %12418 = vmatpush1.bf16.msra.mxu0 %v15544_v25  ;;  %12255 = vmatprep.subr.bf16.mxu1 %v15551_v13  ;;  %v9341_v25 = vld [vmem:[%s17203_s19 + $0xfc8] sm:$0xff] }
 0x7fb   : > { %12419 = vmatprep.subr.bf16.mxu0 %v15553_v10  ;;  %v9345_v13 = vld [vmem:[%s17203_s19 + $0xfe8] sm:$0xff]  ;;  %v12649_v10 = vmul.f32 %v19050_v11, %v12615_v30  ;;  %v8875_v30 = vld [vmem:[%s17203_s19 + $0x138] sm:$0xff] }
 0x7fc   : > { %v15598_v11 = vcombine.low %v9341_v25, %v9345_v13 }
 0x7fd   : > { %12256 = vmatpush1.bf16.msra.mxu1 %v15550_v48  ;;  %v15592_v48 = vcombine.low %v9334_v50, %v9338_v41  ;;  %v12699_v38 = vadd.f32 %v12665_v32, %v12649_v10  ;;  %v15131_v41 = vcombine.high %v8871_v60, %v8875_v30  ;;  %v15947_v10 = vld [vmem:[%s17218_s18 + $0x54] ss:$8 sps:$4 sm:$0xff]   ;;  %v8887_v32 = vld [vmem:[%s17203_s19 + $0x198] sm:$0xff] }
 0x7fe   : > { %12420 = vmatpush1.bf16.msra.mxu0 %v15552_v45  ;;  %12257 = vmatprep.subr.bf16.mxu1 %v15559_v37  ;;  %v15599_v45 = vcombine.high %v9341_v25, %v9345_v13  ;;  %v15601_v37 = vcombine.high %v9342_v44, %v9346_v26  ;;  %v15942_v25 = vld [vmem:[%s17218_s18 + $0x40] ss:$8 sps:$4 sm:$0xff]  }
 0x7ff   : > { %12421 = vmatprep.subr.bf16.mxu0 %v15561_v35  ;;  %v8839_v35 = vld [vmem:[%s17203_s19 + $0x18] sm:$0xff] }
 0x800   : > { %v15099_v47 = vcombine.high %v8839_v35, %v8843_v23  ;;  %v15098_v39 = vcombine.low %v8839_v35, %v8843_v23  ;;  %v8891_v44 = vld [vmem:[%s17203_s19 + $0x1b8] sm:$0xff] }
 0x801   : > { %12258 = vmatpush1.bf16.msra.mxu1 %v15558_v49  ;;  %v15932_v49 = vld [vmem:[%s17218_s18 + $0x4] ss:$8 sps:$4 sm:$0xff]   ;;  %v15146_v23 = vcombine.low %v8887_v32, %v8891_v44 }
 0x802   : > { %12422 = vmatpush1.bf16.msra.mxu0 %v15560_v2  ;;  %12259 = vmatprep.subr.bf16.mxu1 %v15567_v0  ;;  %v12707_v2 = vmax.f32 %v12699_v38, 0.0  ;;  %v8847_v0 = vld [vmem:[%s17203_s19 + $0x58] sm:$0xff] }
 0x803   : > { %12423 = vmatprep.subr.bf16.mxu0 %v15569_v40  ;;  %v8851_v40 = vld [vmem:[%s17203_s19 + $0x78] sm:$0xff] }
 0x804   : > { %v15107_v57 = vcombine.high %v8847_v0, %v8851_v40  ;;  %v8899_v35 = vld [vmem:[%s17203_s19 + $0x1f8] sm:$0xff] }
 0x805   : > { %12260 = vmatpush1.bf16.msra.mxu1 %v15566_v1  ;;  %v8855_v1 = vld [vmem:[%s17203_s19 + $0x98] sm:$0xff] }
 0x806   : > { %12424 = vmatpush1.bf16.msra.mxu0 %v15568_v14  ;;  %12261 = vmatprep.subr.bf16.mxu1 %v15575_v3  ;;  %v8859_v14 = vld [vmem:[%s17203_s19 + $0xb8] sm:$0xff]  ;;  %v12715_v3 = vpack.c.bf16 %v12707_v2, %v12707_v2 }
 0x807   : > { %12425 = vmatprep.subr.bf16.mxu0 %v15577_v20  ;;  %v15106_v20 = vcombine.low %v8847_v0, %v8851_v40  ;;  %v15115_v28 = vcombine.high %v8855_v1, %v8859_v14  ;;  %v15948_v38 = vld [vmem:[%s17218_s18 + $0x60] ss:$8 sps:$4 sm:$0xff]   ;;  %v15951_v0 = vld [vmem:[%s17218_s18 + $0x70] ss:$8 sps:$4 sm:$0xff]  }
 0x809   : > { %12262 = vmatpush1.bf16.msra.mxu1 %v15574_v15  ;;  %v8867_v15 = vld [vmem:[%s17203_s19 + $0xf8] sm:$0xff] }
 0x80a   : > { %12426 = vmatpush1.bf16.msra.mxu0 %v15576_v12  ;;  %12263 = vmatprep.subr.bf16.mxu1 %v15583_v55  ;;  %v15114_v12 = vcombine.low %v8855_v1, %v8859_v14  ;;  %v15936_v55 = vld [vmem:[%s17218_s18 + $0x20] ss:$8 sps:$4 sm:$0xff]   ;;  %v15122_v50 = vcombine.low %v8863_v42, %v8867_v15 }
 0x80b   : > { %12427 = vmatprep.subr.bf16.mxu0 %v15585_v36  ;;  %v15123_v36 = vcombine.high %v8863_v42, %v8867_v15  ;;  %v15954_v1 = vld [vmem:[%s17218_s18 + $0x80] ss:$8 sps:$4 sm:$0xff]   ;;  %v15962_v15 = vld [vmem:[%s17218_s18 + $0xa4] ss:$8 sps:$4 sm:$0xff]  }
 0x80d   : > { %12264 = vmatpush1.bf16.msra.mxu1 %v15582_v31  ;;  %v15944_v31 = vld [vmem:[%s17218_s18 + $0x44] ss:$8 sps:$4 sm:$0xff]  }
 0x80e   : > { %12428 = vmatpush1.bf16.msra.mxu0 %v15584_v24  ;;  %12265 = vmatprep.subr.bf16.mxu1 %v15591_v34  ;;  %v8879_v24 = vld [vmem:[%s17203_s19 + $0x158] sm:$0xff] }
 0x80f   : > { %12429 = vmatprep.subr.bf16.mxu0 %v15593_v4  ;;  %v8883_v34 = vld [vmem:[%s17203_s19 + $0x178] sm:$0xff]  ;;  %v15130_v4 = vcombine.low %v8871_v60, %v8875_v30  ;;  %v15965_v30 = vld [vmem:[%s17218_s18 + $0xb4] ss:$8 sps:$4 sm:$0xff]  }
 0x810   : > { %v15139_v13 = vcombine.high %v8879_v24, %v8883_v34  ;;  %v15138_v26 = vcombine.low %v8879_v24, %v8883_v34  ;;  %v15968_v34 = vld [vmem:[%s17218_s18 + $0xc4] ss:$8 sps:$4 sm:$0xff]  }
 0x811   : > { %12266 = vmatpush1.bf16.msra.mxu1 %v15590_v29  ;;  %v15945_v29 = vld [vmem:[%s17218_s18 + $0x50] ss:$8 sps:$4 sm:$0xff]  }
 0x812   : > { %12430 = vmatpush1.bf16.msra.mxu0 %v15592_v48  ;;  %12267 = vmatprep.subr.bf16.mxu1 %v15599_v45  ;;  %v15147_v48 = vcombine.high %v8887_v32, %v8891_v44  ;;  %v15950_v45 = vld [vmem:[%s17218_s18 + $0x64] ss:$8 sps:$4 sm:$0xff]   ;;  %v12611_v44 = vrot.slane %v19078_v18, %v17324_v58  ;;  %v12661_v18 = vrot.slane %v19088_v21, %v17324_v58 }
 0x813   : > { %12431 = vmatprep.subr.bf16.mxu0 %v15601_v37  ;;  %v8895_v37 = vld [vmem:[%s17203_s19 + $0x1d8] sm:$0xff] }
 0x814   : > { %v15154_v2 = vcombine.low %v8895_v37, %v8899_v35 }
 0x815   : > { %12268 = vmatpush1.bf16.msra.mxu1 %v15598_v11  ;;  %v15155_v11 = vcombine.high %v8895_v37, %v8899_v35  ;;  %v15969_v37 = vld [vmem:[%s17218_s18 + $0xd0] ss:$8 sps:$4 sm:$0xff]  }
 0x816   : > { %12432 = vmatpush1.bf16.msra.mxu0 %v15600_v43  ;;  %12442 = vmatprep.subr.bf16.mxu1 %v15099_v47  ;;  %v15953_v43 = vld [vmem:[%s17218_s18 + $0x74] ss:$8 sps:$4 sm:$0xff]   ;;  %v8903_v47 = vld [vmem:[%s17203_s19 + $0x218] sm:$0xff] }
 0x817   : > { %13502 = vmatprep.subr.bf16.mxu0 %v15932_v49  ;;  %v8907_v49 = vld [vmem:[%s17203_s19 + $0x238] sm:$0xff] }
 0x818   : > { %12270 = vmatmul.mubr.bf16.vlgmr.msra.gmra.mrb[4].mxu1 %v18810_v56  ;;  %v15163_v40 = vcombine.high %v8903_v47, %v8907_v49 }
 0x819   : > { %12434 = vmatmul.mubr.bf16.vlgmr.msra.gmra.mrb[4].mxu0 %v18810_v56  ;;  %12443 = vmatpush1.bf16.msra.mxu1 %v15098_v39  ;;  %v15956_v39 = vld [vmem:[%s17218_s18 + $0x84] ss:$8 sps:$4 sm:$0xff]  }
 0x81a   : > { %13503 = vmatpush1.bf16.msra.mxu0 %v15930_v54  ;;  %13534 = vmatprep.mubr.bf16.mxu0 %v12715_v3  ;;  %v8911_v54 = vld [vmem:[%s17203_s19 + $0x258] sm:$0xff]  ;;  %v15959_v3 = vld [vmem:[%s17218_s18 + $0x94] ss:$8 sps:$4 sm:$0xff]  }
 0x81b   : > { %12444 = vmatprep.subr.bf16.mxu1 %v15107_v57  ;;  %13504 = vmatprep.subr.bf16.mxu0 %v15935_v62  ;;  %v8915_v57 = vld [vmem:[%s17203_s19 + $0x278] sm:$0xff]  ;;  %v15162_v62 = vcombine.low %v8903_v47, %v8907_v49 }
 0x81c   : > { %12474 = vmatprep.mubr.bf16.mxu1 %v18628_v8  ;;  %v15939_v8 = vld [vmem:[%s17218_s18 + $0x30] ss:$8 sps:$4 sm:$0xff]   ;;  %v15171_v14 = vcombine.high %v8911_v54, %v8915_v57  ;;  %v15972_v49 = vld [vmem:[%s17218_s18 + $0xe0] ss:$8 sps:$4 sm:$0xff]  }
 0x81d   : > { %12445 = vmatpush1.bf16.msra.mxu1 %v15106_v20  ;;  %v8919_v20 = vld [vmem:[%s17203_s19 + $0x298] sm:$0xff] }
 0x81e   : > { %13505 = vmatpush1.bf16.msra.mxu0 %v15933_v5  ;;  %12446 = vmatprep.subr.bf16.mxu1 %v15115_v28  ;;  %v8923_v5 = vld [vmem:[%s17203_s19 + $0x2b8] sm:$0xff]  ;;  %v15170_v28 = vcombine.low %v8911_v54, %v8915_v57  ;;  %v15975_v54 = vld [vmem:[%s17218_s18 + $0xf0] ss:$8 sps:$4 sm:$0xff]  }
 0x81f   : > { %13506 = vmatprep.subr.bf16.mxu0 %v15938_v17  ;;  %v15957_v17 = vld [vmem:[%s17218_s18 + $0x90] ss:$8 sps:$4 sm:$0xff]   ;;  %v15179_v42 = vcombine.high %v8919_v20, %v8923_v5 }
 0x821   : > { %12447 = vmatpush1.bf16.msra.mxu1 %v15114_v12  ;;  %v8927_v12 = vld [vmem:[%s17203_s19 + $0x2d8] sm:$0xff] }
 0x822   : > { %13507 = vmatpush1.bf16.msra.mxu0 %v15936_v55  ;;  %12448 = vmatprep.subr.bf16.mxu1 %v15123_v36  ;;  %v8931_v55 = vld [vmem:[%s17203_s19 + $0x2f8] sm:$0xff]  ;;  %v15178_v36 = vcombine.low %v8919_v20, %v8923_v5 }
 0x823   : > { %13508 = vmatprep.subr.bf16.mxu0 %v15941_v16  ;;  %v15960_v16 = vld [vmem:[%s17218_s18 + $0xa0] ss:$8 sps:$4 sm:$0xff]   ;;  %v15187_v60 = vcombine.high %v8927_v12, %v8931_v55 }
 0x825   : > { %12449 = vmatpush1.bf16.msra.mxu1 %v15122_v50  ;;  %v8935_v50 = vld [vmem:[%s17203_s19 + $0x318] sm:$0xff] }
 0x826   : > { %13509 = vmatpush1.bf16.msra.mxu0 %v15939_v8  ;;  %12450 = vmatprep.subr.bf16.mxu1 %v15131_v41  ;;  %v8939_v8 = vld [vmem:[%s17203_s19 + $0x338] sm:$0xff]  ;;  %v15186_v41 = vcombine.low %v8927_v12, %v8931_v55  ;;  %v15983_v12 = vld [vmem:[%s17218_s18 + $0x114] ss:$8 sps:$4 sm:$0xff]  }
 0x827   : > { %13510 = vmatprep.subr.bf16.mxu0 %v15944_v31  ;;  %v15963_v31 = vld [vmem:[%s17218_s18 + $0xb0] ss:$8 sps:$4 sm:$0xff]   ;;  %v15195_v24 = vcombine.high %v8935_v50, %v8939_v8 }
 0x829   : > { %12451 = vmatpush1.bf16.msra.mxu1 %v15130_v4  ;;  %v8943_v4 = vld [vmem:[%s17203_s19 + $0x358] sm:$0xff] }
 0x82a   : > { %13511 = vmatpush1.bf16.msra.mxu0 %v15942_v25  ;;  %12452 = vmatprep.subr.bf16.mxu1 %v15139_v13  ;;  %v8947_v25 = vld [vmem:[%s17203_s19 + $0x378] sm:$0xff]  ;;  %v15194_v13 = vcombine.low %v8935_v50, %v8939_v8 }
 0x82b   : > { %13512 = vmatprep.subr.bf16.mxu0 %v15947_v10  ;;  %v15966_v10 = vld [vmem:[%s17218_s18 + $0xc0] ss:$8 sps:$4 sm:$0xff]   ;;  %v15203_v32 = vcombine.high %v8943_v4, %v8947_v25  ;;  %v15986_v50 = vld [vmem:[%s17218_s18 + $0x124] ss:$8 sps:$4 sm:$0xff]  }
 0x82d   : > { %12453 = vmatpush1.bf16.msra.mxu1 %v15138_v26  ;;  %v15971_v26 = vld [vmem:[%s17218_s18 + $0xd4] ss:$8 sps:$4 sm:$0xff]  }
 0x82e   : > { %13513 = vmatpush1.bf16.msra.mxu0 %v15945_v29  ;;  %12454 = vmatprep.subr.bf16.mxu1 %v15147_v48  ;;  %v8951_v29 = vld [vmem:[%s17203_s19 + $0x398] sm:$0xff] }
 0x82f   : > { %13514 = vmatprep.subr.bf16.mxu0 %v15950_v45  ;;  %v8955_v48 = vld [vmem:[%s17203_s19 + $0x3b8] sm:$0xff]  ;;  %v15202_v45 = vcombine.low %v8943_v4, %v8947_v25 }
 0x830   : > { %v15211_v35 = vcombine.high %v8951_v29, %v8955_v48  ;;  %v15210_v47 = vcombine.low %v8951_v29, %v8955_v48  ;;  %v9007_v25 = vld [vmem:[%s17203_s19 + $0x558] sm:$0xff] }
 0x831   : > { %12455 = vmatpush1.bf16.msra.mxu1 %v15146_v23  ;;  %v12648_v23 = vmul.f32 %v19048_v46, %v12611_v44  ;;  %v15977_v46 = vld [vmem:[%s17218_s18 + $0xf4] ss:$8 sps:$4 sm:$0xff]   ;;  %v9015_v29 = vld [vmem:[%s17203_s19 + $0x598] sm:$0xff] }
 0x832   : > { %13515 = vmatpush1.bf16.msra.mxu0 %v15948_v38  ;;  %12456 = vmatprep.subr.bf16.mxu1 %v15155_v11  ;;  %v15974_v38 = vld [vmem:[%s17218_s18 + $0xe4] ss:$8 sps:$4 sm:$0xff]  }
 0x833   : > { %13516 = vmatprep.subr.bf16.mxu0 %v15953_v43  ;;  %v8959_v11 = vld [vmem:[%s17203_s19 + $0x3d8] sm:$0xff] }
 0x834   : > { %v8963_v43 = vld [vmem:[%s17203_s19 + $0x3f8] sm:$0xff] }
 0x835   : > { %12457 = vmatpush1.bf16.msra.mxu1 %v15154_v2  ;;  %v15219_v2 = vcombine.high %v8959_v11, %v8963_v43  ;;  %v15218_v21 = vcombine.low %v8959_v11, %v8963_v43  ;;  %v9019_v48 = vld [vmem:[%s17203_s19 + $0x5b8] sm:$0xff]  ;;  %v15993_v11 = vld [vmem:[%s17218_s18 + $0x150] ss:$8 sps:$4 sm:$0xff]  }
 0x836   : > { %13517 = vmatpush1.bf16.msra.mxu0 %v15951_v0  ;;  %12458 = vmatprep.subr.bf16.mxu1 %v15163_v40  ;;  %v12698_v0 = vadd.f32 %v12661_v18, %v12648_v23  ;;  %v8967_v40 = vld [vmem:[%s17203_s19 + $0x418] sm:$0xff]  ;;  %v15275_v23 = vcombine.high %v9015_v29, %v9019_v48 }
 0x837   : > { %13518 = vmatprep.subr.bf16.mxu0 %v15956_v39  ;;  %v8971_v39 = vld [vmem:[%s17203_s19 + $0x438] sm:$0xff] }
 0x838   : > { %v15227_v57 = vcombine.high %v8967_v40, %v8971_v39  ;;  %v15226_v20 = vcombine.low %v8967_v40, %v8971_v39  ;;  %v9023_v18 = vld [vmem:[%s17203_s19 + $0x5d8] sm:$0xff]  ;;  %v16001_v40 = vld [vmem:[%s17218_s18 + $0x174] ss:$8 sps:$4 sm:$0xff]  }
 0x839   : > { %12459 = vmatpush1.bf16.msra.mxu1 %v15162_v62  ;;  %v12706_v62 = vmax.f32 %v12698_v0, 0.0  ;;  %v15998_v43 = vld [vmem:[%s17218_s18 + $0x164] ss:$8 sps:$4 sm:$0xff]  }
 0x83a   : > { %13519 = vmatpush1.bf16.msra.mxu0 %v15954_v1  ;;  %12460 = vmatprep.subr.bf16.mxu1 %v15171_v14  ;;  %v8975_v1 = vld [vmem:[%s17203_s19 + $0x458] sm:$0xff] }
 0x83b   : > { %13520 = vmatprep.subr.bf16.mxu0 %v15959_v3  ;;  %v8979_v14 = vld [vmem:[%s17203_s19 + $0x478] sm:$0xff] }
 0x83c   : > { %v15980_v3 = vld [vmem:[%s17218_s18 + $0x104] ss:$8 sps:$4 sm:$0xff]   ;;  %v15235_v5 = vcombine.high %v8975_v1, %v8979_v14  ;;  %v15234_v55 = vcombine.low %v8975_v1, %v8979_v14 }
 0x83d   : > { %12461 = vmatpush1.bf16.msra.mxu1 %v15170_v28  ;;  %v12714_v28 = vpack.c.bf16 %v12706_v62, %v12706_v62  ;;  %v9035_v0 = vld [vmem:[%s17203_s19 + $0x638] sm:$0xff]  ;;  %v15999_v62 = vld [vmem:[%s17218_s18 + $0x170] ss:$8 sps:$4 sm:$0xff]  }
 0x83e   : > { %13521 = vmatpush1.bf16.msra.mxu0 %v15957_v17  ;;  %12462 = vmatprep.subr.bf16.mxu1 %v15179_v42  ;;  %v8983_v17 = vld [vmem:[%s17203_s19 + $0x498] sm:$0xff] }
 0x83f   : > { %13522 = vmatprep.subr.bf16.mxu0 %v15962_v15  ;;  %v8987_v42 = vld [vmem:[%s17203_s19 + $0x4b8] sm:$0xff] }
 0x840   : > { %v15978_v15 = vld [vmem:[%s17218_s18 + $0x100] ss:$8 sps:$4 sm:$0xff]   ;;  %v16004_v1 = vld [vmem:[%s17218_s18 + $0x184] ss:$8 sps:$4 sm:$0xff]  }
 0x841   : > { %12463 = vmatpush1.bf16.msra.mxu1 %v15178_v36  ;;  %v15243_v36 = vcombine.high %v8983_v17, %v8987_v42 }
 0x842   : > { %13523 = vmatpush1.bf16.msra.mxu0 %v15960_v16  ;;  %12464 = vmatprep.subr.bf16.mxu1 %v15187_v60  ;;  %v8991_v16 = vld [vmem:[%s17203_s19 + $0x4d8] sm:$0xff] }
 0x843   : > { %13524 = vmatprep.subr.bf16.mxu0 %v15965_v30  ;;  %v8995_v60 = vld [vmem:[%s17203_s19 + $0x4f8] sm:$0xff]  ;;  %v15981_v30 = vld [vmem:[%s17218_s18 + $0x110] ss:$8 sps:$4 sm:$0xff]  }
 0x844   : > { %v15251_v8 = vcombine.high %v8991_v16, %v8995_v60 }
 0x845   : > { %12465 = vmatpush1.bf16.msra.mxu1 %v15186_v41  ;;  %v8999_v41 = vld [vmem:[%s17203_s19 + $0x518] sm:$0xff] }
 0x846   : > { %13525 = vmatpush1.bf16.msra.mxu0 %v15963_v31  ;;  %12466 = vmatprep.subr.bf16.mxu1 %v15195_v24  ;;  %v9003_v31 = vld [vmem:[%s17203_s19 + $0x538] sm:$0xff] }
 0x847   : > { %13526 = vmatprep.subr.bf16.mxu0 %v15968_v34  ;;  %v15984_v24 = vld [vmem:[%s17218_s18 + $0x120] ss:$8 sps:$4 sm:$0xff]   ;;  %v15250_v34 = vcombine.low %v8991_v16, %v8995_v60  ;;  %v15259_v4 = vcombine.high %v8999_v41, %v9003_v31  ;;  %v15258_v44 = vcombine.low %v8999_v41, %v9003_v31  ;;  %v16010_v16 = vld [vmem:[%s17218_s18 + $0x1a4] ss:$8 sps:$4 sm:$0xff]   ;;  %v16013_v41 = vld [vmem:[%s17218_s18 + $0x1b4] ss:$8 sps:$4 sm:$0xff]  }
 0x849   : > { %12467 = vmatpush1.bf16.msra.mxu1 %v15194_v13  ;;  %v9011_v13 = vld [vmem:[%s17203_s19 + $0x578] sm:$0xff] }
 0x84a   : > { %13527 = vmatpush1.bf16.msra.mxu0 %v15966_v10  ;;  %12468 = vmatprep.subr.bf16.mxu1 %v15203_v32  ;;  %v15987_v10 = vld [vmem:[%s17218_s18 + $0x130] ss:$8 sps:$4 sm:$0xff]   ;;  %v15992_v32 = vld [vmem:[%s17218_s18 + $0x144] ss:$8 sps:$4 sm:$0xff]  }
 0x84b   : > { %13528 = vmatprep.subr.bf16.mxu0 %v15971_v26  ;;  %v15267_v26 = vcombine.high %v9007_v25, %v9011_v13 }
 0x84d   : > { %12469 = vmatpush1.bf16.msra.mxu1 %v15202_v45  ;;  %v15990_v45 = vld [vmem:[%s17218_s18 + $0x140] ss:$8 sps:$4 sm:$0xff]  }
 0x84e   : > { %13529 = vmatpush1.bf16.msra.mxu0 %v15969_v37  ;;  %12470 = vmatprep.subr.bf16.mxu1 %v15211_v35  ;;  %v15995_v37 = vld [vmem:[%s17218_s18 + $0x154] ss:$8 sps:$4 sm:$0xff]   ;;  %v15266_v35 = vcombine.low %v9007_v25, %v9011_v13  ;;  %v16016_v25 = vld [vmem:[%s17218_s18 + $0x1c4] ss:$8 sps:$4 sm:$0xff]  }
 0x84f   : > { %13530 = vmatprep.subr.bf16.mxu0 %v15974_v38  ;;  %v9027_v38 = vld [vmem:[%s17203_s19 + $0x5f8] sm:$0xff] }
 0x850   : > { %v15282_v39 = vcombine.low %v9023_v18, %v9027_v38 }
 0x851   : > { %12471 = vmatpush1.bf16.msra.mxu1 %v15210_v47  ;;  %v15274_v47 = vcombine.low %v9015_v29, %v9019_v48  ;;  %v16019_v29 = vld [vmem:[%s17218_s18 + $0x1d4] ss:$8 sps:$4 sm:$0xff]  }
 0x852   : > { %13531 = vmatpush1.bf16.msra.mxu0 %v15972_v49  ;;  %12472 = vmatprep.subr.bf16.mxu1 %v15219_v2  ;;  %v15283_v49 = vcombine.high %v9023_v18, %v9027_v38  ;;  %v9031_v2 = vld [vmem:[%s17203_s19 + $0x618] sm:$0xff] }
 0x853   : > { %13532 = vmatprep.subr.bf16.mxu0 %v15977_v46  ;;  %v15996_v46 = vld [vmem:[%s17218_s18 + $0x160] ss:$8 sps:$4 sm:$0xff]   ;;  %v15290_v14 = vcombine.low %v9031_v2, %v9035_v0  ;;  %v16022_v18 = vld [vmem:[%s17218_s18 + $0x1e4] ss:$8 sps:$4 sm:$0xff]  }
 0x855   : > { %12473 = vmatpush1.bf16.msra.mxu1 %v15218_v21  ;;  %v15291_v21 = vcombine.high %v9031_v2, %v9035_v0  ;;  %v16025_v2 = vld [vmem:[%s17218_s18 + $0x1f4] ss:$8 sps:$4 sm:$0xff]  }
 0x856   : > { %13533 = vmatpush1.bf16.msra.mxu0 %v15975_v54  ;;  %12483 = vmatprep.subr.bf16.mxu1 %v15227_v57  ;;  %v9039_v54 = vld [vmem:[%s17203_s19 + $0x658] sm:$0xff] }
 0x857   : > { %13543 = vmatprep.subr.bf16.mxu0 %v15980_v3  ;;  %v9043_v57 = vld [vmem:[%s17203_s19 + $0x678] sm:$0xff] }
 0x858   : > { %12475 = vmatmul.mubr.bf16.vlgmr.msra.gmra.mrb[8].mxu1 %v18728_v27  ;;  %v15242_v27 = vcombine.low %v8983_v17, %v8987_v42  ;;  %v15299_v3 = vcombine.high %v9039_v54, %v9043_v57  ;;  %v16007_v17 = vld [vmem:[%s17218_s18 + $0x194] ss:$8 sps:$4 sm:$0xff]   ;;  %v15298_v42 = vcombine.low %v9039_v54, %v9043_v57  ;;  %v16028_v54 = vld [vmem:[%s17218_s18 + $0x204] ss:$8 sps:$4 sm:$0xff]  }
 0x859   : > { %13535 = vmatmul.mubr.bf16.vlgmr.msra.gmra.mrb[8].mxu0 %v12714_v28  ;;  %12484 = vmatpush1.bf16.msra.mxu1 %v15226_v20  ;;  %v9047_v20 = vld [vmem:[%s17203_s19 + $0x698] sm:$0xff] }
 0x85a   : > { %12485 = vmatprep.subr.bf16.mxu1 %v15235_v5  ;;  %12515 = vmatprep.mubr.bf16.mxu1 %v18736_v19  ;;  %v15989_v19 = vld [vmem:[%s17218_s18 + $0x134] ss:$8 sps:$4 sm:$0xff]   ;;  %v9051_v5 = vld [vmem:[%s17203_s19 + $0x6b8] sm:$0xff] }
 0x85b   : > { %13544 = vmatpush1.bf16.msra.mxu0 %v15978_v15  ;;  %v16002_v28 = vld [vmem:[%s17218_s18 + $0x180] ss:$8 sps:$4 sm:$0xff]   ;;  %v15307_v15 = vcombine.high %v9047_v20, %v9051_v5  ;;  %v15306_v60 = vcombine.low %v9047_v20, %v9051_v5 }
 0x85c   : > { %13545 = vmatprep.subr.bf16.mxu0 %v15983_v12  ;;  %v9055_v12 = vld [vmem:[%s17203_s19 + $0x6d8] sm:$0xff] }
 0x85d   : > { %12486 = vmatpush1.bf16.msra.mxu1 %v15234_v55  ;;  %v9059_v55 = vld [vmem:[%s17203_s19 + $0x6f8] sm:$0xff] }
 0x85e   : > { %12487 = vmatprep.subr.bf16.mxu1 %v15243_v36  ;;  %v16005_v36 = vld [vmem:[%s17218_s18 + $0x190] ss:$8 sps:$4 sm:$0xff]   ;;  %v15314_v31 = vcombine.low %v9055_v12, %v9059_v55  ;;  %v9119_v5 = vld [vmem:[%s17203_s19 + $0x8d8] sm:$0xff] }
 0x85f   : > { %13546 = vmatpush1.bf16.msra.mxu0 %v15981_v30  ;;  %v15315_v30 = vcombine.high %v9055_v12, %v9059_v55  ;;  %v9131_v12 = vld [vmem:[%s17203_s19 + $0x938] sm:$0xff] }
 0x860   : > { %13547 = vmatprep.subr.bf16.mxu0 %v15986_v50  ;;  %v9063_v50 = vld [vmem:[%s17203_s19 + $0x718] sm:$0xff] }
 0x861   : > { %12488 = vmatpush1.bf16.msra.mxu1 %v15242_v27  ;;  %v9067_v27 = vld [vmem:[%s17203_s19 + $0x738] sm:$0xff] }
 0x862   : > { %12489 = vmatprep.subr.bf16.mxu1 %v15251_v8  ;;  %v16008_v8 = vld [vmem:[%s17218_s18 + $0x1a0] ss:$8 sps:$4 sm:$0xff]   ;;  %v15322_v13 = vcombine.low %v9063_v50, %v9067_v27 }
 0x863   : > { %13548 = vmatpush1.bf16.msra.mxu0 %v15984_v24  ;;  %v15323_v24 = vcombine.high %v9063_v50, %v9067_v27  ;;  %v9147_v50 = vld [vmem:[%s17203_s19 + $0x9b8] sm:$0xff] }
 0x864   : > { %13549 = vmatprep.subr.bf16.mxu0 %v15989_v19  ;;  %v9071_v19 = vld [vmem:[%s17203_s19 + $0x758] sm:$0xff] }
 0x865   : > { %12490 = vmatpush1.bf16.msra.mxu1 %v15250_v34  ;;  %v9075_v34 = vld [vmem:[%s17203_s19 + $0x778] sm:$0xff] }
 0x866   : > { %12491 = vmatprep.subr.bf16.mxu1 %v15259_v4  ;;  %v16011_v4 = vld [vmem:[%s17218_s18 + $0x1b0] ss:$8 sps:$4 sm:$0xff]   ;;  %v15330_v48 = vcombine.low %v9071_v19, %v9075_v34 }
 0x867   : > { %13550 = vmatpush1.bf16.msra.mxu0 %v15987_v10  ;;  %v15331_v10 = vcombine.high %v9071_v19, %v9075_v34  ;;  %v9159_v34 = vld [vmem:[%s17203_s19 + $0xa18] sm:$0xff] }
 0x868   : > { %13551 = vmatprep.subr.bf16.mxu0 %v15992_v32  ;;  %v9079_v32 = vld [vmem:[%s17203_s19 + $0x798] sm:$0xff] }
 0x869   : > { %12492 = vmatpush1.bf16.msra.mxu1 %v15258_v44  ;;  %v9083_v44 = vld [vmem:[%s17203_s19 + $0x7b8] sm:$0xff] }
 0x86a   : > { %12493 = vmatprep.subr.bf16.mxu1 %v15267_v26  ;;  %v16014_v26 = vld [vmem:[%s17218_s18 + $0x1c0] ss:$8 sps:$4 sm:$0xff]   ;;  %v15338_v38 = vcombine.low %v9079_v32, %v9083_v44 }
 0x86b   : > { %13552 = vmatpush1.bf16.msra.mxu0 %v15990_v45  ;;  %v15339_v45 = vcombine.high %v9079_v32, %v9083_v44  ;;  %v9171_v32 = vld [vmem:[%s17203_s19 + $0xa78] sm:$0xff] }
 0x86c   : > { %13553 = vmatprep.subr.bf16.mxu0 %v15995_v37  ;;  %v9087_v37 = vld [vmem:[%s17203_s19 + $0x7d8] sm:$0xff] }
 0x86d   : > { %12494 = vmatpush1.bf16.msra.mxu1 %v15266_v35  ;;  %v9091_v35 = vld [vmem:[%s17203_s19 + $0x7f8] sm:$0xff] }
 0x86e   : > { %12495 = vmatprep.subr.bf16.mxu1 %v15275_v23  ;;  %v16017_v23 = vld [vmem:[%s17218_s18 + $0x1d0] ss:$8 sps:$4 sm:$0xff]   ;;  %v15346_v0 = vcombine.low %v9087_v37, %v9091_v35 }
 0x86f   : > { %13554 = vmatpush1.bf16.msra.mxu0 %v15993_v11  ;;  %v15347_v11 = vcombine.high %v9087_v37, %v9091_v35  ;;  %v9183_v35 = vld [vmem:[%s17203_s19 + $0xad8] sm:$0xff] }
 0x870   : > { %13555 = vmatprep.subr.bf16.mxu0 %v15998_v43  ;;  %v9095_v43 = vld [vmem:[%s17203_s19 + $0x818] sm:$0xff] }
 0x871   : > { %12496 = vmatpush1.bf16.msra.mxu1 %v15274_v47  ;;  %v9099_v47 = vld [vmem:[%s17203_s19 + $0x838] sm:$0xff] }
 0x872   : > { %12497 = vmatprep.subr.bf16.mxu1 %v15283_v49  ;;  %v16020_v49 = vld [vmem:[%s17218_s18 + $0x1e0] ss:$8 sps:$4 sm:$0xff]   ;;  %v15354_v57 = vcombine.low %v9095_v43, %v9099_v47 }
 0x873   : > { %13556 = vmatpush1.bf16.msra.mxu0 %v15996_v46  ;;  %v15355_v46 = vcombine.high %v9095_v43, %v9099_v47  ;;  %v9195_v43 = vld [vmem:[%s17203_s19 + $0xb38] sm:$0xff] }
 0x874   : > { %13557 = vmatprep.subr.bf16.mxu0 %v16001_v40  ;;  %v9103_v40 = vld [vmem:[%s17203_s19 + $0x858] sm:$0xff] }
 0x875   : > { %12498 = vmatpush1.bf16.msra.mxu1 %v15282_v39  ;;  %v9107_v39 = vld [vmem:[%s17203_s19 + $0x878] sm:$0xff] }
 0x876   : > { %12499 = vmatprep.subr.bf16.mxu1 %v15291_v21  ;;  %v16023_v21 = vld [vmem:[%s17218_s18 + $0x1f0] ss:$8 sps:$4 sm:$0xff]  }
 0x877   : > { %13558 = vmatpush1.bf16.msra.mxu0 %v15999_v62  ;;  %v15363_v62 = vcombine.high %v9103_v40, %v9107_v39 }
 0x878   : > { %13559 = vmatprep.subr.bf16.mxu0 %v16004_v1  ;;  %v9111_v1 = vld [vmem:[%s17203_s19 + $0x898] sm:$0xff] }
 0x879   : > { %12500 = vmatpush1.bf16.msra.mxu1 %v15290_v14  ;;  %v9115_v14 = vld [vmem:[%s17203_s19 + $0x8b8] sm:$0xff] }
 0x87a   : > { %12501 = vmatprep.subr.bf16.mxu1 %v15299_v3  ;;  %v15362_v3 = vcombine.low %v9103_v40, %v9107_v39  ;;  %v15371_v20 = vcombine.high %v9111_v1, %v9115_v14  ;;  %v9207_v39 = vld [vmem:[%s17203_s19 + $0xb98] sm:$0xff] }
 0x87b   : > { %13560 = vmatpush1.bf16.msra.mxu0 %v16002_v28  ;;  %v9123_v28 = vld [vmem:[%s17203_s19 + $0x8f8] sm:$0xff] }
 0x87c   : > { %13561 = vmatprep.subr.bf16.mxu0 %v16007_v17  ;;  %v15370_v17 = vcombine.low %v9111_v1, %v9115_v14  ;;  %v9219_v1 = vld [vmem:[%s17203_s19 + $0xbf8] sm:$0xff] }
 0x87d   : > { %12502 = vmatpush1.bf16.msra.mxu1 %v15298_v42  ;;  %v15379_v42 = vcombine.high %v9119_v5, %v9123_v28 }
 0x87e   : > { %12503 = vmatprep.subr.bf16.mxu1 %v15307_v15  ;;  %v9127_v15 = vld [vmem:[%s17203_s19 + $0x918] sm:$0xff] }
 0x87f   : > { %13562 = vmatpush1.bf16.msra.mxu0 %v16005_v36  ;;  %v15387_v55 = vcombine.high %v9127_v15, %v9131_v12  ;;  %v9139_v36 = vld [vmem:[%s17203_s19 + $0x978] sm:$0xff] }
 0x880   : > { %13563 = vmatprep.subr.bf16.mxu0 %v16010_v16  ;;  %v15386_v16 = vcombine.low %v9127_v15, %v9131_v12  ;;  %v9235_v15 = vld [vmem:[%s17203_s19 + $0xc78] sm:$0xff] }
 0x881   : > { %12504 = vmatpush1.bf16.msra.mxu1 %v15306_v60 }
 0x882   : > { %12505 = vmatprep.subr.bf16.mxu1 %v15315_v30  ;;  %v9143_v30 = vld [vmem:[%s17203_s19 + $0x998] sm:$0xff] }
 0x883   : > { %13564 = vmatpush1.bf16.msra.mxu0 %v16008_v8  ;;  %v15403_v8 = vcombine.high %v9143_v30, %v9147_v50 }
 0x884   : > { %13565 = vmatprep.subr.bf16.mxu0 %v16013_v41  ;;  %v9151_v41 = vld [vmem:[%s17203_s19 + $0x9d8] sm:$0xff] }
 0x885   : > { %12506 = vmatpush1.bf16.msra.mxu1 %v15314_v31  ;;  %v9155_v31 = vld [vmem:[%s17203_s19 + $0x9f8] sm:$0xff] }
 0x886   : > { %12507 = vmatprep.subr.bf16.mxu1 %v15323_v24  ;;  %v15402_v24 = vcombine.low %v9143_v30, %v9147_v50  ;;  %v15411_v19 = vcombine.high %v9151_v41, %v9155_v31  ;;  %v9251_v30 = vld [vmem:[%s17203_s19 + $0xcf8] sm:$0xff] }
 0x887   : > { %13566 = vmatpush1.bf16.msra.mxu0 %v16011_v4  ;;  %v9163_v4 = vld [vmem:[%s17203_s19 + $0xa38] sm:$0xff] }
 0x888   : > { %13567 = vmatprep.subr.bf16.mxu0 %v16016_v25  ;;  %v15410_v25 = vcombine.low %v9151_v41, %v9155_v31  ;;  %v15418_v44 = vcombine.low %v9159_v34, %v9163_v4  ;;  %v9259_v41 = vld [vmem:[%s17203_s19 + $0xd38] sm:$0xff] }
 0x889   : > { %12508 = vmatpush1.bf16.msra.mxu1 %v15322_v13  ;;  %v15419_v13 = vcombine.high %v9159_v34, %v9163_v4  ;;  %v9271_v4 = vld [vmem:[%s17203_s19 + $0xd98] sm:$0xff] }
 0x88a   : > { %12509 = vmatprep.subr.bf16.mxu1 %v15331_v10  ;;  %v9167_v10 = vld [vmem:[%s17203_s19 + $0xa58] sm:$0xff] }
 0x88b   : > { %13568 = vmatpush1.bf16.msra.mxu0 %v16014_v26  ;;  %v15427_v26 = vcombine.high %v9167_v10, %v9171_v32 }
 0x88c   : > { %13569 = vmatprep.subr.bf16.mxu0 %v16019_v29  ;;  %v9175_v29 = vld [vmem:[%s17203_s19 + $0xa98] sm:$0xff] }
 0x88d   : > { %12510 = vmatpush1.bf16.msra.mxu1 %v15330_v48  ;;  %v9179_v48 = vld [vmem:[%s17203_s19 + $0xab8] sm:$0xff] }
 0x88e   : > { %12511 = vmatprep.subr.bf16.mxu1 %v15339_v45  ;;  %v15426_v45 = vcombine.low %v9167_v10, %v9171_v32  ;;  %v15435_v37 = vcombine.high %v9175_v29, %v9179_v48 }
 0x88f   : > { %13570 = vmatpush1.bf16.msra.mxu0 %v16017_v23  ;;  %v9187_v23 = vld [vmem:[%s17203_s19 + $0xaf8] sm:$0xff] }
 0x890   : > { %13571 = vmatprep.subr.bf16.mxu0 %v16022_v18  ;;  %v15434_v18 = vcombine.low %v9175_v29, %v9179_v48  ;;  %v15442_v47 = vcombine.low %v9183_v35, %v9187_v23 }
 0x891   : > { %12512 = vmatpush1.bf16.msra.mxu1 %v15338_v38  ;;  %v15443_v38 = vcombine.high %v9183_v35, %v9187_v23  ;;  %v9279_v23 = vld [vmem:[%s17203_s19 + $0xdd8] sm:$0xff] }
 0x892   : > { %12513 = vmatprep.subr.bf16.mxu1 %v15347_v11  ;;  %v9191_v11 = vld [vmem:[%s17203_s19 + $0xb18] sm:$0xff] }
 0x893   : > { %13572 = vmatpush1.bf16.msra.mxu0 %v16020_v49  ;;  %v15451_v49 = vcombine.high %v9191_v11, %v9195_v43 }
 0x894   : > { %13573 = vmatprep.subr.bf16.mxu0 %v16025_v2  ;;  %v9199_v2 = vld [vmem:[%s17203_s19 + $0xb58] sm:$0xff] }
 0x895   : > { %12514 = vmatpush1.bf16.msra.mxu1 %v15346_v0  ;;  %v9203_v0 = vld [vmem:[%s17203_s19 + $0xb78] sm:$0xff] }
 0x896   : > { %12524 = vmatprep.subr.bf16.mxu1 %v15355_v46  ;;  %v15450_v46 = vcombine.low %v9191_v11, %v9195_v43  ;;  %v15459_v40 = vcombine.high %v9199_v2, %v9203_v0  ;;  %v19308_v11 = vld [vmem:[%s19571_s20] sm:$0xff] }
 0x897   : > { %13574 = vmatpush1.bf16.msra.mxu0 %v16023_v21  ;;  %v9211_v21 = vld [vmem:[%s17203_s19 + $0xbb8] sm:$0xff]  ;;  %v12669_v43 = vrot.slane %v19308_v11, %v17333_v63 }
 0x898   : > { %12516 = vmatmul.mubr.bf16.vlgmr.msra.gmra.mrb[8].mxu1 %v18808_v33  ;;  %13584 = vmatprep.subr.bf16.mxu0 %v16028_v54  ;;  %v15378_v33 = vcombine.low %v9119_v5, %v9123_v28  ;;  %v15458_v54 = vcombine.low %v9199_v2, %v9203_v0  ;;  %v15466_v14 = vcombine.low %v9207_v39, %v9211_v21  ;;  %v9227_v5 = vld [vmem:[%s17203_s19 + $0xc38] sm:$0xff] }
 0x899   : > { %12525 = vmatpush1.bf16.msra.mxu1 %v15354_v57  ;;  %12556 = vmatprep.mubr.bf16.mxu1 %v18630_v53  ;;  %v9135_v53 = vld [vmem:[%s17203_s19 + $0x958] sm:$0xff]  ;;  %v15467_v57 = vcombine.high %v9207_v39, %v9211_v21 }
 0x89a   : > { %12526 = vmatprep.subr.bf16.mxu1 %v15363_v62  ;;  %v15395_v60 = vcombine.high %v9135_v53, %v9139_v36  ;;  %v15394_v27 = vcombine.low %v9135_v53, %v9139_v36  ;;  %v9215_v62 = vld [vmem:[%s17203_s19 + $0xbd8] sm:$0xff] }
 0x89b   : > { %v15474_v28 = vcombine.low %v9215_v62, %v9219_v1  ;;  %v9243_v53 = vld [vmem:[%s17203_s19 + $0xcb8] sm:$0xff] }
 0x89d   : > { %12527 = vmatpush1.bf16.msra.mxu1 %v15362_v3  ;;  %v15475_v3 = vcombine.high %v9215_v62, %v9219_v1 }
 0x89e   : > { %12528 = vmatprep.subr.bf16.mxu1 %v15371_v20  ;;  %v9223_v20 = vld [vmem:[%s17203_s19 + $0xc18] sm:$0xff] }
 0x89f   : > { %v15482_v12 = vcombine.low %v9223_v20, %v9227_v5 }
 0x8a1   : > { %12529 = vmatpush1.bf16.msra.mxu1 %v15370_v17  ;;  %v15483_v17 = vcombine.high %v9223_v20, %v9227_v5  ;;  %v9287_v5 = vld [vmem:[%s17203_s19 + $0xe18] sm:$0xff] }
 0x8a2   : > { %12530 = vmatprep.subr.bf16.mxu1 %v15379_v42  ;;  %v9231_v42 = vld [vmem:[%s17203_s19 + $0xc58] sm:$0xff] }
 0x8a3   : > { %v15490_v36 = vcombine.low %v9231_v42, %v9235_v15 }
 0x8a5   : > { %12531 = vmatpush1.bf16.msra.mxu1 %v15378_v33  ;;  %v15491_v33 = vcombine.high %v9231_v42, %v9235_v15 }
 0x8a6   : > { %12532 = vmatprep.subr.bf16.mxu1 %v15387_v55  ;;  %v9239_v55 = vld [vmem:[%s17203_s19 + $0xc98] sm:$0xff] }
 0x8a7   : > { %v15498_v50 = vcombine.low %v9239_v55, %v9243_v53 }
 0x8a9   : > { %12533 = vmatpush1.bf16.msra.mxu1 %v15386_v16  ;;  %v15499_v16 = vcombine.high %v9239_v55, %v9243_v53 }
 0x8aa   : > { %12534 = vmatprep.subr.bf16.mxu1 %v15395_v60  ;;  %v9247_v60 = vld [vmem:[%s17203_s19 + $0xcd8] sm:$0xff] }
 0x8ad   : > { %12535 = vmatpush1.bf16.msra.mxu1 %v15394_v27  ;;  %v15507_v27 = vcombine.high %v9247_v60, %v9251_v30 }
 0x8ae   : > { %12536 = vmatprep.subr.bf16.mxu1 %v15403_v8  ;;  %v9255_v8 = vld [vmem:[%s17203_s19 + $0xd18] sm:$0xff] }
 0x8af   : > { %v15515_v31 = vcombine.high %v9255_v8, %v9259_v41 }
 0x8b1   : > { %12537 = vmatpush1.bf16.msra.mxu1 %v15402_v24  ;;  %v9267_v24 = vld [vmem:[%s17203_s19 + $0xd78] sm:$0xff] }
 0x8b2   : > { %12538 = vmatprep.subr.bf16.mxu1 %v15411_v19  ;;  %v15514_v19 = vcombine.low %v9255_v8, %v9259_v41  ;;  %v16031_v41 = vld [vmem:[%s17218_s18 + $0x214] ss:$8 sps:$4 sm:$0xff]  }
 0x8b5   : > { %12539 = vmatpush1.bf16.msra.mxu1 %v15410_v25  ;;  %v9275_v25 = vld [vmem:[%s17203_s19 + $0xdb8] sm:$0xff] }
 0x8b6   : > { %12540 = vmatprep.subr.bf16.mxu1 %v15419_v13  ;;  %v19288_v13 = vld [vmem:[%s19569_s29] sm:$0xff]  ;;  %v15530_v21 = vcombine.low %v9271_v4, %v9275_v25 }
 0x8b7   : > { %v9361_v10 = vrot.slane %v19288_v13, %v17333_v63  ;;  %v9365_v32 = vrot.slane %v19288_v13, %v17273_v52  ;;  %v9373_v48 = vrot.slane %v19288_v13, %v17338_v6 }
 0x8b9   : > { %12541 = vmatpush1.bf16.msra.mxu1 %v15418_v44 }
 0x8ba   : > { %12542 = vmatprep.subr.bf16.mxu1 %v15427_v26  ;;  %v19296_v26 = vld [vmem:[%s19570_s15] sm:$0xff] }
 0x8bb   : > { %v12619_v29 = vrot.slane %v19296_v26, %v17333_v63  ;;  %v12623_v35 = vrot.slane %v19296_v26, %v17273_v52  ;;  %v12631_v2 = vrot.slane %v19296_v26, %v17338_v6  ;;  %v12681_v63 = vrot.slane %v19308_v11, %v17338_v6 }
 0x8bd   : > { %12543 = vmatpush1.bf16.msra.mxu1 %v15426_v45  ;;  %v15531_v45 = vcombine.high %v9271_v4, %v9275_v25  ;;  %v9311_v25 = vld [vmem:[%s17203_s19 + $0xed8] sm:$0xff] }
 0x8be   : > { %12544 = vmatprep.subr.bf16.mxu1 %v15435_v37 }
 0x8c1   : > { %12545 = vmatpush1.bf16.msra.mxu1 %v15434_v18  ;;  %v9283_v18 = vld [vmem:[%s17203_s19 + $0xdf8] sm:$0xff] }
 0x8c2   : > { %12546 = vmatprep.subr.bf16.mxu1 %v15443_v38  ;;  %v15538_v15 = vcombine.low %v9279_v23, %v9283_v18 }
 0x8c5   : > { %12547 = vmatpush1.bf16.msra.mxu1 %v15442_v47 }
 0x8c6   : > { %12548 = vmatprep.subr.bf16.mxu1 %v15451_v49 }
 0x8c9   : > { %12549 = vmatpush1.bf16.msra.mxu1 %v15450_v46  ;;  %v12673_v46 = vrot.slane %v19308_v11, %v17273_v52 }
 0x8ca   : > { %12550 = vmatprep.subr.bf16.mxu1 %v15459_v40 }
 0x8cd   : > { %12551 = vmatpush1.bf16.msra.mxu1 %v15458_v54 }
 0x8ce   : > { %12552 = vmatprep.subr.bf16.mxu1 %v15467_v57 }
 0x8d1   : > { %12553 = vmatpush1.bf16.msra.mxu1 %v15466_v14  ;;  %v15539_v14 = vcombine.high %v9279_v23, %v9283_v18  ;;  %v16040_v18 = vld [vmem:[%s17218_s18 + $0x244] ss:$8 sps:$4 sm:$0xff]  }
 0x8d2   : > { %12554 = vmatprep.subr.bf16.mxu1 %v15475_v3 }
 0x8d5   : > { %12555 = vmatpush1.bf16.msra.mxu1 %v15474_v28  ;;  %v9291_v28 = vld [vmem:[%s17203_s19 + $0xe38] sm:$0xff] }
 0x8d6   : > { %12565 = vmatprep.subr.bf16.mxu1 %v15483_v17  ;;  %v15547_v6 = vcombine.high %v9287_v5, %v9291_v28 }
 0x8d8   : > { %12557 = vmatmul.mubr.bf16.vlgmr.msra.gmra.mrb[8].mxu1 %v18732_v9  ;;  %v15506_v9 = vcombine.low %v9247_v60, %v9251_v30  ;;  %v16026_v30 = vld [vmem:[%s17218_s18 + $0x200] ss:$8 sps:$4 sm:$0xff]  }
 0x8d9   : > { %12566 = vmatpush1.bf16.msra.mxu1 %v15482_v12  ;;  %12597 = vmatprep.mubr.bf16.mxu1 %v18741_v22  ;;  %v9263_v22 = vld [vmem:[%s17203_s19 + $0xd58] sm:$0xff] }
 0x8da   : > { %12567 = vmatprep.subr.bf16.mxu1 %v15491_v33  ;;  %v15523_v34 = vcombine.high %v9263_v22, %v9267_v24  ;;  %v15522_v44 = vcombine.low %v9263_v22, %v9267_v24  ;;  %v9307_v22 = vld [vmem:[%s17203_s19 + $0xeb8] sm:$0xff]  ;;  %v16029_v24 = vld [vmem:[%s17218_s18 + $0x210] ss:$8 sps:$4 sm:$0xff]  }
 0x8dd   : > { %12568 = vmatpush1.bf16.msra.mxu1 %v15490_v36  ;;  %v9295_v36 = vld [vmem:[%s17203_s19 + $0xe58] sm:$0xff] }
 0x8de   : > { %12569 = vmatprep.subr.bf16.mxu1 %v15499_v16  ;;  %v9299_v16 = vld [vmem:[%s17203_s19 + $0xe78] sm:$0xff] }
 0x8e1   : > { %12570 = vmatpush1.bf16.msra.mxu1 %v15498_v50  ;;  %v15546_v50 = vcombine.low %v9287_v5, %v9291_v28  ;;  %v16049_v5 = vld [vmem:[%s17218_s18 + $0x274] ss:$8 sps:$4 sm:$0xff]  }
 0x8e2   : > { %12571 = vmatprep.subr.bf16.mxu1 %v15507_v27 }
 0x8e5   : > { %12572 = vmatpush1.bf16.msra.mxu1 %v15506_v9  ;;  %v15555_v9 = vcombine.high %v9295_v36, %v9299_v16 }
 0x8e6   : > { %12573 = vmatprep.subr.bf16.mxu1 %v15515_v31  ;;  %v9303_v31 = vld [vmem:[%s17203_s19 + $0xe98] sm:$0xff] }
 0x8e7   : > { %v15563_v4 = vcombine.high %v9303_v31, %v9307_v22 }
 0x8e9   : > { %12574 = vmatpush1.bf16.msra.mxu1 %v15514_v19  ;;  %v15554_v19 = vcombine.low %v9295_v36, %v9299_v16  ;;  %v16059_v36 = vld [vmem:[%s17218_s18 + $0x2b0] ss:$8 sps:$4 sm:$0xff]   ;;  %v9369_v16 = vrot.slane %v19288_v13, %v17327_v59 }
 0x8ea   : > { %12575 = vmatprep.subr.bf16.mxu1 %v15523_v34  ;;  %v16034_v34 = vld [vmem:[%s17218_s18 + $0x224] ss:$8 sps:$4 sm:$0xff]  }
 0x8eb   : > { %v12271_v37 = vpop.f32.mrb[4].mxu1 }
 0x8ec   : > { %v15749_v38 = vadd.f32 %v12271_v37, %v9361_v10  ;;  %v19312_v47 = vpop.f32.mrb[4].mxu0  ;;  %v12273_v49 = vpop.f32.mrb[5].mxu1  ;;  %v9315_v10 = vld [vmem:[%s17203_s19 + $0xef8] sm:$0xff] }
 0x8ed   : > { %v15750_v0 = vadd.f32 %v12273_v49, %v9365_v32  ;;  %v12437_v40 = vpop.f32.mrb[5].mxu0  ;;  %v12275_v39 = vpop.f32.mrb[6].mxu1  ;;  %12576 = vmatpush1.bf16.msra.mxu1 %v15522_v44  ;;  %v16032_v32 = vld [vmem:[%s17218_s18 + $0x220] ss:$8 sps:$4 sm:$0xff]   ;;  %v15562_v44 = vcombine.low %v9303_v31, %v9307_v22  ;;  %v15570_v23 = vcombine.low %v9311_v25, %v9315_v10  ;;  %v16070_v31 = vld [vmem:[%s17218_s18 + $0x2e4] ss:$8 sps:$4 sm:$0xff]  }
 0x8ee   : > { %v12650_v54 = vmul.f32 %v15749_v38, %v12619_v29  ;;  %v15752_v57 = vadd.f32 %v12437_v40, %v9373_v48  ;;  %v12439_v62 = vpop.f32.mrb[6].mxu0  ;;  %v12276_v1 = vpop.f32.mrb[7].mxu1  ;;  %12577 = vmatprep.subr.bf16.mxu1 %v15531_v45  ;;  %v16037_v29 = vld [vmem:[%s17218_s18 + $0x234] ss:$8 sps:$4 sm:$0xff]   ;;  %v15571_v48 = vcombine.high %v9311_v25, %v9315_v10  ;;  %v9319_v45 = vld [vmem:[%s17203_s19 + $0xf18] sm:$0xff] }
 0x8ef   : > { %v12651_v3 = vmul.f32 %v15750_v0, %v12623_v35  ;;  %v12440_v20 = vpop.f32.mrb[7].mxu0  ;;  %v9323_v37 = vld [vmem:[%s17203_s19 + $0xf38] sm:$0xff]  ;;  %v16035_v35 = vld [vmem:[%s17218_s18 + $0x230] ss:$8 sps:$4 sm:$0xff]   ;;  %v16079_v10 = vld [vmem:[%s17218_s18 + $0x314] ss:$8 sps:$4 sm:$0xff]  }
 0x8f0   : > { %v12700_v52 = vadd.f32 %v12669_v43, %v12650_v54  ;;  %v12653_v17 = vmul.f32 %v15752_v57, %v12631_v2  ;;  %v15579_v38 = vcombine.high %v9319_v45, %v9323_v37  ;;  %v9327_v43 = vld [vmem:[%s17203_s19 + $0xf58] sm:$0xff]  ;;  %v15578_v0 = vcombine.low %v9319_v45, %v9323_v37  ;;  %v16041_v54 = vld [vmem:[%s17218_s18 + $0x250] ss:$8 sps:$4 sm:$0xff]  }
 0x8f1   : > { %v12701_v42 = vadd.f32 %v12673_v46, %v12651_v3  ;;  %12578 = vmatpush1.bf16.msra.mxu1 %v15530_v21  ;;  %v9331_v49 = vld [vmem:[%s17203_s19 + $0xf78] sm:$0xff]  ;;  %v16043_v46 = vld [vmem:[%s17218_s18 + $0x254] ss:$8 sps:$4 sm:$0xff]   ;;  %v16083_v45 = vld [vmem:[%s17218_s18 + $0x330] ss:$8 sps:$4 sm:$0xff]  }
 0x8f2   : > { %v12708_v12 = vmax.f32 %v12700_v52, 0.0  ;;  %v12703_v33 = vadd.f32 %v12681_v63, %v12653_v17  ;;  %12579 = vmatprep.subr.bf16.mxu1 %v15539_v14  ;;  %v16038_v2 = vld [vmem:[%s17218_s18 + $0x240] ss:$8 sps:$4 sm:$0xff]   ;;  %v15587_v40 = vcombine.high %v9327_v43, %v9331_v49  ;;  %v15586_v57 = vcombine.low %v9327_v43, %v9331_v49  ;;  %v16046_v63 = vld [vmem:[%s17218_s18 + $0x264] ss:$8 sps:$4 sm:$0xff]  }
 0x8f3   : > { %v12709_v55 = vmax.f32 %v12701_v42, 0.0  ;;  %v9335_v39 = vld [vmem:[%s17203_s19 + $0xf98] sm:$0xff]  ;;  %v16047_v52 = vld [vmem:[%s17218_s18 + $0x270] ss:$8 sps:$4 sm:$0xff]   ;;  %v16097_v49 = vld [vmem:[%s17218_s18 + $0x374] ss:$8 sps:$4 sm:$0xff]  }
 0x8f4   : > { %v12711_v53 = vmax.f32 %v12703_v33, 0.0  ;;  %v12716_v27 = vpack.c.bf16 %v12708_v12, %v12708_v12  ;;  %v9339_v21 = vld [vmem:[%s17203_s19 + $0xfb8] sm:$0xff]  ;;  %v16055_v12 = vld [vmem:[%s17218_s18 + $0x294] ss:$8 sps:$4 sm:$0xff]   ;;  %v16053_v33 = vld [vmem:[%s17218_s18 + $0x290] ss:$8 sps:$4 sm:$0xff]  }
 0x8f5   : > { %12580 = vmatpush1.bf16.msra.mxu1 %v15538_v15  ;;  %v12717_v60 = vpack.c.bf16 %v12709_v55, %v12709_v55  ;;  %v15595_v62 = vcombine.high %v9335_v39, %v9339_v21  ;;  %v9343_v1 = vld [vmem:[%s17203_s19 + $0xfd8] sm:$0xff]  ;;  %v15594_v20 = vcombine.low %v9335_v39, %v9339_v21  ;;  %v16101_v39 = vld [vmem:[%s17218_s18 + $0x390] ss:$8 sps:$4 sm:$0xff]  }
 0x8f6   : > { %12581 = vmatprep.subr.bf16.mxu1 %v15547_v6  ;;  %v12719_v8 = vpack.c.bf16 %v12711_v53, %v12711_v53  ;;  %v9347_v14 = vld [vmem:[%s17203_s19 + $0xff8] sm:$0xff]  ;;  %v16061_v53 = vld [vmem:[%s17218_s18 + $0x2b4] ss:$8 sps:$4 sm:$0xff]  }
 0x8f7   : > { %13575 = vmatprep.mubr.bf16.mxu0 %v12717_v60  ;;  %v16044_v3 = vld [vmem:[%s17218_s18 + $0x260] ss:$8 sps:$4 sm:$0xff]   ;;  %v15603_v28 = vcombine.high %v9343_v1, %v9347_v14  ;;  %v15602_v17 = vcombine.low %v9343_v1, %v9347_v14  ;;  %v16052_v42 = vld [vmem:[%s17218_s18 + $0x284] ss:$8 sps:$4 sm:$0xff]   ;;  %v16115_v14 = vld [vmem:[%s17218_s18 + $0x3d4] ss:$8 sps:$4 sm:$0xff]  }
 0x8f8   : > { %13576 = vmatmul.mubr.bf16.vlgmr.msra.gmra.mrb[8].mxu0 %v12716_v27  ;;  %v16050_v15 = vld [vmem:[%s17218_s18 + $0x280] ss:$8 sps:$4 sm:$0xff]   ;;  %v16058_v6 = vld [vmem:[%s17218_s18 + $0x2a4] ss:$8 sps:$4 sm:$0xff]   ;;  %v16067_v27 = vld [vmem:[%s17218_s18 + $0x2d4] ss:$8 sps:$4 sm:$0xff]  }
 0x8f9   : > { %13585 = vmatpush1.bf16.msra.mxu0 %v16026_v30  ;;  %12582 = vmatpush1.bf16.msra.mxu1 %v15546_v50  ;;  %v16056_v55 = vld [vmem:[%s17218_s18 + $0x2a0] ss:$8 sps:$4 sm:$0xff]   ;;  %v16064_v60 = vld [vmem:[%s17218_s18 + $0x2c4] ss:$8 sps:$4 sm:$0xff]   ;;  %v15751_v30 = vadd.f32 %v19312_v47, %v9369_v16  ;;  %v12627_v50 = vrot.slane %v19296_v26, %v17327_v59  ;;  %v12689_v16 = vrot.slane %v19308_v11, %v17341_v7 }
 0x8fa   : > { %13616 = vmatprep.mubr.bf16.mxu0 %v12719_v8  ;;  %13586 = vmatprep.subr.bf16.mxu0 %v16031_v41  ;;  %v16065_v8 = vld [vmem:[%s17218_s18 + $0x2d0] ss:$8 sps:$4 sm:$0xff]   ;;  %v16068_v22 = vld [vmem:[%s17218_s18 + $0x2e0] ss:$8 sps:$4 sm:$0xff]   ;;  %v16088_v37 = vld [vmem:[%s17218_s18 + $0x344] ss:$8 sps:$4 sm:$0xff]  }
 0x8fb   : > { %12583 = vmatprep.subr.bf16.mxu1 %v15555_v9  ;;  %v12652_v41 = vmul.f32 %v15751_v30, %v12627_v50  ;;  %v12677_v9 = vrot.slane %v19308_v11, %v17327_v59  ;;  %v16074_v59 = vld [vmem:[%s17218_s18 + $0x300] ss:$8 sps:$4 sm:$0xff]   ;;  %v16106_v21 = vld [vmem:[%s17218_s18 + $0x3a4] ss:$8 sps:$4 sm:$0xff]  }
 0x8fc   : > { %v16092_v43 = vld [vmem:[%s17218_s18 + $0x360] ss:$8 sps:$4 sm:$0xff]  }
 0x8fd   : > { %13587 = vmatpush1.bf16.msra.mxu0 %v16029_v24  ;;  %12584 = vmatpush1.bf16.msra.mxu1 %v15554_v19  ;;  %v12702_v47 = vadd.f32 %v12677_v9, %v12652_v41  ;;  %v16073_v24 = vld [vmem:[%s17218_s18 + $0x2f4] ss:$8 sps:$4 sm:$0xff]   ;;  %v16071_v19 = vld [vmem:[%s17218_s18 + $0x2f0] ss:$8 sps:$4 sm:$0xff]   ;;  %v16110_v1 = vld [vmem:[%s17218_s18 + $0x3c0] ss:$8 sps:$4 sm:$0xff]  }
 0x8fe   : > { %13588 = vmatprep.subr.bf16.mxu0 %v16034_v34  ;;  %12585 = vmatprep.subr.bf16.mxu1 %v15563_v4  ;;  %v16076_v4 = vld [vmem:[%s17218_s18 + $0x304] ss:$8 sps:$4 sm:$0xff]  }
 0x8ff   : > { %v12710_v34 = vmax.f32 %v12702_v47, 0.0 }
 0x901   : > { %13589 = vmatpush1.bf16.msra.mxu0 %v16032_v32  ;;  %12586 = vmatpush1.bf16.msra.mxu1 %v15562_v44  ;;  %v12718_v25 = vpack.c.bf16 %v12710_v34, %v12710_v34  ;;  %v16077_v32 = vld [vmem:[%s17218_s18 + $0x310] ss:$8 sps:$4 sm:$0xff]   ;;  %v16082_v44 = vld [vmem:[%s17218_s18 + $0x324] ss:$8 sps:$4 sm:$0xff]  }
 0x902   : > { %13590 = vmatprep.subr.bf16.mxu0 %v16037_v29  ;;  %12587 = vmatprep.subr.bf16.mxu1 %v15571_v48  ;;  %v16080_v29 = vld [vmem:[%s17218_s18 + $0x320] ss:$8 sps:$4 sm:$0xff]   ;;  %v16085_v48 = vld [vmem:[%s17218_s18 + $0x334] ss:$8 sps:$4 sm:$0xff]  }
 0x905   : > { %13591 = vmatpush1.bf16.msra.mxu0 %v16035_v35  ;;  %12588 = vmatpush1.bf16.msra.mxu1 %v15570_v23  ;;  %v16086_v35 = vld [vmem:[%s17218_s18 + $0x340] ss:$8 sps:$4 sm:$0xff]   ;;  %v16091_v23 = vld [vmem:[%s17218_s18 + $0x354] ss:$8 sps:$4 sm:$0xff]  }
 0x906   : > { %13592 = vmatprep.subr.bf16.mxu0 %v16040_v18  ;;  %12589 = vmatprep.subr.bf16.mxu1 %v15579_v38  ;;  %v16089_v18 = vld [vmem:[%s17218_s18 + $0x350] ss:$8 sps:$4 sm:$0xff]   ;;  %v16094_v38 = vld [vmem:[%s17218_s18 + $0x364] ss:$8 sps:$4 sm:$0xff]  }
 0x909   : > { %13593 = vmatpush1.bf16.msra.mxu0 %v16038_v2  ;;  %12590 = vmatpush1.bf16.msra.mxu1 %v15578_v0  ;;  %v16095_v2 = vld [vmem:[%s17218_s18 + $0x370] ss:$8 sps:$4 sm:$0xff]   ;;  %v16100_v0 = vld [vmem:[%s17218_s18 + $0x384] ss:$8 sps:$4 sm:$0xff]  }
 0x90a   : > { %13594 = vmatprep.subr.bf16.mxu0 %v16043_v46  ;;  %12591 = vmatprep.subr.bf16.mxu1 %v15587_v40  ;;  %v16098_v46 = vld [vmem:[%s17218_s18 + $0x380] ss:$8 sps:$4 sm:$0xff]   ;;  %v16103_v40 = vld [vmem:[%s17218_s18 + $0x394] ss:$8 sps:$4 sm:$0xff]  }
 0x90d   : > { %13595 = vmatpush1.bf16.msra.mxu0 %v16041_v54  ;;  %12592 = vmatpush1.bf16.msra.mxu1 %v15586_v57  ;;  %v16104_v54 = vld [vmem:[%s17218_s18 + $0x3a0] ss:$8 sps:$4 sm:$0xff]   ;;  %v16109_v57 = vld [vmem:[%s17218_s18 + $0x3b4] ss:$8 sps:$4 sm:$0xff]  }
 0x90e   : > { %13596 = vmatprep.subr.bf16.mxu0 %v16046_v63  ;;  %12593 = vmatprep.subr.bf16.mxu1 %v15595_v62  ;;  %v16107_v63 = vld [vmem:[%s17218_s18 + $0x3b0] ss:$8 sps:$4 sm:$0xff]   ;;  %v16112_v62 = vld [vmem:[%s17218_s18 + $0x3c4] ss:$8 sps:$4 sm:$0xff]  }
 0x911   : > { %13597 = vmatpush1.bf16.msra.mxu0 %v16044_v3  ;;  %12594 = vmatpush1.bf16.msra.mxu1 %v15594_v20  ;;  %v16113_v3 = vld [vmem:[%s17218_s18 + $0x3d0] ss:$8 sps:$4 sm:$0xff]   ;;  %v16118_v20 = vld [vmem:[%s17218_s18 + $0x3e4] ss:$8 sps:$4 sm:$0xff]  }
 0x912   : > { %13598 = vmatprep.subr.bf16.mxu0 %v16049_v5  ;;  %12595 = vmatprep.subr.bf16.mxu1 %v15603_v28  ;;  %v16116_v5 = vld [vmem:[%s17218_s18 + $0x3e0] ss:$8 sps:$4 sm:$0xff]   ;;  %v16121_v28 = vld [vmem:[%s17218_s18 + $0x3f4] ss:$8 sps:$4 sm:$0xff]  }
 0x915   : > { %13599 = vmatpush1.bf16.msra.mxu0 %v16047_v52  ;;  %12596 = vmatpush1.bf16.msra.mxu1 %v15602_v17  ;;  %v16119_v52 = vld [vmem:[%s17218_s18 + $0x3f0] ss:$8 sps:$4 sm:$0xff]   ;;  %v9377_v17 = vrot.slane %v19288_v13, %v17330_v61 }
 0x916   : > { %13600 = vmatprep.subr.bf16.mxu0 %v16052_v42  ;;  %v9381_v42 = vrot.slane %v19288_v13, %v17341_v7 }
 0x918   : > { %12598 = vmatmul.mubr.bf16.vlgmr.msra.gmra.mrb[8].mxu1 %v18810_v56  ;;  %v16062_v56 = vld [vmem:[%s17218_s18 + $0x2c0] ss:$8 sps:$4 sm:$0xff]  }
 0x919   : > { %13601 = vmatpush1.bf16.msra.mxu0 %v16050_v15  ;;  %v12635_v15 = vrot.slane %v19296_v26, %v17330_v61 }
 0x91a   : > { %13602 = vmatprep.subr.bf16.mxu0 %v16055_v12 }
 0x91d   : > { %13603 = vmatpush1.bf16.msra.mxu0 %v16053_v33  ;;  %v12639_v33 = vrot.slane %v19296_v26, %v17341_v7 }
 0x91e   : > { %13604 = vmatprep.subr.bf16.mxu0 %v16058_v6 }
 0x921   : > { %13605 = vmatpush1.bf16.msra.mxu0 %v16056_v55  ;;  %v12685_v55 = vrot.slane %v19308_v11, %v17330_v61  ;;  %v12850_v61 = vld [vmem:[%s17221_s27] sm:$0x3] }
 0x922   : > { %13606 = vmatprep.subr.bf16.mxu0 %v16061_v53 }
 0x925   : > { %13607 = vmatpush1.bf16.msra.mxu0 %v16059_v36 }
 0x926   : > { %13608 = vmatprep.subr.bf16.mxu0 %v16064_v60 }
 0x929   : > { %13609 = vmatpush1.bf16.msra.mxu0 %v16062_v56 }
 0x92a   : > { %13610 = vmatprep.subr.bf16.mxu0 %v16067_v27 }
 0x92d   : > { %13611 = vmatpush1.bf16.msra.mxu0 %v16065_v8 }
 0x92e   : > { %13612 = vmatprep.subr.bf16.mxu0 %v16070_v31  ;;  %v12855_v31 = vrot.slane %v12850_v61, %v17324_v58 }
 0x931   : > { %13613 = vmatpush1.bf16.msra.mxu0 %v16068_v22  ;;  %v12859_v22 = vrot.slane %v12850_v61, %v17270_v51 }
 0x932   : > { %13614 = vmatprep.subr.bf16.mxu0 %v16073_v24 }
 0x935   : > { %13615 = vmatpush1.bf16.msra.mxu0 %v16071_v19 }
 0x936   : > { %13625 = vmatprep.subr.bf16.mxu0 %v16076_v4 }
 0x938   : > { %13617 = vmatmul.mubr.bf16.vlgmr.msra.gmra.mrb[8].mxu0 %v12718_v25 }
 0x939   : > { %13626 = vmatpush1.bf16.msra.mxu0 %v16074_v59 }
 0x93a   : > { %13627 = vmatprep.subr.bf16.mxu0 %v16079_v10 }
 0x93d   : > { %13628 = vmatpush1.bf16.msra.mxu0 %v16077_v32 }
 0x93e   : > { %13629 = vmatprep.subr.bf16.mxu0 %v16082_v44 }
 0x941   : > { %13630 = vmatpush1.bf16.msra.mxu0 %v16080_v29 }
 0x942   : > { %13631 = vmatprep.subr.bf16.mxu0 %v16085_v48 }
 0x945   : > { %13632 = vmatpush1.bf16.msra.mxu0 %v16083_v45 }
 0x946   : > { %13633 = vmatprep.subr.bf16.mxu0 %v16088_v37 }
 0x949   : > { %13634 = vmatpush1.bf16.msra.mxu0 %v16086_v35 }
 0x94a   : > { %13635 = vmatprep.subr.bf16.mxu0 %v16091_v23 }
 0x94d   : > { %13636 = vmatpush1.bf16.msra.mxu0 %v16089_v18 }
 0x94e   : > { %13637 = vmatprep.subr.bf16.mxu0 %v16094_v38 }
 0x951   : > { %13638 = vmatpush1.bf16.msra.mxu0 %v16092_v43 }
 0x952   : > { %13639 = vmatprep.subr.bf16.mxu0 %v16097_v49 }
 0x955   : > { %13640 = vmatpush1.bf16.msra.mxu0 %v16095_v2 }
 0x956   : > { %13641 = vmatprep.subr.bf16.mxu0 %v16100_v0 }
 0x959   : > { %13642 = vmatpush1.bf16.msra.mxu0 %v16098_v46 }
 0x95a   : > { %13643 = vmatprep.subr.bf16.mxu0 %v16103_v40 }
 0x95d   : > { %13644 = vmatpush1.bf16.msra.mxu0 %v16101_v39 }
 0x95e   : > { %13645 = vmatprep.subr.bf16.mxu0 %v16106_v21 }
 0x961   : > { %13646 = vmatpush1.bf16.msra.mxu0 %v16104_v54 }
 0x962   : > { %13647 = vmatprep.subr.bf16.mxu0 %v16109_v57 }
 0x965   : > { %13648 = vmatpush1.bf16.msra.mxu0 %v16107_v63 }
 0x966   : > { %13649 = vmatprep.subr.bf16.mxu0 %v16112_v62 }
 0x969   : > { %13650 = vmatpush1.bf16.msra.mxu0 %v16110_v1 }
 0x96a   : > { %13651 = vmatprep.subr.bf16.mxu0 %v16115_v14 }
 0x96d   : > { %13652 = vmatpush1.bf16.msra.mxu0 %v16113_v3 }
 0x96e   : > { %13653 = vmatprep.subr.bf16.mxu0 %v16118_v20 }
 0x971   : > { %13654 = vmatpush1.bf16.msra.mxu0 %v16116_v5 }
 0x972   : > { %13655 = vmatprep.subr.bf16.mxu0 %v16121_v28 }
 0x975   : > { %13656 = vmatpush1.bf16.msra.mxu0 %v16119_v52 }
 0x9eb   : > { %v12599_v12 = vpop.f32.mrb[8].mxu1 }
 0x9ec   : > { %v15753_v6 = vadd.f32 %v12599_v12, %v9377_v17  ;;  %v12601_v53 = vpop.f32.mrb[9].mxu1 }
 0x9ed   : > { %v15754_v36 = vadd.f32 %v12601_v53, %v9381_v42  ;;  %v12603_v60 = vpop.f32.mrb[10].mxu1 }
 0x9ee   : > { %v12654_v56 = vmul.f32 %v15753_v6, %v12635_v15  ;;  %v12604_v13 = vpop.f32.mrb[11].mxu1 }
 0x9ef   : > { %v12655_v30 = vmul.f32 %v15754_v36, %v12639_v33 }
 0x9f0   : > { %v12704_v50 = vadd.f32 %v12685_v55, %v12654_v56 }
 0x9f1   : > { %v12705_v27 = vadd.f32 %v12689_v16, %v12655_v30 }
 0x9f2   : > { %v12712_v8 = vmax.f32 %v12704_v50, 0.0 }
 0x9f3   : > { %v12713_v26 = vmax.f32 %v12705_v27, 0.0 }
 0x9f4   : > { %v12720_v9 = vpack.c.bf16 %v12712_v8, %v12712_v8 }
 0x9f5   : > { %v12721_v41 = vpack.c.bf16 %v12713_v26, %v12713_v26 }
 0x9f7   : > { %13657 = vmatprep.mubr.bf16.mxu0 %v12721_v41 }
 0x9f8   : > { %13658 = vmatmul.mubr.bf16.vlgmr.msra.gmra.mrb[8].mxu0 %v12720_v9 }
 0xacb   : > { %v13659_v7 = vpop.f32.mrb[8].mxu0 }
 0xacc   : > { %v15755_v11 = vadd.f32 %v13659_v7, %v12855_v31  ;;  %v13661_v47 = vpop.f32.mrb[9].mxu0 }
 0xacd   : > { %v15756_v24 = vadd.f32 %v13661_v47, %v12859_v22  ;;  %v13663_v19 = vpop.f32.mrb[10].mxu0 }
 0xace   : > { %13666 = vst [vmem:[%s17233_s23] sm:$0xff] %v15755_v11  ;;  %v13664_v34 = vpop.f32.mrb[11].mxu0 }
 0xacf   : > { %13667 = vst [vmem:[%s17233_s23 + $0x8] sm:$0xff] %v15756_v24 }
 0xad0 PF: > { %s19572_s12 = sld [smem:[#allocation35_spill]]  ;;  %s19573_s25 = sld [smem:[#allocation29_spill]] }
 0xad1   : > { %s19574_s26 = sld [smem:[#allocation30_spill]]  ;;  %s19575_s27 = sld [smem:[#allocation39_spill]] }
 0xad2   : > { %s19576_s28 = sld [smem:[#allocation31_spill]]  ;;  %s19577_s29 = sld [smem:[#allocation32_spill]] }
 0xad3   : > { %s19578_s30 = sld [smem:[#allocation40_spill]]  ;;  %s19579_s19 = sld [smem:[#allocation36_spill]] }
 0xad4   : > { %s19580_s2 = sld [smem:[#allocation37_spill]]  ;;  %s19581_s14 = smov %s16567_s16 }
 0xad5   : > { %s19582_s15 = smov %s16571_s17 }
 0xad6   : > { %s44_s18 = sadd.s32 1, %s19572_s12  }
 0xad7   : > { %p41_p8 = scmp.ge.s32.totalorder %s44_s18, 14  }
 0xad9   : > { %s19583_s16 = smov %s19579_s19  ;;  %43 = sbr.rel (!%p41_p8) target bundleno = 30 (0x1e), region = 256 }
 0xada   : > { %s19584_s17 = smov %s19580_s2 }
 0xae0   :  { %13689 = vsyncpa [#allocation4], 1 }
 0xae1   :  { %13691 = vsyncpa [#allocation4 + $0x1], 1 }
 0xae2   :  { %13692 = vsyncpa [#allocation6], 1 }
 0xae3   :  { %13694 = vsyncpa [#allocation6 + $0x1], 1 }
 0xae4   :  { %13695 = vsyncpa [#allocation9], 1 }
 0xae5   :  { %13697 = vsyncpa [#allocation9 + $0x1], 1 }
 0xae6   :  { %13698 = vsyncpa [#allocation12], 1 }
 0xae7   :  { %13700 = vsyncpa [#allocation12 + $0x1], 1 }
 0xae8   :  { %13701 = vsyncpa [#allocation15], 1 }
 0xae9   :  { %13703 = vsyncpa [#allocation15 + $0x1], 1 }
 0xaea   :  { %13704 = vsyncpa [#allocation18], 1 }
 0xaeb   :  { %13706 = vsyncpa [#allocation18 + $0x1], 1 }
 0xaec   :  { %13707 = vsyncpa [#allocation21], 1 }
 0xaed   :  { %13709 = vsyncpa [#allocation21 + $0x1], 1 }

</bundles_post_ra>
